<compile_context>
chip_gen: v5e
topology: v5e:2x2
jax: 0.10.0
libtpu: 0.0.40
codegen_flags: <defaults>
</compile_context>

<pallas_src>
import functools
import numpy as np
import jax
import jax.numpy as jnp
from jax.experimental import pallas as pl
from jax.experimental.pallas import tpu as pltpu

# ----------------------------- configuration --------------------------------
PAD = 0                       # Constants.PAD
VOCAB_SIZE = 100
IN_DIM = 64
MEM_DIM = 462                 # forced by nn.Linear(924, hidden) in Similarity
MEMP = 512                    # MEM_DIM zero-padded to a lane-aligned width
HIDDEN_DIM = 50
HIDP = 128                    # HIDDEN_DIM zero-padded for the similarity head
NUM_CLASSES = 5
SEQ = 8
SUB = 8                       # sublane granularity for level padding

F32 = jnp.float32
BF16 = jnp.bfloat16


# ----------------------------- tree plumbing (host-side glue) ---------------
class Tree:
    def __init__(self, idx, children=()):
        self.idx = idx
        self.children = list(children)


def build_level_schedule(trees, seq, sublane=SUB):
    """Level-synchronous (wavefront) schedule, baked as static Python data.

    Level of a node = 1 + max(level of children); leaves are level 0, so all
    nodes of a level are independent and can share one matmul.  Each level's
    node slots are padded to a multiple of `sublane`.  For every level L >= 1
    there is a contiguous, 8-row-aligned "child slot" block of
    nch[L] * m_pad[L] rows: child j of the parent in slot p lives at row
    cslot_off[L] + j * m_pad[L] + p.  Rows never written stay zero (missing /
    sentinel children).  Padded parent slots never scatter and are never read.
    """
    node_info = []            # (tree_idx, node, level, parent, child_index)
    depth = 0
    for ti, t in enumerate(trees):
        def walk(node, parent, cj):
            lvl = 0
            for j, ch in enumerate(node.children):
                lvl = max(lvl, walk(ch, node, j) + 1)
            node_info.append((ti, node, lvl, parent, cj))
            return lvl
        depth = max(depth, walk(t, None, 0) + 1)

    level_nodes = [[] for _ in range(depth)]
    for ti, node, lvl, parent, cj in node_info:
        level_nodes[lvl].append((ti, node, parent, cj))

    m_pad = [max(sublane, -(-len(level_nodes[L]) // sublane) * sublane)
             for L in range(depth)]
    x_off, acc = [], 0
    for L in range(depth):
        x_off.append(acc)
        acc += m_pad[L]
    total_slots = acc

    slot_of = {}
    for L in range(depth):
        for s, (_, node, _, _) in enumerate(level_nodes[L]):
            slot_of[id(node)] = (L, s)

    nch = [0] * depth
    for L in range(1, depth):
        nch[L] = max(len(node.children) for (_, node, _, _) in level_nodes[L])

    cslot_off, acc = [0] * depth, 0
    for L in range(1, depth):
        cslot_off[L] = acc
        acc += nch[L] * m_pad[L]
    cslot_rows = max(acc, sublane)

    x_index = np.zeros((total_slots,), np.int32)
    x_valid = np.zeros((total_slots,), np.float32)
    for L in range(depth):
        for s, (ti, node, _, _) in enumerate(level_nodes[L]):
            x_index[x_off[L] + s] = ti * seq + node.idx
            x_valid[x_off[L] + s] = 1.0

    scatter = [[] for _ in range(depth)]
    for L in range(depth):
        for s, (_, node, parent, cj) in enumerate(level_nodes[L]):
            if parent is not None:
                p_lvl, p_slot = slot_of[id(parent)]
                scatter[L].append((s, cslot_off[p_lvl] + cj * m_pad[p_lvl] + p_slot))

    roots = [slot_of[id(t)] for t in trees]
    return dict(depth=depth, m_pad=m_pad, x_off=x_off, total_slots=total_slots,
                nch=nch, cslot_off=cslot_off, cslot_rows=cslot_rows,
                x_index=x_index, x_valid=x_valid, scatter=scatter, roots=roots)


# ----------------------------- fused kernel ----------------------------------
def fused_kernel(x_ref, wx_ref, bx_ref, wh_iou_ref, wh_f_ref,
                 wh_cat_ref, bh_ref, wp_ref, bp_ref,
                 out_ref, ch_h, ch_c, *, sched):
    depth = sched["depth"]
    m_pad = sched["m_pad"]
    x_off = sched["x_off"]
    nch = sched["nch"]
    cslot_off = sched["cslot_off"]
    scatter = sched["scatter"]
    roots = sched["roots"]

    # Child-slot buffers start as zeros: every never-written row is the zero
    # (c, h) state of a missing child.  Together with the zero-padded MEM
    # lanes this invariant is load-bearing for child masking.
    ch_h[...] = jnp.zeros_like(ch_h)
    ch_c[...] = jnp.zeros_like(ch_c)

    # Hoisted x-path: every node's [i|o|u|f] projection (+ pre-summed biases)
    # in a single (TOTAL_SLOTS, IN_DIM) @ (IN_DIM, 4*MEMP) matmul.
    xproj = jnp.dot(x_ref[...], wx_ref[...], preferred_element_type=F32) + bx_ref[...]

    root_c = [None] * len(roots)

    for lvl in range(depth):                        # fully unrolled wavefront
        m = m_pad[lvl]
        xo = x_off[lvl]
        xp = xproj[xo:xo + m]                       # (m, 4*MEMP) static slice
        x_iou = xp[:, :3 * MEMP]                    # includes b_i | b_o | b_u
        x_f = xp[:, 3 * MEMP:]                      # includes b_f

        if lvl == 0:
            iou = x_iou                             # leaves: child_h_sum == 0
            fc_sum = None
        else:
            k = nch[lvl]
            co = cslot_off[lvl]
            rows = k * m
            h_blk = ch_h[co:co + rows, :]           # contiguous aligned load
            c_blk = ch_c[co:co + rows, :]

            h_sum = h_blk[0:m]
            for j in range(1, k):
                h_sum = h_sum + h_blk[j * m:(j + 1) * m]

            iou = x_iou + jnp.dot(h_sum.astype(BF16), wh_iou_ref[...],
                                  preferred_element_type=F32)
            fh = jnp.dot(h_blk.astype(BF16), wh_f_ref[...],
                         preferred_element_type=F32)          # (k*m, MEMP)
            fc_sum = None
            for j in range(k):
                f_j = jax.nn.sigmoid(fh[j * m:(j + 1) * m] + x_f)
                term = f_j * c_blk[j * m:(j + 1) * m]         # 0 for missing child
                fc_sum = term if fc_sum is None else fc_sum + term

        i_g = jax.nn.sigmoid(iou[:, :MEMP])
        o_g = jax.nn.sigmoid(iou[:, MEMP:2 * MEMP])
        u_g = jnp.tanh(iou[:, 2 * MEMP:])
        c = i_g * u_g if fc_sum is None else i_g * u_g + fc_sum
        h = o_g * jnp.tanh(c)

        # Scatter each real node's state into the row its parent will read.
        # Static single-row stores: one per tree edge for the whole forward.
        for (slot, dst) in scatter[lvl]:
            ch_h[dst:dst + 1, :] = h[slot:slot + 1, :]
            ch_c[dst:dst + 1, :] = c[slot:slot + 1, :]

        for ti, (r_lvl, r_slot) in enumerate(roots):
            if r_lvl == lvl:
                root_c[ti] = c[r_slot:r_slot + 1, :]

    # ---- fused Similarity head on the two root cell states ------------------
    lvec, rvec = root_c[0], root_c[1]
    mult_dist = lvec * rvec
    abs_dist = jnp.abs(lvec - rvec)
    vec = jnp.concatenate([mult_dist, abs_dist], axis=1)       # (1, 2*MEMP)
    hid = jax.nn.sigmoid(jnp.dot(vec, wh_cat_ref[...],
                                 preferred_element_type=F32) + bh_ref[...])
    logits = jnp.dot(hid, wp_ref[...], preferred_element_type=F32) + bp_ref[...]
    mx = jnp.max(logits, axis=1, keepdims=True)
    lse = jnp.log(jnp.sum(jnp.exp(logits - mx), axis=1, keepdims=True))
    out_ref[...] = logits - mx - lse                           # log_softmax, dim=1


def forward_pallas(kparams, x_sched, sched):
    tensors = [x_sched, kparams["wx_all"], kparams["bx_all"], kparams["wh_iou"],
               kparams["wh_f"], kparams["wh_cat"], kparams["bh"], kparams["wp"],
               kparams["bp"]]
    idx0 = lambda i: (0, 0)
    kern = functools.partial(fused_kernel, sched=sched)
    # TODO(synk): for batched-pair throughput (esp. v7x) add a leading
    # "parallel" grid axis over independent sentence pairs and consider
    # pipeline_mode=pl.Buffered(1) on the weight specs to avoid the redundant
    # second weight buffer against the 64 MiB VMEM budget.
    return pl.pallas_call(
        kern,
        out_shape=jax.ShapeDtypeStruct((1, NUM_CLASSES), F32),
        grid=(1,),
        in_specs=[pl.BlockSpec(t.shape, idx0) for t in tensors],
        out_specs=pl.BlockSpec((1, NUM_CLASSES), idx0),
        scratch_shapes=[pltpu.VMEM((sched["cslot_rows"], MEMP), F32),   # child h
                        pltpu.VMEM((sched["cslot_rows"], MEMP), F32)],  # child c
        compiler_params=pltpu.CompilerParams(
            dimension_semantics=("arbitrary",)),
    )(*tensors)


# ----------------------------- full model ------------------------------------
def similarity_tree_lstm_forward(params, kparams, ltree, linputs, rtree, rinputs):
    # Host/XLA glue: frozen-embedding lookup (padding_idx row is zero) and
    # reordering of the embedded tokens into level/slot order so the kernel
    # reads x with static contiguous slices (no in-kernel x gather).
    lemb = jnp.take(params["emb"], linputs, axis=0).astype(F32)
    remb = jnp.take(params["emb"], rinputs, axis=0).astype(F32)
    xall = jnp.concatenate([lemb, remb], axis=0)               # (2*SEQ, IN_DIM)

    sched = build_level_schedule([ltree, rtree], SEQ)
    x_sched = (jnp.take(xall, jnp.asarray(sched["x_index"]), axis=0)
               * jnp.asarray(sched["x_valid"])[:, None])       # (TOTAL_SLOTS, IN_DIM)
    return forward_pallas(kparams, x_sched, sched)


# ----------------------------- padded / fused kernel params ------------------
def _pad_cols(w, cols):
    return jnp.pad(w, ((0, 0), (0, cols - w.shape[1])))


def _pad_rows(w, rows):
    return jnp.pad(w, ((0, rows - w.shape[0]), (0, 0)))


def _pad_rc(w, rows, cols):
    return jnp.pad(w, ((0, rows - w.shape[0]), (0, cols - w.shape[1])))


def _check_pad_invariants(kp):
    """Child masking relies on padded MEM lanes / sentinel rows being exactly
    zero (sigmoid(0)=0.5 is harmless only because it multiplies an exact-zero
    c).  The bf16 cast must not perturb those zeros."""
    def z(a):
        return bool(np.all(np.asarray(a.astype(jnp.float32)) == 0.0))
    iou_pad_cols = np.concatenate([np.arange(b * MEMP + MEM_DIM, (b + 1) * MEMP)
                                   for b in range(3)])
    all_pad_cols = np.concatenate([np.arange(b * MEMP + MEM_DIM, (b + 1) * MEMP)
                                   for b in range(4)])
    assert z(kp["wx_all"][:, all_pad_cols]) and z(kp["bx_all"][:, all_pad_cols])
    assert z(kp["wh_iou"][MEM_DIM:, :]) and z(kp["wh_iou"][:, iou_pad_cols])
    assert z(kp["wh_f"][MEM_DIM:, :]) and z(kp["wh_f"][:, MEM_DIM:])
    assert z(kp["wp"][HIDDEN_DIM:, :])


def prepare_kernel_params(p):
    # x-path: [wxi | wxo | wxu | wxf] with pre-summed biases, f32 (one-shot).
    wx_all = jnp.concatenate(
        [_pad_cols(p["wxi"], MEMP), _pad_cols(p["wxo"], MEMP),
         _pad_cols(p["wxu"], MEMP), _pad_cols(p["wxf"], MEMP)], axis=1)
    bx_all = jnp.concatenate(
        [_pad_cols(p["bi"], MEMP), _pad_cols(p["bo"], MEMP),
         _pad_cols(p["bu"], MEMP), _pad_cols(p["bf"], MEMP)], axis=1)
    # h-path: bf16 weights (MXU native), f32 accumulation in the kernel.
    wh_iou = jnp.concatenate(
        [_pad_rc(p["whi"], MEMP, MEMP), _pad_rc(p["who"], MEMP, MEMP),
         _pad_rc(p["whu"], MEMP, MEMP)], axis=1).astype(BF16)
    wh_f = _pad_rc(p["whf"], MEMP, MEMP).astype(BF16)
    # Similarity head: one fused matmul over K = [mult | abs] = 2*MEMP.
    wh_cat = jnp.concatenate(
        [_pad_rows(p["wh_mult"], MEMP), _pad_rows(p["wh_abs"], MEMP)], axis=0)
    wh_cat = _pad_cols(wh_cat, HIDP)
    bh = _pad_cols(p["bh"], HIDP)
    wp = _pad_rows(p["wp"], HIDP)

    kp = {"wx_all": wx_all, "bx_all": bx_all, "wh_iou": wh_iou, "wh_f": wh_f,
          "wh_cat": wh_cat, "bh": bh, "wp": wp, "bp": p["bp"]}
    _check_pad_invariants(kp)
    return kp


# ----------------------------- pure-JAX reference (unpadded) -----------------
def ref_node_forward(p, x, child_c, child_h, wdt):
    def hdot(a, wname):
        return jnp.dot(a.astype(wdt), p[wname].astype(wdt),
                       preferred_element_type=F32)
    h_sum = jnp.sum(child_h, axis=0, keepdims=True)
    i = jax.nn.sigmoid(x @ p["wxi"] + hdot(h_sum, "whi") + p["bi"])
    o = jax.nn.sigmoid(x @ p["wxo"] + hdot(h_sum, "who") + p["bo"])
    u = jnp.tanh(x @ p["wxu"] + hdot(h_sum, "whu") + p["bu"])
    f = jax.nn.sigmoid(hdot(child_h, "whf") + (x @ p["wxf"] + p["bf"]))
    fc = f * child_c
    c = i * u + jnp.sum(fc, axis=0, keepdims=True)
    h = o * jnp.tanh(c)
    return c, h


def ref_tree_lstm(p, tree, inputs, wdt):
    states = [ref_tree_lstm(p, ch, inputs, wdt) for ch in tree.children]
    if not states:
        child_c = jnp.zeros((1, MEM_DIM), F32)
        child_h = jnp.zeros((1, MEM_DIM), F32)
    else:
        child_c = jnp.concatenate([s[0] for s in states], axis=0)
        child_h = jnp.concatenate([s[1] for s in states], axis=0)
    x = inputs[tree.idx][None, :]
    return ref_node_forward(p, x, child_c, child_h, wdt)


def ref_forward(p, ltree, linputs, rtree, rinputs, wdt=jnp.float32):
    lemb = jnp.take(p["emb"], linputs, axis=0).astype(F32)
    remb = jnp.take(p["emb"], rinputs, axis=0).astype(F32)
    lc, _ = ref_tree_lstm(p, ltree, lemb, wdt)
    rc, _ = ref_tree_lstm(p, rtree, remb, wdt)
    mult = lc * rc
    absd = jnp.abs(lc - rc)
    hid = jax.nn.sigmoid(mult @ p["wh_mult"] + absd @ p["wh_abs"] + p["bh"])
    logits = hid @ p["wp"] + p["bp"]
    return jax.nn.log_softmax(logits, axis=1)


# ----------------------------- parameter init --------------------------------
def init_params(key):
    ks = jax.random.split(key, 24)
    n = iter(range(24))
    rnd = lambda shape, scale=0.1: (jax.random.normal(ks[next(n)], shape, F32) * scale)

    emb = rnd((VOCAB_SIZE, IN_DIM), 0.5).at[PAD].set(0.0)   # frozen embedding
    params = {
        "emb": emb,
        # ioux / iouh split into (i, o, u) blocks; biases of the paired Linears
        # are pre-summed (mathematically identical to the PyTorch forward).
        "wxi": rnd((IN_DIM, MEM_DIM)), "wxo": rnd((IN_DIM, MEM_DIM)),
        "wxu": rnd((IN_DIM, MEM_DIM)), "wxf": rnd((IN_DIM, MEM_DIM)),
        "whi": rnd((MEM_DIM, MEM_DIM)), "who": rnd((MEM_DIM, MEM_DIM)),
        "whu": rnd((MEM_DIM, MEM_DIM)), "whf": rnd((MEM_DIM, MEM_DIM)),
        "bi": rnd((1, MEM_DIM)), "bo": rnd((1, MEM_DIM)),
        "bu": rnd((1, MEM_DIM)), "bf": rnd((1, MEM_DIM)),
        # Similarity: wh = Linear(924, hidden) split into mult / abs halves.
        "wh_mult": rnd((MEM_DIM, HIDDEN_DIM)),
        "wh_abs": rnd((MEM_DIM, HIDDEN_DIM)),
        "bh": rnd((1, HIDDEN_DIM)),
        "wp": rnd((HIDDEN_DIM, NUM_CLASSES)),
        "bp": rnd((1, NUM_CLASSES)),
    }
    return params


# ----------------------------- main -------------------------------------------
if __name__ == "__main__":
    key = jax.random.PRNGKey(0)
    pkey, lkey, rkey = jax.random.split(key, 3)
    params = init_params(pkey)
    kparams = prepare_kernel_params(params)

    # Deterministic token ids (avoid PAD=0 so embeddings are non-trivial).
    linputs = jax.random.randint(lkey, (SEQ,), 1, VOCAB_SIZE, dtype=jnp.int32)
    rinputs = jax.random.randint(rkey, (SEQ,), 1, VOCAB_SIZE, dtype=jnp.int32)

    # Deterministic dependency-style trees over the SEQ tokens.
    ltree = Tree(3, [Tree(1, [Tree(0), Tree(2)]),
                     Tree(5, [Tree(4), Tree(6), Tree(7)])])
    rtree = Tree(0, [Tree(2, [Tree(1)]),
                     Tree(4, [Tree(3)]),
                     Tree(6, [Tree(5), Tree(7)])])

    out = similarity_tree_lstm_forward(params, kparams, ltree, linputs, rtree, rinputs)
    out = jax.block_until_ready(out)
    out_np = np.asarray(out)

    # (1) Tight check against a reference that applies the SAME bf16 weight
    #     quantization on the h-path (deliberate tolerance choice for bf16).
    ref_bf16 = np.asarray(jax.block_until_ready(
        ref_forward(params, ltree, linputs, rtree, rinputs, wdt=BF16)))
    if not np.allclose(out_np, ref_bf16, atol=1e-3, rtol=1e-3):
        raise AssertionError(f"mismatch vs bf16-weight ref: kernel={out_np} ref={ref_bf16}")

    # (2) Loose sanity check against the pure-f32 reference (original module
    #     semantics); the only difference is bf16 rounding of the h-path.
    ref_f32 = np.asarray(jax.block_until_ready(
        ref_forward(params, ltree, linputs, rtree, rinputs, wdt=jnp.float32)))
    if not np.allclose(out_np, ref_f32, atol=5e-2, rtol=5e-2):
        raise AssertionError(f"mismatch vs f32 ref: kernel={out_np} ref={ref_f32}")

    print("KERNEL_OK")
</pallas_src>

<mosaic_0001>
module attributes {stable_mosaic.version = 11 : i64} {
  func.func @fused_kernel(%arg0: i32, %arg1: memref<32x64xf32, #tpu.memory_space<vmem>>, %arg2: memref<64x2048xf32, #tpu.memory_space<vmem>>, %arg3: memref<1x2048xf32, #tpu.memory_space<vmem>>, %arg4: memref<512x1536xbf16, #tpu.memory_space<vmem>>, %arg5: memref<512x512xbf16, #tpu.memory_space<vmem>>, %arg6: memref<1024x128xf32, #tpu.memory_space<vmem>>, %arg7: memref<1x128xf32, #tpu.memory_space<vmem>>, %arg8: memref<128x5xf32, #tpu.memory_space<vmem>>, %arg9: memref<1x5xf32, #tpu.memory_space<vmem>>, %arg10: memref<1x5xf32, #tpu.memory_space<vmem>>, %arg11: memref<48x512xf32, #tpu.memory_space<vmem>>, %arg12: memref<48x512xf32, #tpu.memory_space<vmem>>) attributes {dimension_semantics = [#tpu.dimension_semantics<arbitrary>], iteration_bounds = array<i64: 1>, scalar_prefetch = 0 : i64, scratch_operands = 2 : i64, tpu.core_type = #tpu.core_type<tc>, window_params = [{pipeline_mode = #tpu.pipeline_mode<synchronous>, transform_indices = @transform_0, window_bounds = array<i64: 32, 64>}, {pipeline_mode = #tpu.pipeline_mode<synchronous>, transform_indices = @transform_1, window_bounds = array<i64: 64, 2048>}, {pipeline_mode = #tpu.pipeline_mode<synchronous>, transform_indices = @transform_2, window_bounds = array<i64: 1, 2048>}, {pipeline_mode = #tpu.pipeline_mode<synchronous>, transform_indices = @transform_3, window_bounds = array<i64: 512, 1536>}, {pipeline_mode = #tpu.pipeline_mode<synchronous>, transform_indices = @transform_4, window_bounds = array<i64: 512, 512>}, {pipeline_mode = #tpu.pipeline_mode<synchronous>, transform_indices = @transform_5, window_bounds = array<i64: 1024, 128>}, {pipeline_mode = #tpu.pipeline_mode<synchronous>, transform_indices = @transform_6, window_bounds = array<i64: 1, 128>}, {pipeline_mode = #tpu.pipeline_mode<synchronous>, transform_indices = @transform_7, window_bounds = array<i64: 128, 5>}, {pipeline_mode = #tpu.pipeline_mode<synchronous>, transform_indices = @transform_8, window_bounds = array<i64: 1, 5>}, {pipeline_mode = #tpu.pipeline_mode<synchronous>, transform_indices = @transform_9, window_bounds = array<i64: 1, 5>}]} {
    %cst = arith.constant 0.000000e+00 : f32
    %0 = vector.broadcast %cst : f32 to vector<48x512xf32>
    %c0 = arith.constant 0 : index
    %c0_0 = arith.constant 0 : index
    %1 = vector.load %arg11[%c0, %c0_0] : memref<48x512xf32, #tpu.memory_space<vmem>>, vector<48x512xf32>
    tpu.vector_store %arg11[%c0, %c0_0], %0 {strides = array<i32>} : memref<48x512xf32, #tpu.memory_space<vmem>>, vector<48x512xf32>,
    %cst_1 = arith.constant 0.000000e+00 : f32
    %2 = vector.broadcast %cst_1 : f32 to vector<48x512xf32>
    %c0_2 = arith.constant 0 : index
    %c0_3 = arith.constant 0 : index
    %3 = vector.load %arg12[%c0_2, %c0_3] : memref<48x512xf32, #tpu.memory_space<vmem>>, vector<48x512xf32>
    tpu.vector_store %arg12[%c0_2, %c0_3], %2 {strides = array<i32>} : memref<48x512xf32, #tpu.memory_space<vmem>>, vector<48x512xf32>,
    %c0_4 = arith.constant 0 : index
    %c0_5 = arith.constant 0 : index
    %4 = vector.load %arg1[%c0_4, %c0_5] : memref<32x64xf32, #tpu.memory_space<vmem>>, vector<32x64xf32>
    %c0_6 = arith.constant 0 : index
    %c0_7 = arith.constant 0 : index
    %5 = vector.load %arg2[%c0_6, %c0_7] : memref<64x2048xf32, #tpu.memory_space<vmem>>, vector<64x2048xf32>
    %cst_8 = arith.constant dense<0.000000e+00> : vector<32x2048xf32>
    %6 = tpu.matmul %4, %5, %cst_8 {dimension_numbers = #tpu.dot_dimension_numbers<[1], [0], [0], [1], [0, 0, 1, 1], [], []>} : vector<32x64xf32>, vector<64x2048xf32>, vector<32x2048xf32> -> vector<32x2048xf32>
    %c0_9 = arith.constant 0 : index
    %c0_10 = arith.constant 0 : index
    %7 = vector.load %arg3[%c0_9, %c0_10] : memref<1x2048xf32, #tpu.memory_space<vmem>>, vector<1x2048xf32>
    %8 = vector.broadcast %7 : vector<1x2048xf32> to vector<32x2048xf32>
    %9 = arith.addf %6, %8 : vector<32x2048xf32>
    %10 = vector.extract_strided_slice %9 {offsets = [0, 0], sizes = [16, 2048], strides = [1, 1]} : vector<32x2048xf32> to vector<16x2048xf32>
    %11 = vector.extract_strided_slice %10 {offsets = [0, 0], sizes = [16, 1536], strides = [1, 1]} : vector<16x2048xf32> to vector<16x1536xf32>
    %12 = vector.extract_strided_slice %11 {offsets = [0, 0], sizes = [16, 512], strides = [1, 1]} : vector<16x1536xf32> to vector<16x512xf32>
    %13 = arith.negf %12 : vector<16x512xf32>
    %14 = math.exp %13 : vector<16x512xf32>
    %cst_11 = arith.constant 1.000000e+00 : f32
    %15 = vector.broadcast %cst_11 : f32 to vector<16x512xf32>
    %16 = arith.addf %15, %14 : vector<16x512xf32>
    %17 = arith.divf %15, %16 : vector<16x512xf32>
    %18 = vector.extract_strided_slice %11 {offsets = [0, 512], sizes = [16, 512], strides = [1, 1]} : vector<16x1536xf32> to vector<16x512xf32>
    %19 = arith.negf %18 : vector<16x512xf32>
    %20 = math.exp %19 : vector<16x512xf32>
    %cst_12 = arith.constant 1.000000e+00 : f32
    %21 = vector.broadcast %cst_12 : f32 to vector<16x512xf32>
    %22 = arith.addf %21, %20 : vector<16x512xf32>
    %23 = arith.divf %21, %22 : vector<16x512xf32>
    %24 = vector.extract_strided_slice %11 {offsets = [0, 1024], sizes = [16, 512], strides = [1, 1]} : vector<16x1536xf32> to vector<16x512xf32>
    %25 = math.tanh %24 : vector<16x512xf32>
    %26 = arith.mulf %17, %25 : vector<16x512xf32>
    %27 = math.tanh %26 : vector<16x512xf32>
    %28 = arith.mulf %23, %27 : vector<16x512xf32>
    %29 = vector.extract_strided_slice %28 {offsets = [0, 0], sizes = [1, 512], strides = [1, 1]} : vector<16x512xf32> to vector<1x512xf32>
    %c0_13 = arith.constant 0 : index
    %c0_14 = arith.constant 0 : index
    %30 = vector.load %arg11[%c0_13, %c0_14] : memref<48x512xf32, #tpu.memory_space<vmem>>, vector<1x512xf32>
    tpu.vector_store %arg11[%c0_13, %c0_14], %29 {strides = array<i32>} : memref<48x512xf32, #tpu.memory_space<vmem>>, vector<1x512xf32>,
    %31 = vector.extract_strided_slice %26 {offsets = [0, 0], sizes = [1, 512], strides = [1, 1]} : vector<16x512xf32> to vector<1x512xf32>
    %c0_15 = arith.constant 0 : index
    %c0_16 = arith.constant 0 : index
    %32 = vector.load %arg12[%c0_15, %c0_16] : memref<48x512xf32, #tpu.memory_space<vmem>>, vector<1x512xf32>
    tpu.vector_store %arg12[%c0_15, %c0_16], %31 {strides = array<i32>} : memref<48x512xf32, #tpu.memory_space<vmem>>, vector<1x512xf32>,
    %33 = vector.extract_strided_slice %28 {offsets = [1, 0], sizes = [1, 512], strides = [1, 1]} : vector<16x512xf32> to vector<1x512xf32>
    %c8 = arith.constant 8 : index
    %c0_17 = arith.constant 0 : index
    %34 = vector.load %arg11[%c8, %c0_17] : memref<48x512xf32, #tpu.memory_space<vmem>>, vector<1x512xf32>
    tpu.vector_store %arg11[%c8, %c0_17], %33 {strides = array<i32>} : memref<48x512xf32, #tpu.memory_space<vmem>>, vector<1x512xf32>,
    %35 = vector.extract_strided_slice %26 {offsets = [1, 0], sizes = [1, 512], strides = [1, 1]} : vector<16x512xf32> to vector<1x512xf32>
    %c8_18 = arith.constant 8 : index
    %c0_19 = arith.constant 0 : index
    %36 = vector.load %arg12[%c8_18, %c0_19] : memref<48x512xf32, #tpu.memory_space<vmem>>, vector<1x512xf32>
    tpu.vector_store %arg12[%c8_18, %c0_19], %35 {strides = array<i32>} : memref<48x512xf32, #tpu.memory_space<vmem>>, vector<1x512xf32>,
    %37 = vector.extract_strided_slice %28 {offsets = [2, 0], sizes = [1, 512], strides = [1, 1]} : vector<16x512xf32> to vector<1x512xf32>
    %c1 = arith.constant 1 : index
    %c0_20 = arith.constant 0 : index
    %38 = vector.load %arg11[%c1, %c0_20] : memref<48x512xf32, #tpu.memory_space<vmem>>, vector<1x512xf32>
    tpu.vector_store %arg11[%c1, %c0_20], %37 {strides = array<i32>} : memref<48x512xf32, #tpu.memory_space<vmem>>, vector<1x512xf32>,
    %39 = vector.extract_strided_slice %26 {offsets = [2, 0], sizes = [1, 512], strides = [1, 1]} : vector<16x512xf32> to vector<1x512xf32>
    %c1_21 = arith.constant 1 : index
    %c0_22 = arith.constant 0 : index
    %40 = vector.load %arg12[%c1_21, %c0_22] : memref<48x512xf32, #tpu.memory_space<vmem>>, vector<1x512xf32>
    tpu.vector_store %arg12[%c1_21, %c0_22], %39 {strides = array<i32>} : memref<48x512xf32, #tpu.memory_space<vmem>>, vector<1x512xf32>,
    %41 = vector.extract_strided_slice %28 {offsets = [3, 0], sizes = [1, 512], strides = [1, 1]} : vector<16x512xf32> to vector<1x512xf32>
    %c9 = arith.constant 9 : index
    %c0_23 = arith.constant 0 : index
    %42 = vector.load %arg11[%c9, %c0_23] : memref<48x512xf32, #tpu.memory_space<vmem>>, vector<1x512xf32>
    tpu.vector_store %arg11[%c9, %c0_23], %41 {strides = array<i32>} : memref<48x512xf32, #tpu.memory_space<vmem>>, vector<1x512xf32>,
    %43 = vector.extract_strided_slice %26 {offsets = [3, 0], sizes = [1, 512], strides = [1, 1]} : vector<16x512xf32> to vector<1x512xf32>
    %c9_24 = arith.constant 9 : index
    %c0_25 = arith.constant 0 : index
    %44 = vector.load %arg12[%c9_24, %c0_25] : memref<48x512xf32, #tpu.memory_space<vmem>>, vector<1x512xf32>
    tpu.vector_store %arg12[%c9_24, %c0_25], %43 {strides = array<i32>} : memref<48x512xf32, #tpu.memory_space<vmem>>, vector<1x512xf32>,
    %45 = vector.extract_strided_slice %28 {offsets = [4, 0], sizes = [1, 512], strides = [1, 1]} : vector<16x512xf32> to vector<1x512xf32>
    %c17 = arith.constant 17 : index
    %c0_26 = arith.constant 0 : index
    %46 = vector.load %arg11[%c17, %c0_26] : memref<48x512xf32, #tpu.memory_space<vmem>>, vector<1x512xf32>
    tpu.vector_store %arg11[%c17, %c0_26], %45 {strides = array<i32>} : memref<48x512xf32, #tpu.memory_space<vmem>>, vector<1x512xf32>,
    %47 = vector.extract_strided_slice %26 {offsets = [4, 0], sizes = [1, 512], strides = [1, 1]} : vector<16x512xf32> to vector<1x512xf32>
    %c17_27 = arith.constant 17 : index
    %c0_28 = arith.constant 0 : index
    %48 = vector.load %arg12[%c17_27, %c0_28] : memref<48x512xf32, #tpu.memory_space<vmem>>, vector<1x512xf32>
    tpu.vector_store %arg12[%c17_27, %c0_28], %47 {strides = array<i32>} : memref<48x512xf32, #tpu.memory_space<vmem>>, vector<1x512xf32>,
    %49 = vector.extract_strided_slice %28 {offsets = [5, 0], sizes = [1, 512], strides = [1, 1]} : vector<16x512xf32> to vector<1x512xf32>
    %c2 = arith.constant 2 : index
    %c0_29 = arith.constant 0 : index
    %50 = vector.load %arg11[%c2, %c0_29] : memref<48x512xf32, #tpu.memory_space<vmem>>, vector<1x512xf32>
    tpu.vector_store %arg11[%c2, %c0_29], %49 {strides = array<i32>} : memref<48x512xf32, #tpu.memory_space<vmem>>, vector<1x512xf32>,
    %51 = vector.extract_strided_slice %26 {offsets = [5, 0], sizes = [1, 512], strides = [1, 1]} : vector<16x512xf32> to vector<1x512xf32>
    %c2_30 = arith.constant 2 : index
    %c0_31 = arith.constant 0 : index
    %52 = vector.load %arg12[%c2_30, %c0_31] : memref<48x512xf32, #tpu.memory_space<vmem>>, vector<1x512xf32>
    tpu.vector_store %arg12[%c2_30, %c0_31], %51 {strides = array<i32>} : memref<48x512xf32, #tpu.memory_space<vmem>>, vector<1x512xf32>,
    %53 = vector.extract_strided_slice %28 {offsets = [6, 0], sizes = [1, 512], strides = [1, 1]} : vector<16x512xf32> to vector<1x512xf32>
    %c3 = arith.constant 3 : index
    %c0_32 = arith.constant 0 : index
    %54 = vector.load %arg11[%c3, %c0_32] : memref<48x512xf32, #tpu.memory_space<vmem>>, vector<1x512xf32>
    tpu.vector_store %arg11[%c3, %c0_32], %53 {strides = array<i32>} : memref<48x512xf32, #tpu.memory_space<vmem>>, vector<1x512xf32>,
    %55 = vector.extract_strided_slice %26 {offsets = [6, 0], sizes = [1, 512], strides = [1, 1]} : vector<16x512xf32> to vector<1x512xf32>
    %c3_33 = arith.constant 3 : index
    %c0_34 = arith.constant 0 : index
    %56 = vector.load %arg12[%c3_33, %c0_34] : memref<48x512xf32, #tpu.memory_space<vmem>>, vector<1x512xf32>
    tpu.vector_store %arg12[%c3_33, %c0_34], %55 {strides = array<i32>} : memref<48x512xf32, #tpu.memory_space<vmem>>, vector<1x512xf32>,
    %57 = vector.extract_strided_slice %28 {offsets = [7, 0], sizes = [1, 512], strides = [1, 1]} : vector<16x512xf32> to vector<1x512xf32>
    %c4 = arith.constant 4 : index
    %c0_35 = arith.constant 0 : index
    %58 = vector.load %arg11[%c4, %c0_35] : memref<48x512xf32, #tpu.memory_space<vmem>>, vector<1x512xf32>
    tpu.vector_store %arg11[%c4, %c0_35], %57 {strides = array<i32>} : memref<48x512xf32, #tpu.memory_space<vmem>>, vector<1x512xf32>,
    %59 = vector.extract_strided_slice %26 {offsets = [7, 0], sizes = [1, 512], strides = [1, 1]} : vector<16x512xf32> to vector<1x512xf32>
    %c4_36 = arith.constant 4 : index
    %c0_37 = arith.constant 0 : index
    %60 = vector.load %arg12[%c4_36, %c0_37] : memref<48x512xf32, #tpu.memory_space<vmem>>, vector<1x512xf32>
    tpu.vector_store %arg12[%c4_36, %c0_37], %59 {strides = array<i32>} : memref<48x512xf32, #tpu.memory_space<vmem>>, vector<1x512xf32>,
    %61 = vector.extract_strided_slice %28 {offsets = [8, 0], sizes = [1, 512], strides = [1, 1]} : vector<16x512xf32> to vector<1x512xf32>
    %c12 = arith.constant 12 : index
    %c0_38 = arith.constant 0 : index
    %62 = vector.load %arg11[%c12, %c0_38] : memref<48x512xf32, #tpu.memory_space<vmem>>, vector<1x512xf32>
    tpu.vector_store %arg11[%c12, %c0_38], %61 {strides = array<i32>} : memref<48x512xf32, #tpu.memory_space<vmem>>, vector<1x512xf32>,
    %63 = vector.extract_strided_slice %26 {offsets = [8, 0], sizes = [1, 512], strides = [1, 1]} : vector<16x512xf32> to vector<1x512xf32>
    %c12_39 = arith.constant 12 : index
    %c0_40 = arith.constant 0 : index
    %64 = vector.load %arg12[%c12_39, %c0_40] : memref<48x512xf32, #tpu.memory_space<vmem>>, vector<1x512xf32>
    tpu.vector_store %arg12[%c12_39, %c0_40], %63 {strides = array<i32>} : memref<48x512xf32, #tpu.memory_space<vmem>>, vector<1x512xf32>,
    %65 = vector.extract_strided_slice %9 {offsets = [16, 0], sizes = [8, 2048], strides = [1, 1]} : vector<32x2048xf32> to vector<8x2048xf32>
    %66 = vector.extract_strided_slice %65 {offsets = [0, 0], sizes = [8, 1536], strides = [1, 1]} : vector<8x2048xf32> to vector<8x1536xf32>
    %67 = vector.extract_strided_slice %65 {offsets = [0, 1536], sizes = [8, 512], strides = [1, 1]} : vector<8x2048xf32> to vector<8x512xf32>
    %c0_41 = arith.constant 0 : index
    %c0_42 = arith.constant 0 : index
    %68 = vector.load %arg11[%c0_41, %c0_42] : memref<48x512xf32, #tpu.memory_space<vmem>>, vector<24x512xf32>
    %c0_43 = arith.constant 0 : index
    %c0_44 = arith.constant 0 : index
    %69 = vector.load %arg12[%c0_43, %c0_44] : memref<48x512xf32, #tpu.memory_space<vmem>>, vector<24x512xf32>
    %70 = vector.extract_strided_slice %68 {offsets = [0, 0], sizes = [8, 512], strides = [1, 1]} : vector<24x512xf32> to vector<8x512xf32>
    %71 = vector.extract_strided_slice %68 {offsets = [8, 0], sizes = [8, 512], strides = [1, 1]} : vector<24x512xf32> to vector<8x512xf32>
    %72 = arith.addf %70, %71 : vector<8x512xf32>
    %73 = vector.extract_strided_slice %68 {offsets = [16, 0], sizes = [8, 512], strides = [1, 1]} : vector<24x512xf32> to vector<8x512xf32>
    %74 = arith.addf %72, %73 : vector<8x512xf32>
    %75 = arith.truncf %74 : vector<8x512xf32> to vector<8x512xbf16>
    %c0_45 = arith.constant 0 : index
    %c0_46 = arith.constant 0 : index
    %76 = vector.load %arg4[%c0_45, %c0_46] : memref<512x1536xbf16, #tpu.memory_space<vmem>>, vector<512x1536xbf16>
    %cst_47 = arith.constant dense<0.000000e+00> : vector<8x1536xf32>
    %77 = tpu.matmul %75, %76, %cst_47 {dimension_numbers = #tpu.dot_dimension_numbers<[1], [0], [0], [1], [0, 0, 1, 1], [], []>} : vector<8x512xbf16>, vector<512x1536xbf16>, vector<8x1536xf32> -> vector<8x1536xf32>
    %78 = arith.addf %66, %77 : vector<8x1536xf32>
    %79 = arith.truncf %68 : vector<24x512xf32> to vector<24x512xbf16>
    %c0_48 = arith.constant 0 : index
    %c0_49 = arith.constant 0 : index
    %80 = vector.load %arg5[%c0_48, %c0_49] : memref<512x512xbf16, #tpu.memory_space<vmem>>, vector<512x512xbf16>
    %cst_50 = arith.constant dense<0.000000e+00> : vector<24x512xf32>
    %81 = tpu.matmul %79, %80, %cst_50 {dimension_numbers = #tpu.dot_dimension_numbers<[1], [0], [0], [1], [0, 0, 1, 1], [], []>} : vector<24x512xbf16>, vector<512x512xbf16>, vector<24x512xf32> -> vector<24x512xf32>
    %82 = vector.extract_strided_slice %81 {offsets = [0, 0], sizes = [8, 512], strides = [1, 1]} : vector<24x512xf32> to vector<8x512xf32>
    %83 = arith.addf %82, %67 : vector<8x512xf32>
    %84 = arith.negf %83 : vector<8x512xf32>
    %85 = math.exp %84 : vector<8x512xf32>
    %cst_51 = arith.constant 1.000000e+00 : f32
    %86 = vector.broadcast %cst_51 : f32 to vector<8x512xf32>
    %87 = arith.addf %86, %85 : vector<8x512xf32>
    %88 = arith.divf %86, %87 : vector<8x512xf32>
    %89 = vector.extract_strided_slice %69 {offsets = [0, 0], sizes = [8, 512], strides = [1, 1]} : vector<24x512xf32> to vector<8x512xf32>
    %90 = arith.mulf %88, %89 : vector<8x512xf32>
    %91 = vector.extract_strided_slice %81 {offsets = [8, 0], sizes = [8, 512], strides = [1, 1]} : vector<24x512xf32> to vector<8x512xf32>
    %92 = arith.addf %91, %67 : vector<8x512xf32>
    %93 = arith.negf %92 : vector<8x512xf32>
    %94 = math.exp %93 : vector<8x512xf32>
    %cst_52 = arith.constant 1.000000e+00 : f32
    %95 = vector.broadcast %cst_52 : f32 to vector<8x512xf32>
    %96 = arith.addf %95, %94 : vector<8x512xf32>
    %97 = arith.divf %95, %96 : vector<8x512xf32>
    %98 = vector.extract_strided_slice %69 {offsets = [8, 0], sizes = [8, 512], strides = [1, 1]} : vector<24x512xf32> to vector<8x512xf32>
    %99 = arith.mulf %97, %98 : vector<8x512xf32>
    %100 = arith.addf %90, %99 : vector<8x512xf32>
    %101 = vector.extract_strided_slice %81 {offsets = [16, 0], sizes = [8, 512], strides = [1, 1]} : vector<24x512xf32> to vector<8x512xf32>
    %102 = arith.addf %101, %67 : vector<8x512xf32>
    %103 = arith.negf %102 : vector<8x512xf32>
    %104 = math.exp %103 : vector<8x512xf32>
    %cst_53 = arith.constant 1.000000e+00 : f32
    %105 = vector.broadcast %cst_53 : f32 to vector<8x512xf32>
    %106 = arith.addf %105, %104 : vector<8x512xf32>
    %107 = arith.divf %105, %106 : vector<8x512xf32>
    %108 = vector.extract_strided_slice %69 {offsets = [16, 0], sizes = [8, 512], strides = [1, 1]} : vector<24x512xf32> to vector<8x512xf32>
    %109 = arith.mulf %107, %108 : vector<8x512xf32>
    %110 = arith.addf %100, %109 : vector<8x512xf32>
    %111 = vector.extract_strided_slice %78 {offsets = [0, 0], sizes = [8, 512], strides = [1, 1]} : vector<8x1536xf32> to vector<8x512xf32>
    %112 = arith.negf %111 : vector<8x512xf32>
    %113 = math.exp %112 : vector<8x512xf32>
    %cst_54 = arith.constant 1.000000e+00 : f32
    %114 = vector.broadcast %cst_54 : f32 to vector<8x512xf32>
    %115 = arith.addf %114, %113 : vector<8x512xf32>
    %116 = arith.divf %114, %115 : vector<8x512xf32>
    %117 = vector.extract_strided_slice %78 {offsets = [0, 512], sizes = [8, 512], strides = [1, 1]} : vector<8x1536xf32> to vector<8x512xf32>
    %118 = arith.negf %117 : vector<8x512xf32>
    %119 = math.exp %118 : vector<8x512xf32>
    %cst_55 = arith.constant 1.000000e+00 : f32
    %120 = vector.broadcast %cst_55 : f32 to vector<8x512xf32>
    %121 = arith.addf %120, %119 : vector<8x512xf32>
    %122 = arith.divf %120, %121 : vector<8x512xf32>
    %123 = vector.extract_strided_slice %78 {offsets = [0, 1024], sizes = [8, 512], strides = [1, 1]} : vector<8x1536xf32> to vector<8x512xf32>
    %124 = math.tanh %123 : vector<8x512xf32>
    %125 = arith.mulf %116, %124 : vector<8x512xf32>
    %126 = arith.addf %125, %110 : vector<8x512xf32>
    %127 = math.tanh %126 : vector<8x512xf32>
    %128 = arith.mulf %122, %127 : vector<8x512xf32>
    %129 = vector.extract_strided_slice %128 {offsets = [0, 0], sizes = [1, 512], strides = [1, 1]} : vector<8x512xf32> to vector<1x512xf32>
    %c24 = arith.constant 24 : index
    %c0_56 = arith.constant 0 : index
    %130 = vector.load %arg11[%c24, %c0_56] : memref<48x512xf32, #tpu.memory_space<vmem>>, vector<1x512xf32>
    tpu.vector_store %arg11[%c24, %c0_56], %129 {strides = array<i32>} : memref<48x512xf32, #tpu.memory_space<vmem>>, vector<1x512xf32>,
    %131 = vector.extract_strided_slice %126 {offsets = [0, 0], sizes = [1, 512], strides = [1, 1]} : vector<8x512xf32> to vector<1x512xf32>
    %c24_57 = arith.constant 24 : index
    %c0_58 = arith.constant 0 : index
    %132 = vector.load %arg12[%c24_57, %c0_58] : memref<48x512xf32, #tpu.memory_space<vmem>>, vector<1x512xf32>
    tpu.vector_store %arg12[%c24_57, %c0_58], %131 {strides = array<i32>} : memref<48x512xf32, #tpu.memory_space<vmem>>, vector<1x512xf32>,
    %133 = vector.extract_strided_slice %128 {offsets = [1, 0], sizes = [1, 512], strides = [1, 1]} : vector<8x512xf32> to vector<1x512xf32>
    %c32 = arith.constant 32 : index
    %c0_59 = arith.constant 0 : index
    %134 = vector.load %arg11[%c32, %c0_59] : memref<48x512xf32, #tpu.memory_space<vmem>>, vector<1x512xf32>
    tpu.vector_store %arg11[%c32, %c0_59], %133 {strides = array<i32>} : memref<48x512xf32, #tpu.memory_space<vmem>>, vector<1x512xf32>,
    %135 = vector.extract_strided_slice %126 {offsets = [1, 0], sizes = [1, 512], strides = [1, 1]} : vector<8x512xf32> to vector<1x512xf32>
    %c32_60 = arith.constant 32 : index
    %c0_61 = arith.constant 0 : index
    %136 = vector.load %arg12[%c32_60, %c0_61] : memref<48x512xf32, #tpu.memory_space<vmem>>, vector<1x512xf32>
    tpu.vector_store %arg12[%c32_60, %c0_61], %135 {strides = array<i32>} : memref<48x512xf32, #tpu.memory_space<vmem>>, vector<1x512xf32>,
    %137 = vector.extract_strided_slice %128 {offsets = [2, 0], sizes = [1, 512], strides = [1, 1]} : vector<8x512xf32> to vector<1x512xf32>
    %c25 = arith.constant 25 : index
    %c0_62 = arith.constant 0 : index
    %138 = vector.load %arg11[%c25, %c0_62] : memref<48x512xf32, #tpu.memory_space<vmem>>, vector<1x512xf32>
    tpu.vector_store %arg11[%c25, %c0_62], %137 {strides = array<i32>} : memref<48x512xf32, #tpu.memory_space<vmem>>, vector<1x512xf32>,
    %139 = vector.extract_strided_slice %126 {offsets = [2, 0], sizes = [1, 512], strides = [1, 1]} : vector<8x512xf32> to vector<1x512xf32>
    %c25_63 = arith.constant 25 : index
    %c0_64 = arith.constant 0 : index
    %140 = vector.load %arg12[%c25_63, %c0_64] : memref<48x512xf32, #tpu.memory_space<vmem>>, vector<1x512xf32>
    tpu.vector_store %arg12[%c25_63, %c0_64], %139 {strides = array<i32>} : memref<48x512xf32, #tpu.memory_space<vmem>>, vector<1x512xf32>,
    %141 = vector.extract_strided_slice %128 {offsets = [3, 0], sizes = [1, 512], strides = [1, 1]} : vector<8x512xf32> to vector<1x512xf32>
    %c33 = arith.constant 33 : index
    %c0_65 = arith.constant 0 : index
    %142 = vector.load %arg11[%c33, %c0_65] : memref<48x512xf32, #tpu.memory_space<vmem>>, vector<1x512xf32>
    tpu.vector_store %arg11[%c33, %c0_65], %141 {strides = array<i32>} : memref<48x512xf32, #tpu.memory_space<vmem>>, vector<1x512xf32>,
    %143 = vector.extract_strided_slice %126 {offsets = [3, 0], sizes = [1, 512], strides = [1, 1]} : vector<8x512xf32> to vector<1x512xf32>
    %c33_66 = arith.constant 33 : index
    %c0_67 = arith.constant 0 : index
    %144 = vector.load %arg12[%c33_66, %c0_67] : memref<48x512xf32, #tpu.memory_space<vmem>>, vector<1x512xf32>
    tpu.vector_store %arg12[%c33_66, %c0_67], %143 {strides = array<i32>} : memref<48x512xf32, #tpu.memory_space<vmem>>, vector<1x512xf32>,
    %145 = vector.extract_strided_slice %128 {offsets = [4, 0], sizes = [1, 512], strides = [1, 1]} : vector<8x512xf32> to vector<1x512xf32>
    %c41 = arith.constant 41 : index
    %c0_68 = arith.constant 0 : index
    %146 = vector.load %arg11[%c41, %c0_68] : memref<48x512xf32, #tpu.memory_space<vmem>>, vector<1x512xf32>
    tpu.vector_store %arg11[%c41, %c0_68], %145 {strides = array<i32>} : memref<48x512xf32, #tpu.memory_space<vmem>>, vector<1x512xf32>,
    %147 = vector.extract_strided_slice %126 {offsets = [4, 0], sizes = [1, 512], strides = [1, 1]} : vector<8x512xf32> to vector<1x512xf32>
    %c41_69 = arith.constant 41 : index
    %c0_70 = arith.constant 0 : index
    %148 = vector.load %arg12[%c41_69, %c0_70] : memref<48x512xf32, #tpu.memory_space<vmem>>, vector<1x512xf32>
    tpu.vector_store %arg12[%c41_69, %c0_70], %147 {strides = array<i32>} : memref<48x512xf32, #tpu.memory_space<vmem>>, vector<1x512xf32>,
    %149 = vector.extract_strided_slice %9 {offsets = [24, 0], sizes = [8, 2048], strides = [1, 1]} : vector<32x2048xf32> to vector<8x2048xf32>
    %150 = vector.extract_strided_slice %149 {offsets = [0, 0], sizes = [8, 1536], strides = [1, 1]} : vector<8x2048xf32> to vector<8x1536xf32>
    %151 = vector.extract_strided_slice %149 {offsets = [0, 1536], sizes = [8, 512], strides = [1, 1]} : vector<8x2048xf32> to vector<8x512xf32>
    %c24_71 = arith.constant 24 : index
    %c0_72 = arith.constant 0 : index
    %152 = vector.load %arg11[%c24_71, %c0_72] : memref<48x512xf32, #tpu.memory_space<vmem>>, vector<24x512xf32>
    %c24_73 = arith.constant 24 : index
    %c0_74 = arith.constant 0 : index
    %153 = vector.load %arg12[%c24_73, %c0_74] : memref<48x512xf32, #tpu.memory_space<vmem>>, vector<24x512xf32>
    %154 = vector.extract_strided_slice %152 {offsets = [0, 0], sizes = [8, 512], strides = [1, 1]} : vector<24x512xf32> to vector<8x512xf32>
    %155 = vector.extract_strided_slice %152 {offsets = [8, 0], sizes = [8, 512], strides = [1, 1]} : vector<24x512xf32> to vector<8x512xf32>
    %156 = arith.addf %154, %155 : vector<8x512xf32>
    %157 = vector.extract_strided_slice %152 {offsets = [16, 0], sizes = [8, 512], strides = [1, 1]} : vector<24x512xf32> to vector<8x512xf32>
    %158 = arith.addf %156, %157 : vector<8x512xf32>
    %159 = arith.truncf %158 : vector<8x512xf32> to vector<8x512xbf16>
    %c0_75 = arith.constant 0 : index
    %c0_76 = arith.constant 0 : index
    %160 = vector.load %arg4[%c0_75, %c0_76] : memref<512x1536xbf16, #tpu.memory_space<vmem>>, vector<512x1536xbf16>
    %cst_77 = arith.constant dense<0.000000e+00> : vector<8x1536xf32>
    %161 = tpu.matmul %159, %160, %cst_77 {dimension_numbers = #tpu.dot_dimension_numbers<[1], [0], [0], [1], [0, 0, 1, 1], [], []>} : vector<8x512xbf16>, vector<512x1536xbf16>, vector<8x1536xf32> -> vector<8x1536xf32>
    %162 = arith.addf %150, %161 : vector<8x1536xf32>
    %163 = arith.truncf %152 : vector<24x512xf32> to vector<24x512xbf16>
    %c0_78 = arith.constant 0 : index
    %c0_79 = arith.constant 0 : index
    %164 = vector.load %arg5[%c0_78, %c0_79] : memref<512x512xbf16, #tpu.memory_space<vmem>>, vector<512x512xbf16>
    %cst_80 = arith.constant dense<0.000000e+00> : vector<24x512xf32>
    %165 = tpu.matmul %163, %164, %cst_80 {dimension_numbers = #tpu.dot_dimension_numbers<[1], [0], [0], [1], [0, 0, 1, 1], [], []>} : vector<24x512xbf16>, vector<512x512xbf16>, vector<24x512xf32> -> vector<24x512xf32>
    %166 = vector.extract_strided_slice %165 {offsets = [0, 0], sizes = [8, 512], strides = [1, 1]} : vector<24x512xf32> to vector<8x512xf32>
    %167 = arith.addf %166, %151 : vector<8x512xf32>
    %168 = arith.negf %167 : vector<8x512xf32>
    %169 = math.exp %168 : vector<8x512xf32>
    %cst_81 = arith.constant 1.000000e+00 : f32
    %170 = vector.broadcast %cst_81 : f32 to vector<8x512xf32>
    %171 = arith.addf %170, %169 : vector<8x512xf32>
    %172 = arith.divf %170, %171 : vector<8x512xf32>
    %173 = vector.extract_strided_slice %153 {offsets = [0, 0], sizes = [8, 512], strides = [1, 1]} : vector<24x512xf32> to vector<8x512xf32>
    %174 = arith.mulf %172, %173 : vector<8x512xf32>
    %175 = vector.extract_strided_slice %165 {offsets = [8, 0], sizes = [8, 512], strides = [1, 1]} : vector<24x512xf32> to vector<8x512xf32>
    %176 = arith.addf %175, %151 : vector<8x512xf32>
    %177 = arith.negf %176 : vector<8x512xf32>
    %178 = math.exp %177 : vector<8x512xf32>
    %cst_82 = arith.constant 1.000000e+00 : f32
    %179 = vector.broadcast %cst_82 : f32 to vector<8x512xf32>
    %180 = arith.addf %179, %178 : vector<8x512xf32>
    %181 = arith.divf %179, %180 : vector<8x512xf32>
    %182 = vector.extract_strided_slice %153 {offsets = [8, 0], sizes = [8, 512], strides = [1, 1]} : vector<24x512xf32> to vector<8x512xf32>
    %183 = arith.mulf %181, %182 : vector<8x512xf32>
    %184 = arith.addf %174, %183 : vector<8x512xf32>
    %185 = vector.extract_strided_slice %165 {offsets = [16, 0], sizes = [8, 512], strides = [1, 1]} : vector<24x512xf32> to vector<8x512xf32>
    %186 = arith.addf %185, %151 : vector<8x512xf32>
    %187 = arith.negf %186 : vector<8x512xf32>
    %188 = math.exp %187 : vector<8x512xf32>
    %cst_83 = arith.constant 1.000000e+00 : f32
    %189 = vector.broadcast %cst_83 : f32 to vector<8x512xf32>
    %190 = arith.addf %189, %188 : vector<8x512xf32>
    %191 = arith.divf %189, %190 : vector<8x512xf32>
    %192 = vector.extract_strided_slice %153 {offsets = [16, 0], sizes = [8, 512], strides = [1, 1]} : vector<24x512xf32> to vector<8x512xf32>
    %193 = arith.mulf %191, %192 : vector<8x512xf32>
    %194 = arith.addf %184, %193 : vector<8x512xf32>
    %195 = vector.extract_strided_slice %162 {offsets = [0, 0], sizes = [8, 512], strides = [1, 1]} : vector<8x1536xf32> to vector<8x512xf32>
    %196 = arith.negf %195 : vector<8x512xf32>
    %197 = math.exp %196 : vector<8x512xf32>
    %cst_84 = arith.constant 1.000000e+00 : f32
    %198 = vector.broadcast %cst_84 : f32 to vector<8x512xf32>
    %199 = arith.addf %198, %197 : vector<8x512xf32>
    %200 = arith.divf %198, %199 : vector<8x512xf32>
    %201 = vector.extract_strided_slice %162 {offsets = [0, 1024], sizes = [8, 512], strides = [1, 1]} : vector<8x1536xf32> to vector<8x512xf32>
    %202 = math.tanh %201 : vector<8x512xf32>
    %203 = arith.mulf %200, %202 : vector<8x512xf32>
    %204 = arith.addf %203, %194 : vector<8x512xf32>
    %205 = vector.extract_strided_slice %204 {offsets = [0, 0], sizes = [1, 512], strides = [1, 1]} : vector<8x512xf32> to vector<1x512xf32>
    %206 = vector.extract_strided_slice %204 {offsets = [1, 0], sizes = [1, 512], strides = [1, 1]} : vector<8x512xf32> to vector<1x512xf32>
    %207 = arith.mulf %205, %206 : vector<1x512xf32>
    %208 = arith.subf %205, %206 : vector<1x512xf32>
    %209 = math.absf %208 : vector<1x512xf32>
    %210 = tpu.concatenate %207, %209 in 1 : vector<1x512xf32>, vector<1x512xf32> -> vector<1x1024xf32>
    %c0_85 = arith.constant 0 : index
    %c0_86 = arith.constant 0 : index
    %211 = vector.load %arg6[%c0_85, %c0_86] : memref<1024x128xf32, #tpu.memory_space<vmem>>, vector<1024x128xf32>
    %cst_87 = arith.constant dense<0.000000e+00> : vector<1x128xf32>
    %212 = tpu.matmul %210, %211, %cst_87 {dimension_numbers = #tpu.dot_dimension_numbers<[1], [0], [0], [1], [0, 0, 1, 1], [], []>} : vector<1x1024xf32>, vector<1024x128xf32>, vector<1x128xf32> -> vector<1x128xf32>
    %c0_88 = arith.constant 0 : index
    %c0_89 = arith.constant 0 : index
    %213 = vector.load %arg7[%c0_88, %c0_89] : memref<1x128xf32, #tpu.memory_space<vmem>>, vector<1x128xf32>
    %214 = arith.addf %212, %213 : vector<1x128xf32>
    %215 = arith.negf %214 : vector<1x128xf32>
    %216 = math.exp %215 : vector<1x128xf32>
    %cst_90 = arith.constant 1.000000e+00 : f32
    %217 = vector.broadcast %cst_90 : f32 to vector<1x128xf32>
    %218 = arith.addf %217, %216 : vector<1x128xf32>
    %219 = arith.divf %217, %218 : vector<1x128xf32>
    %c0_91 = arith.constant 0 : index
    %c0_92 = arith.constant 0 : index
    %220 = vector.load %arg8[%c0_91, %c0_92] : memref<128x5xf32, #tpu.memory_space<vmem>>, vector<128x5xf32>
    %cst_93 = arith.constant dense<0.000000e+00> : vector<1x5xf32>
    %221 = tpu.matmul %219, %220, %cst_93 {dimension_numbers = #tpu.dot_dimension_numbers<[1], [0], [0], [1], [0, 0, 1, 1], [], []>} : vector<1x128xf32>, vector<128x5xf32>, vector<1x5xf32> -> vector<1x5xf32>
    %c0_94 = arith.constant 0 : index
    %c0_95 = arith.constant 0 : index
    %222 = vector.load %arg9[%c0_94, %c0_95] : memref<1x5xf32, #tpu.memory_space<vmem>>, vector<1x5xf32>
    %223 = arith.addf %221, %222 : vector<1x5xf32>
    %cst_96 = arith.constant dense<0xFF800000> : vector<1xf32>
    %224 = vector.multi_reduction <maximumf>, %223, %cst_96 [1] : vector<1x5xf32> to vector<1xf32>
    %225 = vector.shape_cast %224 : vector<1xf32> to vector<1x1xf32>
    %226 = vector.broadcast %225 : vector<1x1xf32> to vector<1x5xf32>
    %227 = arith.subf %223, %226 : vector<1x5xf32>
    %228 = math.exp %227 : vector<1x5xf32>
    %cst_97 = arith.constant dense<0.000000e+00> : vector<1xf32>
    %229 = vector.multi_reduction <add>, %228, %cst_97 [1] : vector<1x5xf32> to vector<1xf32>
    %230 = vector.shape_cast %229 : vector<1xf32> to vector<1x1xf32>
    %231 = math.log %230 : vector<1x1xf32>
    %232 = vector.broadcast %225 : vector<1x1xf32> to vector<1x5xf32>
    %233 = arith.subf %223, %232 : vector<1x5xf32>
    %234 = vector.broadcast %231 : vector<1x1xf32> to vector<1x5xf32>
    %235 = arith.subf %233, %234 : vector<1x5xf32>
    %c0_98 = arith.constant 0 : index
    %c0_99 = arith.constant 0 : index
    %236 = vector.load %arg10[%c0_98, %c0_99] : memref<1x5xf32, #tpu.memory_space<vmem>>, vector<1x5xf32>
    tpu.vector_store %arg10[%c0_98, %c0_99], %235 {strides = array<i32>} : memref<1x5xf32, #tpu.memory_space<vmem>>, vector<1x5xf32>,
    return
  }
  func.func @transform_0(%arg0: i32) -> (i32, i32) {
    %c0_i32 = arith.constant 0 : i32
    %c0_i32_0 = arith.constant 0 : i32
    %c0_i32_1 = arith.constant 0 : i32
    return %c0_i32, %c0_i32_0 : i32, i32
  }
  func.func @transform_1(%arg0: i32) -> (i32, i32) {
    %c0_i32 = arith.constant 0 : i32
    %c0_i32_0 = arith.constant 0 : i32
    %c0_i32_1 = arith.constant 0 : i32
    return %c0_i32, %c0_i32_0 : i32, i32
  }
  func.func @transform_2(%arg0: i32) -> (i32, i32) {
    %c0_i32 = arith.constant 0 : i32
    %c0_i32_0 = arith.constant 0 : i32
    %c0_i32_1 = arith.constant 0 : i32
    return %c0_i32, %c0_i32_0 : i32, i32
  }
  func.func @transform_3(%arg0: i32) -> (i32, i32) {
    %c0_i32 = arith.constant 0 : i32
    %c0_i32_0 = arith.constant 0 : i32
    %c0_i32_1 = arith.constant 0 : i32
    return %c0_i32, %c0_i32_0 : i32, i32
  }
  func.func @transform_4(%arg0: i32) -> (i32, i32) {
    %c0_i32 = arith.constant 0 : i32
    %c0_i32_0 = arith.constant 0 : i32
    %c0_i32_1 = arith.constant 0 : i32
    return %c0_i32, %c0_i32_0 : i32, i32
  }
  func.func @transform_5(%arg0: i32) -> (i32, i32) {
    %c0_i32 = arith.constant 0 : i32
    %c0_i32_0 = arith.constant 0 : i32
    %c0_i32_1 = arith.constant 0 : i32
    return %c0_i32, %c0_i32_0 : i32, i32
  }
  func.func @transform_6(%arg0: i32) -> (i32, i32) {
    %c0_i32 = arith.constant 0 : i32
    %c0_i32_0 = arith.constant 0 : i32
    %c0_i32_1 = arith.constant 0 : i32
    return %c0_i32, %c0_i32_0 : i32, i32
  }
  func.func @transform_7(%arg0: i32) -> (i32, i32) {
    %c0_i32 = arith.constant 0 : i32
    %c0_i32_0 = arith.constant 0 : i32
    %c0_i32_1 = arith.constant 0 : i32
    return %c0_i32, %c0_i32_0 : i32, i32
  }
  func.func @transform_8(%arg0: i32) -> (i32, i32) {
    %c0_i32 = arith.constant 0 : i32
    %c0_i32_0 = arith.constant 0 : i32
    %c0_i32_1 = arith.constant 0 : i32
    return %c0_i32, %c0_i32_0 : i32, i32
  }
  func.func @transform_9(%arg0: i32) -> (i32, i32) {
    %c0_i32 = arith.constant 0 : i32
    %c0_i32_0 = arith.constant 0 : i32
    %c0_i32_1 = arith.constant 0 : i32
    return %c0_i32, %c0_i32_0 : i32, i32
  }
}

</mosaic_0001>

<bundles_post_ra>
// kernel: tpu_custom_call.1
= control target key start
LH: loop header
LB: loop body
LE: loop exit
PB: predicated region body
PF: predicated region fallthrough
CT: control target
= control target key end

     0   :  { %14 = vsyncpa [#allocation5], 0  ;;  %s16975_s0 = inlined_call_operand.hbm [shape: f32[32,64], index: 0, kind: input, shape index: {}]   ;;  %s16976_s1 = inlined_call_operand.hbm [shape: f32[64,2048], index: 1, kind: input, shape index: {}]   ;;  %s16977_s2 = inlined_call_operand.hbm [shape: f32[1,2048], index: 2, kind: input, shape index: {}]   ;;  %s16978_s3 = inlined_call_operand.hbm [shape: bf16[512,1536], index: 3, kind: input, shape index: {}]   ;;  %s16979_s4 = inlined_call_operand.hbm [shape: bf16[512,512], index: 4, kind: input, shape index: {}]   ;;  %s16980_s5 = inlined_call_operand.hbm [shape: f32[1024,128], index: 5, kind: input, shape index: {}]   ;;  %s16981_s6 = inlined_call_operand.hbm [shape: f32[1,128], index: 6, kind: input, shape index: {}]   ;;  %s16982_s7 = inlined_call_operand.vmem [shape: f32[128,5], index: 7, kind: input, shape index: {}]   ;;  %s16983_s8 = inlined_call_operand.hbm [shape: f32[1,5], index: 8, kind: input, shape index: {}]   ;;  %s16984_s9 = inlined_call_operand.hbm [shape: f32[1,5], index: 9, kind: output, shape index: {}]  }
   0x1   :  { %15 = vsyncpa [#allocation8], 0 }
   0x2   :  { %16 = vsyncpa [#allocation11], 0 }
   0x3   :  { %17 = vsyncpa [#allocation14], 0 }
   0x4   :  { %18 = vsyncpa [#allocation17], 0  ;;  %s37_s11 = sshll.u32 %s16976_s1, 4  ;;  %s38_s11 = int_to_ptr.hbm [resolvable:$true] %s37_s11 }
   0x5   :  { %19 = vsyncpa [#allocation6], 0  ;;  %s14897_s12 = smov [#allocation7]   ;;  %s61_s16 = sshll.u32 %s16978_s3, 4  ;;  %s62_s16 = int_to_ptr.hbm [resolvable:$true] %s61_s16 }
   0x6   :  { %s39_s13 = sshll.u32 %s14897_s12, 4  ;;  %s14898_s17 = smov 2048   ;;  %s40_s13 = int_to_ptr.vmem [resolvable:$true] %s39_s13 }
   0x7   :  { %s14899_s18 = smov 128   ;;  %s14900_s19 = smov [#allocation10]  }
   0x8   :  { %45 = dma.hbm_to_vmem [thread:$0]  %s38_s11, 16384, %s40_s13, [#allocation8], %s14898_s17, %s14898_s17, %s14899_s18  }
   0x9   :  { %s63_s20 = sshll.u32 %s14900_s19, 4  ;;  %s14901_s21 = smov 768   ;;  %s64_s20 = int_to_ptr.vmem [resolvable:$true] %s63_s20 }
   0xa   :  { %s14902_s22 = smov 48   ;;  %s87_s24 = sshll.u32 %s16980_s5, 4  ;;  %s88_s24 = int_to_ptr.hbm [resolvable:$true] %s87_s24 }
   0xb   :  { %69 = dma.hbm_to_vmem [thread:$0]  %s62_s16, 49152, %s64_s20, [#allocation11], %s14901_s21, %s14901_s21, %s14902_s22  }
   0xc   :  { %s14903_s25 = smov [#allocation13]   ;;  %s24_s3 = sshll.u32 %s16975_s0, 4  ;;  %s25_s3 = int_to_ptr.hbm [resolvable:$true] %s24_s3 }
   0xd   :  { %s89_s26 = sshll.u32 %s14903_s25, 4  ;;  %s14904_s29 = smov 8   ;;  %s90_s26 = int_to_ptr.vmem [resolvable:$true] %s89_s26 }
   0xe   :  { %95 = dma.hbm_to_vmem [thread:$0]  %s88_s24, 16384, %s90_s26, [#allocation14], %s14899_s18, %s14899_s18, %s14904_s29  }
   0xf   :  { %s51_s11 = sshll.u32 %s16977_s2, 4  ;;  %s14905_s12 = smov [#allocation4]   ;;  %s52_s11 = int_to_ptr.hbm [resolvable:$true] %s51_s11 }
  0x10   :  { %s26_s13 = sshll.u32 %s14905_s12, 4  ;;  %s14906_s5 = smov [#allocation9]   ;;  %s27_s13 = int_to_ptr.vmem [resolvable:$true] %s26_s13 }
  0x11   :  { %32 = dma.hbm_to_vmem [thread:$0]  %s25_s3, 512, %s27_s13, [#allocation5], %s14899_s18, %s14899_s18, %s14904_s29  }
  0x12   :  { %s53_s14 = sshll.u32 %s14906_s5, 4  ;;  %s74_s17 = sshll.u32 %s16979_s4, 4  ;;  %s54_s14 = int_to_ptr.vmem [resolvable:$true] %s53_s14  ;;  %s75_s17 = int_to_ptr.hbm [resolvable:$true] %s74_s17 }
  0x13   :  { %56 = dma.hbm_to_vmem [thread:$0]  %s52_s11, 256, %s54_s14, [#allocation8]  }
  0x14   :  { %s14907_s0 = smov [#allocation12]   ;;  %s101_s2 = sshll.u32 %s16981_s6, 4  ;;  %s102_s2 = int_to_ptr.hbm [resolvable:$true] %s101_s2 }
  0x15   :  { %s76_s19 = sshll.u32 %s14907_s0, 4  ;;  %s14908_s22 = smov 256   ;;  %s77_s19 = int_to_ptr.vmem [resolvable:$true] %s76_s19 }
  0x16   :  { %s14909_s1 = smov 16   ;;  %s14910_s18 = smov [#allocation15]  }
  0x17   :  { %82 = dma.hbm_to_vmem [thread:$0]  %s75_s17, 16384, %s77_s19, [#allocation11], %s14908_s22, %s14908_s22, %s14909_s1  }
  0x18   :  { %s103_s23 = sshll.u32 %s14910_s18, 4  ;;  %s114_s4 = sshll.u32 %s16983_s8, 4  ;;  %s104_s23 = int_to_ptr.vmem [resolvable:$true] %s103_s23  ;;  %s115_s4 = int_to_ptr.hbm [resolvable:$true] %s114_s4 }
  0x19   :  { %106 = dma.hbm_to_vmem [thread:$0]  %s102_s2, 16, %s104_s23, [#allocation14]  }
  0x1a   :  { %s14911_s26 = smov [#allocation16]  }
  0x1b   :  { %s116_s27 = sshll.u32 %s14911_s26, 4  ;;  %s117_s27 = int_to_ptr.vmem [resolvable:$true] %s116_s27 }
  0x1c   :  { %119 = dma.hbm_to_vmem [thread:$0]  %s115_s4, 16, %s117_s27, [#allocation17]  }
  0x1d   :  { %14885 = dma.done.wait [#allocation5], 512  }
  0x1e   :  { %14886 = vsyncadd [#allocation5], 4294966784 }
  0x1f   :  { %14887 = dma.done.wait [#allocation8], 16640  }
  0x20   :  { %14888 = vsyncadd [#allocation8], 4294950656 }
  0x21   :  { %14889 = dma.done.wait [#allocation11], 65536  }
  0x22   :  { %14890 = vsyncadd [#allocation11], 4294901760 }
  0x23   :  { %14891 = dma.done.wait [#allocation14], 16400  }
  0x24   :  { %14892 = vsyncadd [#allocation14], 4294950896 }
  0x25   :  { %14893 = dma.done.wait [#allocation17], 16  }
  0x26   :  { %14894 = vsyncadd [#allocation17], 4294967280  ;;  %v316_v0 = vld [vmem:[#allocation7 + $0x380] sm:$0xff]  ;;  %v318_v1 = vld [vmem:[#allocation7 + $0x390] sm:$0xff]  ;;  %vm368_vm0 = vcmask 523264   ;;  %s9748_s10 = sshll.u32 %s16984_s9, 4  ;;  %s9749_s10 = int_to_ptr.hbm [resolvable:$true] %s9748_s10 }
  0x27   :  { %v319_v2 = vld [vmem:[#allocation7 + $0x398] sm:$0xff]  ;;  %389 = vmatpush.msra.mxu0 %v316_v0  ;;  %14359 = vmatpush.msra.mxu1 %v316_v0  ;;  %v300_v3 = vld [vmem:[#allocation7 + $0x300] sm:$0xff]  ;;  %v302_v4 = vld [vmem:[#allocation7 + $0x310] sm:$0xff] }
  0x28   :  { %v303_v5 = vld [vmem:[#allocation7 + $0x318] sm:$0xff]  ;;  %447 = vmatpush.msra.mxu2 %v318_v1  ;;  %476 = vmatpush.msra.mxu3 %v319_v2  ;;  %v284_v6 = vld [vmem:[#allocation7 + $0x280] sm:$0xff]  ;;  %v286_v7 = vld [vmem:[#allocation7 + $0x290] sm:$0xff] }
  0x29   :  { %390 = vmatpush.msra.mxu0 %v300_v3  ;;  %14360 = vmatpush.msra.mxu1 %v300_v3  ;;  %v287_v8 = vld [vmem:[#allocation7 + $0x298] sm:$0xff]  ;;  %v268_v9 = vld [vmem:[#allocation7 + $0x200] sm:$0xff]  ;;  %v270_v10 = vld [vmem:[#allocation7 + $0x210] sm:$0xff] }
  0x2a   :  { %448 = vmatpush.msra.mxu2 %v302_v4  ;;  %477 = vmatpush.msra.mxu3 %v303_v5  ;;  %v271_v11 = vld [vmem:[#allocation7 + $0x218] sm:$0xff]  ;;  %v252_v12 = vld [vmem:[#allocation7 + $0x180] sm:$0xff]  ;;  %v254_v13 = vld [vmem:[#allocation7 + $0x190] sm:$0xff] }
  0x2b   :  { %391 = vmatpush.msra.mxu0 %v284_v6  ;;  %14361 = vmatpush.msra.mxu1 %v284_v6  ;;  %v255_v14 = vld [vmem:[#allocation7 + $0x198] sm:$0xff]  ;;  %v236_v15 = vld [vmem:[#allocation7 + $0x100] sm:$0xff]  ;;  %v238_v16 = vld [vmem:[#allocation7 + $0x110] sm:$0xff] }
  0x2c   :  { %449 = vmatpush.msra.mxu2 %v286_v7  ;;  %478 = vmatpush.msra.mxu3 %v287_v8  ;;  %v239_v17 = vld [vmem:[#allocation7 + $0x118] sm:$0xff]  ;;  %v220_v18 = vld [vmem:[#allocation7 + $0x80] sm:$0xff]  ;;  %v222_v19 = vld [vmem:[#allocation7 + $0x90] sm:$0xff] }
  0x2d   :  { %392 = vmatpush.msra.mxu0 %v268_v9  ;;  %14362 = vmatpush.msra.mxu1 %v268_v9  ;;  %v223_v20 = vld [vmem:[#allocation7 + $0x98] sm:$0xff]  ;;  %v204_v21 = vld [vmem:[#allocation7] sm:$0xff]  ;;  %v206_v22 = vld [vmem:[#allocation7 + $0x10] sm:$0xff] }
  0x2e   :  { %450 = vmatpush.msra.mxu2 %v270_v10  ;;  %479 = vmatpush.msra.mxu3 %v271_v11  ;;  %v207_v23 = vld [vmem:[#allocation7 + $0x18] sm:$0xff]  ;;  %v14988_v24 = vld [vmem:[#allocation4] sm:$0xff]  ;;  %v14990_v25 = vld [vmem:[#allocation4 + $0x10] sm:$0xff] }
  0x2f   :  { %393 = vmatpush.msra.mxu0 %v252_v12  ;;  %14363 = vmatpush.msra.mxu1 %v252_v12  ;;  %v317_v26 = vld [vmem:[#allocation7 + $0x388] sm:$0xff]  ;;  %v320_v27 = vld [vmem:[#allocation7 + $0x3a0] sm:$0xff]  ;;  %v322_v28 = vld [vmem:[#allocation7 + $0x3b0] sm:$0xff] }
  0x30   :  { %451 = vmatpush.msra.mxu2 %v254_v13  ;;  %480 = vmatpush.msra.mxu3 %v255_v14  ;;  %v323_v29 = vld [vmem:[#allocation7 + $0x3b8] sm:$0xff]  ;;  %v301_v30 = vld [vmem:[#allocation7 + $0x308] sm:$0xff]  ;;  %v304_v31 = vld [vmem:[#allocation7 + $0x320] sm:$0xff] }
  0x31   :  { %394 = vmatpush.msra.mxu0 %v236_v15  ;;  %14364 = vmatpush.msra.mxu1 %v236_v15  ;;  %v306_v32 = vld [vmem:[#allocation7 + $0x330] sm:$0xff]  ;;  %v307_v33 = vld [vmem:[#allocation7 + $0x338] sm:$0xff]  ;;  %v285_v34 = vld [vmem:[#allocation7 + $0x288] sm:$0xff] }
  0x32   :  { %452 = vmatpush.msra.mxu2 %v238_v16  ;;  %481 = vmatpush.msra.mxu3 %v239_v17  ;;  %v288_v35 = vld [vmem:[#allocation7 + $0x2a0] sm:$0xff]  ;;  %v290_v36 = vld [vmem:[#allocation7 + $0x2b0] sm:$0xff]  ;;  %v291_v37 = vld [vmem:[#allocation7 + $0x2b8] sm:$0xff] }
  0x33   :  { %395 = vmatpush.msra.mxu0 %v220_v18  ;;  %14365 = vmatpush.msra.mxu1 %v220_v18  ;;  %v269_v38 = vld [vmem:[#allocation7 + $0x208] sm:$0xff]  ;;  %v272_v39 = vld [vmem:[#allocation7 + $0x220] sm:$0xff]  ;;  %v15002_v41 = vld [vmem:[#allocation4 + $0x18] sm:$0xff] }
  0x34   :  { %453 = vmatpush.msra.mxu2 %v222_v19  ;;  %482 = vmatpush.msra.mxu3 %v223_v20  ;;  %v15000_v40 = vld [vmem:[#allocation4 + $0x8] sm:$0xff]  ;;  %v256_v43 = vld [vmem:[#allocation7 + $0x1a0] sm:$0xff]  ;;  %v274_v44 = vld [vmem:[#allocation7 + $0x230] sm:$0xff] }
  0x35   :  { %396 = vmatpush.msra.mxu0 %v204_v21  ;;  %14366 = vmatpush.msra.mxu1 %v204_v21  ;;  %v253_v42 = vld [vmem:[#allocation7 + $0x188] sm:$0xff]  ;;  %v275_v45 = vld [vmem:[#allocation7 + $0x238] sm:$0xff]  ;;  %v240_v47 = vld [vmem:[#allocation7 + $0x120] sm:$0xff] }
  0x36   :  { %454 = vmatpush.msra.mxu2 %v206_v22  ;;  %483 = vmatpush.msra.mxu3 %v207_v23  ;;  %v237_v46 = vld [vmem:[#allocation7 + $0x108] sm:$0xff]  ;;  %v258_v48 = vld [vmem:[#allocation7 + $0x1b0] sm:$0xff]  ;;  %v259_v49 = vld [vmem:[#allocation7 + $0x1b8] sm:$0xff] }
  0x37   :  { %9762 = vmatmul.msk.f32.vlgmr.msra.gmra.mxu0 %vm368_vm0, %v14988_v24  ;;  %9764 = vmatmul.msk.f32.vlgmr.msra.gmra.mxu1 %vm368_vm0, %v14990_v25  ;;  %v221_v50 = vld [vmem:[#allocation7 + $0x88] sm:$0xff]  ;;  %v224_v51 = vld [vmem:[#allocation7 + $0xa0] sm:$0xff]  ;;  %v242_v52 = vld [vmem:[#allocation7 + $0x130] sm:$0xff] }
  0x38   :  { %9770 = vmatmul.msk.f32.vlgmr.msra.gmra.mxu2 %vm368_vm0, %v14988_v24  ;;  %9774 = vmatmul.msk.f32.vlgmr.msra.gmra.mxu3 %vm368_vm0, %v14988_v24  ;;  %v243_v53 = vld [vmem:[#allocation7 + $0x138] sm:$0xff]  ;;  %v205_v54 = vld [vmem:[#allocation7 + $0x8] sm:$0xff]  ;;  %v208_v55 = vld [vmem:[#allocation7 + $0x20] sm:$0xff] }
  0x39   :  { %418 = vmatpush.msrb.mxu1 %v317_v26  ;;  %505 = vmatpush.msrb.mxu0 %v320_v27  ;;  %v226_v56 = vld [vmem:[#allocation7 + $0xb0] sm:$0xff]  ;;  %v227_v57 = vld [vmem:[#allocation7 + $0xb8] sm:$0xff]  ;;  %v321_v58 = vld [vmem:[#allocation7 + $0x3a8] sm:$0xff] }
  0x3a   :  { %561 = vmatpush.msrb.mxu2 %v322_v28  ;;  %589 = vmatpush.msrb.mxu3 %v323_v29  ;;  %v324_v59 = vld [vmem:[#allocation7 + $0x3c0] sm:$0xff]  ;;  %v210_v60 = vld [vmem:[#allocation7 + $0x30] sm:$0xff]  ;;  %v211_v61 = vld [vmem:[#allocation7 + $0x38] sm:$0xff] }
  0x3b   :  { %419 = vmatpush.msrb.mxu1 %v301_v30  ;;  %506 = vmatpush.msrb.mxu0 %v304_v31  ;;  %v305_v62 = vld [vmem:[#allocation7 + $0x328] sm:$0xff]  ;;  %v308_v63 = vld [vmem:[#allocation7 + $0x340] sm:$0xff]  ;;  %v326_v0 = vld [vmem:[#allocation7 + $0x3d0] sm:$0xff] }
  0x3c   :  { %562 = vmatpush.msrb.mxu2 %v306_v32  ;;  %590 = vmatpush.msrb.mxu3 %v307_v33  ;;  %v327_v1 = vld [vmem:[#allocation7 + $0x3d8] sm:$0xff]  ;;  %v289_v2 = vld [vmem:[#allocation7 + $0x2a8] sm:$0xff]  ;;  %v292_v3 = vld [vmem:[#allocation7 + $0x2c0] sm:$0xff] }
  0x3d   :  { %420 = vmatpush.msrb.mxu1 %v285_v34  ;;  %507 = vmatpush.msrb.mxu0 %v288_v35  ;;  %v273_v4 = vld [vmem:[#allocation7 + $0x228] sm:$0xff]  ;;  %v276_v5 = vld [vmem:[#allocation7 + $0x240] sm:$0xff]  ;;  %v310_v6 = vld [vmem:[#allocation7 + $0x350] sm:$0xff] }
  0x3e   :  { %563 = vmatpush.msrb.mxu2 %v290_v36  ;;  %591 = vmatpush.msrb.mxu3 %v291_v37  ;;  %v311_v7 = vld [vmem:[#allocation7 + $0x358] sm:$0xff]  ;;  %v257_v8 = vld [vmem:[#allocation7 + $0x1a8] sm:$0xff]  ;;  %v260_v9 = vld [vmem:[#allocation7 + $0x1c0] sm:$0xff] }
  0x3f   :  { %421 = vmatpush.msrb.mxu1 %v269_v38  ;;  %508 = vmatpush.msrb.mxu0 %v272_v39  ;;  %v294_v10 = vld [vmem:[#allocation7 + $0x2d0] sm:$0xff]  ;;  %v295_v11 = vld [vmem:[#allocation7 + $0x2d8] sm:$0xff]  ;;  %v241_v12 = vld [vmem:[#allocation7 + $0x128] sm:$0xff] }
  0x40   :  { %9763 = vmatmul.msk.f32.gmra.mxu0 %vm368_vm0, %v15000_v40  ;;  %9765 = vmatmul.msk.f32.gmra.mxu1 %vm368_vm0, %v15002_v41  ;;  %v244_v13 = vld [vmem:[#allocation7 + $0x140] sm:$0xff]  ;;  %v278_v14 = vld [vmem:[#allocation7 + $0x250] sm:$0xff]  ;;  %v279_v15 = vld [vmem:[#allocation7 + $0x258] sm:$0xff] }
  0x41   :  { %9771 = vmatmul.msk.f32.gmra.mxu2 %vm368_vm0, %v15000_v40  ;;  %9775 = vmatmul.msk.f32.gmra.mxu3 %vm368_vm0, %v15000_v40  ;;  %v225_v16 = vld [vmem:[#allocation7 + $0xa8] sm:$0xff]  ;;  %v228_v17 = vld [vmem:[#allocation7 + $0xc0] sm:$0xff]  ;;  %v262_v18 = vld [vmem:[#allocation7 + $0x1d0] sm:$0xff] }
  0x42   :  { %422 = vmatpush.msrb.mxu1 %v253_v42  ;;  %509 = vmatpush.msrb.mxu0 %v256_v43  ;;  %v263_v19 = vld [vmem:[#allocation7 + $0x1d8] sm:$0xff]  ;;  %v209_v20 = vld [vmem:[#allocation7 + $0x28] sm:$0xff]  ;;  %v212_v21 = vld [vmem:[#allocation7 + $0x40] sm:$0xff] }
  0x43   :  { %564 = vmatpush.msrb.mxu2 %v274_v44  ;;  %592 = vmatpush.msrb.mxu3 %v275_v45  ;;  %v246_v22 = vld [vmem:[#allocation7 + $0x150] sm:$0xff]  ;;  %v247_v23 = vld [vmem:[#allocation7 + $0x158] sm:$0xff]  ;;  %v325_v26 = vld [vmem:[#allocation7 + $0x3c8] sm:$0xff] }
  0x44   :  { %423 = vmatpush.msrb.mxu1 %v237_v46  ;;  %510 = vmatpush.msrb.mxu0 %v240_v47  ;;  %v230_v27 = vld [vmem:[#allocation7 + $0xd0] sm:$0xff]  ;;  %v231_v28 = vld [vmem:[#allocation7 + $0xd8] sm:$0xff]  ;;  %v309_v31 = vld [vmem:[#allocation7 + $0x348] sm:$0xff] }
  0x45   :  { %565 = vmatpush.msrb.mxu2 %v258_v48  ;;  %593 = vmatpush.msrb.mxu3 %v259_v49  ;;  %v214_v29 = vld [vmem:[#allocation7 + $0x50] sm:$0xff]  ;;  %v215_v30 = vld [vmem:[#allocation7 + $0x58] sm:$0xff]  ;;  %v293_v32 = vld [vmem:[#allocation7 + $0x2c8] sm:$0xff] }
  0x46   :  { %424 = vmatpush.msrb.mxu1 %v221_v50  ;;  %511 = vmatpush.msrb.mxu0 %v224_v51  ;;  %v277_v33 = vld [vmem:[#allocation7 + $0x248] sm:$0xff] }
  0x47   :  { %566 = vmatpush.msrb.mxu2 %v242_v52  ;;  %594 = vmatpush.msrb.mxu3 %v243_v53  ;;  %v261_v34 = vld [vmem:[#allocation7 + $0x1c8] sm:$0xff] }
  0x48   :  { %425 = vmatpush.msrb.mxu1 %v205_v54  ;;  %512 = vmatpush.msrb.mxu0 %v208_v55  ;;  %v245_v35 = vld [vmem:[#allocation7 + $0x148] sm:$0xff] }
  0x49   :  { %9766 = vmatmul.msk.f32.vlgmr.msrb.gmra.mxu1 %vm368_vm0, %v14988_v24  ;;  %9772 = vmatmul.msk.f32.gmra.mxu2 %vm368_vm0, %v14990_v25  ;;  %v229_v36 = vld [vmem:[#allocation7 + $0xc8] sm:$0xff] }
  0x4a   :  { %9776 = vmatmul.msk.f32.gmra.mxu3 %vm368_vm0, %v14990_v25  ;;  %9778 = vmatmul.msk.f32.vlgmr.msrb.gmra.mxu0 %vm368_vm0, %v14988_v24  ;;  %v213_v37 = vld [vmem:[#allocation7 + $0x48] sm:$0xff] }
  0x4b   :  { %567 = vmatpush.msrb.mxu2 %v226_v56  ;;  %595 = vmatpush.msrb.mxu3 %v227_v57 }
  0x4c   :  { %533 = vmatpush.msra.mxu1 %v321_v58  ;;  %617 = vmatpush.msra.mxu0 %v324_v59 }
  0x4d   :  { %568 = vmatpush.msrb.mxu2 %v210_v60  ;;  %596 = vmatpush.msrb.mxu3 %v211_v61 }
  0x4e   :  { %534 = vmatpush.msra.mxu1 %v305_v62  ;;  %618 = vmatpush.msra.mxu0 %v308_v63 }
  0x4f   :  { %675 = vmatpush.msra.mxu2 %v326_v0  ;;  %704 = vmatpush.msra.mxu3 %v327_v1 }
  0x50   :  { %535 = vmatpush.msra.mxu1 %v289_v2  ;;  %619 = vmatpush.msra.mxu0 %v292_v3 }
  0x51   :  { %9767 = vmatmul.msk.f32.gmra.mxu1 %vm368_vm0, %v15000_v40  ;;  %9773 = vmatmul.msk.f32.gmra.mxu2 %vm368_vm0, %v15002_v41 }
  0x52   :  { %9777 = vmatmul.msk.f32.gmra.mxu3 %vm368_vm0, %v15002_v41  ;;  %9779 = vmatmul.msk.f32.gmra.mxu0 %vm368_vm0, %v15000_v40 }
  0x53   :  { %536 = vmatpush.msra.mxu1 %v273_v4  ;;  %620 = vmatpush.msra.mxu0 %v276_v5 }
  0x54   :  { %676 = vmatpush.msra.mxu2 %v310_v6  ;;  %705 = vmatpush.msra.mxu3 %v311_v7 }
  0x55   :  { %537 = vmatpush.msra.mxu1 %v257_v8  ;;  %621 = vmatpush.msra.mxu0 %v260_v9 }
  0x56   :  { %677 = vmatpush.msra.mxu2 %v294_v10  ;;  %706 = vmatpush.msra.mxu3 %v295_v11 }
  0x57   :  { %538 = vmatpush.msra.mxu1 %v241_v12  ;;  %622 = vmatpush.msra.mxu0 %v244_v13 }
  0x58   :  { %678 = vmatpush.msra.mxu2 %v278_v14  ;;  %707 = vmatpush.msra.mxu3 %v279_v15 }
  0x59   :  { %9768 = vmatmul.msk.f32.gmra.mxu1 %vm368_vm0, %v14990_v25  ;;  %9786 = vmatmul.msk.f32.vlgmr.msrb.gmra.mxu2 %vm368_vm0, %v14988_v24 }
  0x5a   :  { %9780 = vmatmul.msk.f32.gmra.mxu0 %vm368_vm0, %v14990_v25  ;;  %9790 = vmatmul.msk.f32.vlgmr.msrb.gmra.mxu3 %vm368_vm0, %v14988_v24 }
  0x5b   :  { %539 = vmatpush.msra.mxu1 %v225_v16  ;;  %623 = vmatpush.msra.mxu0 %v228_v17 }
  0x5c   :  { %679 = vmatpush.msra.mxu2 %v262_v18  ;;  %708 = vmatpush.msra.mxu3 %v263_v19 }
  0x5d   :  { %540 = vmatpush.msra.mxu1 %v209_v20  ;;  %624 = vmatpush.msra.mxu0 %v212_v21 }
  0x5e   :  { %680 = vmatpush.msra.mxu2 %v246_v22  ;;  %709 = vmatpush.msra.mxu3 %v247_v23 }
  0x5f   :  { %646 = vmatpush.msrb.mxu1 %v325_v26 }
  0x60   :  { %681 = vmatpush.msra.mxu2 %v230_v27  ;;  %710 = vmatpush.msra.mxu3 %v231_v28 }
  0x61   :  { %9769 = vmatmul.msk.f32.gmra.mxu1 %vm368_vm0, %v15002_v41  ;;  %9787 = vmatmul.msk.f32.gmra.mxu2 %vm368_vm0, %v15000_v40 }
  0x62   :  { %9781 = vmatmul.msk.f32.gmra.mxu0 %vm368_vm0, %v15002_v41  ;;  %9791 = vmatmul.msk.f32.gmra.mxu3 %vm368_vm0, %v15000_v40 }
  0x63   :  { %682 = vmatpush.msra.mxu2 %v214_v29  ;;  %711 = vmatpush.msra.mxu3 %v215_v30 }
  0x64   :  { %647 = vmatpush.msrb.mxu1 %v309_v31 }
  0x66   :  { %648 = vmatpush.msrb.mxu1 %v293_v32 }
  0x68   :  { %649 = vmatpush.msrb.mxu1 %v277_v33 }
  0x69   :  { %9782 = vmatmul.msk.f32.vlgmr.msra.gmra.mxu1 %vm368_vm0, %v14988_v24  ;;  %9788 = vmatmul.msk.f32.gmra.mxu2 %vm368_vm0, %v14990_v25 }
  0x6a   :  { %9792 = vmatmul.msk.f32.gmra.mxu3 %vm368_vm0, %v14990_v25  ;;  %9794 = vmatmul.msk.f32.vlgmr.msra.gmra.mxu0 %vm368_vm0, %v14988_v24 }
  0x6b   :  { %650 = vmatpush.msrb.mxu1 %v261_v34 }
  0x6d   :  { %651 = vmatpush.msrb.mxu1 %v245_v35 }
  0x6f   :  { %652 = vmatpush.msrb.mxu1 %v229_v36 }
  0x71   :  { %9783 = vmatmul.msk.f32.gmra.mxu1 %vm368_vm0, %v15000_v40  ;;  %9789 = vmatmul.msk.f32.gmra.mxu2 %vm368_vm0, %v15002_v41 }
  0x72   :  { %9793 = vmatmul.msk.f32.gmra.mxu3 %vm368_vm0, %v15002_v41  ;;  %9795 = vmatmul.msk.f32.gmra.mxu0 %vm368_vm0, %v15000_v40 }
  0x73   :  { %653 = vmatpush.msrb.mxu1 %v213_v37 }
  0x79   :  { %9784 = vmatmul.msk.f32.gmra.mxu1 %vm368_vm0, %v14990_v25  ;;  %9802 = vmatmul.msk.f32.vlgmr.msra.gmra.mxu2 %vm368_vm0, %v14988_v24 }
  0x7a   :  { %9806 = vmatmul.msk.f32.vlgmr.msra.gmra.mxu3 %vm368_vm0, %v14988_v24  ;;  %9796 = vmatmul.msk.f32.gmra.mxu0 %vm368_vm0, %v14990_v25 }
  0x81   :  { %9785 = vmatmul.msk.f32.gmra.mxu1 %vm368_vm0, %v15002_v41  ;;  %9803 = vmatmul.msk.f32.gmra.mxu2 %vm368_vm0, %v15000_v40 }
  0x82   :  { %9807 = vmatmul.msk.f32.gmra.mxu3 %vm368_vm0, %v15000_v40  ;;  %9797 = vmatmul.msk.f32.gmra.mxu0 %vm368_vm0, %v15002_v41 }
  0x89   :  { %9798 = vmatmul.msk.f32.vlgmr.msrb.gmra.mxu1 %vm368_vm0, %v14988_v24  ;;  %9804 = vmatmul.msk.f32.gmra.mxu2 %vm368_vm0, %v14990_v25  ;;  %v15092_v24 = vld [vmem:[#allocation9] sm:$0xff] }
  0x8a   :  { %9808 = vmatmul.msk.f32.gmra.mxu3 %vm368_vm0, %v14990_v25  ;;  %v15095_v38 = vperm.slane %v15092_v24, 0  ;;  %v340_v52 = vperm.slane %v15092_v24, 4  ;;  %v15110_v53 = vperm.slane %v15092_v24, 2  ;;  %v15113_v55 = vperm.slane %v15092_v24, 3 }
  0x8b   :  { %v15131_v9 = vperm.slane %v15092_v24, 1  ;;  %v15143_v17 = vperm.slane %v15092_v24, 6  ;;  %v15149_v22 = vperm.slane %v15092_v24, 7 }
  0x8c   :  { %16988 = vst [vmem:[#allocation25_spill] sm:$0xff] %v15110_v53 }
  0x8d   :  { %16989 = vst [vmem:[#allocation26_spill] sm:$0xff] %v15113_v55 }
  0x8e   :  { %16991 = vst [vmem:[#allocation28_spill] sm:$0xff] %v15131_v9 }
  0x91   :  { %9799 = vmatmul.msk.f32.gmra.mxu1 %vm368_vm0, %v15000_v40  ;;  %9805 = vmatmul.msk.f32.gmra.mxu2 %vm368_vm0, %v15002_v41 }
  0x92   :  { %9809 = vmatmul.msk.f32.gmra.mxu3 %vm368_vm0, %v15002_v41 }
  0x99   :  { %9800 = vmatmul.msk.f32.gmra.mxu1 %vm368_vm0, %v14990_v25 }
  0xa1   :  { %9801 = vmatmul.msk.f32.gmra.mxu1 %vm368_vm0, %v15002_v41 }
  0xb4   :  { %v398_v39 = vpop.f32.mrf.mxu0  ;;  %v404_v42 = vpop.f32.mrf.mxu1 }
  0xb5   :  { %v15098_v40 = vadd.f32 %v404_v42, %v15095_v38  ;;  %v399_v25 = vadd.f32 %v398_v39, %v15095_v38 }
  0xb7   :  { %v9826_v47 = vmul.f32 -1.442695, %v399_v25 }
  0xb9   :  { %14384 = vpow2.f32 %v9826_v47 }
  0xbb   :  { %v456_v43 = vpop.f32.mrf.mxu2  ;;  %v485_v44 = vpop.f32.mrf.mxu3 }
  0xbc   :  { %v457_v0 = vadd.f32 %v456_v43, %v15110_v53  ;;  %v486_v8 = vadd.f32 %v485_v44, %v15113_v55 }
  0xbd   :  { %v401_v45 = vpop.f32.mrf.mxu0  ;;  %v15100_v46 = vpop.f32.mrf.mxu1 }
  0xbe   :  { %v402_v50 = vadd.f32 %v401_v45, %v15095_v38  ;;  %v9828_v5 = vmul.f32 -1.442695, %v457_v0  ;;  %v9829_v15 = vmul.f32 -1.442695, %v486_v8 }
  0xbf   :  { %v14385_v59 = vpop.eup %14384 }
  0xc0   :  { %v9830_v54 = vmul.f32 -1.442695, %v402_v50  ;;  %v15124_v2 = vadd.f32 1.0, %v14385_v59  ;;  %v15178_v50 = vperm.slane %v15092_v24, 5 }
  0xc2   :  { %14386 = vpow2.f32 %v9830_v54  ;;  %vm870_vm1 = vweird.f32 %v15124_v2 }
  0xc3   :  { %14388 = vrcp.f32 %v15124_v2 }
  0xc4   :  { %v15103_v48 = vpop.f32.mrf.mxu2  ;;  %v15105_v41 = vpop.f32.mrf.mxu3 }
  0xc5   :  { %v460_v43 = vadd.f32 %v15103_v48, %v15110_v53 }
  0xc6   :  { %v427_v49 = vpop.f32.mrf.mxu1 }
  0xc7   :  { %v514_v51 = vpop.f32.mrf.mxu0  ;;  %v428_v42 = vadd.f32 %v427_v49, %v15131_v9  ;;  %v15180_v49 = vld [vmem:[#allocation9 + $0x8] sm:$0xff] }
  0xc8   :  { %v515_v60 = vadd.f32 %v514_v51, %v340_v52  ;;  %v14387_v7 = vpop.eup %14386  ;;  %v15186_v59 = vperm.slane %v15180_v49, 0 }
  0xc9   :  { %v15138_v14 = vadd.f32 1.0, %v14387_v7  ;;  %v15145_v18 = vpop.eup %14388  ;;  %v9827_v54 = vmul.f32 -1.442695, %v428_v42 }
  0xca   :  { %v9834_v3 = vmul.f32 -1.442695, %v515_v60  ;;  %v866_v27 = vmul.f32 %v15145_v18, %v15124_v2  ;;  %vm871_vm2 = vweird.f32 %v15145_v18 }
  0xcb   :  { %vm15201_vm3 = vmor %vm870_vm1, %vm871_vm2  ;;  %vm930_vm5 = vweird.f32 %v15138_v14 }
  0xcc   :  { %v462_v56 = vpop.f32.mrf.mxu2  ;;  %14390 = vpow2.f32 %v9834_v3  ;;  %v867_v36 = vsub.f32 1.0, %v866_v27  ;;  %v874_v3 = vand.u32 2147483647, %v15124_v2 }
  0xcd   :  { %v15116_v57 = vadd.f32 %v462_v56, %v15110_v53  ;;  %v491_v58 = vpop.f32.mrf.mxu3  ;;  %v13736_v53 = vld [vmem:[#allocation10 + $0x884] sm:$0xf0] }
  0xce   :  { %v15119_v61 = vadd.f32 %v491_v58, %v15113_v55  ;;  %v15121_v62 = vpop.f32.mrf.mxu1  ;;  %v9832_v58 = vmul.f32 -1.442695, %v460_v43  ;;  %vm15223_vm4 = vcmp.eq.f32.partialorder %v874_v3, 8.507059e+37 }
  0xcf   :  { %v517_v63 = vpop.f32.mrf.mxu0 }
  0xd0   :  { %v518_v1 = vadd.f32 %v517_v63, %v340_v52 }
  0xd2   :  { %v9838_v4 = vmul.f32 -1.442695, %v518_v1  ;;  %v14391_v19 = vpop.eup %14390 }
  0xd3   :  { %v15156_v30 = vadd.f32 1.0, %v14391_v19 }
  0xd4   :  { %v15126_v6 = vpop.f32.mrf.mxu2  ;;  %14392 = vpow2.f32 %v9838_v4  ;;  %v876_v4 = vand.u32 2147483648, %v15124_v2 }
  0xd5   :  { %16990 = vst [vmem:[#allocation27_spill] sm:$0xff] %v15126_v6  ;;  %v15133_v10 = vpop.f32.mrf.mxu3  ;;  %14394 = vpow2.f32 %v9828_v5  ;;  %vm1022_vm8 = vweird.f32 %v15156_v30  ;;  %v10540_v6 = vld [vmem:[#allocation10 + $0x558] sm:$0xf] }
  0xd6   :  { %16992 = vst [vmem:[#allocation29_spill] sm:$0xff] %v15133_v10  ;;  %v433_v11 = vpop.f32.mrf.mxu1  ;;  %14396 = vrcp.f32 %v15138_v14  ;;  %v10156_v10 = vld [vmem:[#allocation10 + $0x258] sm:$0xf] }
  0xd7   :  { %v15136_v12 = vadd.f32 %v433_v11, %v15131_v9  ;;  %v520_v13 = vpop.f32.mrf.mxu0  ;;  %14398 = vpow2.f32 %v9829_v15  ;;  %v489_v11 = vadd.f32 %v15105_v41, %v15113_v55  ;;  %v13544_v55 = vld [vmem:[#allocation10 + $0x284] sm:$0xf0] }
  0xd8   :  { %v15140_v16 = vadd.f32 %v520_v13, %v340_v52  ;;  %14400 = vrcp.f32 %v15156_v30  ;;  %v868_v52 = vmul.f32 %v15145_v18, %v867_v36 }
  0xda   :  { %v14393_v21 = vpop.eup %14392  ;;  %v869_v1 = vadd.f32 %v15145_v18, %v868_v52 }
  0xdb   :  { %v14395_v26 = vpop.eup %14394  ;;  %v15158_v32 = vadd.f32 1.0, %v14393_v21 }
  0xdc   :  { %v570_v20 = vpop.f32.mrf.mxu2  ;;  %v15160_v33 = vadd.f32 1.0, %v14395_v26  ;;  %v15163_v35 = vpop.eup %14396  ;;  %v873_v41 = vsel %vm15201_vm3, %v15145_v18, %v869_v1 }
  0xdd   :  { %v598_v23 = vpop.f32.mrf.mxu3  ;;  %v571_v28 = vadd.f32 %v570_v20, %v15143_v17  ;;  %v14399_v39 = vpop.eup %14398  ;;  %14402 = vrcp.f32 %v15158_v32  ;;  %v926_v45 = vmul.f32 %v15163_v35, %v15138_v14  ;;  %vm931_vm6 = vweird.f32 %v15163_v35 }
  0xde   :  { %v15154_v29 = vpop.f32.mrf.mxu1  ;;  %v599_v34 = vadd.f32 %v598_v23, %v15149_v22  ;;  %14404 = vrcp.f32 %v15160_v33  ;;  %v15182_v51 = vadd.f32 1.0, %v14399_v39  ;;  %v15190_v24 = vpop.eup %14400  ;;  %vm15246_vm7 = vmor %vm930_vm5, %vm931_vm6  ;;  %vm1082_vm11 = vweird.f32 %v15158_v32 }
  0xdf   :  { %16993 = vst [vmem:[#allocation30_spill] sm:$0xff] %v15154_v29  ;;  %v523_v31 = vpop.f32.mrf.mxu0  ;;  %v9836_v37 = vmul.f32 -1.442695, %v571_v28  ;;  %v927_v60 = vsub.f32 1.0, %v926_v45  ;;  %v1018_v13 = vmul.f32 %v15190_v24, %v15156_v30  ;;  %vm1023_vm10 = vweird.f32 %v15190_v24 }
  0xe0   :  { %v9837_v25 = vmul.f32 -1.442695, %v599_v34  ;;  %v877_v31 = vor.u32 1.1754944e-38, %v876_v4  ;;  %v15253_v4 = vmul.f32 -1.442695, %v489_v11  ;;  %vm15288_vm13 = vmor %vm1022_vm8, %vm1023_vm10  ;;  %vm900_vm2 = vweird.f32 %v15160_v33 }
  0xe1   :  { %14406 = vpow2.f32 %v9836_v37  ;;  %v928_v26 = vmul.f32 %v15163_v35, %v927_v60  ;;  %v1019_v18 = vsub.f32 1.0, %v1018_v13  ;;  %vm915_vm5 = vweird.f32 %v15182_v51 }
  0xe2   :  { %14408 = vpow2.f32 %v9837_v25  ;;  %v936_v25 = vand.u32 2147483648, %v15138_v14 }
  0xe3   :  { %v15193_v0 = vpop.eup %14402  ;;  %14410 = vrcp.f32 %v15182_v51 }
  0xe4   :  { %v15170_v44 = vpop.f32.mrf.mxu2  ;;  %v15199_v5 = vpop.eup %14404  ;;  %14412 = vpow2.f32 %v9827_v54  ;;  %v1078_v2 = vmul.f32 %v15193_v0, %v15158_v32  ;;  %v929_v54 = vadd.f32 %v15163_v35, %v928_v26  ;;  %v937_v13 = vor.u32 1.1754944e-38, %v936_v25 }
  0xe5   :  { %v15175_v47 = vpop.f32.mrf.mxu3  ;;  %14414 = vpow2.f32 %v9832_v58  ;;  %v15218_v27 = vmul.f32 %v15199_v5, %v15160_v33  ;;  %v1026_v26 = vand.u32 2147483647, %v15156_v30  ;;  %vm1083_vm12 = vweird.f32 %v15193_v0 }
  0xe6   :  { %v542_v48 = vpop.f32.mrf.mxu1  ;;  %v1079_v52 = vsub.f32 1.0, %v1078_v2  ;;  %v933_v11 = vsel %vm15246_vm7, %v15163_v35, %v929_v54  ;;  %v1088_v35 = vand.u32 2147483648, %v15158_v32  ;;  %vm15310_vm15 = vmor %vm1082_vm11, %vm1083_vm12  ;;  %vm901_vm3 = vweird.f32 %v15199_v5 }
  0xe7   :  { %v626_v56 = vpop.f32.mrf.mxu0  ;;  %v543_v63 = vadd.f32 %v542_v48, %v15178_v50  ;;  %v14407_v8 = vpop.eup %14406  ;;  %v897_v1 = vsub.f32 1.0, %v15218_v27  ;;  %v1028_v27 = vand.u32 2147483648, %v15156_v30  ;;  %vm15300_vm14 = vcmp.eq.f32.partialorder %v1026_v26, 8.507059e+37 }
  0xe8   :  { %v627_v15 = vadd.f32 %v626_v56, %v15186_v59  ;;  %v14409_v36 = vpop.eup %14408  ;;  %v15229_v37 = vadd.f32 1.0, %v14407_v8  ;;  %v934_v56 = vand.u32 2147483647, %v15138_v14  ;;  %v1020_v14 = vmul.f32 %v15190_v24, %v1019_v18 }
  0xe9   :  { %v9835_v20 = vmul.f32 -1.442695, %v543_v63  ;;  %v15236_v43 = vpop.eup %14410  ;;  %v15244_v60 = vadd.f32 1.0, %v14409_v36  ;;  %v878_v8 = vsel %vm15223_vm4, %v877_v31, %v873_v41  ;;  %v1086_v18 = vand.u32 2147483647, %v15158_v32  ;;  %vm15355_vm4 = vmor %vm900_vm2, %vm901_vm3 }
  0xea   :  { %14416 = vtanh.f32 %v627_v15  ;;  %v14413_v48 = vpop.eup %14412  ;;  %v911_v3 = vmul.f32 %v15236_v43, %v15182_v51  ;;  %vm15266_vm9 = vcmp.eq.f32.partialorder %v934_v56, 8.507059e+37  ;;  %v15298_v63 = vperm.slane %v15180_v49, 2 }
  0xeb   :  { %14418 = vpow2.f32 %v9835_v20  ;;  %v15242_v58 = vpop.eup %14414  ;;  %v15256_v7 = vadd.f32 1.0, %v14413_v48  ;;  %v431_v30 = vadd.f32 %v15121_v62, %v15131_v9  ;;  %vm15333_vm1 = vcmp.eq.f32.partialorder %v1086_v18, 8.507059e+37  ;;  %v13634_v9 = vld [vmem:[#allocation10 + $0x55c] sm:$0xf] }
  0xec   :  { %v576_v19 = vpop.f32.mrf.mxu2  ;;  %v912_v31 = vsub.f32 1.0, %v911_v3  ;;  %v906_v18 = vand.u32 2147483648, %v15160_v33  ;;  %vm916_vm6 = vweird.f32 %v15236_v43  ;;  %vm1052_vm10 = vweird.f32 %v15229_v37 }
  0xed   :  { %v15213_v21 = vadd.f32 %v576_v19, %v15143_v17  ;;  %v604_v23 = vpop.f32.mrf.mxu3  ;;  %v1080_v19 = vmul.f32 %v15193_v0, %v1079_v52  ;;  %vm15379_vm7 = vmor %vm915_vm5, %vm916_vm6  ;;  %vm1067_vm12 = vweird.f32 %v15244_v60  ;;  %vm885_vm3 = vweird.f32 %v15256_v7 }
  0xee   :  { %v15227_v34 = vpop.f32.mrf.mxu1  ;;  %v15232_v39 = vadd.f32 %v604_v23, %v15149_v22 }
  0xef   :  { %v629_v42 = vpop.f32.mrf.mxu0  ;;  %v1081_v52 = vadd.f32 %v15193_v0, %v1080_v19 }
  0xf0   :  { %v630_v45 = vadd.f32 %v629_v42, %v15186_v59  ;;  %v14417_v23 = vpop.eup %14416  ;;  %v1021_v42 = vadd.f32 %v15190_v24, %v1020_v14  ;;  %v1029_v14 = vor.u32 1.1754944e-38, %v1028_v27 }
  0xf1   :  { %v14419_v28 = vpop.eup %14418  ;;  %v15293_v54 = vmul.f32 %v14417_v23, %v878_v8  ;;  %v1085_v23 = vsel %vm15310_vm15, %v15193_v0, %v1081_v52 }
  0xf2   :  { %14420 = vtanh.f32 %v630_v45  ;;  %v938_v45 = vsel %vm15266_vm9, %v937_v13, %v933_v11  ;;  %v898_v13 = vmul.f32 %v15199_v5, %v897_v1  ;;  %v15315_v19 = vadd.f32 1.0, %v14419_v28 }
  0xf3   :  { %14422 = vrcp.f32 %v15229_v37  ;;  %v913_v11 = vmul.f32 %v15236_v43, %v912_v31  ;;  %v1025_v62 = vsel %vm15288_vm13, %v15190_v24, %v1021_v42  ;;  %v15339_v24 = vperm.slane %v15180_v49, 3 }
  0xf4   :  { %v579_v15 = vpop.f32.mrf.mxu2  ;;  %14424 = vrcp.f32 %v15244_v60  ;;  %v899_v31 = vadd.f32 %v15199_v5, %v898_v13  ;;  %v1056_v13 = vand.u32 2147483647, %v15229_v37 }
  0xf5   :  { %v607_v20 = vpop.f32.mrf.mxu3  ;;  %14426 = vrcp.f32 %v15256_v7  ;;  %v1089_v15 = vor.u32 1.1754944e-38, %v1088_v35 }
  0xf6   :  { %v548_v41 = vpop.f32.mrf.mxu1  ;;  %14428 = vtanh.f32 %v15293_v54 }
  0xf7   :  { %v15328_v1 = vadd.f32 %v548_v41, %v15178_v50  ;;  %v904_v41 = vand.u32 2147483647, %v15160_v33  ;;  %v1090_v52 = vsel %vm15333_vm1, %v1089_v15, %v1085_v23  ;;  %v903_v15 = vsel %vm15355_vm4, %v15199_v5, %v899_v31 }
  0xf8   :  { %v14421_v36 = vpop.eup %14420  ;;  %v15386_v31 = vadd.f32 1.0, %v15242_v58  ;;  %vm1057_vm1 = vcmp.eq.f32.partialorder %v1056_v13, 8.507059e+37 }
  0xf9   :  { %v15282_v25 = vpop.eup %14422  ;;  %v15295_v56 = vmul.f32 %v14421_v36, %v938_v45  ;;  %v1030_v36 = vsel %vm15300_vm14, %v1029_v14, %v1025_v62  ;;  %v9831_v45 = vmul.f32 -1.442695, %v431_v30  ;;  %v914_v14 = vadd.f32 %v15236_v43, %v913_v11 }
  0xfa   :  { %v15319_v2 = vpop.eup %14424  ;;  %v1048_v32 = vmul.f32 %v15282_v25, %v15229_v37  ;;  %v919_v11 = vand.u32 2147483647, %v15182_v51  ;;  %vm905_vm8 = vcmp.eq.f32.partialorder %v904_v41, 8.507059e+37  ;;  %vm1053_vm11 = vweird.f32 %v15282_v25 }
  0xfb   :  { %14430 = vtanh.f32 %v15295_v56  ;;  %v15341_v28 = vpop.eup %14426  ;;  %v1063_v42 = vmul.f32 %v15319_v2, %v15244_v60  ;;  %vm15413_vm13 = vmor %vm1052_vm10, %vm1053_vm11  ;;  %vm1068_vm14 = vweird.f32 %v15319_v2  ;;  %vm960_vm11 = vweird.f32 %v15386_v31 }
  0xfc   :  { %v684_v20 = vpop.f32.mrf.mxu2  ;;  %14432 = vrcp.f32 %v15315_v19  ;;  %v1049_v48 = vsub.f32 1.0, %v1048_v32  ;;  %v14429_v8 = vpop.eup %14428  ;;  %v881_v30 = vmul.f32 %v15341_v28, %v15256_v7  ;;  %v921_v32 = vand.u32 2147483648, %v15182_v51  ;;  %vm15433_vm2 = vmor %vm1067_vm12, %vm1068_vm14 }
  0xfd   :  { %v685_v27 = vadd.f32 %v684_v20, %v15298_v63  ;;  %v713_v0 = vpop.f32.mrf.mxu3  ;;  %v15365_v62 = vmul.f32 %v14429_v8, %v1030_v36  ;;  %v1064_v20 = vsub.f32 1.0, %v1063_v42  ;;  %v1058_v42 = vand.u32 2147483648, %v15229_v37 }
  0xfe   :  { %v551_v35 = vpop.f32.mrf.mxu1  ;;  %v714_v3 = vadd.f32 %v713_v0, %v15339_v24  ;;  %v1050_v26 = vmul.f32 %v15282_v25, %v1049_v48  ;;  %v882_v36 = vsub.f32 1.0, %v881_v30  ;;  %vm920_vm9 = vcmp.eq.f32.partialorder %v919_v11, 8.507059e+37 }
  0xff   :  { %14434 = vtanh.f32 %v685_v27  ;;  %1202 = vst [vmem:[#allocation1] sm:$0xff] %v15365_v62  ;;  %v907_v27 = vor.u32 1.1754944e-38, %v906_v18  ;;  %v922_v18 = vor.u32 1.1754944e-38, %v921_v32  ;;  %v1065_v48 = vmul.f32 %v15319_v2, %v1064_v20 }
 0x100   :  { %14436 = vtanh.f32 %v714_v3  ;;  %v1051_v58 = vadd.f32 %v15282_v25, %v1050_v26  ;;  %v883_v11 = vmul.f32 %v15341_v28, %v882_v36  ;;  %vm886_vm15 = vweird.f32 %v15341_v28 }
 0x101   :  { %v14431_v33 = vpop.eup %14430  ;;  %14438 = vpow2.f32 %v15253_v4  ;;  %v918_v4 = vsel %vm15379_vm7, %v15236_v43, %v914_v14  ;;  %v908_v51 = vsel %vm905_vm8, %v907_v27, %v903_v15  ;;  %v1059_v14 = vor.u32 1.1754944e-38, %v1058_v42  ;;  %vm15448_vm4 = vmor %vm885_vm3, %vm886_vm15 }
 0x102   :  { %v15371_v23 = vmul.f32 %v14431_v33, %v1090_v52  ;;  %v15383_v5 = vpop.eup %14432  ;;  %14440 = vpow2.f32 %v9831_v45  ;;  %v574_v52 = vadd.f32 %v15170_v44, %v15143_v17  ;;  %v923_v43 = vsel %vm920_vm9, %v922_v18, %v918_v4 }
 0x103   :  { %v1033_v3 = vmul.f32 %v15383_v5, %v15315_v19  ;;  %v15405_v17 = vperm.slane %v15180_v49, 1  ;;  %v1071_v33 = vand.u32 2147483647, %v15244_v60  ;;  %v1066_v20 = vadd.f32 %v15319_v2, %v1065_v48 }
 0x104   :  { %v1055_v26 = vsel %vm15413_vm13, %v15282_v25, %v1051_v58  ;;  %v1073_v27 = vand.u32 2147483648, %v15244_v60  ;;  %v884_v0 = vadd.f32 %v15341_v28, %v883_v11  ;;  %v891_v4 = vand.u32 2147483648, %v15256_v7 }
 0x105   :  { %v14435_v35 = vpop.eup %14434  ;;  %v1034_v37 = vsub.f32 1.0, %v1033_v3  ;;  %v889_v25 = vand.u32 2147483647, %v15256_v7  ;;  %v1060_v18 = vsel %vm1057_vm1, %v1059_v14, %v1055_v26  ;;  %v1070_v48 = vsel %vm15433_vm2, %v15319_v2, %v1066_v20 }
 0x106   :  { %v15395_v8 = vmul.f32 %v14435_v35, %v908_v51  ;;  %v655_v41 = vpop.f32.mrf.mxu1  ;;  %v14437_v45 = vpop.eup %14436  ;;  %v546_v58 = vadd.f32 %v15227_v34, %v15178_v50  ;;  %v602_v7 = vadd.f32 %v15175_v47, %v15149_v22  ;;  %vm1072_vm5 = vcmp.eq.f32.partialorder %v1071_v33, 8.507059e+37 }
 0x107   :  { %v14439_v44 = vpop.eup %14438  ;;  %v15409_v30 = vmul.f32 %v14437_v45, %v923_v43  ;;  %v656_v49 = vadd.f32 %v655_v41, %v15405_v17  ;;  %v1074_v43 = vor.u32 1.1754944e-38, %v1073_v27  ;;  %v888_v45 = vsel %vm15448_vm4, %v15341_v28, %v884_v0 }
 0x108   :  { %14442 = vtanh.f32 %v15395_v8  ;;  %v14441_v15 = vpop.eup %14440  ;;  %v15429_v35 = vadd.f32 1.0, %v14439_v44  ;;  %v9840_v2 = vmul.f32 -1.442695, %v574_v52  ;;  %v1035_v50 = vmul.f32 %v15383_v5, %v1034_v37 }
 0x109   :  { %14444 = vtanh.f32 %v15409_v30  ;;  %v15439_v51 = vadd.f32 1.0, %v14441_v15  ;;  %v892_v34 = vor.u32 1.1754944e-38, %v891_v4  ;;  %v1075_v3 = vsel %vm1072_vm5, %v1074_v43, %v1070_v48 }
 0x10a   :  { %14446 = vtanh.f32 %v656_v49  ;;  %vm890_vm6 = vcmp.eq.f32.partialorder %v889_v25, 8.507059e+37  ;;  %v9839_v22 = vmul.f32 -1.442695, %v546_v58  ;;  %v9841_v52 = vmul.f32 -1.442695, %v602_v7 }
 0x10b   :  { %14448 = vrcp.f32 %v15386_v31  ;;  %v893_v14 = vsel %vm890_vm6, %v892_v34, %v888_v45  ;;  %v1036_v33 = vadd.f32 %v15383_v5, %v1035_v50  ;;  %vm1038_vm7 = vweird.f32 %v15383_v5  ;;  %v716_v34 = vpop.f32.mrf.mxu3 }
 0x10c   :  { %14450 = vrcp.f32 %v15429_v35  ;;  %v1043_v15 = vand.u32 2147483648, %v15315_v19  ;;  %vm1037_vm8 = vweird.f32 %v15315_v19  ;;  %v1041_v32 = vand.u32 2147483647, %v15315_v19 }
 0x10d   :  { %14452 = vrcp.f32 %v15439_v51  ;;  %vm1039_vm9 = vmor %vm1037_vm8, %vm1038_vm7  ;;  %vm975_vm14 = vweird.f32 %v15429_v35  ;;  %vm945_vm1 = vweird.f32 %v15439_v51 }
 0x10e   :  { %v14443_v42 = vpop.eup %14442  ;;  %14454 = vpow2.f32 %v9840_v2  ;;  %v1040_v11 = vsel %vm1039_vm9, %v15383_v5, %v1036_v33  ;;  %v1044_v27 = vor.u32 1.1754944e-38, %v1043_v15  ;;  %vm1042_vm10 = vcmp.eq.f32.partialorder %v1041_v32, 8.507059e+37  ;;  %v687_v2 = vpop.f32.mrf.mxu2 }
 0x10f   :  { %v15454_v41 = vmul.f32 %v14443_v42, %v1060_v18  ;;  %v14445_v13 = vpop.eup %14444  ;;  %v717_v15 = vadd.f32 %v716_v34, %v15339_v24 }
 0x110   :  { %v14447_v44 = vpop.eup %14446  ;;  %v15463_v47 = vmul.f32 %v14445_v13, %v1075_v3  ;;  %v1045_v4 = vsel %vm1042_vm10, %v1044_v27, %v1040_v11  ;;  %v658_v3 = vpop.f32.mrf.mxu1 }
 0x111   :  { %1204 = vst [vmem:[#allocation1 + $0x12] sm:$0xff] %v15454_v41  ;;  %v15466_v28 = vmul.f32 %v14447_v44, %v893_v14  ;;  %v15475_v20 = vpop.eup %14448 }
 0x112   :  { %1205 = vst [vmem:[#allocation1 + $0x1b] sm:$0xff] %v15463_v47  ;;  %v15477_v49 = vpop.eup %14450  ;;  %v956_v19 = vmul.f32 %v15475_v20, %v15386_v31  ;;  %vm961_vm12 = vweird.f32 %v15475_v20 }
 0x113   :  { %14456 = vtanh.f32 %v15466_v28  ;;  %v15480_v26 = vpop.eup %14452  ;;  %v971_v5 = vmul.f32 %v15477_v49, %v15429_v35  ;;  %vm976_vm15 = vweird.f32 %v15477_v49  ;;  %vm15548_vm3 = vmor %vm960_vm11, %vm961_vm12 }
 0x114   :  { %14458 = vpow2.f32 %v9839_v22  ;;  %v14455_v37 = vpop.eup %14454  ;;  %v941_v48 = vmul.f32 %v15480_v26, %v15439_v51  ;;  %v957_v60 = vsub.f32 1.0, %v956_v19  ;;  %v688_v22 = vadd.f32 %v687_v2, %v15298_v63  ;;  %vm15564_vm4 = vmor %vm975_vm14, %vm976_vm15 }
 0x115   :  { %14460 = vpow2.f32 %v9841_v52  ;;  %v15486_v42 = vadd.f32 1.0, %v14455_v37  ;;  %v972_v7 = vsub.f32 1.0, %v971_v5  ;;  %v659_v52 = vadd.f32 %v658_v3, %v15405_v17 }
 0x116   :  { %v942_v45 = vsub.f32 1.0, %v941_v48  ;;  %v958_v50 = vmul.f32 %v15475_v20, %v957_v60  ;;  %v966_v37 = vand.u32 2147483648, %v15386_v31  ;;  %vm946_vm13 = vweird.f32 %v15480_v26 }
 0x117   :  { %14462 = vrcp.f32 %v15486_v42  ;;  %v973_v14 = vmul.f32 %v15477_v49, %v972_v7  ;;  %v14912_v5 = vmov 0.0   ;;  %v949_v48 = vand.u32 2147483647, %v15439_v51  ;;  %vm15540_vm2 = vmor %vm945_vm1, %vm946_vm13 }
 0x118   :  { %v943_v33 = vmul.f32 %v15480_v26, %v942_v45  ;;  %v959_v11 = vadd.f32 %v15475_v20, %v958_v50  ;;  %152 = vst [vmem:[#allocation2] sm:$0xff] %v14912_v5  ;;  %v964_v7 = vand.u32 2147483647, %v15386_v31  ;;  %v981_v45 = vand.u32 2147483648, %v15429_v35 }
 0x119   :  { %v14457_v0 = vpop.eup %14456  ;;  %153 = vst [vmem:[#allocation2 + $0x8] sm:$0xff] %v14912_v5  ;;  %vm950_vm5 = vcmp.eq.f32.partialorder %v949_v48, 8.507059e+37  ;;  %vm1112_vm8 = vweird.f32 %v15486_v42 }
 0x11a   :  { %v14459_v36 = vpop.eup %14458  ;;  %v15482_v25 = vmul.f32 %v14457_v0, %v1045_v4  ;;  %v974_v4 = vadd.f32 %v15477_v49, %v973_v14  ;;  %154 = vst [vmem:[#allocation2 + $0x10] sm:$0xff] %v14912_v5  ;;  %vm965_vm6 = vcmp.eq.f32.partialorder %v964_v7, 8.507059e+37 }
 0x11b   :  { %v14461_v18 = vpop.eup %14460  ;;  %v15493_v58 = vadd.f32 1.0, %v14459_v36  ;;  %v944_v36 = vadd.f32 %v15480_v26, %v943_v33  ;;  %155 = vst [vmem:[#allocation2 + $0x18] sm:$0xff] %v14912_v5 }
 0x11c   :  { %1203 = vst [vmem:[#allocation1 + $0x9] sm:$0xff] %v15482_v25  ;;  %v15496_v43 = vadd.f32 1.0, %v14461_v18  ;;  %v951_v18 = vand.u32 2147483648, %v15439_v51  ;;  %v979_v51 = vand.u32 2147483647, %v15429_v35 }
 0x11d   :  { %14464 = vrcp.f32 %v15493_v58  ;;  %v15504_v44 = vpop.eup %14462  ;;  %v948_v34 = vsel %vm15540_vm2, %v15480_v26, %v944_v36  ;;  %v978_v36 = vsel %vm15564_vm4, %v15477_v49, %v974_v4  ;;  %156 = vst [vmem:[#allocation2 + $0x20] sm:$0xff] %v14912_v5  ;;  %vm1097_vm15 = vweird.f32 %v15493_v58 }
 0x11e   :  { %14466 = vrcp.f32 %v15496_v43  ;;  %v1108_v27 = vmul.f32 %v15504_v44, %v15486_v42  ;;  %v952_v26 = vor.u32 1.1754944e-38, %v951_v18  ;;  %vm980_vm7 = vcmp.eq.f32.partialorder %v979_v51, 8.507059e+37  ;;  %157 = vst [vmem:[#allocation2 + $0x28] sm:$0xff] %v14912_v5 }
 0x11f   :  { %14468 = vtanh.f32 %v659_v52  ;;  %v963_v52 = vsel %vm15548_vm3, %v15475_v20, %v959_v11  ;;  %v982_v11 = vor.u32 1.1754944e-38, %v981_v45  ;;  %v1118_v45 = vand.u32 2147483648, %v15486_v42  ;;  %158 = vst [vmem:[#allocation2 + $0x30] sm:$0xff] %v14912_v5 }
 0x120   :  { %14470 = vtanh.f32 %v688_v22  ;;  %v1109_v22 = vsub.f32 1.0, %v1108_v27  ;;  %v967_v27 = vor.u32 1.1754944e-38, %v966_v37  ;;  %vm1113_vm9 = vweird.f32 %v15504_v44  ;;  %159 = vst [vmem:[#allocation2 + $0x38] sm:$0xff] %v14912_v5 }
 0x121   :  { %14472 = vtanh.f32 %v717_v15  ;;  %v983_v48 = vsel %vm980_vm7, %v982_v11, %v978_v36  ;;  %v1131_v51 = vand.u32 2147483647, %v15496_v43  ;;  %vm1127_vm12 = vweird.f32 %v15496_v43  ;;  %176 = vst [vmem:[#allocation3] sm:$0xff] %v14912_v5  ;;  %vm15614_vm13 = vmor %vm1112_vm8, %vm1113_vm9 }
 0x122   :  { %v968_v2 = vsel %vm965_vm6, %v967_v27, %v963_v52  ;;  %v1110_v37 = vmul.f32 %v15504_v44, %v1109_v22  ;;  %v1103_v52 = vand.u32 2147483648, %v15493_v58  ;;  %177 = vst [vmem:[#allocation3 + $0x8] sm:$0xff] %v14912_v5  ;;  %v1119_v27 = vor.u32 1.1754944e-38, %v1118_v45 }
 0x123   :  { %v15501_v13 = vld [vmem:[#allocation1 + $0x1] ss:$9 sm:$0xff]  ;;  %v15513_v32 = vpop.eup %14464  ;;  %vm15623_vm1 = vcmp.eq.f32.partialorder %v1131_v51, 8.507059e+37  ;;  %178 = vst [vmem:[#allocation3 + $0x10] sm:$0xff] %v14912_v5  ;;  %vm1176_vm4 = vcmask 1040384   ;;  %vm1178_vm6 = vcmask 1042434  }
 0x124   :  { %1212 = vst [vmem:[#allocation1] sm:$0xff] %v15293_v54  ;;  %v15522_v0 = vpop.eup %14466  ;;  %v1093_v19 = vmul.f32 %v15513_v32, %v15493_v58  ;;  %vm1098_vm10 = vweird.f32 %v15513_v32  ;;  %vm1180_vm7 = vcmask 1041408  }
 0x125   :  { %1213 = vst [vmem:[#allocation1 + $0x9] sm:$0xff] %v15466_v28  ;;  %v1123_v60 = vmul.f32 %v15522_v0, %v15496_v43  ;;  %v14469_v3 = vpop.eup %14468  ;;  %vm1128_vm14 = vweird.f32 %v15522_v0  ;;  %vm15629_vm2 = vmor %vm1097_vm15, %vm1098_vm10 }
 0x126   :  { %1214 = vst [vmem:[#allocation1 + $0x12] sm:$0xff] %v15395_v8  ;;  %v1094_v14 = vsub.f32 1.0, %v1093_v19  ;;  %v14471_v15 = vpop.eup %14470  ;;  %v953_v19 = vsel %vm950_vm5, %v952_v26, %v948_v34  ;;  %v1133_v34 = vand.u32 2147483648, %v15496_v43  ;;  %vm15649_vm3 = vmor %vm1127_vm12, %vm1128_vm14  ;;  %v1194_v43 = vrot.slane %v15395_v8, 6 }
 0x127   :  { %1215 = vst [vmem:[#allocation1 + $0x1b] sm:$0xff] %v15409_v30  ;;  %v14473_v20 = vpop.eup %14472  ;;  %v1124_v35 = vsub.f32 1.0, %v1123_v60  ;;  %v15577_v18 = vmul.f32 %v14469_v3, %v953_v19  ;;  %v15581_v4 = vmul.f32 %v14471_v15, %v968_v2  ;;  %v1116_v60 = vand.u32 2147483647, %v15486_v42 }
 0x128   :  { %v1095_v49 = vmul.f32 %v15513_v32, %v1094_v14  ;;  %v15585_v7 = vmul.f32 %v14473_v20, %v983_v48  ;;  %v1111_v3 = vadd.f32 %v15504_v44, %v1110_v37  ;;  %v1101_v15 = vand.u32 2147483647, %v15493_v58  ;;  %179 = vst [vmem:[#allocation3 + $0x18] sm:$0xff] %v14912_v5 }
 0x129   :  { %v1125_v50 = vmul.f32 %v15522_v0, %v1124_v35  ;;  %14474 = vtanh.f32 %v15577_v18  ;;  %vm15602_vm11 = vcmp.eq.f32.partialorder %v1116_v60, 8.507059e+37  ;;  %v1173_v35 = vrot.slane %v15482_v25, 7  ;;  %180 = vst [vmem:[#allocation3 + $0x20] sm:$0xff] %v14912_v5 }
 0x12a   :  { %v1096_v22 = vadd.f32 %v15513_v32, %v1095_v49  ;;  %14476 = vtanh.f32 %v15581_v4  ;;  %v1115_v58 = vsel %vm15614_vm13, %v15504_v44, %v1111_v3  ;;  %v1134_v11 = vor.u32 1.1754944e-38, %v1133_v34  ;;  %181 = vst [vmem:[#allocation3 + $0x28] sm:$0xff] %v14912_v5 }
 0x12b   :  { %14478 = vtanh.f32 %v15585_v7  ;;  %v1126_v26 = vadd.f32 %v15522_v0, %v1125_v50  ;;  %v1193_v2 = vrot.slane %v15466_v28, 7  ;;  %v1104_v48 = vor.u32 1.1754944e-38, %v1103_v52  ;;  %182 = vst [vmem:[#allocation3 + $0x30] sm:$0xff] %v14912_v5 }
 0x12c   :  { %v1100_v19 = vsel %vm15629_vm2, %v15513_v32, %v1096_v22  ;;  %v1174_v44 = vrot.slane %v15454_v41, 6  ;;  %v1175_v60 = vrot.slane %v15463_v47, 5  ;;  %vm1102_vm5 = vcmp.eq.f32.partialorder %v1101_v15, 8.507059e+37  ;;  %183 = vst [vmem:[#allocation3 + $0x38] sm:$0xff] %v14912_v5 }
 0x12d   :  { %v1130_v45 = vsel %vm15649_vm3, %v15522_v0, %v1126_v26  ;;  %v1195_v50 = vrot.slane %v15409_v30, 5  ;;  %v1105_v34 = vsel %vm1102_vm5, %v1104_v48, %v1100_v19  ;;  %v1177_v3 = vsel %vm1176_vm4, %v15365_v62, %v1173_v35  ;;  %160 = vst [vmem:[#allocation2 + $0x40] sm:$0xff] %v14912_v5 }
 0x12e   :  { %v15568_v33 = vld [vmem:[#allocation1 + $0x1] ss:$9 sm:$0xff]  ;;  %v1183_v22 = vlaneseq  ;;  %v1120_v52 = vsel %vm15602_vm11, %v1119_v27, %v1115_v58  ;;  %v1196_v31 = vsel %vm1176_vm4, %v15293_v54, %v1193_v2  ;;  %v1135_v15 = vsel %vm15623_vm1, %v1134_v11, %v1130_v45  ;;  %161 = vst [vmem:[#allocation2 + $0x48] sm:$0xff] %v14912_v5 }
 0x12f   :  { %1222 = vst [vmem:[#allocation1] sm:$0xff] %v15365_v62  ;;  %v14475_v37 = vpop.eup %14474  ;;  %v1179_v42 = vsel %vm1178_vm6, %v1174_v44, %v1175_v60  ;;  %v1197_v19 = vsel %vm1178_vm6, %v1194_v43, %v1195_v50  ;;  %v1360_v2 = vrot.slane %v15577_v18, 7  ;;  %v1361_v48 = vrot.slane %v15581_v4, 6  ;;  %v328_v45 = vld [vmem:[#allocation7 + $0x3e0] sm:$0xff]  ;;  %v329_v43 = vld [vmem:[#allocation7 + $0x3e8] sm:$0xff]  ;;  %v330_v50 = vld [vmem:[#allocation7 + $0x3f0] sm:$0xff] }
 0x130   :  { %1223 = vst [vmem:[#allocation1 + $0x9] sm:$0xff] %v15482_v25  ;;  %v14477_v32 = vpop.eup %14476  ;;  %v1166_v0 = vmul.f32 %v14475_v37, %v1105_v34  ;;  %v1181_v14 = vsel %vm1180_vm7, %v1177_v3, %v1179_v42  ;;  %vm15678_vm8 = vcmp.lt.s32.totalorder %v1183_v22, 512  ;;  %v1198_v36 = vsel %vm1180_vm7, %v1196_v31, %v1197_v19  ;;  %733 = vmatpush.msrb.mxu0 %v328_v45  ;;  %v312_v34 = vld [vmem:[#allocation7 + $0x360] sm:$0xff]  ;;  %v313_v3 = vld [vmem:[#allocation7 + $0x368] sm:$0xff]  ;;  %v314_v22 = vld [vmem:[#allocation7 + $0x370] sm:$0xff] }
 0x131   :  { %1224 = vst [vmem:[#allocation1 + $0x12] sm:$0xff] %v15454_v41  ;;  %v14479_v51 = vpop.eup %14478  ;;  %v1167_v26 = vmul.f32 %v14477_v32, %v1120_v52  ;;  %v1362_v44 = vrot.slane %v15585_v7, 5  ;;  %v1363_v18 = vsel %vm1176_vm4, %v15295_v56, %v1360_v2  ;;  %760 = vmatpush.msra.mxu1 %v329_v43  ;;  %787 = vmatpush.msrb.mxu2 %v330_v50  ;;  %v315_v52 = vld [vmem:[#allocation7 + $0x378] sm:$0xff]  ;;  %v297_v31 = vld [vmem:[#allocation7 + $0x2e8] sm:$0xff]  ;;  %v280_v42 = vld [vmem:[#allocation7 + $0x260] sm:$0xff] }
 0x132   :  { %1225 = vst [vmem:[#allocation1 + $0x1b] sm:$0xff] %v15463_v47  ;;  %v1168_v35 = vmul.f32 %v14479_v51, %v1135_v15  ;;  %v1346_v58 = vrot.slane %v1166_v0, 7  ;;  %v331_v51 = vld [vmem:[#allocation7 + $0x3f8] sm:$0xff]  ;;  %734 = vmatpush.msrb.mxu0 %v312_v34  ;;  %v296_v0 = vld [vmem:[#allocation7 + $0x2e0] sm:$0xff]  ;;  %v282_v19 = vld [vmem:[#allocation7 + $0x270] sm:$0xff] }
 0x133   :  { %v1347_v11 = vrot.slane %v1167_v26, 6  ;;  %1187 = vst.msk [vmem:[#allocation2] ss:$8 sm:$0xf] %vm15678_vm8, %v1181_v14  ;;  %v1364_v4 = vsel %vm1178_vm6, %v1361_v48, %v1362_v44  ;;  %814 = vmatpush.msrb.mxu3 %v331_v51  ;;  %761 = vmatpush.msra.mxu1 %v313_v3  ;;  %v298_v26 = vld [vmem:[#allocation7 + $0x2f0] sm:$0xff]  ;;  %v299_v15 = vld [vmem:[#allocation7 + $0x2f8] sm:$0xff] }
 0x134   :  { %v1348_v37 = vrot.slane %v1168_v35, 5  ;;  %1200 = vst.msk [vmem:[#allocation3] ss:$8 sm:$0xf] %vm15678_vm8, %v1198_v36  ;;  %v1349_v60 = vsel %vm1176_vm4, %v15371_v23, %v1346_v58  ;;  %v1365_v23 = vsel %vm1180_vm7, %v1363_v18, %v1364_v4  ;;  %788 = vmatpush.msrb.mxu2 %v314_v22  ;;  %735 = vmatpush.msrb.mxu0 %v296_v0  ;;  %v281_v35 = vld [vmem:[#allocation7 + $0x268] sm:$0xff]  ;;  %v283_v14 = vld [vmem:[#allocation7 + $0x278] sm:$0xff] }
 0x135   :  { %1210 = vst.msk [vmem:[#allocation2 + $0x20] ss:$8 sm:$0xf] %vm15678_vm8, %v15501_v13  ;;  %815 = vmatpush.msrb.mxu3 %v315_v52  ;;  %762 = vmatpush.msra.mxu1 %v297_v31  ;;  %v264_v36 = vld [vmem:[#allocation7 + $0x1e0] sm:$0xff]  ;;  %v265_v58 = vld [vmem:[#allocation7 + $0x1e8] sm:$0xff]  ;;  %v267_v2 = vld [vmem:[#allocation7 + $0x1f8] sm:$0xff] }
 0x136   :  { %v1350_v32 = vsel %vm1178_vm6, %v1347_v11, %v1348_v37  ;;  %1220 = vst.msk [vmem:[#allocation3 + $0x20] ss:$8 sm:$0xf] %vm15678_vm8, %v15568_v33  ;;  %789 = vmatpush.msrb.mxu2 %v298_v26  ;;  %736 = vmatpush.msrb.mxu0 %v280_v42  ;;  %v266_v11 = vld [vmem:[#allocation7 + $0x1f0] sm:$0xff]  ;;  %v248_v48 = vld [vmem:[#allocation7 + $0x160] sm:$0xff]  ;;  %v249_v44 = vld [vmem:[#allocation7 + $0x168] sm:$0xff] }
 0x137   :  { %v1351_v7 = vsel %vm1180_vm7, %v1349_v60, %v1350_v32  ;;  %1368 = vst.msk [vmem:[#allocation3 + $0x24] ss:$8 sm:$0xf] %vm15678_vm8, %v1365_v23  ;;  %816 = vmatpush.msrb.mxu3 %v299_v15  ;;  %763 = vmatpush.msra.mxu1 %v281_v35  ;;  %v250_v60 = vld [vmem:[#allocation7 + $0x170] sm:$0xff]  ;;  %v251_v18 = vld [vmem:[#allocation7 + $0x178] sm:$0xff]  ;;  %v232_v32 = vld [vmem:[#allocation7 + $0xe0] sm:$0xff] }
 0x138   :  { %1354 = vst.msk [vmem:[#allocation2 + $0x24] ss:$8 sm:$0xf] %vm15678_vm8, %v1351_v7  ;;  %790 = vmatpush.msrb.mxu2 %v282_v19  ;;  %737 = vmatpush.msrb.mxu0 %v264_v36  ;;  %v233_v4 = vld [vmem:[#allocation7 + $0xe8] sm:$0xff]  ;;  %v234_v7 = vld [vmem:[#allocation7 + $0xf0] sm:$0xff]  ;;  %v235_v23 = vld [vmem:[#allocation7 + $0xf8] sm:$0xff] }
 0x139   :  { %v15633_v20 = vld [vmem:[#allocation1 + $0x2] ss:$9 sm:$0xff]  ;;  %162 = vst [vmem:[#allocation2 + $0x50] sm:$0xff] %v14912_v5  ;;  %817 = vmatpush.msrb.mxu3 %v283_v14  ;;  %764 = vmatpush.msra.mxu1 %v265_v58 }
 0x13a   :  { %1232 = vst [vmem:[#allocation1] sm:$0xff] %v15293_v54  ;;  %791 = vmatpush.msrb.mxu2 %v266_v11  ;;  %738 = vmatpush.msrb.mxu0 %v248_v48  ;;  %v216_v45 = vld [vmem:[#allocation7 + $0x60] sm:$0xff]  ;;  %v217_v43 = vld [vmem:[#allocation7 + $0x68] sm:$0xff]  ;;  %v218_v50 = vld [vmem:[#allocation7 + $0x70] sm:$0xff] }
 0x13b   :  { %1233 = vst [vmem:[#allocation1 + $0x9] sm:$0xff] %v15466_v28  ;;  %818 = vmatpush.msrb.mxu3 %v267_v2  ;;  %765 = vmatpush.msra.mxu1 %v249_v44  ;;  %v219_v34 = vld [vmem:[#allocation7 + $0x78] sm:$0xff]  ;;  %v10564_v3 = vld [vmem:[#allocation10 + $0x5a0] sm:$0xf]  ;;  %v13649_v22 = vld [vmem:[#allocation10 + $0x5cc] sm:$0xf0] }
 0x13c   :  { %1234 = vst [vmem:[#allocation1 + $0x12] sm:$0xff] %v15395_v8  ;;  %792 = vmatpush.msrb.mxu2 %v250_v60  ;;  %739 = vmatpush.msrb.mxu0 %v232_v32  ;;  %v10948_v52 = vld [vmem:[#allocation10 + $0x8a0] sm:$0xf]  ;;  %v10565_v0 = vor.u32 %v13649_v22, %v10564_v3  ;;  %v13745_v31 = vld [vmem:[#allocation10 + $0x8cc] sm:$0xf0] }
 0x13d   :  { %1235 = vst [vmem:[#allocation1 + $0x1b] sm:$0xff] %v15409_v30  ;;  %819 = vmatpush.msrb.mxu3 %v251_v18  ;;  %766 = vmatpush.msra.mxu1 %v233_v4  ;;  %v11332_v26 = vld [vmem:[#allocation10 + $0xba0] sm:$0xf]  ;;  %v14656_v15 = vld [vmem:[#allocation4] sm:$0xff]  ;;  %v10949_v42 = vor.u32 %v13745_v31, %v10948_v52  ;;  %v12786_v27 = vld [vmem:[#allocation10 + $0xa58] sm:$0xf0] }
 0x13e   :  { %1230 = vst.msk [vmem:[#allocation2 + $0x1] ss:$8 sm:$0xf] %vm15678_vm8, %v15633_v20  ;;  %793 = vmatpush.msrb.mxu2 %v234_v7  ;;  %740 = vmatpush.msrb.mxu0 %v216_v45  ;;  %v13841_v35 = vld [vmem:[#allocation10 + $0xbcc] sm:$0xf0] }
 0x13f   :  { %163 = vst [vmem:[#allocation2 + $0x58] sm:$0xff] %v14912_v5  ;;  %820 = vmatpush.msrb.mxu3 %v235_v23  ;;  %767 = vmatpush.msra.mxu1 %v217_v43  ;;  %v10132_v19 = vld [vmem:[#allocation10 + $0x240] sm:$0xf]  ;;  %v11333_v14 = vor.u32 %v13841_v35, %v11332_v26  ;;  %v13541_v36 = vld [vmem:[#allocation10 + $0x26c] sm:$0xf0] }
 0x140   :  { %164 = vst [vmem:[#allocation2 + $0x60] sm:$0xff] %v14912_v5  ;;  %794 = vmatpush.msrb.mxu2 %v218_v50  ;;  %9814 = vmatmul.msk.f32.vlgmr.msra.gmra.mxu1 %vm368_vm0, %v14656_v15  ;;  %v10516_v58 = vld [vmem:[#allocation10 + $0x540] sm:$0xf]  ;;  %v10133_v11 = vor.u32 %v13541_v36, %v10132_v19  ;;  %v13637_v2 = vld [vmem:[#allocation10 + $0x56c] sm:$0xf0] }
 0x141   :  { %165 = vst [vmem:[#allocation2 + $0x68] sm:$0xff] %v14912_v5  ;;  %821 = vmatpush.msrb.mxu3 %v219_v34  ;;  %9810 = vmatmul.msk.f32.vlgmr.msrb.gmra.mxu0 %vm368_vm0, %v14656_v15  ;;  %v10900_v48 = vld [vmem:[#allocation10 + $0x840] sm:$0xf]  ;;  %v13733_v44 = vld [vmem:[#allocation10 + $0x86c] sm:$0xf0] }
 0x142   :  { %166 = vst [vmem:[#allocation2 + $0x70] sm:$0xff] %v14912_v5  ;;  %9818 = vmatmul.msk.f32.vlgmr.msrb.gmra.mxu2 %vm368_vm0, %v14656_v15  ;;  %3723 = vmatpush.bf16.msrb.mxu1 %v10565_v0  ;;  %v10901_v60 = vor.u32 %v13733_v44, %v10900_v48  ;;  %v13829_v18 = vld [vmem:[#allocation10 + $0xb6c] sm:$0xf0]  ;;  %v10084_v4 = vld [vmem:[#allocation10 + $0x1e0] sm:$0xf] }
 0x143   :  { %167 = vst [vmem:[#allocation2 + $0x78] sm:$0xff] %v14912_v5  ;;  %9822 = vmatmul.msk.f32.vlgmr.msrb.gmra.mxu3 %vm368_vm0, %v14656_v15  ;;  %3736 = vmatpush.bf16.msra.mxu2 %v10949_v42  ;;  %v13529_v7 = vld [vmem:[#allocation10 + $0x20c] sm:$0xf0]  ;;  %v10468_v23 = vld [vmem:[#allocation10 + $0x4e0] sm:$0xf] }
 0x144   :  { %v15687_v49 = vld [vmem:[#allocation1 + $0x2] ss:$9 sm:$0xff]  ;;  %168 = vst [vmem:[#allocation2 + $0x80] sm:$0xff] %v14912_v5  ;;  %3749 = vmatpush.bf16.msra.mxu3 %v11333_v14 }
 0x145   :  { %1242 = vst [vmem:[#allocation1] sm:$0xff] %v15365_v62  ;;  %v10852_v43 = vld [vmem:[#allocation10 + $0x7e0] sm:$0xf]  ;;  %v13721_v50 = vld [vmem:[#allocation10 + $0x80c] sm:$0xf0] }
 0x146   :  { %1243 = vst [vmem:[#allocation1 + $0x9] sm:$0xff] %v15482_v25  ;;  %v11236_v34 = vld [vmem:[#allocation10 + $0xae0] sm:$0xf]  ;;  %v13817_v3 = vld [vmem:[#allocation10 + $0xb0c] sm:$0xf0] }
 0x147   :  { %1244 = vst [vmem:[#allocation1 + $0x12] sm:$0xff] %v15454_v41  ;;  %3737 = vmatpush.bf16.msra.mxu2 %v10901_v60  ;;  %v10036_v22 = vld [vmem:[#allocation10 + $0x180] sm:$0xf]  ;;  %v11237_v52 = vor.u32 %v13817_v3, %v11236_v34  ;;  %v13517_v0 = vld [vmem:[#allocation10 + $0x1ac] sm:$0xf0] }
 0x148   :  { %1245 = vst [vmem:[#allocation1 + $0x1b] sm:$0xff] %v15463_v47  ;;  %v10420_v31 = vld [vmem:[#allocation10 + $0x480] sm:$0xf]  ;;  %v13613_v26 = vld [vmem:[#allocation10 + $0x4ac] sm:$0xf0]  ;;  %v10037_v15 = vor.u32 %v13517_v0, %v10036_v22 }
 0x149   :  { %169 = vst [vmem:[#allocation2 + $0x88] sm:$0xff] %v14912_v5  ;;  %v10421_v42 = vor.u32 %v13613_v26, %v10420_v31  ;;  %v10804_v35 = vld [vmem:[#allocation10 + $0x780] sm:$0xf]  ;;  %v13805_v36 = vld [vmem:[#allocation10 + $0xaac] sm:$0xf0] }
 0x14a   :  { %170 = vst [vmem:[#allocation2 + $0x90] sm:$0xff] %v14912_v5  ;;  %v11188_v19 = vld [vmem:[#allocation10 + $0xa80] sm:$0xf]  ;;  %v13601_v44 = vld [vmem:[#allocation10 + $0x44c] sm:$0xf0] }
 0x14b   :  { %171 = vst [vmem:[#allocation2 + $0x98] sm:$0xff] %v14912_v5  ;;  %v10372_v48 = vld [vmem:[#allocation10 + $0x420] sm:$0xf]  ;;  %v13685_v3 = vld [vmem:[#allocation10 + $0x6ec] sm:$0xf0] }
 0x14c   :  { %172 = vst [vmem:[#allocation2 + $0xa0] sm:$0xff] %v14912_v5  ;;  %v10373_v60 = vor.u32 %v13601_v44, %v10372_v48  ;;  %v10708_v34 = vld [vmem:[#allocation10 + $0x6c0] sm:$0xf]  ;;  %v13469_v48 = vld [vmem:[#allocation10 + $0x2c] sm:$0xf0] }
 0x14d   :  { %173 = vst [vmem:[#allocation2 + $0xa8] sm:$0xff] %v14912_v5  ;;  %v11092_v22 = vld [vmem:[#allocation10 + $0x9c0] sm:$0xf]  ;;  %v10709_v0 = vor.u32 %v13685_v3, %v10708_v34  ;;  %v10566_v34 = vld [vmem:[#allocation10 + $0x5d0] sm:$0xf0] }
 0x14e   :  { %174 = vst [vmem:[#allocation2 + $0xb0] sm:$0xff] %v14912_v5  ;;  %v9892_v26 = vld [vmem:[#allocation10 + $0x60] sm:$0xf] }
 0x14f   :  { %v1247_v56 = vld [vmem:[#allocation1 + $0x3] ss:$9 sm:$0xff]  ;;  %175 = vst [vmem:[#allocation2 + $0xb8] sm:$0xff] %v14912_v5 }
 0x150   :  { %1252 = vst [vmem:[#allocation1] sm:$0xff] %v15293_v54  ;;  %v10228_v44 = vld [vmem:[#allocation10 + $0x300] sm:$0xf] }
 0x151   :  { %1253 = vst [vmem:[#allocation1 + $0x9] sm:$0xff] %v15466_v28 }
 0x152   :  { %1254 = vst [vmem:[#allocation1 + $0x12] sm:$0xff] %v15395_v8 }
 0x153   :  { %1255 = vst [vmem:[#allocation1 + $0x1b] sm:$0xff] %v15409_v30 }
 0x154   :  { %1250 = vst.msk [vmem:[#allocation2 + $0x21] ss:$8 sm:$0xf] %vm15678_vm8, %v1247_v56  ;;  %v10180_v56 = vld [vmem:[#allocation10 + $0x2a0] sm:$0xf] }
 0x155   :  { %184 = vst [vmem:[#allocation3 + $0x40] sm:$0xff] %v14912_v5 }
 0x156   :  { %185 = vst [vmem:[#allocation3 + $0x48] sm:$0xff] %v14912_v5 }
 0x157   :  { %186 = vst [vmem:[#allocation3 + $0x50] sm:$0xff] %v14912_v5 }
 0x158   :  { %187 = vst [vmem:[#allocation3 + $0x58] sm:$0xff] %v14912_v5 }
 0x159   :  { %188 = vst [vmem:[#allocation3 + $0x60] sm:$0xff] %v14912_v5 }
 0x15a   :  { %v1257_v13 = vld [vmem:[#allocation1 + $0x3] ss:$9 sm:$0xff]  ;;  %189 = vst [vmem:[#allocation3 + $0x68] sm:$0xff] %v14912_v5 }
 0x15b   :  { %1262 = vst [vmem:[#allocation1] sm:$0xff] %v15365_v62 }
 0x15c   :  { %1263 = vst [vmem:[#allocation1 + $0x9] sm:$0xff] %v15482_v25 }
 0x15d   :  { %1264 = vst [vmem:[#allocation1 + $0x12] sm:$0xff] %v15454_v41 }
 0x15e   :  { %1265 = vst [vmem:[#allocation1 + $0x1b] sm:$0xff] %v15463_v47 }
 0x15f   :  { %1260 = vst.msk [vmem:[#allocation3 + $0x21] ss:$8 sm:$0xf] %vm15678_vm8, %v1257_v13  ;;  %v13553_v13 = vld [vmem:[#allocation10 + $0x2cc] sm:$0xf0] }
 0x160   :  { %190 = vst [vmem:[#allocation3 + $0x70] sm:$0xff] %v14912_v5  ;;  %v10181_v51 = vor.u32 %v13553_v13, %v10180_v56  ;;  %v13625_v56 = vld [vmem:[#allocation10 + $0x50c] sm:$0xf0]  ;;  %v14657_v13 = vld [vmem:[#allocation4 + $0x8] sm:$0xff] }
 0x161   :  { %191 = vst [vmem:[#allocation3 + $0x78] sm:$0xff] %v14912_v5  ;;  %9815 = vmatmul.msk.f32.gmra.mxu1 %vm368_vm0, %v14657_v13  ;;  %v10469_v45 = vor.u32 %v13625_v56, %v10468_v23  ;;  %9811 = vmatmul.msk.f32.gmra.mxu0 %vm368_vm0, %v14657_v13  ;;  %v9940_v56 = vld [vmem:[#allocation10 + $0xc0] sm:$0xf] }
 0x162   :  { %192 = vst [vmem:[#allocation3 + $0x80] sm:$0xff] %v14912_v5  ;;  %3710 = vmatpush.bf16.msra.mxu0 %v10181_v51  ;;  %9819 = vmatmul.msk.f32.gmra.mxu2 %vm368_vm0, %v14657_v13  ;;  %v10853_v51 = vor.u32 %v13721_v50, %v10852_v43  ;;  %v10324_v43 = vld [vmem:[#allocation10 + $0x3c0] sm:$0xf]  ;;  %v13589_v50 = vld [vmem:[#allocation10 + $0x3ec] sm:$0xf0] }
 0x163   :  { %193 = vst [vmem:[#allocation3 + $0x88] sm:$0xff] %v14912_v5  ;;  %9823 = vmatmul.msk.f32.gmra.mxu3 %vm368_vm0, %v14657_v13  ;;  %v13493_v13 = vld [vmem:[#allocation10 + $0xec] sm:$0xf0] }
 0x164   :  { %194 = vst [vmem:[#allocation3 + $0x90] sm:$0xff] %v14912_v5  ;;  %3738 = vmatpush.bf16.msra.mxu2 %v10853_v51  ;;  %v10325_v51 = vor.u32 %v13589_v50, %v10324_v43 }
 0x165   :  { %v15743_v33 = vld [vmem:[#allocation1 + $0x4] ss:$9 sm:$0xff]  ;;  %195 = vst [vmem:[#allocation3 + $0x98] sm:$0xff] %v14912_v5 }
 0x166   :  { %1272 = vst [vmem:[#allocation1] sm:$0xff] %v15293_v54  ;;  %3711 = vmatpush.bf16.msra.mxu0 %v10133_v11  ;;  %v13505_v11 = vld [vmem:[#allocation10 + $0x14c] sm:$0xf0] }
 0x167   :  { %1273 = vst [vmem:[#allocation1 + $0x9] sm:$0xff] %v15466_v28 }
 0x168   :  { %1274 = vst [vmem:[#allocation1 + $0x12] sm:$0xff] %v15395_v8 }
 0x169   :  { %1275 = vst [vmem:[#allocation1 + $0x1b] sm:$0xff] %v15409_v30 }
 0x16a   :  { %196 = vst [vmem:[#allocation3 + $0xa0] sm:$0xff] %v14912_v5 }
 0x16b   :  { %197 = vst [vmem:[#allocation3 + $0xa8] sm:$0xff] %v14912_v5 }
 0x16c   :  { %198 = vst [vmem:[#allocation3 + $0xb0] sm:$0xff] %v14912_v5 }
 0x16d   :  { %199 = vst [vmem:[#allocation3 + $0xb8] sm:$0xff] %v14912_v5  ;;  %v10517_v5 = vor.u32 %v13637_v2, %v10516_v58  ;;  %v9988_v58 = vld [vmem:[#allocation10 + $0x120] sm:$0xf] }
 0x16e   :  { %1240 = vst.msk [vmem:[#allocation3 + $0x1] ss:$8 sm:$0xf] %vm15678_vm8, %v15687_v49  ;;  %v11284_v49 = vld [vmem:[#allocation10 + $0xb40] sm:$0xf] }
 0x16f   :  { %1270 = vst.msk [vmem:[#allocation2 + $0x41] ss:$8 sm:$0xf] %vm15678_vm8, %v15743_v33  ;;  %3724 = vmatpush.bf16.msrb.mxu1 %v10517_v5  ;;  %v11285_v32 = vor.u32 %v13829_v18, %v11284_v49  ;;  %v10085_v33 = vor.u32 %v13529_v7, %v10084_v4  ;;  %v9989_v5 = vor.u32 %v13505_v11, %v9988_v58  ;;  %v10756_v49 = vld [vmem:[#allocation10 + $0x720] sm:$0xf] }
 0x170   :  { %v15756_v20 = vld [vmem:[#allocation1 + $0x4] ss:$9 sm:$0xff] }
 0x171   :  { %1282 = vst [vmem:[#allocation1] sm:$0xff] %v15365_v62  ;;  %3750 = vmatpush.bf16.msra.mxu3 %v11285_v32  ;;  %3712 = vmatpush.bf16.msra.mxu0 %v10085_v33  ;;  %v13697_v18 = vld [vmem:[#allocation10 + $0x74c] sm:$0xf0]  ;;  %v14658_v32 = vld [vmem:[#allocation4 + $0x10] sm:$0xff] }
 0x172   :  { %1283 = vst [vmem:[#allocation1 + $0x9] sm:$0xff] %v15482_v25  ;;  %9816 = vmatmul.msk.f32.gmra.mxu1 %vm368_vm0, %v14658_v32  ;;  %v10757_v4 = vor.u32 %v13697_v18, %v10756_v49  ;;  %v11140_v7 = vld [vmem:[#allocation10 + $0xa20] sm:$0xf]  ;;  %v13793_v33 = vld [vmem:[#allocation10 + $0xa4c] sm:$0xf0]  ;;  %9812 = vmatmul.msk.f32.gmra.mxu0 %vm368_vm0, %v14658_v32 }
 0x173   :  { %1284 = vst [vmem:[#allocation1 + $0x12] sm:$0xff] %v15454_v41  ;;  %3725 = vmatpush.bf16.msrb.mxu1 %v10469_v45  ;;  %v11141_v23 = vor.u32 %v13793_v33, %v11140_v7  ;;  %9820 = vmatmul.msk.f32.gmra.mxu2 %vm368_vm0, %v14658_v32  ;;  %v9941_v45 = vor.u32 %v13493_v13, %v9940_v56  ;;  %v11044_v58 = vld [vmem:[#allocation10 + $0x960] sm:$0xf]  ;;  %v13769_v11 = vld [vmem:[#allocation10 + $0x98c] sm:$0xf0] }
 0x174   :  { %1285 = vst [vmem:[#allocation1 + $0x1b] sm:$0xff] %v15463_v47  ;;  %9824 = vmatmul.msk.f32.gmra.mxu3 %vm368_vm0, %v14658_v32  ;;  %v11045_v18 = vor.u32 %v13769_v11, %v11044_v58  ;;  %v10612_v32 = vld [vmem:[#allocation10 + $0x600] sm:$0xf]  ;;  %v13757_v56 = vld [vmem:[#allocation10 + $0x92c] sm:$0xf0] }
 0x175   :  { %1280 = vst.msk [vmem:[#allocation3 + $0x41] ss:$8 sm:$0xf] %vm15678_vm8, %v15756_v20  ;;  %v13709_v20 = vld [vmem:[#allocation10 + $0x7ac] sm:$0xf0]  ;;  %3751 = vmatpush.bf16.msra.mxu3 %v11237_v52  ;;  %3713 = vmatpush.bf16.msra.mxu0 %v10037_v15 }
 0x176   :  { %v10805_v14 = vor.u32 %v13709_v20, %v10804_v35  ;;  %v13781_v52 = vld [vmem:[#allocation10 + $0x9ec] sm:$0xf0]  ;;  %v13547_v13 = vld [vmem:[#allocation10 + $0x2a4] sm:$0xf]  ;;  %v11286_v58 = vld [vmem:[#allocation10 + $0xb70] sm:$0xf0] }
 0x177   :  { %3726 = vmatpush.bf16.msrb.mxu1 %v10421_v42  ;;  %v11093_v31 = vor.u32 %v13781_v52, %v11092_v22  ;;  %v13481_v15 = vld [vmem:[#allocation10 + $0x8c] sm:$0xf0]  ;;  %v10276_v42 = vld [vmem:[#allocation10 + $0x360] sm:$0xf]  ;;  %v13739_v22 = vld [vmem:[#allocation10 + $0x8a4] sm:$0xf] }
 0x178   :  { %3739 = vmatpush.bf16.msra.mxu2 %v10805_v14  ;;  %v9893_v35 = vor.u32 %v13481_v15, %v9892_v26  ;;  %v13577_v20 = vld [vmem:[#allocation10 + $0x38c] sm:$0xf0]  ;;  %v10950_v52 = vld [vmem:[#allocation10 + $0x8d0] sm:$0xf0] }
 0x179   :  { %3714 = vmatpush.bf16.msra.mxu0 %v9989_v5  ;;  %v13673_v14 = vld [vmem:[#allocation10 + $0x68c] sm:$0xf0]  ;;  %v10134_v26 = vld [vmem:[#allocation10 + $0x270] sm:$0xf0] }
 0x17b   :  { %v1287_v37 = vld [vmem:[#allocation1 + $0x5] ss:$9 sm:$0xff]  ;;  %3727 = vmatpush.bf16.msrb.mxu1 %v10373_v60 }
 0x17c   :  { %1292 = vst [vmem:[#allocation1] sm:$0xff] %v15293_v54  ;;  %3740 = vmatpush.bf16.msra.mxu2 %v10757_v4  ;;  %v13565_v60 = vld [vmem:[#allocation10 + $0x32c] sm:$0xf0] }
 0x17d   :  { %1293 = vst [vmem:[#allocation1 + $0x9] sm:$0xff] %v15466_v28  ;;  %3715 = vmatpush.bf16.msra.mxu0 %v9941_v45  ;;  %v13661_v4 = vld [vmem:[#allocation10 + $0x62c] sm:$0xf0]  ;;  %v10229_v33 = vor.u32 %v13565_v60, %v10228_v44  ;;  %v10182_v45 = vld [vmem:[#allocation10 + $0x2d0] sm:$0xf0] }
 0x17e   :  { %1294 = vst [vmem:[#allocation1 + $0x12] sm:$0xff] %v15395_v8  ;;  %v10613_v43 = vor.u32 %v13661_v4, %v10612_v32  ;;  %v10185_v50 = vor.u32 %v13547_v13, %v10182_v45  ;;  %v10470_v60 = vld [vmem:[#allocation10 + $0x510] sm:$0xf0] }
 0x17f   :  { %1295 = vst [vmem:[#allocation1 + $0x1b] sm:$0xff] %v15409_v30  ;;  %3728 = vmatpush.bf16.msrb.mxu1 %v10325_v51  ;;  %v13643_v51 = vld [vmem:[#allocation10 + $0x5a4] sm:$0xf]  ;;  %v10038_v13 = vld [vmem:[#allocation10 + $0x1b0] sm:$0xf0] }
 0x180   :  { %1290 = vst.msk [vmem:[#allocation2 + $0x2] ss:$8 sm:$0xf] %vm15678_vm8, %v1287_v37  ;;  %3741 = vmatpush.bf16.msra.mxu2 %v10709_v0  ;;  %v10569_v3 = vor.u32 %v13643_v51, %v10566_v34  ;;  %v13835_v0 = vld [vmem:[#allocation10 + $0xba4] sm:$0xf] }
 0x181   :  { %3716 = vmatpush.bf16.msra.mxu0 %v9893_v35  ;;  %v10518_v35 = vld [vmem:[#allocation10 + $0x570] sm:$0xf0] }
 0x186   :  { %v1297_v37 = vld [vmem:[#allocation1 + $0x5] ss:$9 sm:$0xff] }
 0x187   :  { %1302 = vst [vmem:[#allocation1] sm:$0xff] %v15365_v62 }
 0x188   :  { %1303 = vst [vmem:[#allocation1 + $0x9] sm:$0xff] %v15482_v25 }
 0x189   :  { %1304 = vst [vmem:[#allocation1 + $0x12] sm:$0xff] %v15454_v41 }
 0x18a   :  { %1305 = vst [vmem:[#allocation1 + $0x1b] sm:$0xff] %v15463_v47 }
 0x18b   :  { %1300 = vst.msk [vmem:[#allocation3 + $0x2] ss:$8 sm:$0xf] %vm15678_vm8, %v1297_v37  ;;  %v11189_v37 = vor.u32 %v13805_v36, %v11188_v19  ;;  %v10660_v19 = vld [vmem:[#allocation10 + $0x660] sm:$0xf]  ;;  %v10277_v36 = vor.u32 %v13577_v20, %v10276_v42 }
 0x18c   :  { %v10661_v5 = vor.u32 %v13673_v14, %v10660_v19  ;;  %v13631_v42 = vld [vmem:[#allocation10 + $0x544] sm:$0xf]  ;;  %v10902_v14 = vld [vmem:[#allocation10 + $0x870] sm:$0xf0] }
 0x18d   :  { %3752 = vmatpush.bf16.msra.mxu3 %v11189_v37  ;;  %v14659_v37 = vld [vmem:[#allocation4 + $0x18] sm:$0xff]  ;;  %3729 = vmatpush.bf16.msrb.mxu1 %v10277_v36  ;;  %v13727_v20 = vld [vmem:[#allocation10 + $0x844] sm:$0xf]  ;;  %v10521_v19 = vor.u32 %v13631_v42, %v10518_v35  ;;  %v11142_v42 = vld [vmem:[#allocation10 + $0xa50] sm:$0xf0] }
 0x18e   :  { %9817 = vmatmul.msk.f32.gmra.mxu1 %vm368_vm0, %v14659_v37  ;;  %9813 = vmatmul.msk.f32.gmra.mxu0 %vm368_vm0, %v14659_v37  ;;  %v13823_v36 = vld [vmem:[#allocation10 + $0xb44] sm:$0xf]  ;;  %v10905_v11 = vor.u32 %v13727_v20, %v10902_v14  ;;  %v9942_v20 = vld [vmem:[#allocation10 + $0xf0] sm:$0xf0] }
 0x18f   :  { %9821 = vmatmul.msk.f32.gmra.mxu2 %vm368_vm0, %v14659_v37  ;;  %9825 = vmatmul.msk.f32.gmra.mxu3 %vm368_vm0, %v14659_v37  ;;  %v13523_v37 = vld [vmem:[#allocation10 + $0x1e4] sm:$0xf] }
 0x190   :  { %3742 = vmatpush.bf16.msra.mxu2 %v10661_v5  ;;  %v10086_v5 = vld [vmem:[#allocation10 + $0x210] sm:$0xf0]  ;;  %v13487_v35 = vld [vmem:[#allocation10 + $0xc4] sm:$0xf] }
 0x191   :  { %v1307_v2 = vld [vmem:[#allocation1 + $0x6] ss:$9 sm:$0xff]  ;;  %3753 = vmatpush.bf16.msra.mxu3 %v11141_v23  ;;  %3730 = vmatpush.bf16.msrb.mxu1 %v10229_v33  ;;  %v10089_v44 = vor.u32 %v13523_v37, %v10086_v5 }
 0x192   :  { %1312 = vst [vmem:[#allocation1] sm:$0xff] %v15293_v54  ;;  %v10996_v23 = vld [vmem:[#allocation10 + $0x900] sm:$0xf]  ;;  %v11238_v33 = vld [vmem:[#allocation10 + $0xb10] sm:$0xf0] }
 0x193   :  { %1313 = vst [vmem:[#allocation1 + $0x9] sm:$0xff] %v15466_v28  ;;  %v13583_v14 = vld [vmem:[#allocation10 + $0x3c4] sm:$0xf] }
 0x194   :  { %1314 = vst [vmem:[#allocation1 + $0x12] sm:$0xff] %v15395_v8  ;;  %3743 = vmatpush.bf16.msra.mxu2 %v10613_v43  ;;  %v13607_v43 = vld [vmem:[#allocation10 + $0x484] sm:$0xf] }
 0x195   :  { %1315 = vst [vmem:[#allocation1 + $0x1b] sm:$0xff] %v15409_v30  ;;  %3754 = vmatpush.bf16.msra.mxu3 %v11093_v31  ;;  %3775 = vmatpush.bf16.msra.mxu1 %v10569_v3  ;;  %v13535_v31 = vld [vmem:[#allocation10 + $0x244] sm:$0xf]  ;;  %v10806_v3 = vld [vmem:[#allocation10 + $0x7b0] sm:$0xf0] }
 0x196   :  { %1310 = vst.msk [vmem:[#allocation2 + $0x3] ss:$8 sm:$0xf] %vm15678_vm8, %v1307_v2  ;;  %v9844_v2 = vld [vmem:[#allocation10] sm:$0xf] }
 0x197   :  { %v9845_v7 = vor.u32 %v13469_v48, %v9844_v2  ;;  %v11289_v2 = vor.u32 %v13823_v36, %v11286_v58  ;;  %v13619_v48 = vld [vmem:[#allocation10 + $0x4e4] sm:$0xf]  ;;  %v10326_v36 = vld [vmem:[#allocation10 + $0x3f0] sm:$0xf0] }
 0x198   :  { %v10473_v4 = vor.u32 %v13619_v48, %v10470_v60  ;;  %v13679_v58 = vld [vmem:[#allocation10 + $0x6c4] sm:$0xf]  ;;  %v10710_v48 = vld [vmem:[#allocation10 + $0x6f0] sm:$0xf0] }
 0x199   :  { %3755 = vmatpush.bf16.msra.mxu3 %v11045_v18  ;;  %3717 = vmatpush.bf16.msra.mxu0 %v9845_v7  ;;  %v10854_v18 = vld [vmem:[#allocation10 + $0x810] sm:$0xf0]  ;;  %v13811_v7 = vld [vmem:[#allocation10 + $0xae4] sm:$0xf] }
 0x19a   :  { %3776 = vmatpush.bf16.msra.mxu1 %v10521_v19  ;;  %v11241_v45 = vor.u32 %v13811_v7, %v11238_v33  ;;  %v1376_v37 = vld [vmem:[#allocation2 + $0x30] sm:$0xff]  ;;  %v11094_v60 = vld [vmem:[#allocation10 + $0x9f0] sm:$0xf0] }
 0x19b   :  { %v13475_v7 = vld [vmem:[#allocation10 + $0x64] sm:$0xf]  ;;  %v9894_v33 = vld [vmem:[#allocation10 + $0x90] sm:$0xf0] }
 0x19c   :  { %v1317_v49 = vld [vmem:[#allocation1 + $0x6] ss:$9 sm:$0xff] }
 0x19d   :  { %1322 = vst [vmem:[#allocation1] sm:$0xff] %v15365_v62  ;;  %v10997_v62 = vor.u32 %v13757_v56, %v10996_v23  ;;  %3762 = vmatpush.bf16.msrb.mxu0 %v10185_v50  ;;  %v13511_v56 = vld [vmem:[#allocation10 + $0x184] sm:$0xf]  ;;  %v10422_v50 = vld [vmem:[#allocation10 + $0x4b0] sm:$0xf0] }
 0x19e   :  { %1323 = vst [vmem:[#allocation1 + $0x9] sm:$0xff] %v15482_v25  ;;  %v10953_v25 = vor.u32 %v13739_v22, %v10950_v52  ;;  %3777 = vmatpush.bf16.msra.mxu1 %v10473_v4  ;;  %v10041_v51 = vor.u32 %v13511_v56, %v10038_v13  ;;  %v10425_v34 = vor.u32 %v13607_v43, %v10422_v50  ;;  %v11190_v22 = vld [vmem:[#allocation10 + $0xab0] sm:$0xf0]  ;;  %v13499_v52 = vld [vmem:[#allocation10 + $0x124] sm:$0xf]  ;;  %v1379_v50 = vld [vmem:[#allocation2 + $0x48] sm:$0xff] }
 0x19f   :  { %1324 = vst [vmem:[#allocation1 + $0x12] sm:$0xff] %v15454_v41  ;;  %v11334_v41 = vld [vmem:[#allocation10 + $0xbd0] sm:$0xf0]  ;;  %3756 = vmatpush.bf16.msra.mxu3 %v10997_v62  ;;  %v13703_v62 = vld [vmem:[#allocation10 + $0x784] sm:$0xf]  ;;  %v10329_v4 = vor.u32 %v13583_v14, %v10326_v36 }
 0x1a0   :  { %1325 = vst [vmem:[#allocation1 + $0x1b] sm:$0xff] %v15463_v47  ;;  %v11337_v15 = vor.u32 %v13835_v0, %v11334_v41  ;;  %v10137_v47 = vor.u32 %v13535_v31, %v10134_v26  ;;  %3788 = vmatpush.bf16.msrb.mxu2 %v10953_v25  ;;  %v9990_v0 = vld [vmem:[#allocation10 + $0x150] sm:$0xf0]  ;;  %v13559_v36 = vld [vmem:[#allocation10 + $0x304] sm:$0xf] }
 0x1a1   :  { %1320 = vst.msk [vmem:[#allocation3 + $0x3] ss:$8 sm:$0xf] %vm15678_vm8, %v1317_v49  ;;  %v13715_v49 = vld [vmem:[#allocation10 + $0x7e4] sm:$0xf]  ;;  %v9993_v31 = vor.u32 %v13499_v52, %v9990_v0  ;;  %v1378_v43 = vld [vmem:[#allocation2 + $0x40] sm:$0xff] }
 0x1a2   :  { %3763 = vmatpush.bf16.msrb.mxu0 %v10137_v47  ;;  %v10857_v23 = vor.u32 %v13715_v49, %v10854_v18  ;;  %v10374_v41 = vld [vmem:[#allocation10 + $0x450] sm:$0xf0]  ;;  %3778 = vmatpush.bf16.msra.mxu1 %v10425_v34  ;;  %v15829_v18 = vld [vmem:[#allocation2 + $0x38] sm:$0xff]  ;;  %v1380_v52 = vld [vmem:[#allocation2 + $0x50] sm:$0xff] }
 0x1a3   :  { %3801 = vmatpush.bf16.msrb.mxu3 %v11337_v15  ;;  %v13691_v15 = vld [vmem:[#allocation10 + $0x724] sm:$0xf]  ;;  %v10758_v47 = vld [vmem:[#allocation10 + $0x750] sm:$0xf0] }
 0x1a4   :  { %3789 = vmatpush.bf16.msrb.mxu2 %v10905_v11  ;;  %v10761_v19 = vor.u32 %v13691_v15, %v10758_v47  ;;  %v1374_v11 = vld [vmem:[#allocation2 + $0x20] sm:$0xff] }
 0x1a6   :  { %3764 = vmatpush.bf16.msrb.mxu0 %v10089_v44  ;;  %v13775_v44 = vld [vmem:[#allocation10 + $0x9c4] sm:$0xf] }
 0x1a7   :  { %v1327_v32 = vld [vmem:[#allocation1 + $0x7] ss:$9 sm:$0xff]  ;;  %3802 = vmatpush.bf16.msrb.mxu3 %v11289_v2 }
 0x1a8   :  { %1332 = vst [vmem:[#allocation1] sm:$0xff] %v15293_v54  ;;  %v13799_v54 = vld [vmem:[#allocation10 + $0xa84] sm:$0xf]  ;;  %3790 = vmatpush.bf16.msrb.mxu2 %v10857_v23  ;;  %v1375_v2 = vld [vmem:[#allocation2 + $0x28] sm:$0xff] }
 0x1a9   :  { %1333 = vst [vmem:[#allocation1 + $0x9] sm:$0xff] %v15466_v28  ;;  %v10809_v28 = vor.u32 %v13703_v62, %v10806_v3  ;;  %v11193_v25 = vor.u32 %v13799_v54, %v11190_v22  ;;  %v11097_v54 = vor.u32 %v13775_v44, %v11094_v60  ;;  %v13571_v22 = vld [vmem:[#allocation10 + $0x364] sm:$0xf] }
 0x1aa   :  { %1334 = vst [vmem:[#allocation1 + $0x12] sm:$0xff] %v15395_v8  ;;  %v13595_v8 = vld [vmem:[#allocation10 + $0x424] sm:$0xf]  ;;  %3765 = vmatpush.bf16.msrb.mxu0 %v10041_v51 }
 0x1ab   :  { %1335 = vst [vmem:[#allocation1 + $0x1b] sm:$0xff] %v15409_v30  ;;  %3803 = vmatpush.bf16.msrb.mxu3 %v11241_v45  ;;  %v10377_v26 = vor.u32 %v13595_v8, %v10374_v41  ;;  %v13787_v30 = vld [vmem:[#allocation10 + $0xa24] sm:$0xf]  ;;  %v10713_v45 = vor.u32 %v13679_v58, %v10710_v48  ;;  %v9897_v8 = vor.u32 %v13475_v7, %v9894_v33  ;;  %v10230_v58 = vld [vmem:[#allocation10 + $0x330] sm:$0xf0] }
 0x1ac   :  { %1330 = vst.msk [vmem:[#allocation2 + $0x4] ss:$8 sm:$0xf] %vm15678_vm8, %v1327_v32  ;;  %3791 = vmatpush.bf16.msrb.mxu2 %v10809_v28  ;;  %v11145_v5 = vor.u32 %v13787_v30, %v11142_v42  ;;  %v9945_v32 = vor.u32 %v13487_v35, %v9942_v20  ;;  %v10278_v28 = vld [vmem:[#allocation10 + $0x390] sm:$0xf0] }
 0x1ad   :  { %3779 = vmatpush.bf16.msra.mxu1 %v10377_v26  ;;  %v13667_v41 = vld [vmem:[#allocation10 + $0x664] sm:$0xf]  ;;  %v10281_v30 = vor.u32 %v13571_v22, %v10278_v28  ;;  %v11046_v42 = vld [vmem:[#allocation10 + $0x990] sm:$0xf0]  ;;  %v10956_v22 = vld [vmem:[#allocation10 + $0x8a8] sm:$0xf] }
 0x1ae   :  { %3766 = vmatpush.bf16.msrb.mxu0 %v9993_v31  ;;  %v10662_v31 = vld [vmem:[#allocation10 + $0x690] sm:$0xf0]  ;;  %v13763_v26 = vld [vmem:[#allocation10 + $0x964] sm:$0xf]  ;;  %v13746_v28 = vld [vmem:[#allocation10 + $0x8d4] sm:$0xf0] }
 0x1af   :  { %3804 = vmatpush.bf16.msrb.mxu3 %v11193_v25  ;;  %v1381_v25 = vld [vmem:[#allocation2 + $0x58] sm:$0xff]  ;;  %v13463_v35 = vld [vmem:[#allocation10 + $0x4] sm:$0xf]  ;;  %v9846_v20 = vld [vmem:[#allocation10 + $0x30] sm:$0xf0]  ;;  %v10665_v60 = vor.u32 %v13667_v41, %v10662_v31  ;;  %v11049_v33 = vor.u32 %v13763_v26, %v11046_v42 }
 0x1b0   :  { %3792 = vmatpush.bf16.msrb.mxu2 %v10761_v19  ;;  %v13655_v48 = vld [vmem:[#allocation10 + $0x604] sm:$0xf]  ;;  %v10998_v7 = vld [vmem:[#allocation10 + $0x930] sm:$0xf0]  ;;  %v13542_v41 = vld [vmem:[#allocation10 + $0x274] sm:$0xf0] }
 0x1b1   :  { %3780 = vmatpush.bf16.msra.mxu1 %v10329_v4  ;;  %v10524_v31 = vld [vmem:[#allocation10 + $0x548] sm:$0xf]  ;;  %v13638_v26 = vld [vmem:[#allocation10 + $0x574] sm:$0xf0] }
 0x1b2   :  { %v1337_v49 = vld [vmem:[#allocation1 + $0x7] ss:$9 sm:$0xff]  ;;  %3767 = vmatpush.bf16.msrb.mxu0 %v9945_v32 }
 0x1b3   :  { %v1370_v23 = vld [vmem:[#allocation2] sm:$0xff]  ;;  %v1371_v56 = vld [vmem:[#allocation2 + $0x8] sm:$0xff]  ;;  %v1372_v13 = vld [vmem:[#allocation2 + $0x10] sm:$0xff]  ;;  %1340 = vst.msk [vmem:[#allocation3 + $0x4] ss:$8 sm:$0xf] %vm15678_vm8, %v1337_v49  ;;  %3805 = vmatpush.bf16.msrb.mxu3 %v11145_v5 }
 0x1b4   :  { %v1373_v51 = vld [vmem:[#allocation2 + $0x18] sm:$0xff]  ;;  %v1394_v34 = vadd.f32 %v1374_v11, %v1370_v23  ;;  %v1395_v62 = vadd.f32 %v1375_v2, %v1371_v56  ;;  %v1396_v3 = vadd.f32 %v1376_v37, %v1372_v13  ;;  %v15834_v15 = vpack.c.bf16 %v1374_v11, %v1370_v23  ;;  %3793 = vmatpush.bf16.msrb.mxu2 %v10713_v45  ;;  %v10614_v49 = vld [vmem:[#allocation10 + $0x630] sm:$0xf0]  ;;  %v13751_v11 = vld [vmem:[#allocation10 + $0x904] sm:$0xf] }
 0x1b5   :  { %v1397_v0 = vadd.f32 %v15829_v18, %v1373_v51  ;;  %v15836_v47 = vpack.c.bf16 %v1375_v2, %v1371_v56  ;;  %v15842_v4 = vpack.c.bf16 %v1376_v37, %v1372_v13  ;;  %3781 = vmatpush.bf16.msra.mxu1 %v10281_v30  ;;  %v9849_v45 = vor.u32 %v13463_v35, %v9846_v20  ;;  %v10908_v42 = vld [vmem:[#allocation10 + $0x848] sm:$0xf]  ;;  %v13734_v35 = vld [vmem:[#allocation10 + $0x874] sm:$0xf0] }
 0x1b6   :  { %v1398_v19 = vadd.f32 %v1394_v34, %v1378_v43  ;;  %v1399_v14 = vadd.f32 %v1395_v62, %v1379_v50  ;;  %v1400_v5 = vadd.f32 %v1396_v3, %v1380_v52  ;;  %v10188_v43 = vld [vmem:[#allocation10 + $0x2a8] sm:$0xf]  ;;  %v13554_v50 = vld [vmem:[#allocation10 + $0x2d4] sm:$0xf0]  ;;  %3768 = vmatpush.bf16.msrb.mxu0 %v9897_v8  ;;  %v10233_v62 = vor.u32 %v13559_v36, %v10230_v58 }
 0x1b7   :  { %v1401_v44 = vadd.f32 %v1397_v0, %v1381_v25  ;;  %3806 = vmatpush.bf16.msrb.mxu3 %v11097_v54  ;;  %v10572_v34 = vld [vmem:[#allocation10 + $0x5a8] sm:$0xf]  ;;  %v13650_v3 = vld [vmem:[#allocation10 + $0x5d4] sm:$0xf0]  ;;  %v15849_v52 = vpack.c.bf16 %v15829_v18, %v1373_v51  ;;  %v10189_v37 = vor.u32 %v13554_v50, %v10188_v43  ;;  %v10617_v8 = vor.u32 %v13655_v48, %v10614_v49 }
 0x1b8   :  { %v15838_v2 = vpack.c.bf16 %v1398_v19, %v1398_v19  ;;  %v15840_v32 = vpack.c.bf16 %v1399_v14, %v1399_v14  ;;  %v15844_v23 = vpack.c.bf16 %v1400_v5, %v1400_v5  ;;  %v10573_v13 = vor.u32 %v13650_v3, %v10572_v34  ;;  %v11340_v54 = vld [vmem:[#allocation10 + $0xba8] sm:$0xf]  ;;  %v13842_v25 = vld [vmem:[#allocation10 + $0xbd4] sm:$0xf0]  ;;  %3794 = vmatpush.bf16.msrb.mxu2 %v10665_v60 }
 0x1b9   :  { %v15846_v56 = vpack.c.bf16 %v1401_v44, %v1401_v44  ;;  %v10140_v0 = vld [vmem:[#allocation10 + $0x248] sm:$0xf]  ;;  %v11001_v30 = vor.u32 %v13751_v11, %v10998_v7  ;;  %v10957_v18 = vor.u32 %v13746_v28, %v10956_v22  ;;  %3782 = vmatpush.bf16.msra.mxu1 %v10233_v62  ;;  %v11341_v51 = vor.u32 %v13842_v25, %v11340_v54  ;;  %v13830_v36 = vld [vmem:[#allocation10 + $0xb74] sm:$0xf0] }
 0x1ba   :  { %3718 = vmatmul.bf16.vlgmr.msra.gmra.mxu0 %v15838_v2  ;;  %3731 = vmatmul.bf16.vlgmr.msrb.gmra.mxu1 %v15840_v32  ;;  %v10141_v20 = vor.u32 %v13542_v41, %v10140_v0  ;;  %v10525_v19 = vor.u32 %v13638_v26, %v10524_v31  ;;  %v11292_v14 = vld [vmem:[#allocation10 + $0xb48] sm:$0xf]  ;;  %v13530_v48 = vld [vmem:[#allocation10 + $0x214] sm:$0xf0]  ;;  %v10909_v60 = vor.u32 %v13734_v35, %v10908_v42 }
 0x1bb   :  { %3757 = vmatmul.bf16.vlgmr.msra.gmra.mxu3 %v15846_v56  ;;  %3744 = vmatmul.bf16.vlgmr.msra.gmra.mxu2 %v15844_v23  ;;  %v10092_v58 = vld [vmem:[#allocation10 + $0x1e8] sm:$0xf]  ;;  %v13626_v44 = vld [vmem:[#allocation10 + $0x514] sm:$0xf0]  ;;  %v11293_v49 = vor.u32 %v13830_v36, %v11292_v14 }
 0x1bc   :  { %3807 = vmatpush.bf16.msrb.mxu3 %v11049_v33  ;;  %3769 = vmatpush.bf16.msrb.mxu0 %v9849_v45  ;;  %v10476_v5 = vld [vmem:[#allocation10 + $0x4e8] sm:$0xf]  ;;  %v13722_v7 = vld [vmem:[#allocation10 + $0x814] sm:$0xf0]  ;;  %v10093_v33 = vor.u32 %v13530_v48, %v10092_v58 }
 0x1bd   :  { %3827 = vmatpush.bf16.msrb.mxu1 %v10573_v13  ;;  %3795 = vmatpush.bf16.msrb.mxu2 %v10617_v8  ;;  %v10860_v11 = vld [vmem:[#allocation10 + $0x7e8] sm:$0xf]  ;;  %v10477_v43 = vor.u32 %v13626_v44, %v10476_v5  ;;  %v13818_v34 = vld [vmem:[#allocation10 + $0xb14] sm:$0xf0] }
 0x1be   :  { %v11244_v50 = vld [vmem:[#allocation10 + $0xae8] sm:$0xf]  ;;  %v13518_v62 = vld [vmem:[#allocation10 + $0x1b4] sm:$0xf0]  ;;  %v10861_v28 = vor.u32 %v13722_v7, %v10860_v11 }
 0x1bf   :  { %v10044_v45 = vld [vmem:[#allocation10 + $0x188] sm:$0xf]  ;;  %v13614_v22 = vld [vmem:[#allocation10 + $0x4b4] sm:$0xf0] }
 0x1c0   :  { %3814 = vmatpush.bf16.msra.mxu0 %v10189_v37  ;;  %3808 = vmatpush.bf16.msrb.mxu3 %v11001_v30  ;;  %v10428_v3 = vld [vmem:[#allocation10 + $0x488] sm:$0xf]  ;;  %v11245_v37 = vor.u32 %v13818_v34, %v11244_v50  ;;  %v13710_v54 = vld [vmem:[#allocation10 + $0x7b4] sm:$0xf0]  ;;  %v10045_v25 = vor.u32 %v13518_v62, %v10044_v45 }
 0x1c1   :  { %3840 = vmatpush.bf16.msra.mxu2 %v10957_v18  ;;  %3828 = vmatpush.bf16.msrb.mxu1 %v10525_v19  ;;  %v10812_v13 = vld [vmem:[#allocation10 + $0x788] sm:$0xf]  ;;  %v10429_v0 = vor.u32 %v13614_v22, %v10428_v3  ;;  %v13806_v41 = vld [vmem:[#allocation10 + $0xab4] sm:$0xf0] }
 0x1c2   :  { %v11196_v8 = vld [vmem:[#allocation10 + $0xa88] sm:$0xf]  ;;  %v13506_v26 = vld [vmem:[#allocation10 + $0x154] sm:$0xf0] }
 0x1c3   :  { %v9996_v31 = vld [vmem:[#allocation10 + $0x128] sm:$0xf]  ;;  %v13602_v18 = vld [vmem:[#allocation10 + $0x454] sm:$0xf0]  ;;  %v11197_v42 = vor.u32 %v13806_v41, %v11196_v8 }
 0x1c4   :  { %3853 = vmatpush.bf16.msra.mxu3 %v11341_v51  ;;  %3815 = vmatpush.bf16.msra.mxu0 %v10141_v20  ;;  %v10380_v30 = vld [vmem:[#allocation10 + $0x428] sm:$0xf]  ;;  %v10813_v51 = vor.u32 %v13710_v54, %v10812_v13  ;;  %v13698_v20 = vld [vmem:[#allocation10 + $0x754] sm:$0xf0]  ;;  %v9997_v19 = vor.u32 %v13506_v26, %v9996_v31 }
 0x1c5   :  { %3841 = vmatpush.bf16.msra.mxu2 %v10909_v60  ;;  %3829 = vmatpush.bf16.msrb.mxu1 %v10477_v43  ;;  %v10764_v35 = vld [vmem:[#allocation10 + $0x728] sm:$0xf]  ;;  %v10381_v14 = vor.u32 %v13602_v18, %v10380_v30  ;;  %v13794_v58 = vld [vmem:[#allocation10 + $0xa54] sm:$0xf0] }
 0x1c6   :  { %v11148_v36 = vld [vmem:[#allocation10 + $0xa28] sm:$0xf]  ;;  %v13494_v5 = vld [vmem:[#allocation10 + $0xf4] sm:$0xf0] }
 0x1c7   :  { %v9948_v48 = vld [vmem:[#allocation10 + $0xc8] sm:$0xf]  ;;  %v13590_v60 = vld [vmem:[#allocation10 + $0x3f4] sm:$0xf0]  ;;  %v11149_v11 = vor.u32 %v13794_v58, %v11148_v36 }
 0x1c8   :  { %3854 = vmatpush.bf16.msra.mxu3 %v11293_v49  ;;  %3816 = vmatpush.bf16.msra.mxu0 %v10093_v33  ;;  %v10332_v44 = vld [vmem:[#allocation10 + $0x3c8] sm:$0xf]  ;;  %v10765_v49 = vor.u32 %v13698_v20, %v10764_v35  ;;  %v13686_v33 = vld [vmem:[#allocation10 + $0x6f4] sm:$0xf0]  ;;  %v9949_v43 = vor.u32 %v13494_v5, %v9948_v48  ;;  %v10190_v20 = vld [vmem:[#allocation10 + $0x2d8] sm:$0xf0] }
 0x1c9   :  { %3842 = vmatpush.bf16.msra.mxu2 %v10861_v28  ;;  %3830 = vmatpush.bf16.msrb.mxu1 %v10429_v0  ;;  %v10716_v7 = vld [vmem:[#allocation10 + $0x6c8] sm:$0xf]  ;;  %v10333_v50 = vor.u32 %v13590_v60, %v10332_v44  ;;  %v13782_v45 = vld [vmem:[#allocation10 + $0x9f4] sm:$0xf0] }
 0x1ca   :  { %3770 = vmatmul.bf16.vlgmr.msrb.gmra.mxu0 %v15838_v2  ;;  %3783 = vmatmul.bf16.vlgmr.msra.gmra.mxu1 %v15840_v32  ;;  %v11100_v34 = vld [vmem:[#allocation10 + $0x9c8] sm:$0xf]  ;;  %v13482_v3 = vld [vmem:[#allocation10 + $0x94] sm:$0xf0] }
 0x1cb   :  { %3809 = vmatmul.bf16.vlgmr.msrb.gmra.mxu3 %v15846_v56  ;;  %3796 = vmatmul.bf16.vlgmr.msrb.gmra.mxu2 %v15844_v23  ;;  %v9900_v62 = vld [vmem:[#allocation10 + $0x68] sm:$0xf]  ;;  %v13578_v28 = vld [vmem:[#allocation10 + $0x394] sm:$0xf0]  ;;  %v11101_v13 = vor.u32 %v13782_v45, %v11100_v34  ;;  %v11342_v34 = vld [vmem:[#allocation10 + $0xbd8] sm:$0xf0] }
 0x1cc   :  { %3855 = vmatpush.bf16.msra.mxu3 %v11245_v37  ;;  %3817 = vmatpush.bf16.msra.mxu0 %v10045_v25  ;;  %v10284_v22 = vld [vmem:[#allocation10 + $0x368] sm:$0xf]  ;;  %v10717_v37 = vor.u32 %v13686_v33, %v10716_v7  ;;  %v13674_v25 = vld [vmem:[#allocation10 + $0x694] sm:$0xf0]  ;;  %v9901_v8 = vor.u32 %v13482_v3, %v9900_v62  ;;  %v10958_v7 = vld [vmem:[#allocation10 + $0x8d8] sm:$0xf0] }
 0x1cd   :  { %3843 = vmatpush.bf16.msra.mxu2 %v10813_v51  ;;  %3831 = vmatpush.bf16.msrb.mxu1 %v10381_v14  ;;  %v10668_v54 = vld [vmem:[#allocation10 + $0x668] sm:$0xf]  ;;  %v10285_v41 = vor.u32 %v13578_v28, %v10284_v22  ;;  %v13770_v31 = vld [vmem:[#allocation10 + $0x994] sm:$0xf0]  ;;  %v10574_v14 = vld [vmem:[#allocation10 + $0x5d8] sm:$0xf0] }
 0x1ce   :  { %v11052_v0 = vld [vmem:[#allocation10 + $0x968] sm:$0xf]  ;;  %v13470_v30 = vld [vmem:[#allocation10 + $0x34] sm:$0xf0]  ;;  %v10669_v35 = vor.u32 %v13674_v25, %v10668_v54  ;;  %v13536_v22 = vld [vmem:[#allocation10 + $0x24c] sm:$0xf] }
 0x1cf   :  { %v9852_v26 = vld [vmem:[#allocation10 + $0x8] sm:$0xf]  ;;  %v13566_v51 = vld [vmem:[#allocation10 + $0x334] sm:$0xf0]  ;;  %v11053_v36 = vor.u32 %v13770_v31, %v11052_v0  ;;  %v10142_v28 = vld [vmem:[#allocation10 + $0x278] sm:$0xf0] }
 0x1d0   :  { %3856 = vmatpush.bf16.msra.mxu3 %v11197_v42  ;;  %3818 = vmatpush.bf16.msra.mxu0 %v9997_v19  ;;  %v10236_v18 = vld [vmem:[#allocation10 + $0x308] sm:$0xf]  ;;  %v13548_v42 = vld [vmem:[#allocation10 + $0x2ac] sm:$0xf]  ;;  %v13662_v48 = vld [vmem:[#allocation10 + $0x634] sm:$0xf0]  ;;  %v9853_v44 = vor.u32 %v13470_v30, %v9852_v26  ;;  %v10145_v31 = vor.u32 %v13536_v22, %v10142_v28 }
 0x1d1   :  { %3844 = vmatpush.bf16.msra.mxu2 %v10765_v49  ;;  %3832 = vmatpush.bf16.msrb.mxu1 %v10333_v50  ;;  %v13644_v19 = vld [vmem:[#allocation10 + $0x5ac] sm:$0xf]  ;;  %v10620_v58 = vld [vmem:[#allocation10 + $0x608] sm:$0xf]  ;;  %v10237_v60 = vor.u32 %v13566_v51, %v10236_v18  ;;  %v13758_v49 = vld [vmem:[#allocation10 + $0x934] sm:$0xf0]  ;;  %v10193_v33 = vor.u32 %v13548_v42, %v10190_v20 }
 0x1d2   :  { %v11004_v5 = vld [vmem:[#allocation10 + $0x908] sm:$0xf]  ;;  %v13836_v50 = vld [vmem:[#allocation10 + $0xbac] sm:$0xf]  ;;  %v10621_v45 = vor.u32 %v13662_v48, %v10620_v58  ;;  %v10526_v54 = vld [vmem:[#allocation10 + $0x578] sm:$0xf0] }
 0x1d3   :  { %v11005_v62 = vor.u32 %v13758_v49, %v11004_v5  ;;  %v13728_v25 = vld [vmem:[#allocation10 + $0x84c] sm:$0xf]  ;;  %v10910_v0 = vld [vmem:[#allocation10 + $0x878] sm:$0xf0] }
 0x1d4   :  { %3857 = vmatpush.bf16.msra.mxu3 %v11149_v11  ;;  %3819 = vmatpush.bf16.msra.mxu0 %v9949_v43  ;;  %v13740_v11 = vld [vmem:[#allocation10 + $0x8ac] sm:$0xf]  ;;  %v10577_v43 = vor.u32 %v13644_v19, %v10574_v14  ;;  %v10913_v30 = vor.u32 %v13728_v25, %v10910_v0  ;;  %v10094_v51 = vld [vmem:[#allocation10 + $0x218] sm:$0xf0] }
 0x1d5   :  { %3845 = vmatpush.bf16.msra.mxu2 %v10717_v37  ;;  %3833 = vmatpush.bf16.msrb.mxu1 %v10285_v41  ;;  %v10961_v3 = vor.u32 %v13740_v11, %v10958_v7  ;;  %v13632_v37 = vld [vmem:[#allocation10 + $0x54c] sm:$0xf]  ;;  %v11294_v41 = vld [vmem:[#allocation10 + $0xb78] sm:$0xf0] }
 0x1d6   :  { %v10529_v26 = vor.u32 %v13632_v37, %v10526_v54  ;;  %v13524_v18 = vld [vmem:[#allocation10 + $0x1ec] sm:$0xf]  ;;  %v10478_v20 = vld [vmem:[#allocation10 + $0x518] sm:$0xf0] }
 0x1d7   :  { %v13620_v42 = vld [vmem:[#allocation10 + $0x4ec] sm:$0xf]  ;;  %v10862_v14 = vld [vmem:[#allocation10 + $0x818] sm:$0xf0]  ;;  %v10097_v48 = vor.u32 %v13524_v18, %v10094_v51 }
 0x1d8   :  { %3858 = vmatpush.bf16.msra.mxu3 %v11101_v13  ;;  %3820 = vmatpush.bf16.msra.mxu0 %v9901_v8  ;;  %v11345_v13 = vor.u32 %v13836_v50, %v11342_v34  ;;  %v13824_v8 = vld [vmem:[#allocation10 + $0xb4c] sm:$0xf]  ;;  %v11246_v58 = vld [vmem:[#allocation10 + $0xb18] sm:$0xf0]  ;;  %v10481_v5 = vor.u32 %v13620_v42, %v10478_v20 }
 0x1d9   :  { %3846 = vmatpush.bf16.msra.mxu2 %v10669_v35  ;;  %3834 = vmatpush.bf16.msrb.mxu1 %v10237_v60  ;;  %v11297_v35 = vor.u32 %v13824_v8, %v11294_v41  ;;  %v13716_v19 = vld [vmem:[#allocation10 + $0x7ec] sm:$0xf]  ;;  %v10046_v49 = vld [vmem:[#allocation10 + $0x1b8] sm:$0xf0] }
 0x1da   :  { %v13512_v60 = vld [vmem:[#allocation10 + $0x18c] sm:$0xf]  ;;  %v10814_v50 = vld [vmem:[#allocation10 + $0x7b8] sm:$0xf0] }
 0x1db   :  { %v13608_v11 = vld [vmem:[#allocation10 + $0x48c] sm:$0xf]  ;;  %v9998_v37 = vld [vmem:[#allocation10 + $0x158] sm:$0xf0] }
 0x1dc   :  { %3859 = vmatpush.bf16.msra.mxu3 %v11053_v36  ;;  %3821 = vmatpush.bf16.msra.mxu0 %v9853_v44  ;;  %v13812_v36 = vld [vmem:[#allocation10 + $0xaec] sm:$0xf]  ;;  %v10865_v44 = vor.u32 %v13716_v19, %v10862_v14  ;;  %v10382_v25 = vld [vmem:[#allocation10 + $0x458] sm:$0xf0] }
 0x1dd   :  { %3879 = vmatpush.bf16.msra.mxu1 %v10577_v43  ;;  %3847 = vmatpush.bf16.msra.mxu2 %v10621_v45  ;;  %v11249_v7 = vor.u32 %v13812_v36, %v11246_v58  ;;  %v13704_v43 = vld [vmem:[#allocation10 + $0x78c] sm:$0xf]  ;;  %v11198_v45 = vld [vmem:[#allocation10 + $0xab8] sm:$0xf0] }
 0x1de   :  { %3835 = vmatmul.bf16.vlgmr.msrb.gmra.mxu1 %v15840_v32  ;;  %v13800_v34 = vld [vmem:[#allocation10 + $0xa8c] sm:$0xf]  ;;  %v10817_v22 = vor.u32 %v13704_v43, %v10814_v50  ;;  %v10766_v8 = vld [vmem:[#allocation10 + $0x758] sm:$0xf0] }
 0x1df   :  { %3822 = vmatmul.bf16.vlgmr.msra.gmra.mxu0 %v15838_v2  ;;  %v13500_v28 = vld [vmem:[#allocation10 + $0x12c] sm:$0xf]  ;;  %v11201_v54 = vor.u32 %v13800_v34, %v11198_v45  ;;  %v9950_v42 = vld [vmem:[#allocation10 + $0xf8] sm:$0xf0] }
 0x1e0   :  { %3866 = vmatpush.bf16.msrb.mxu0 %v10193_v33  ;;  %3860 = vmatpush.bf16.msra.mxu3 %v11005_v62  ;;  %v10430_v33 = vld [vmem:[#allocation10 + $0x4b8] sm:$0xf0]  ;;  %v10049_v62 = vor.u32 %v13512_v60, %v10046_v49  ;;  %v13692_v0 = vld [vmem:[#allocation10 + $0x72c] sm:$0xf]  ;;  %v15865_v60 = vpop.f32.mrf.mxu1 }
 0x1e1   :  { %3892 = vmatpush.bf16.msrb.mxu2 %v10961_v3  ;;  %3880 = vmatpush.bf16.msra.mxu1 %v10529_v26  ;;  %v10433_v3 = vor.u32 %v13608_v11, %v10430_v33  ;;  %v13788_v41 = vld [vmem:[#allocation10 + $0xa2c] sm:$0xf]  ;;  %v10001_v26 = vor.u32 %v13500_v28, %v9998_v37  ;;  %v10769_v18 = vor.u32 %v13692_v0, %v10766_v8  ;;  %v10334_v19 = vld [vmem:[#allocation10 + $0x3f8] sm:$0xf0] }
 0x1e2   :  { %3848 = vmatmul.bf16.vlgmr.msra.gmra.mxu2 %v15844_v23  ;;  %v13488_v51 = vld [vmem:[#allocation10 + $0xcc] sm:$0xf]  ;;  %v10718_v36 = vld [vmem:[#allocation10 + $0x6f8] sm:$0xf0] }
 0x1e3   :  { %3861 = vmatmul.bf16.vlgmr.msra.gmra.mxu3 %v15846_v56  ;;  %v13680_v14 = vld [vmem:[#allocation10 + $0x6cc] sm:$0xf]  ;;  %v9902_v33 = vld [vmem:[#allocation10 + $0x98] sm:$0xf0] }
 0x1e4   :  { %3905 = vmatpush.bf16.msrb.mxu3 %v11345_v13  ;;  %3867 = vmatpush.bf16.msrb.mxu0 %v10145_v31  ;;  %v13596_v13 = vld [vmem:[#allocation10 + $0x42c] sm:$0xf]  ;;  %v11150_v31 = vld [vmem:[#allocation10 + $0xa58] sm:$0xf0]  ;;  %v10721_v11 = vor.u32 %v13680_v14, %v10718_v36  ;;  %v10964_v14 = vld [vmem:[#allocation10 + $0x8b0] sm:$0xf] }
 0x1e5   :  { %3893 = vmatpush.bf16.msrb.mxu2 %v10913_v30  ;;  %3881 = vmatpush.bf16.msra.mxu1 %v10481_v5  ;;  %v10385_v30 = vor.u32 %v13596_v13, %v10382_v25  ;;  %v11153_v20 = vor.u32 %v13788_v41, %v11150_v31  ;;  %v13776_v58 = vld [vmem:[#allocation10 + $0x9cc] sm:$0xf]  ;;  %v9953_v5 = vor.u32 %v13488_v51, %v9950_v42  ;;  %v10286_v34 = vld [vmem:[#allocation10 + $0x398] sm:$0xf0]  ;;  %v10196_v51 = vld [vmem:[#allocation10 + $0x2b0] sm:$0xf] }
 0x1e6   :  { %v13572_v43 = vld [vmem:[#allocation10 + $0x36c] sm:$0xf]  ;;  %v9854_v13 = vld [vmem:[#allocation10 + $0x38] sm:$0xf0]  ;;  %v13555_v42 = vld [vmem:[#allocation10 + $0x2dc] sm:$0xf0] }
 0x1e7   :  { %v13668_v45 = vld [vmem:[#allocation10 + $0x66c] sm:$0xf]  ;;  %v10238_v8 = vld [vmem:[#allocation10 + $0x338] sm:$0xf0]  ;;  %v13747_v36 = vld [vmem:[#allocation10 + $0x8dc] sm:$0xf0] }
 0x1e8   :  { %3906 = vmatpush.bf16.msrb.mxu3 %v11297_v35  ;;  %3868 = vmatpush.bf16.msrb.mxu0 %v10097_v48  ;;  %v13584_v35 = vld [vmem:[#allocation10 + $0x3cc] sm:$0xf]  ;;  %v11102_v48 = vld [vmem:[#allocation10 + $0x9f8] sm:$0xf0] }
 0x1e9   :  { %3894 = vmatpush.bf16.msrb.mxu2 %v10865_v44  ;;  %3882 = vmatpush.bf16.msra.mxu1 %v10433_v3  ;;  %v15863_v44 = vpop.f32.mrf.mxu0  ;;  %v10337_v49 = vor.u32 %v13584_v35, %v10334_v19  ;;  %v11105_v50 = vor.u32 %v13776_v58, %v11102_v48  ;;  %v13764_v3 = vld [vmem:[#allocation10 + $0x96c] sm:$0xf]  ;;  %v10580_v35 = vld [vmem:[#allocation10 + $0x5b0] sm:$0xf]  ;;  %v13651_v19 = vld [vmem:[#allocation10 + $0x5dc] sm:$0xf0]  ;;  %v15867_v58 = vpop.f32.mrf.mxu2 }
 0x1ea   :  { %v13464_v37 = vld [vmem:[#allocation10 + $0xc] sm:$0xf]  ;;  %v15869_v48 = vpop.f32.mrf.mxu3 }
 0x1eb   :  { %v13560_v0 = vld [vmem:[#allocation10 + $0x30c] sm:$0xf] }
 0x1ec   :  { %3907 = vmatpush.bf16.msrb.mxu3 %v11249_v7  ;;  %3869 = vmatpush.bf16.msrb.mxu0 %v10049_v62  ;;  %v13476_v7 = vld [vmem:[#allocation10 + $0x6c] sm:$0xf]  ;;  %v10670_v62 = vld [vmem:[#allocation10 + $0x698] sm:$0xf0] }
 0x1ed   :  { %3895 = vmatpush.bf16.msrb.mxu2 %v10817_v22  ;;  %3883 = vmatpush.bf16.msra.mxu1 %v10385_v30  ;;  %v11054_v22 = vld [vmem:[#allocation10 + $0x998] sm:$0xf0]  ;;  %v9905_v28 = vor.u32 %v13476_v7, %v9902_v33  ;;  %v10673_v25 = vor.u32 %v13668_v45, %v10670_v62  ;;  %v13656_v41 = vld [vmem:[#allocation10 + $0x60c] sm:$0xf]  ;;  %v13843_v7 = vld [vmem:[#allocation10 + $0xbdc] sm:$0xf0]  ;;  %v10581_v45 = vor.u32 %v13651_v19, %v10580_v35 }
 0x1ee   :  { %v11057_v31 = vor.u32 %v13764_v3, %v11054_v22  ;;  %v13752_v30 = vld [vmem:[#allocation10 + $0x90c] sm:$0xf]  ;;  %v10965_v62 = vor.u32 %v13747_v36, %v10964_v14  ;;  %v10148_v3 = vld [vmem:[#allocation10 + $0x250] sm:$0xf]  ;;  %v13543_v22 = vld [vmem:[#allocation10 + $0x27c] sm:$0xf0] }
 0x1ef   :  { %v13627_v35 = vld [vmem:[#allocation10 + $0x51c] sm:$0xf0] }
 0x1f0   :  { %3908 = vmatpush.bf16.msrb.mxu3 %v11201_v54  ;;  %3870 = vmatpush.bf16.msrb.mxu0 %v10001_v26  ;;  %v10289_v54 = vor.u32 %v13572_v43, %v10286_v34  ;;  %v10622_v26 = vld [vmem:[#allocation10 + $0x638] sm:$0xf0]  ;;  %v15873_v43 = vpop.f32.mrf.mxu1  ;;  %v10197_v34 = vor.u32 %v13555_v42, %v10196_v51  ;;  %v10484_v51 = vld [vmem:[#allocation10 + $0x4f0] sm:$0xf]  ;;  %v13723_v19 = vld [vmem:[#allocation10 + $0x81c] sm:$0xf0] }
 0x1f1   :  { %3896 = vmatpush.bf16.msrb.mxu2 %v10769_v18  ;;  %3884 = vmatpush.bf16.msra.mxu1 %v10337_v49  ;;  %v11006_v18 = vld [vmem:[#allocation10 + $0x938] sm:$0xf0]  ;;  %v10625_v49 = vor.u32 %v13656_v41, %v10622_v26  ;;  %v15871_v33 = vpop.f32.mrf.mxu0  ;;  %17039 = vst [vmem:[#allocation32_spill] sm:$0xff] %v15873_v43  ;;  %v10149_v41 = vor.u32 %v13543_v22, %v10148_v3  ;;  %v15876_v14 = vpop.f32.mrf.mxu2  ;;  %v10436_v3 = vld [vmem:[#allocation10 + $0x490] sm:$0xf] }
 0x1f2   :  { %17038 = vst [vmem:[#allocation31_spill] sm:$0xff] %v15871_v33  ;;  %v15878_v36 = vpop.f32.mrf.mxu3  ;;  %v13783_v33 = vld [vmem:[#allocation10 + $0x9fc] sm:$0xf0]  ;;  %v10918_v43 = vld [vmem:[#allocation10 + $0x880] sm:$0xf0] }
 0x1f3   :  { %17040 = vst [vmem:[#allocation33_spill] sm:$0xff] %v15876_v14  ;;  %v13633_v14 = vld [vmem:[#allocation10 + $0x554] sm:$0xf] }
 0x1f4   :  { %3909 = vmatpush.bf16.msrb.mxu3 %v11153_v20  ;;  %3871 = vmatpush.bf16.msrb.mxu0 %v9953_v5  ;;  %v9857_v20 = vor.u32 %v13464_v37, %v9854_v13  ;;  %v10241_v5 = vor.u32 %v13560_v0, %v10238_v8  ;;  %v13639_v13 = vld [vmem:[#allocation10 + $0x57c] sm:$0xf0]  ;;  %v11300_v0 = vld [vmem:[#allocation10 + $0xb50] sm:$0xf]  ;;  %17041 = vst [vmem:[#allocation34_spill] sm:$0xff] %v15878_v36 }
 0x1f5   :  { %3897 = vmatpush.bf16.msrb.mxu2 %v10721_v11  ;;  %3885 = vmatpush.bf16.msra.mxu1 %v10289_v54  ;;  %v11348_v11 = vld [vmem:[#allocation10 + $0xbb0] sm:$0xf]  ;;  %v13831_v8 = vld [vmem:[#allocation10 + $0xb7c] sm:$0xf0]  ;;  %v10150_v36 = vld [vmem:[#allocation10 + $0x280] sm:$0xf0] }
 0x1f6   :  { %v11349_v37 = vor.u32 %v13843_v7, %v11348_v11  ;;  %v10916_v54 = vld [vmem:[#allocation10 + $0x850] sm:$0xf]  ;;  %v11301_v42 = vor.u32 %v13831_v8, %v11300_v0  ;;  %v13807_v0 = vld [vmem:[#allocation10 + $0xabc] sm:$0xf0] }
 0x1f8   :  { %3910 = vmatpush.bf16.msrb.mxu3 %v11105_v50  ;;  %3872 = vmatpush.bf16.msrb.mxu0 %v9905_v28  ;;  %v11009_v50 = vor.u32 %v13752_v30, %v11006_v18  ;;  %v10532_v28 = vld [vmem:[#allocation10 + $0x550] sm:$0xf]  ;;  %v13531_v18 = vld [vmem:[#allocation10 + $0x21c] sm:$0xf0]  ;;  %v769_v7 = vpop.f32.mrf.mxu1 }
 0x1f9   :  { %3898 = vmatpush.bf16.msrb.mxu2 %v10673_v25  ;;  %v13735_v25 = vld [vmem:[#allocation10 + $0x87c] sm:$0xf0]  ;;  %3886 = vmatpush.bf16.msra.mxu1 %v10241_v5  ;;  %v10100_v30 = vld [vmem:[#allocation10 + $0x1f0] sm:$0xf]  ;;  %v742_v22 = vpop.f32.mrf.mxu0 }
 0x1fa   :  { %v10917_v26 = vor.u32 %v13735_v25, %v10916_v54  ;;  %v11252_v5 = vld [vmem:[#allocation10 + $0xaf0] sm:$0xf]  ;;  %v10101_v11 = vor.u32 %v13531_v18, %v10100_v30  ;;  %v13711_v54 = vld [vmem:[#allocation10 + $0x7bc] sm:$0xf0]  ;;  %v823_v22 = vpop.f32.mrf.mxu3 }
 0x1fb   :  { %v11204_v25 = vld [vmem:[#allocation10 + $0xa90] sm:$0xf]  ;;  %v13507_v30 = vld [vmem:[#allocation10 + $0x15c] sm:$0xf0] }
 0x1fc   :  { %3911 = vmatpush.bf16.msrb.mxu3 %v11057_v31  ;;  %3873 = vmatpush.bf16.msrb.mxu0 %v9857_v20  ;;  %v10533_v31 = vor.u32 %v13639_v13, %v10532_v28  ;;  %v10868_v20 = vld [vmem:[#allocation10 + $0x7f0] sm:$0xf] }
 0x1fd   :  { %3899 = vmatpush.bf16.msrb.mxu2 %v10625_v49  ;;  %3931 = vmatpush.bf16.msrb.mxu1 %v10581_v45  ;;  %v13819_v49 = vld [vmem:[#allocation10 + $0xb1c] sm:$0xf0]  ;;  %v10052_v45 = vld [vmem:[#allocation10 + $0x190] sm:$0xf] }
 0x1fe   :  { %3887 = vmatmul.bf16.vlgmr.msra.gmra.mxu1 %v15840_v32  ;;  %v11253_v28 = vor.u32 %v13819_v49, %v11252_v5  ;;  %v10820_v13 = vld [vmem:[#allocation10 + $0x790] sm:$0xf]  ;;  %v13795_v5 = vld [vmem:[#allocation10 + $0xa5c] sm:$0xf0]  ;;  %v796_v49 = vpop.f32.mrf.mxu2 }
 0x1ff   :  { %3874 = vmatmul.bf16.vlgmr.msrb.gmra.mxu0 %v15838_v2  ;;  %v10388_v18 = vld [vmem:[#allocation10 + $0x430] sm:$0xf] }
 0x200   :  { %3912 = vmatpush.bf16.msrb.mxu3 %v11009_v50  ;;  %3918 = vmatpush.bf16.msra.mxu0 %v10197_v34  ;;  %v10485_v50 = vor.u32 %v13627_v35, %v10484_v51  ;;  %v10869_v34 = vor.u32 %v13723_v19, %v10868_v20  ;;  %v11205_v51 = vor.u32 %v13807_v0, %v11204_v25  ;;  %v13603_v35 = vld [vmem:[#allocation10 + $0x45c] sm:$0xf0]  ;;  %v10772_v20 = vld [vmem:[#allocation10 + $0x730] sm:$0xf] }
 0x201   :  { %3944 = vmatpush.bf16.msra.mxu2 %v10965_v62  ;;  %3932 = vmatpush.bf16.msrb.mxu1 %v10533_v31  ;;  %v13519_v62 = vld [vmem:[#allocation10 + $0x1bc] sm:$0xf0]  ;;  %v10821_v31 = vor.u32 %v13711_v54, %v10820_v13  ;;  %v11156_v19 = vld [vmem:[#allocation10 + $0xa30] sm:$0xf] }
 0x202   :  { %3900 = vmatmul.bf16.vlgmr.msrb.gmra.mxu2 %v15844_v23  ;;  %v10053_v8 = vor.u32 %v13519_v62, %v10052_v45  ;;  %v9956_v45 = vld [vmem:[#allocation10 + $0xd0] sm:$0xf]  ;;  %v13495_v62 = vld [vmem:[#allocation10 + $0xfc] sm:$0xf0] }
 0x203   :  { %3913 = vmatmul.bf16.vlgmr.msrb.gmra.mxu3 %v15846_v56  ;;  %v13591_v13 = vld [vmem:[#allocation10 + $0x3fc] sm:$0xf0]  ;;  %v10724_v54 = vld [vmem:[#allocation10 + $0x6d0] sm:$0xf] }
 0x204   :  { %3957 = vmatpush.bf16.msra.mxu3 %v11349_v37  ;;  %3919 = vmatpush.bf16.msra.mxu0 %v10149_v41  ;;  %v13615_v37 = vld [vmem:[#allocation10 + $0x4bc] sm:$0xf0]  ;;  %v11108_v0 = vld [vmem:[#allocation10 + $0x9d0] sm:$0xf] }
 0x205   :  { %3945 = vmatpush.bf16.msra.mxu2 %v10917_v26  ;;  %3933 = vmatpush.bf16.msrb.mxu1 %v10485_v50  ;;  %v10437_v41 = vor.u32 %v13615_v37, %v10436_v3  ;;  %v10004_v26 = vld [vmem:[#allocation10 + $0x130] sm:$0xf]  ;;  %v10389_v50 = vor.u32 %v13603_v35, %v10388_v18  ;;  %v744_v37 = vpop.f32.mrf.mxu0  ;;  %v13687_v25 = vld [vmem:[#allocation10 + $0x6fc] sm:$0xf0]  ;;  %v11109_v35 = vor.u32 %v13783_v33, %v11108_v0  ;;  %v10198_v0 = vld [vmem:[#allocation10 + $0x2e0] sm:$0xf0] }
 0x206   :  { %v10005_v7 = vor.u32 %v13507_v30, %v10004_v26  ;;  %v10340_v3 = vld [vmem:[#allocation10 + $0x3d0] sm:$0xf]  ;;  %v13483_v30 = vld [vmem:[#allocation10 + $0x9c] sm:$0xf0]  ;;  %v825_v37 = vpop.f32.mrf.mxu3 }
 0x207   :  { %v10341_v26 = vor.u32 %v13591_v13, %v10340_v3  ;;  %v10292_v18 = vld [vmem:[#allocation10 + $0x370] sm:$0xf]  ;;  %v13537_v37 = vld [vmem:[#allocation10 + $0x254] sm:$0xf] }
 0x208   :  { %3958 = vmatpush.bf16.msra.mxu3 %v11301_v42  ;;  %3920 = vmatpush.bf16.msra.mxu0 %v10101_v11  ;;  %v13699_v42 = vld [vmem:[#allocation10 + $0x75c] sm:$0xf0]  ;;  %v771_v11 = vpop.f32.mrf.mxu1  ;;  %v9860_v22 = vld [vmem:[#allocation10 + $0x10] sm:$0xf] }
 0x209   :  { %3946 = vmatpush.bf16.msra.mxu2 %v10869_v34  ;;  %3934 = vmatpush.bf16.msrb.mxu1 %v10437_v41  ;;  %v10773_v34 = vor.u32 %v13699_v42, %v10772_v20  ;;  %v10725_v41 = vor.u32 %v13687_v25, %v10724_v54  ;;  %v13579_v20 = vld [vmem:[#allocation10 + $0x39c] sm:$0xf0]  ;;  %v10676_v42 = vld [vmem:[#allocation10 + $0x670] sm:$0xf]  ;;  %v13549_v25 = vld [vmem:[#allocation10 + $0x2b4] sm:$0xf] }
 0x20a   :  { %v13471_v11 = vld [vmem:[#allocation10 + $0x3c] sm:$0xf0]  ;;  %v10628_v3 = vld [vmem:[#allocation10 + $0x610] sm:$0xf] }
 0x20b   :  { %v11012_v13 = vld [vmem:[#allocation10 + $0x910] sm:$0xf]  ;;  %v13759_v54 = vld [vmem:[#allocation10 + $0x93c] sm:$0xf0] }
 0x20c   :  { %3959 = vmatpush.bf16.msra.mxu3 %v11253_v28  ;;  %3921 = vmatpush.bf16.msra.mxu0 %v10053_v8  ;;  %v11157_v28 = vor.u32 %v13795_v5, %v11156_v19  ;;  %v9957_v8 = vor.u32 %v13495_v62, %v9956_v45  ;;  %v11060_v19 = vld [vmem:[#allocation10 + $0x970] sm:$0xf]  ;;  %v13771_v5 = vld [vmem:[#allocation10 + $0x99c] sm:$0xf0] }
 0x20d   :  { %3947 = vmatpush.bf16.msra.mxu2 %v10821_v31  ;;  %3935 = vmatpush.bf16.msrb.mxu1 %v10389_v50  ;;  %v9908_v31 = vld [vmem:[#allocation10 + $0x70] sm:$0xf]  ;;  %v10293_v50 = vor.u32 %v13579_v20, %v10292_v18  ;;  %v13567_v62 = vld [vmem:[#allocation10 + $0x33c] sm:$0xf0]  ;;  %v11061_v33 = vor.u32 %v13771_v5, %v11060_v19  ;;  %v13837_v20 = vld [vmem:[#allocation10 + $0xbb4] sm:$0xf] }
 0x20e   :  { %v9909_v49 = vor.u32 %v13483_v30, %v9908_v31  ;;  %v10244_v45 = vld [vmem:[#allocation10 + $0x310] sm:$0xf]  ;;  %v9861_v31 = vor.u32 %v13471_v11, %v9860_v22  ;;  %v10582_v30 = vld [vmem:[#allocation10 + $0x5e0] sm:$0xf0]  ;;  %v13729_v11 = vld [vmem:[#allocation10 + $0x854] sm:$0xf] }
 0x20f   :  { %v10534_v22 = vld [vmem:[#allocation10 + $0x580] sm:$0xf0] }
 0x210   :  { %3960 = vmatpush.bf16.msra.mxu3 %v11205_v51  ;;  %3922 = vmatpush.bf16.msra.mxu0 %v10005_v7  ;;  %v13675_v51 = vld [vmem:[#allocation10 + $0x69c] sm:$0xf0]  ;;  %v798_v7 = vpop.f32.mrf.mxu2 }
 0x211   :  { %3948 = vmatpush.bf16.msra.mxu2 %v10773_v34  ;;  %3936 = vmatpush.bf16.msrb.mxu1 %v10341_v26  ;;  %v10677_v34 = vor.u32 %v13675_v51, %v10676_v42  ;;  %v13741_v7 = vld [vmem:[#allocation10 + $0x8b4] sm:$0xf]  ;;  %v10966_v26 = vld [vmem:[#allocation10 + $0x8e0] sm:$0xf0]  ;;  %v10201_v51 = vor.u32 %v13549_v25, %v10198_v0 }
 0x212   :  { %v11350_v42 = vld [vmem:[#allocation10 + $0xbe0] sm:$0xf0]  ;;  %v10969_v5 = vor.u32 %v13741_v7, %v10966_v26  ;;  %v13717_v0 = vld [vmem:[#allocation10 + $0x7f4] sm:$0xf] }
 0x213   :  { %v10486_v25 = vld [vmem:[#allocation10 + $0x520] sm:$0xf0]  ;;  %v13513_v7 = vld [vmem:[#allocation10 + $0x194] sm:$0xf] }
 0x214   :  { %3961 = vmatpush.bf16.msra.mxu3 %v11157_v28  ;;  %3923 = vmatpush.bf16.msra.mxu0 %v9957_v8  ;;  %v13663_v28 = vld [vmem:[#allocation10 + $0x63c] sm:$0xf0]  ;;  %v13645_v8 = vld [vmem:[#allocation10 + $0x5b4] sm:$0xf]  ;;  %v10054_v26 = vld [vmem:[#allocation10 + $0x1c0] sm:$0xf0] }
 0x215   :  { %3949 = vmatpush.bf16.msra.mxu2 %v10725_v41  ;;  %3937 = vmatpush.bf16.msrb.mxu1 %v10293_v50  ;;  %v10245_v41 = vor.u32 %v13567_v62, %v10244_v45  ;;  %v10629_v18 = vor.u32 %v13663_v28, %v10628_v3  ;;  %v10585_v19 = vor.u32 %v13645_v8, %v10582_v30  ;;  %v13825_v50 = vld [vmem:[#allocation10 + $0xb54] sm:$0xf]  ;;  %v10102_v28 = vld [vmem:[#allocation10 + $0x220] sm:$0xf0] }
 0x216   :  { %v10153_v45 = vor.u32 %v13537_v37, %v10150_v36  ;;  %v10537_v62 = vor.u32 %v13633_v14, %v10534_v22  ;;  %v10921_v3 = vor.u32 %v13729_v11, %v10918_v43  ;;  %v10870_v8 = vld [vmem:[#allocation10 + $0x820] sm:$0xf0]  ;;  %v13501_v22 = vld [vmem:[#allocation10 + $0x134] sm:$0xf] }
 0x217   :  { %v11254_v36 = vld [vmem:[#allocation10 + $0xb20] sm:$0xf0]  ;;  %v10873_v30 = vor.u32 %v13717_v0, %v10870_v8 }
 0x218   :  { %3962 = vmatpush.bf16.msra.mxu3 %v11109_v35  ;;  %3924 = vmatpush.bf16.msra.mxu0 %v9909_v49  ;;  %v11013_v35 = vor.u32 %v13759_v54, %v11012_v13  ;;  %v11353_v49 = vor.u32 %v13837_v20, %v11350_v42  ;;  %v13621_v13 = vld [vmem:[#allocation10 + $0x4f4] sm:$0xf]  ;;  %v10438_v20 = vld [vmem:[#allocation10 + $0x4c0] sm:$0xf0] }
 0x219   :  { %3950 = vmatpush.bf16.msra.mxu2 %v10677_v34  ;;  %3938 = vmatpush.bf16.msrb.mxu1 %v10245_v41  ;;  %v11302_v34 = vld [vmem:[#allocation10 + $0xb80] sm:$0xf0]  ;;  %v10489_v14 = vor.u32 %v13621_v13, %v10486_v25  ;;  %v13609_v41 = vld [vmem:[#allocation10 + $0x494] sm:$0xf]  ;;  %v15887_v13 = vpop.f32.mrf.mxu0 }
 0x21a   :  { %v11305_v54 = vor.u32 %v13825_v50, %v11302_v34  ;;  %v13705_v42 = vld [vmem:[#allocation10 + $0x794] sm:$0xf]  ;;  %v10441_v37 = vor.u32 %v13609_v41, %v10438_v20  ;;  %v10006_v11 = vld [vmem:[#allocation10 + $0x160] sm:$0xf0] }
 0x21b   :  { %v13597_v50 = vld [vmem:[#allocation10 + $0x434] sm:$0xf]  ;;  %v10009_v25 = vor.u32 %v13501_v22, %v10006_v11  ;;  %v10678_v11 = vld [vmem:[#allocation10 + $0x6a0] sm:$0xf0] }
 0x21c   :  { %3963 = vmatpush.bf16.msra.mxu3 %v11061_v33  ;;  %3925 = vmatpush.bf16.msra.mxu0 %v9861_v31  ;;  %v13525_v33 = vld [vmem:[#allocation10 + $0x1f4] sm:$0xf] }
 0x21d   :  { %3951 = vmatpush.bf16.msra.mxu2 %v10629_v18  ;;  %3983 = vmatpush.bf16.msra.mxu1 %v10585_v19  ;;  %v13813_v31 = vld [vmem:[#allocation10 + $0xaf4] sm:$0xf]  ;;  %v10105_v43 = vor.u32 %v13525_v33, %v10102_v28  ;;  %v11206_v19 = vld [vmem:[#allocation10 + $0xac0] sm:$0xf0] }
 0x21e   :  { %3939 = vmatmul.bf16.vlgmr.msrb.gmra.mxu1 %v15840_v32  ;;  %v11257_v18 = vor.u32 %v13813_v31, %v11254_v36  ;;  %v13789_v33 = vld [vmem:[#allocation10 + $0xa34] sm:$0xf]  ;;  %v11158_v28 = vld [vmem:[#allocation10 + $0xa60] sm:$0xf0] }
 0x21f   :  { %3926 = vmatmul.bf16.vlgmr.msra.gmra.mxu0 %v15838_v2  ;;  %v13489_v31 = vld [vmem:[#allocation10 + $0xd4] sm:$0xf]  ;;  %v9958_v36 = vld [vmem:[#allocation10 + $0x100] sm:$0xf0] }
 0x220   :  { %3964 = vmatpush.bf16.msra.mxu3 %v11013_v35  ;;  %3970 = vmatpush.bf16.msrb.mxu0 %v10201_v51  ;;  %v10822_v35 = vld [vmem:[#allocation10 + $0x7c0] sm:$0xf0]  ;;  %v13801_v51 = vld [vmem:[#allocation10 + $0xa94] sm:$0xf]  ;;  %v9961_v20 = vor.u32 %v13489_v31, %v9958_v36 }
 0x221   :  { %3996 = vmatpush.bf16.msrb.mxu2 %v10969_v5  ;;  %3984 = vmatpush.bf16.msra.mxu1 %v10537_v62  ;;  %v10057_v5 = vor.u32 %v13513_v7, %v10054_v26  ;;  %v11209_v34 = vor.u32 %v13801_v51, %v11206_v19  ;;  %v13693_v62 = vld [vmem:[#allocation10 + $0x734] sm:$0xf]  ;;  %v10726_v26 = vld [vmem:[#allocation10 + $0x700] sm:$0xf0] }
 0x222   :  { %3952 = vmatmul.bf16.vlgmr.msra.gmra.mxu2 %v15844_v23  ;;  %v13681_v7 = vld [vmem:[#allocation10 + $0x6d4] sm:$0xf]  ;;  %v9910_v19 = vld [vmem:[#allocation10 + $0xa0] sm:$0xf0] }
 0x223   :  { %3965 = vmatmul.bf16.vlgmr.msra.gmra.mxu3 %v15846_v56  ;;  %v13777_v41 = vld [vmem:[#allocation10 + $0x9d4] sm:$0xf]  ;;  %v10246_v31 = vld [vmem:[#allocation10 + $0x340] sm:$0xf0] }
 0x224   :  { %4009 = vmatpush.bf16.msrb.mxu3 %v11353_v49  ;;  %3971 = vmatpush.bf16.msrb.mxu0 %v10153_v45  ;;  %v10825_v49 = vor.u32 %v13705_v42, %v10822_v35  ;;  %v10390_v45 = vld [vmem:[#allocation10 + $0x460] sm:$0xf0]  ;;  %v10729_v35 = vor.u32 %v13681_v7, %v10726_v26  ;;  %v13477_v51 = vld [vmem:[#allocation10 + $0x74] sm:$0xf] }
 0x225   :  { %3997 = vmatpush.bf16.msrb.mxu2 %v10921_v3  ;;  %3985 = vmatpush.bf16.msra.mxu1 %v10489_v14  ;;  %v10774_v3 = vld [vmem:[#allocation10 + $0x760] sm:$0xf0]  ;;  %v10393_v0 = vor.u32 %v13597_v50, %v10390_v45  ;;  %v11161_v14 = vor.u32 %v13789_v33, %v11158_v28  ;;  %v13669_v22 = vld [vmem:[#allocation10 + $0x674] sm:$0xf]  ;;  %v15891_v50 = vpop.f32.mrf.mxu3 }
 0x226   :  { %v10777_v8 = vor.u32 %v13693_v62, %v10774_v3  ;;  %v11062_v45 = vld [vmem:[#allocation10 + $0x9a0] sm:$0xf0]  ;;  %v15893_v62 = vpop.f32.mrf.mxu2  ;;  %v9913_v3 = vor.u32 %v13477_v51, %v9910_v19  ;;  %v13465_v33 = vld [vmem:[#allocation10 + $0x14] sm:$0xf]  ;;  %v10588_v51 = vld [vmem:[#allocation10 + $0x5b8] sm:$0xf] }
 0x227   :  { %v9862_v28 = vld [vmem:[#allocation10 + $0x40] sm:$0xf0]  ;;  %v13657_v36 = vld [vmem:[#allocation10 + $0x614] sm:$0xf]  ;;  %v10972_v19 = vld [vmem:[#allocation10 + $0x8b8] sm:$0xf] }
 0x228   :  { %4010 = vmatpush.bf16.msrb.mxu3 %v11305_v54  ;;  %3972 = vmatpush.bf16.msrb.mxu0 %v10105_v43  ;;  %v15889_v54 = vpop.f32.mrf.mxu1  ;;  %v13585_v43 = vld [vmem:[#allocation10 + $0x3d4] sm:$0xf]  ;;  %v10630_v7 = vld [vmem:[#allocation10 + $0x640] sm:$0xf0] }
 0x229   :  { %3998 = vmatpush.bf16.msrb.mxu2 %v10873_v30  ;;  %3986 = vmatpush.bf16.msra.mxu1 %v10441_v37  ;;  %v10342_v30 = vld [vmem:[#allocation10 + $0x400] sm:$0xf0]  ;;  %v13753_v26 = vld [vmem:[#allocation10 + $0x914] sm:$0xf] }
 0x22a   :  { %v10345_v42 = vor.u32 %v13585_v43, %v10342_v30  ;;  %v15895_v43 = vpop.f32.mrf.mxu0 }
 0x22b   :  { %17042 = vst [vmem:[#allocation35_spill] sm:$0xff] %v15895_v43  ;;  %v13844_v43 = vld [vmem:[#allocation10 + $0xbe4] sm:$0xf0] }
 0x22c   :  { %4011 = vmatpush.bf16.msrb.mxu3 %v11257_v18  ;;  %3973 = vmatpush.bf16.msrb.mxu0 %v10057_v5  ;;  %v11110_v18 = vld [vmem:[#allocation10 + $0xa00] sm:$0xf0]  ;;  %v13573_v5 = vld [vmem:[#allocation10 + $0x374] sm:$0xf] }
 0x22d   :  { %3999 = vmatpush.bf16.msrb.mxu2 %v10825_v49  ;;  %3987 = vmatpush.bf16.msra.mxu1 %v10393_v0  ;;  %v11113_v37 = vor.u32 %v13777_v41, %v11110_v18  ;;  %v10294_v49 = vld [vmem:[#allocation10 + $0x3a0] sm:$0xf0]  ;;  %v10681_v0 = vor.u32 %v13669_v22, %v10678_v11  ;;  %v10204_v18 = vld [vmem:[#allocation10 + $0x2b8] sm:$0xf]  ;;  %v10633_v22 = vor.u32 %v13657_v36, %v10630_v7  ;;  %v15899_v29 = vpop.f32.mrf.mxu3 }
 0x22e   :  { %v11014_v41 = vld [vmem:[#allocation10 + $0x940] sm:$0xf0]  ;;  %v11356_v11 = vld [vmem:[#allocation10 + $0xbb8] sm:$0xf]  ;;  %17044 = vst [vmem:[#allocation37_spill] sm:$0xff] %v15899_v29 }
 0x22f   :  { %v10108_v7 = vld [vmem:[#allocation10 + $0x1f8] sm:$0xf] }
 0x230   :  { %4012 = vmatpush.bf16.msrb.mxu3 %v11209_v34  ;;  %3974 = vmatpush.bf16.msrb.mxu0 %v10009_v25  ;;  %v13765_v34 = vld [vmem:[#allocation10 + $0x974] sm:$0xf]  ;;  %v10297_v25 = vor.u32 %v13573_v5, %v10294_v49  ;;  %v13748_v5 = vld [vmem:[#allocation10 + $0x8e4] sm:$0xf0] }
 0x231   :  { %4000 = vmatpush.bf16.msrb.mxu2 %v10777_v8  ;;  %3988 = vmatpush.bf16.msra.mxu1 %v10345_v42  ;;  %v13561_v8 = vld [vmem:[#allocation10 + $0x314] sm:$0xf]  ;;  %v11065_v30 = vor.u32 %v13765_v34, %v11062_v45  ;;  %v9865_v42 = vor.u32 %v13465_v33, %v9862_v28  ;;  %v13640_v33 = vld [vmem:[#allocation10 + $0x584] sm:$0xf0]  ;;  %v10924_v28 = vld [vmem:[#allocation10 + $0x858] sm:$0xf] }
 0x232   :  { %v10249_v49 = vor.u32 %v13561_v8, %v10246_v31  ;;  %v15901_v8 = vpop.f32.mrf.mxu2  ;;  %v10157_v31 = vor.u32 %v13544_v55, %v10156_v10  ;;  %v10541_v36 = vor.u32 %v13640_v33, %v10540_v6  ;;  %v11260_v55 = vld [vmem:[#allocation10 + $0xaf8] sm:$0xf]  ;;  %v13820_v6 = vld [vmem:[#allocation10 + $0xb24] sm:$0xf0] }
 0x233   :  { %17045 = vst [vmem:[#allocation38_spill] sm:$0xff] %v15901_v8  ;;  %v13808_v33 = vld [vmem:[#allocation10 + $0xac4] sm:$0xf0] }
 0x234   :  { %4013 = vmatpush.bf16.msrb.mxu3 %v11161_v14  ;;  %3975 = vmatpush.bf16.msrb.mxu0 %v9961_v20  ;;  %v15897_v14 = vpop.f32.mrf.mxu1  ;;  %v13556_v20 = vld [vmem:[#allocation10 + $0x2e4] sm:$0xf0] }
 0x235   :  { %4001 = vmatpush.bf16.msrb.mxu2 %v10729_v35  ;;  %17043 = vst [vmem:[#allocation36_spill] sm:$0xff] %v15897_v14  ;;  %v13652_v35 = vld [vmem:[#allocation10 + $0x5e4] sm:$0xf0]  ;;  %3989 = vmatpush.bf16.msra.mxu1 %v10297_v25  ;;  %v10205_v34 = vor.u32 %v13556_v20, %v10204_v18  ;;  %v10973_v14 = vor.u32 %v13748_v5, %v10972_v19  ;;  %v11308_v25 = vld [vmem:[#allocation10 + $0xb58] sm:$0xf] }
 0x236   :  { %v10589_v45 = vor.u32 %v13652_v35, %v10588_v51  ;;  %v13628_v51 = vld [vmem:[#allocation10 + $0x524] sm:$0xf0]  ;;  %v10060_v5 = vld [vmem:[#allocation10 + $0x198] sm:$0xf] }
 0x237   :  { %v13724_v35 = vld [vmem:[#allocation10 + $0x824] sm:$0xf0] }
 0x238   :  { %4014 = vmatpush.bf16.msrb.mxu3 %v11113_v37  ;;  %3976 = vmatpush.bf16.msrb.mxu0 %v9913_v3  ;;  %v11017_v37 = vor.u32 %v13753_v26, %v11014_v41  ;;  %v11357_v3 = vor.u32 %v13844_v43, %v11356_v11  ;;  %v13532_v43 = vld [vmem:[#allocation10 + $0x224] sm:$0xf0]  ;;  %v10492_v26 = vld [vmem:[#allocation10 + $0x4f8] sm:$0xf]  ;;  %v3719_v41 = vpop.f32.mrf.mxu0  ;;  %v11261_v11 = vor.u32 %v13820_v6, %v11260_v55 }
 0x239   :  { %4002 = vmatpush.bf16.msrb.mxu2 %v10681_v0  ;;  %3990 = vmatpush.bf16.msra.mxu1 %v10249_v49  ;;  %v13832_v0 = vld [vmem:[#allocation10 + $0xb84] sm:$0xf0]  ;;  %v10493_v10 = vor.u32 %v13628_v51, %v10492_v26  ;;  %v10780_v51 = vld [vmem:[#allocation10 + $0x738] sm:$0xf] }
 0x23a   :  { %v11309_v20 = vor.u32 %v13832_v0, %v11308_v25  ;;  %v13520_v49 = vld [vmem:[#allocation10 + $0x1c4] sm:$0xf0]  ;;  %v11164_v55 = vld [vmem:[#allocation10 + $0xa38] sm:$0xf] }
 0x23b   :  { %v13796_v6 = vld [vmem:[#allocation10 + $0xa64] sm:$0xf0] }
 0x23c   :  { %4015 = vmatpush.bf16.msrb.mxu3 %v11065_v30  ;;  %3977 = vmatpush.bf16.msrb.mxu0 %v9865_v42  ;;  %v10925_v30 = vor.u32 %v13736_v53, %v10924_v28  ;;  %v3732_v18 = vpop.f32.mrf.mxu1  ;;  %v10876_v42 = vld [vmem:[#allocation10 + $0x7f8] sm:$0xf]  ;;  %v10109_v53 = vor.u32 %v13532_v43, %v10108_v7  ;;  %v10061_v28 = vor.u32 %v13520_v49, %v10060_v5  ;;  %v13508_v7 = vld [vmem:[#allocation10 + $0x164] sm:$0xf0] }
 0x23d   :  { %4003 = vmatpush.bf16.msrb.mxu2 %v10633_v22  ;;  %4035 = vmatpush.bf16.msrb.mxu1 %v10589_v45  ;;  %v3733_v19 = vadd.f32 %v3732_v18, %v3719_v41  ;;  %v10444_v22 = vld [vmem:[#allocation10 + $0x498] sm:$0xf]  ;;  %v13712_v45 = vld [vmem:[#allocation10 + $0x7c4] sm:$0xf0] }
 0x23e   :  { %3991 = vmatmul.bf16.vlgmr.msra.gmra.mxu1 %v15840_v32  ;;  %v3758_v25 = vpop.f32.mrf.mxu3  ;;  %v10396_v43 = vld [vmem:[#allocation10 + $0x438] sm:$0xf] }
 0x23f   :  { %3978 = vmatmul.bf16.vlgmr.msrb.gmra.mxu0 %v15838_v2  ;;  %v9964_v49 = vld [vmem:[#allocation10 + $0xd8] sm:$0xf] }
 0x240   :  { %4016 = vmatpush.bf16.msrb.mxu3 %v11017_v37  ;;  %4022 = vmatpush.bf16.msra.mxu0 %v10205_v34  ;;  %v13616_v37 = vld [vmem:[#allocation10 + $0x4c4] sm:$0xf0]  ;;  %v10828_v34 = vld [vmem:[#allocation10 + $0x798] sm:$0xf]  ;;  %v3721_v26 = vpop.f32.mrf.mxu0 }
 0x241   :  { %4048 = vmatpush.bf16.msra.mxu2 %v10973_v14  ;;  %4036 = vmatpush.bf16.msrb.mxu1 %v10541_v36  ;;  %v10877_v14 = vor.u32 %v13724_v35, %v10876_v42  ;;  %v10445_v0 = vor.u32 %v13616_v37, %v10444_v22  ;;  %v3745_v36 = vpop.f32.mrf.mxu2  ;;  %v13700_v42 = vld [vmem:[#allocation10 + $0x764] sm:$0xf0]  ;;  %v10348_v37 = vld [vmem:[#allocation10 + $0x3d8] sm:$0xf] }
 0x242   :  { %4004 = vmatmul.bf16.vlgmr.msrb.gmra.mxu2 %v15844_v23  ;;  %v3746_v18 = vadd.f32 %v3745_v36, %v3733_v19  ;;  %v10781_v5 = vor.u32 %v13700_v42, %v10780_v51  ;;  %v13496_v22 = vld [vmem:[#allocation10 + $0x104] sm:$0xf0]  ;;  %v11165_v19 = vor.u32 %v13796_v6, %v11164_v55  ;;  %v10300_v26 = vld [vmem:[#allocation10 + $0x378] sm:$0xf] }
 0x243   :  { %4017 = vmatmul.bf16.vlgmr.msrb.gmra.mxu3 %v15846_v56  ;;  %v13784_v36 = vld [vmem:[#allocation10 + $0xa04] sm:$0xf0] }
 0x244   :  { %4061 = vmatpush.bf16.msra.mxu3 %v11357_v3  ;;  %4023 = vmatpush.bf16.msra.mxu0 %v10157_v31  ;;  %v11212_v3 = vld [vmem:[#allocation10 + $0xa98] sm:$0xf]  ;;  %v10829_v31 = vor.u32 %v13712_v45, %v10828_v34  ;;  %v3734_v35 = vpop.f32.mrf.mxu1  ;;  %v13592_v34 = vld [vmem:[#allocation10 + $0x404] sm:$0xf0] }
 0x245   :  { %4049 = vmatpush.bf16.msra.mxu2 %v10925_v30  ;;  %4037 = vmatpush.bf16.msrb.mxu1 %v10493_v10  ;;  %v10012_v30 = vld [vmem:[#allocation10 + $0x138] sm:$0xf]  ;;  %v11213_v41 = vor.u32 %v13808_v33, %v11212_v3  ;;  %v13688_v3 = vld [vmem:[#allocation10 + $0x704] sm:$0xf0] }
 0x246   :  { %v10013_v10 = vor.u32 %v13508_v7, %v10012_v30  ;;  %v10732_v45 = vld [vmem:[#allocation10 + $0x6d8] sm:$0xf]  ;;  %v13772_v55 = vld [vmem:[#allocation10 + $0x9a4] sm:$0xf0] }
 0x247   :  { %v11116_v33 = vld [vmem:[#allocation10 + $0x9d8] sm:$0xf] }
 0x248   :  { %4062 = vmatpush.bf16.msra.mxu3 %v11309_v20  ;;  %4024 = vmatpush.bf16.msra.mxu0 %v10109_v53  ;;  %v13604_v20 = vld [vmem:[#allocation10 + $0x464] sm:$0xf0]  ;;  %v3759_v53 = vadd.f32 %v3758_v25, %v3746_v18  ;;  %v3760_v25 = vpop.f32.mrf.mxu3  ;;  %v9916_v7 = vld [vmem:[#allocation10 + $0x78] sm:$0xf]  ;;  %v3771_v51 = vpop.f32.mrf.mxu0 }
 0x249   :  { %4050 = vmatpush.bf16.msra.mxu2 %v10877_v14  ;;  %4038 = vmatpush.bf16.msrb.mxu1 %v10445_v0  ;;  %v10397_v14 = vor.u32 %v13604_v20, %v10396_v43  ;;  %v10349_v0 = vor.u32 %v13592_v34, %v10348_v37  ;;  %v3747_v30 = vpop.f32.mrf.mxu2  ;;  %v13484_v43 = vld [vmem:[#allocation10 + $0xa4] sm:$0xf0]  ;;  %v10684_v18 = vld [vmem:[#allocation10 + $0x678] sm:$0xf]  ;;  %v10206_v25 = vld [vmem:[#allocation10 + $0x2e8] sm:$0xf0] }
 0x24a   :  { %v13676_v20 = vld [vmem:[#allocation10 + $0x6a4] sm:$0xf0]  ;;  %v11068_v35 = vld [vmem:[#allocation10 + $0x978] sm:$0xf]  ;;  %v13646_v30 = vld [vmem:[#allocation10 + $0x5bc] sm:$0xf] }
 0x24b   :  { %v13568_v37 = vld [vmem:[#allocation10 + $0x344] sm:$0xf0]  ;;  %v11069_v34 = vor.u32 %v13772_v55, %v11068_v35 }
 0x24c   :  { %4063 = vmatpush.bf16.msra.mxu3 %v11261_v11  ;;  %4025 = vmatpush.bf16.msra.mxu0 %v10061_v28  ;;  %v15908_v11 = vadd.f32 %v3759_v53, %v15098_v40  ;;  %v9965_v28 = vor.u32 %v13496_v22, %v9964_v49  ;;  %v11117_v40 = vor.u32 %v13784_v36, %v11116_v33  ;;  %v3784_v42 = vpop.f32.mrf.mxu1  ;;  %v10252_v22 = vld [vmem:[#allocation10 + $0x318] sm:$0xf]  ;;  %v13760_v33 = vld [vmem:[#allocation10 + $0x944] sm:$0xf0]  ;;  %v13550_v36 = vld [vmem:[#allocation10 + $0x2bc] sm:$0xf] }
 0x24d   :  { %4051 = vmatpush.bf16.msra.mxu2 %v10829_v31  ;;  %4039 = vmatpush.bf16.msrb.mxu1 %v10397_v14  ;;  %v10733_v31 = vor.u32 %v13688_v3, %v10732_v45  ;;  %v3785_v6 = vadd.f32 %v3784_v42, %v3771_v51  ;;  %v9917_v53 = vor.u32 %v13484_v43, %v9916_v7  ;;  %v13472_v14 = vld [vmem:[#allocation10 + $0x44] sm:$0xf0]  ;;  %v11020_v3 = vld [vmem:[#allocation10 + $0x918] sm:$0xf]  ;;  %v10590_v7 = vld [vmem:[#allocation10 + $0x5e8] sm:$0xf0] }
 0x24e   :  { %v10685_v49 = vor.u32 %v13676_v20, %v10684_v18  ;;  %v13664_v45 = vld [vmem:[#allocation10 + $0x644] sm:$0xf0]  ;;  %v13742_v43 = vld [vmem:[#allocation10 + $0x8bc] sm:$0xf]  ;;  %v10974_v51 = vld [vmem:[#allocation10 + $0x8e8] sm:$0xf0]  ;;  %v10209_v20 = vor.u32 %v13550_v36, %v10206_v25  ;;  %v10593_v55 = vor.u32 %v13646_v30, %v10590_v7 }
 0x24f   :  { %v10977_v29 = vor.u32 %v13742_v43, %v10974_v51  ;;  %v13526_v25 = vld [vmem:[#allocation10 + $0x1fc] sm:$0xf]  ;;  %v10110_v30 = vld [vmem:[#allocation10 + $0x228] sm:$0xf0] }
 0x250   :  { %4064 = vmatpush.bf16.msra.mxu3 %v11213_v41  ;;  %4026 = vmatpush.bf16.msra.mxu0 %v10013_v10  ;;  %v13580_v41 = vld [vmem:[#allocation10 + $0x3a4] sm:$0xf0]  ;;  %v9868_v10 = vld [vmem:[#allocation10 + $0x18] sm:$0xf]  ;;  %v3810_v18 = vpop.f32.mrf.mxu3  ;;  %v3773_v35 = vpop.f32.mrf.mxu0  ;;  %v13718_v43 = vld [vmem:[#allocation10 + $0x7fc] sm:$0xf] }
 0x251   :  { %4052 = vmatpush.bf16.msra.mxu2 %v10781_v5  ;;  %4040 = vmatpush.bf16.msrb.mxu1 %v10349_v0  ;;  %v10301_v5 = vor.u32 %v13580_v41, %v10300_v26  ;;  %v10253_v0 = vor.u32 %v13568_v37, %v10252_v22  ;;  %v13838_v26 = vld [vmem:[#allocation10 + $0xbbc] sm:$0xf]  ;;  %v11358_v41 = vld [vmem:[#allocation10 + $0xbe8] sm:$0xf0]  ;;  %v3797_v42 = vpop.f32.mrf.mxu2 }
 0x252   :  { %v3798_v8 = vadd.f32 %v3797_v42, %v3785_v6  ;;  %v13730_v22 = vld [vmem:[#allocation10 + $0x85c] sm:$0xf]  ;;  %v10926_v37 = vld [vmem:[#allocation10 + $0x888] sm:$0xf0] }
 0x253   :  { %v10929_v36 = vor.u32 %v13730_v22, %v10926_v37  ;;  %v10878_v51 = vld [vmem:[#allocation10 + $0x828] sm:$0xf0] }
 0x254   :  { %4065 = vmatpush.bf16.msra.mxu3 %v11165_v19  ;;  %4027 = vmatpush.bf16.msra.mxu0 %v9965_v28  ;;  %v10636_v19 = vld [vmem:[#allocation10 + $0x618] sm:$0xf]  ;;  %v9869_v28 = vor.u32 %v13472_v14, %v9868_v10  ;;  %v13538_v10 = vld [vmem:[#allocation10 + $0x25c] sm:$0xf]  ;;  %v10158_v14 = vld [vmem:[#allocation10 + $0x288] sm:$0xf0] }
 0x255   :  { %4053 = vmatpush.bf16.msra.mxu2 %v10733_v31  ;;  %4041 = vmatpush.bf16.msrb.mxu1 %v10301_v5  ;;  %v10637_v31 = vor.u32 %v13664_v45, %v10636_v19  ;;  %v11361_v5 = vor.u32 %v13838_v26, %v11358_v41  ;;  %v3811_v19 = vadd.f32 %v3810_v18, %v3798_v8  ;;  %v11310_v45 = vld [vmem:[#allocation10 + $0xb88] sm:$0xf0]  ;;  %v13514_v18 = vld [vmem:[#allocation10 + $0x19c] sm:$0xf] }
 0x256   :  { %v10494_v8 = vld [vmem:[#allocation10 + $0x528] sm:$0xf0]  ;;  %v10881_v41 = vor.u32 %v13718_v43, %v10878_v51 }
 0x257   :  { %v15911_v6 = vadd.f32 %v3811_v19, %v15136_v12  ;;  %v10446_v35 = vld [vmem:[#allocation10 + $0x4c8] sm:$0xf0] }
 0x258   :  { %4066 = vmatpush.bf16.msra.mxu3 %v11117_v40  ;;  %4028 = vmatpush.bf16.msra.mxu0 %v9917_v53  ;;  %v11021_v40 = vor.u32 %v13760_v33, %v11020_v3  ;;  %v3786_v53 = vpop.f32.mrf.mxu1  ;;  %v10161_v3 = vor.u32 %v13538_v10, %v10158_v14  ;;  %v3812_v12 = vpop.f32.mrf.mxu3  ;;  %v13802_v14 = vld [vmem:[#allocation10 + $0xa9c] sm:$0xf] }
 0x259   :  { %4054 = vmatpush.bf16.msra.mxu2 %v10685_v49  ;;  %v10542_v49 = vld [vmem:[#allocation10 + $0x588] sm:$0xf0]  ;;  %4042 = vmatpush.bf16.msrb.mxu1 %v10253_v0 }
 0x25a   :  { %v10545_v33 = vor.u32 %v13634_v9, %v10542_v49  ;;  %v11262_v0 = vld [vmem:[#allocation10 + $0xb28] sm:$0xf0]  ;;  %v10113_v9 = vor.u32 %v13526_v25, %v10110_v30  ;;  %v13694_v30 = vld [vmem:[#allocation10 + $0x73c] sm:$0xf] }
 0x25b   :  { %v10830_v53 = vld [vmem:[#allocation10 + $0x7c8] sm:$0xf0] }
 0x25c   :  { %4067 = vmatpush.bf16.msra.mxu3 %v11069_v34  ;;  %4029 = vmatpush.bf16.msra.mxu0 %v9869_v28  ;;  %v13826_v34 = vld [vmem:[#allocation10 + $0xb5c] sm:$0xf]  ;;  %v3823_v10 = vpop.f32.mrf.mxu0  ;;  %v10398_v25 = vld [vmem:[#allocation10 + $0x468] sm:$0xf0] }
 0x25d   :  { %4055 = vmatpush.bf16.msra.mxu2 %v10637_v31  ;;  %4087 = vmatpush.bf16.msra.mxu1 %v10593_v55  ;;  %v13622_v28 = vld [vmem:[#allocation10 + $0x4fc] sm:$0xf]  ;;  %v11313_v7 = vor.u32 %v13826_v34, %v11310_v45  ;;  %v3799_v31 = vpop.f32.mrf.mxu2  ;;  %v9966_v12 = vld [vmem:[#allocation10 + $0x108] sm:$0xf0] }
 0x25e   :  { %4043 = vmatmul.bf16.vlgmr.msrb.gmra.mxu1 %v15840_v32  ;;  %v10497_v26 = vor.u32 %v13622_v28, %v10494_v8  ;;  %v13706_v55 = vld [vmem:[#allocation10 + $0x79c] sm:$0xf]  ;;  %v10782_v28 = vld [vmem:[#allocation10 + $0x768] sm:$0xf0] }
 0x25f   :  { %4030 = vmatmul.bf16.vlgmr.msra.gmra.mxu0 %v15838_v2  ;;  %v10833_v34 = vor.u32 %v13706_v55, %v10830_v53  ;;  %v13502_v45 = vld [vmem:[#allocation10 + $0x13c] sm:$0xf]  ;;  %v11166_v8 = vld [vmem:[#allocation10 + $0xa68] sm:$0xf0] }
 0x260   :  { %4068 = vmatpush.bf16.msra.mxu3 %v11021_v40  ;;  %4074 = vmatpush.bf16.msrb.mxu0 %v10209_v20  ;;  %v10062_v40 = vld [vmem:[#allocation10 + $0x1c8] sm:$0xf0]  ;;  %v13610_v20 = vld [vmem:[#allocation10 + $0x49c] sm:$0xf]  ;;  %v3836_v49 = vpop.f32.mrf.mxu1 }
 0x261   :  { %4100 = vmatpush.bf16.msrb.mxu2 %v10977_v29  ;;  %v13814_v29 = vld [vmem:[#allocation10 + $0xafc] sm:$0xf]  ;;  %4088 = vmatpush.bf16.msra.mxu1 %v10545_v33  ;;  %v10065_v22 = vor.u32 %v13514_v18, %v10062_v40  ;;  %v3837_v37 = vadd.f32 %v3836_v49, %v3823_v10  ;;  %v10449_v19 = vor.u32 %v13610_v20, %v10446_v35  ;;  %v10734_v40 = vld [vmem:[#allocation10 + $0x708] sm:$0xf0] }
 0x262   :  { %4056 = vmatmul.bf16.vlgmr.msra.gmra.mxu2 %v15844_v23  ;;  %v11265_v42 = vor.u32 %v13814_v29, %v11262_v0  ;;  %v13598_v33 = vld [vmem:[#allocation10 + $0x43c] sm:$0xf]  ;;  %v10785_v29 = vor.u32 %v13694_v30, %v10782_v28  ;;  %v11118_v53 = vld [vmem:[#allocation10 + $0xa08] sm:$0xf0] }
 0x263   :  { %4069 = vmatmul.bf16.vlgmr.msra.gmra.mxu3 %v15846_v56  ;;  %v10401_v51 = vor.u32 %v13598_v33, %v10398_v25  ;;  %v13490_v0 = vld [vmem:[#allocation10 + $0xdc] sm:$0xf]  ;;  %v10302_v33 = vld [vmem:[#allocation10 + $0x3a8] sm:$0xf0] }
 0x264   :  { %4113 = vmatpush.bf16.msrb.mxu3 %v11361_v5  ;;  %4075 = vmatpush.bf16.msrb.mxu0 %v10161_v3  ;;  %v11214_v5 = vld [vmem:[#allocation10 + $0xac8] sm:$0xf0]  ;;  %v13682_v18 = vld [vmem:[#allocation10 + $0x6dc] sm:$0xf]  ;;  %v3825_v35 = vpop.f32.mrf.mxu0 }
 0x265   :  { %4101 = vmatpush.bf16.msrb.mxu2 %v10929_v36  ;;  %4089 = vmatpush.bf16.msra.mxu1 %v10497_v26  ;;  %v10014_v3 = vld [vmem:[#allocation10 + $0x168] sm:$0xf0]  ;;  %v11217_v36 = vor.u32 %v13802_v14, %v11214_v5  ;;  %v3849_v26 = vpop.f32.mrf.mxu2  ;;  %v13778_v55 = vld [vmem:[#allocation10 + $0x9dc] sm:$0xf]  ;;  %v9969_v14 = vor.u32 %v13490_v0, %v9966_v12  ;;  %v10596_v35 = vld [vmem:[#allocation10 + $0x5c0] sm:$0xf] }
 0x266   :  { %v10017_v43 = vor.u32 %v13502_v45, %v10014_v3  ;;  %v3850_v20 = vadd.f32 %v3849_v26, %v3837_v37  ;;  %v13574_v45 = vld [vmem:[#allocation10 + $0x37c] sm:$0xf]  ;;  %v11121_v3 = vor.u32 %v13778_v55, %v11118_v53  ;;  %v10686_v37 = vld [vmem:[#allocation10 + $0x6a8] sm:$0xf0]  ;;  %v13653_v53 = vld [vmem:[#allocation10 + $0x5ec] sm:$0xf0] }
 0x267   :  { %v13766_v30 = vld [vmem:[#allocation10 + $0x97c] sm:$0xf]  ;;  %v11070_v28 = vld [vmem:[#allocation10 + $0x9a8] sm:$0xf0] }
 0x268   :  { %4114 = vmatpush.bf16.msrb.mxu3 %v11313_v7  ;;  %4076 = vmatpush.bf16.msrb.mxu0 %v10113_v9  ;;  %v13790_v7 = vld [vmem:[#allocation10 + $0xa3c] sm:$0xf]  ;;  %v3838_v10 = vpop.f32.mrf.mxu1  ;;  %v10254_v12 = vld [vmem:[#allocation10 + $0x348] sm:$0xf0] }
 0x269   :  { %4102 = vmatpush.bf16.msrb.mxu2 %v10881_v41  ;;  %4090 = vmatpush.bf16.msra.mxu1 %v10449_v19  ;;  %v13586_v9 = vld [vmem:[#allocation10 + $0x3dc] sm:$0xf]  ;;  %v11169_v31 = vor.u32 %v13790_v7, %v11166_v8  ;;  %v10350_v41 = vld [vmem:[#allocation10 + $0x408] sm:$0xf0]  ;;  %v10980_v10 = vld [vmem:[#allocation10 + $0x8c0] sm:$0xf] }
 0x26a   :  { %v10353_v49 = vor.u32 %v13586_v9, %v10350_v41  ;;  %v13478_v19 = vld [vmem:[#allocation10 + $0x7c] sm:$0xf]  ;;  %v10638_v41 = vld [vmem:[#allocation10 + $0x648] sm:$0xf0] }
 0x26b   :  { %v13466_v8 = vld [vmem:[#allocation10 + $0x1c] sm:$0xf] }
 0x26c   :  { %4115 = vmatpush.bf16.msrb.mxu3 %v11265_v42  ;;  %4077 = vmatpush.bf16.msrb.mxu0 %v10065_v22  ;;  %v3862_v42 = vpop.f32.mrf.mxu3  ;;  %v10737_v22 = vor.u32 %v13682_v18, %v10734_v40  ;;  %v13562_v0 = vld [vmem:[#allocation10 + $0x31c] sm:$0xf] }
 0x26d   :  { %4103 = vmatpush.bf16.msrb.mxu2 %v10833_v34  ;;  %4091 = vmatpush.bf16.msra.mxu1 %v10401_v51  ;;  %v3863_v5 = vadd.f32 %v3862_v42, %v3850_v20  ;;  %v9918_v34 = vld [vmem:[#allocation10 + $0xa8] sm:$0xf0]  ;;  %v10305_v51 = vor.u32 %v13574_v45, %v10302_v33  ;;  %v13658_v9 = vld [vmem:[#allocation10 + $0x61c] sm:$0xf]  ;;  %v3851_v26 = vpop.f32.mrf.mxu2  ;;  %v10212_v20 = vld [vmem:[#allocation10 + $0x2c0] sm:$0xf] }
 0x26e   :  { %v9921_v7 = vor.u32 %v13478_v19, %v9918_v34  ;;  %v13754_v18 = vld [vmem:[#allocation10 + $0x91c] sm:$0xf]  ;;  %v13557_v42 = vld [vmem:[#allocation10 + $0x2ec] sm:$0xf0] }
 0x26f   :  { %v15918_v25 = vadd.f32 %v3863_v5, %v15116_v57  ;;  %v11022_v57 = vld [vmem:[#allocation10 + $0x948] sm:$0xf0]  ;;  %v10257_v5 = vor.u32 %v13562_v0, %v10254_v12  ;;  %v13845_v19 = vld [vmem:[#allocation10 + $0xbec] sm:$0xf0]  ;;  %v10213_v45 = vor.u32 %v13557_v42, %v10212_v20  ;;  %v11268_v42 = vld [vmem:[#allocation10 + $0xb00] sm:$0xf] }
 0x270   :  { %4116 = vmatpush.bf16.msrb.mxu3 %v11217_v36  ;;  %4078 = vmatpush.bf16.msrb.mxu0 %v10017_v43  ;;  %v13670_v36 = vld [vmem:[#allocation10 + $0x67c] sm:$0xf]  ;;  %v9870_v43 = vld [vmem:[#allocation10 + $0x48] sm:$0xf0]  ;;  %v11025_v34 = vor.u32 %v13754_v18, %v11022_v57  ;;  %v13533_v26 = vld [vmem:[#allocation10 + $0x22c] sm:$0xf0] }
 0x271   :  { %4104 = vmatpush.bf16.msrb.mxu2 %v10785_v29  ;;  %4092 = vmatpush.bf16.msra.mxu1 %v10353_v49  ;;  %v10689_v29 = vor.u32 %v13670_v36, %v10686_v37  ;;  %v9873_v55 = vor.u32 %v13466_v8, %v9870_v43  ;;  %v10641_v49 = vor.u32 %v13658_v9, %v10638_v41  ;;  %v10164_v36 = vld [vmem:[#allocation10 + $0x260] sm:$0xf]  ;;  %v13545_v37 = vld [vmem:[#allocation10 + $0x28c] sm:$0xf0] }
 0x272   :  { %v10932_v8 = vld [vmem:[#allocation10 + $0x860] sm:$0xf]  ;;  %v13737_v43 = vld [vmem:[#allocation10 + $0x88c] sm:$0xf0]  ;;  %v10165_v0 = vor.u32 %v13545_v37, %v10164_v36 }
 0x273   :  { %v10933_v9 = vor.u32 %v13737_v43, %v10932_v8  ;;  %v10500_v41 = vld [vmem:[#allocation10 + $0x500] sm:$0xf]  ;;  %v13629_v57 = vld [vmem:[#allocation10 + $0x52c] sm:$0xf0] }
 0x274   :  { %4117 = vmatpush.bf16.msrb.mxu3 %v11169_v31  ;;  %4079 = vmatpush.bf16.msrb.mxu0 %v9969_v14  ;;  %v11073_v31 = vor.u32 %v13766_v30, %v11070_v28  ;;  %v3864_v40 = vpop.f32.mrf.mxu3  ;;  %v13749_v14 = vld [vmem:[#allocation10 + $0x8ec] sm:$0xf0]  ;;  %v10548_v30 = vld [vmem:[#allocation10 + $0x560] sm:$0xf] }
 0x275   :  { %4105 = vmatpush.bf16.msrb.mxu2 %v10737_v22  ;;  %4093 = vmatpush.bf16.msra.mxu1 %v10305_v51  ;;  %v11364_v22 = vld [vmem:[#allocation10 + $0xbc0] sm:$0xf]  ;;  %v10981_v33 = vor.u32 %v13749_v14, %v10980_v10  ;;  %v13725_v20 = vld [vmem:[#allocation10 + $0x82c] sm:$0xf0] }
 0x276   :  { %v11365_v28 = vor.u32 %v13845_v19, %v11364_v22  ;;  %v11316_v51 = vld [vmem:[#allocation10 + $0xb60] sm:$0xf]  ;;  %v13617_v19 = vld [vmem:[#allocation10 + $0x4cc] sm:$0xf0] }
 0x277   :  { %v10884_v40 = vld [vmem:[#allocation10 + $0x800] sm:$0xf]  ;;  %v13809_v36 = vld [vmem:[#allocation10 + $0xacc] sm:$0xf0] }
 0x278   :  { %4118 = vmatpush.bf16.msrb.mxu3 %v11121_v3  ;;  %4080 = vmatpush.bf16.msrb.mxu0 %v9921_v7  ;;  %v10597_v3 = vor.u32 %v13653_v53, %v10596_v35  ;;  %v13641_v7 = vld [vmem:[#allocation10 + $0x58c] sm:$0xf0]  ;;  %v10501_v53 = vor.u32 %v13629_v57, %v10500_v41  ;;  %v10885_v10 = vor.u32 %v13725_v20, %v10884_v40  ;;  %v10068_v14 = vld [vmem:[#allocation10 + $0x1a0] sm:$0xf] }
 0x279   :  { %4106 = vmatpush.bf16.msrb.mxu2 %v10689_v29  ;;  %4094 = vmatpush.bf16.msra.mxu1 %v10257_v5  ;;  %v13833_v29 = vld [vmem:[#allocation10 + $0xb8c] sm:$0xf0]  ;;  %v10549_v12 = vor.u32 %v13641_v7, %v10548_v30  ;;  %v10020_v43 = vld [vmem:[#allocation10 + $0x140] sm:$0xf] }
 0x27a   :  { %v11317_v18 = vor.u32 %v13833_v29, %v11316_v51  ;;  %v13821_v35 = vld [vmem:[#allocation10 + $0xb2c] sm:$0xf0]  ;;  %v10404_v29 = vld [vmem:[#allocation10 + $0x440] sm:$0xf] }
 0x27b   :  { %v13521_v5 = vld [vmem:[#allocation10 + $0x1cc] sm:$0xf0]  ;;  %v11269_v22 = vor.u32 %v13821_v35, %v11268_v42  ;;  %v3888_v37 = vpop.f32.mrf.mxu1  ;;  %v9972_v20 = vld [vmem:[#allocation10 + $0xe0] sm:$0xf] }
 0x27c   :  { %4119 = vmatpush.bf16.msrb.mxu3 %v11073_v31  ;;  %4081 = vmatpush.bf16.msrb.mxu0 %v9873_v55  ;;  %v10116_v31 = vld [vmem:[#allocation10 + $0x200] sm:$0xf]  ;;  %v10069_v30 = vor.u32 %v13521_v5, %v10068_v14  ;;  %v13509_v51 = vld [vmem:[#allocation10 + $0x16c] sm:$0xf0] }
 0x27d   :  { %4107 = vmatpush.bf16.msrb.mxu2 %v10641_v49  ;;  %4139 = vmatpush.bf16.msrb.mxu1 %v10597_v3  ;;  %v10117_v55 = vor.u32 %v13533_v26, %v10116_v31  ;;  %v10452_v49 = vld [vmem:[#allocation10 + $0x4a0] sm:$0xf]  ;;  %v3875_v3 = vpop.f32.mrf.mxu0  ;;  %v13701_v31 = vld [vmem:[#allocation10 + $0x76c] sm:$0xf0] }
 0x27e   :  { %4095 = vmatmul.bf16.vlgmr.msra.gmra.mxu1 %v15840_v32  ;;  %v10453_v7 = vor.u32 %v13617_v19, %v10452_v49  ;;  %v11172_v26 = vld [vmem:[#allocation10 + $0xa40] sm:$0xf]  ;;  %v13797_v41 = vld [vmem:[#allocation10 + $0xa6c] sm:$0xf0] }
 0x27f   :  { %4082 = vmatmul.bf16.vlgmr.msrb.gmra.mxu0 %v15838_v2  ;;  %v13497_v42 = vld [vmem:[#allocation10 + $0x10c] sm:$0xf0]  ;;  %v10356_v35 = vld [vmem:[#allocation10 + $0x3e0] sm:$0xf] }
 0x280   :  { %4120 = vmatpush.bf16.msrb.mxu3 %v11025_v34  ;;  %4126 = vmatpush.bf16.msra.mxu0 %v10213_v45  ;;  %v10836_v34 = vld [vmem:[#allocation10 + $0x7a0] sm:$0xf]  ;;  %v13713_v45 = vld [vmem:[#allocation10 + $0x7cc] sm:$0xf0] }
 0x281   :  { %4152 = vmatpush.bf16.msra.mxu2 %v10981_v33  ;;  %4140 = vmatpush.bf16.msrb.mxu1 %v10549_v12  ;;  %v11220_v33 = vld [vmem:[#allocation10 + $0xaa0] sm:$0xf]  ;;  %v10837_v8 = vor.u32 %v13713_v45, %v10836_v34  ;;  %v13605_v12 = vld [vmem:[#allocation10 + $0x46c] sm:$0xf0] }
 0x282   :  { %4108 = vmatmul.bf16.vlgmr.msrb.gmra.mxu2 %v15844_v23  ;;  %v10405_v57 = vor.u32 %v13605_v12, %v10404_v29  ;;  %v10740_v14 = vld [vmem:[#allocation10 + $0x6e0] sm:$0xf]  ;;  %v13689_v5 = vld [vmem:[#allocation10 + $0x70c] sm:$0xf0] }
 0x283   :  { %4121 = vmatmul.bf16.vlgmr.msrb.gmra.mxu3 %v15846_v56  ;;  %v11124_v34 = vld [vmem:[#allocation10 + $0x9e0] sm:$0xf]  ;;  %v13785_v45 = vld [vmem:[#allocation10 + $0xa0c] sm:$0xf0] }
 0x284   :  { %4165 = vmatpush.bf16.msra.mxu3 %v11365_v28  ;;  %4127 = vmatpush.bf16.msra.mxu0 %v10165_v0  ;;  %v3889_v28 = vadd.f32 %v3888_v37, %v3875_v3  ;;  %v11221_v0 = vor.u32 %v13809_v36, %v11220_v33  ;;  %v3890_v3 = vpop.f32.mrf.mxu1  ;;  %v9973_v33 = vor.u32 %v13497_v42, %v9972_v20  ;;  %v13581_v29 = vld [vmem:[#allocation10 + $0x3ac] sm:$0xf0]  ;;  %v10260_v20 = vld [vmem:[#allocation10 + $0x320] sm:$0xf] }
 0x285   :  { %4153 = vmatpush.bf16.msra.mxu2 %v10933_v9  ;;  %4141 = vmatpush.bf16.msrb.mxu1 %v10501_v53  ;;  %v10788_v9 = vld [vmem:[#allocation10 + $0x740] sm:$0xf]  ;;  %v3901_v53 = vpop.f32.mrf.mxu2  ;;  %v3877_v19 = vpop.f32.mrf.mxu0  ;;  %v13569_v42 = vld [vmem:[#allocation10 + $0x34c] sm:$0xf0]  ;;  %v13743_v3 = vld [vmem:[#allocation10 + $0x8c4] sm:$0xf] }
 0x286   :  { %v10789_v40 = vor.u32 %v13701_v31, %v10788_v9  ;;  %v3902_v49 = vadd.f32 %v3901_v53, %v3889_v28  ;;  %v13677_v28 = vld [vmem:[#allocation10 + $0x6ac] sm:$0xf0]  ;;  %v11076_v9 = vld [vmem:[#allocation10 + $0x980] sm:$0xf]  ;;  %v13647_v19 = vld [vmem:[#allocation10 + $0x5c4] sm:$0xf] }
 0x287   :  { %v13773_v31 = vld [vmem:[#allocation10 + $0x9ac] sm:$0xf0] }
 0x288   :  { %4166 = vmatpush.bf16.msra.mxu3 %v11317_v18  ;;  %4128 = vmatpush.bf16.msra.mxu0 %v10117_v55  ;;  %v10021_v18 = vor.u32 %v13509_v51, %v10020_v43  ;;  %v11173_v55 = vor.u32 %v13797_v41, %v11172_v26  ;;  %v10308_v43 = vld [vmem:[#allocation10 + $0x380] sm:$0xf]  ;;  %v11125_v51 = vor.u32 %v13785_v45, %v11124_v34  ;;  %v10598_v45 = vld [vmem:[#allocation10 + $0x5f0] sm:$0xf0] }
 0x289   :  { %4154 = vmatpush.bf16.msra.mxu2 %v10885_v10  ;;  %4142 = vmatpush.bf16.msrb.mxu1 %v10453_v7  ;;  %v13593_v10 = vld [vmem:[#allocation10 + $0x40c] sm:$0xf0]  ;;  %v9924_v7 = vld [vmem:[#allocation10 + $0x80] sm:$0xf] }
 0x28a   :  { %v10357_v37 = vor.u32 %v13593_v10, %v10356_v35  ;;  %v9876_v41 = vld [vmem:[#allocation10 + $0x20] sm:$0xf]  ;;  %v13665_v10 = vld [vmem:[#allocation10 + $0x64c] sm:$0xf0] }
 0x28b   :  { %v10644_v35 = vld [vmem:[#allocation10 + $0x620] sm:$0xf] }
 0x28c   :  { %4167 = vmatpush.bf16.msra.mxu3 %v11269_v22  ;;  %4129 = vmatpush.bf16.msra.mxu0 %v10069_v30  ;;  %v3914_v22 = vpop.f32.mrf.mxu3  ;;  %v10741_v30 = vor.u32 %v13689_v5, %v10740_v14  ;;  %v11028_v14 = vld [vmem:[#allocation10 + $0x920] sm:$0xf] }
 0x28d   :  { %4155 = vmatpush.bf16.msra.mxu2 %v10837_v8  ;;  %4143 = vmatpush.bf16.msrb.mxu1 %v10405_v57  ;;  %v3915_v36 = vadd.f32 %v3914_v22, %v3902_v49  ;;  %v13485_v8 = vld [vmem:[#allocation10 + $0xac] sm:$0xf0]  ;;  %v10309_v57 = vor.u32 %v13581_v29, %v10308_v43  ;;  %v3903_v53 = vpop.f32.mrf.mxu2  ;;  %v13551_v49 = vld [vmem:[#allocation10 + $0x2c4] sm:$0xf]  ;;  %v10214_v22 = vld [vmem:[#allocation10 + $0x2f0] sm:$0xf0] }
 0x28e   :  { %v9925_v26 = vor.u32 %v13485_v8, %v9924_v7  ;;  %v11366_v7 = vld [vmem:[#allocation10 + $0xbf0] sm:$0xf0]  ;;  %v10217_v43 = vor.u32 %v13551_v49, %v10214_v22  ;;  %v13815_v22 = vld [vmem:[#allocation10 + $0xb04] sm:$0xf] }
 0x28f   :  { %v15925_v12 = vadd.f32 %v3915_v36, %v15119_v61  ;;  %v13761_v61 = vld [vmem:[#allocation10 + $0x94c] sm:$0xf0]  ;;  %v10261_v36 = vor.u32 %v13569_v42, %v10260_v20  ;;  %v10118_v53 = vld [vmem:[#allocation10 + $0x230] sm:$0xf0] }
 0x290   :  { %4168 = vmatpush.bf16.msra.mxu3 %v11221_v0  ;;  %4130 = vmatpush.bf16.msra.mxu0 %v10021_v18  ;;  %v10692_v0 = vld [vmem:[#allocation10 + $0x680] sm:$0xf]  ;;  %v13473_v18 = vld [vmem:[#allocation10 + $0x4c] sm:$0xf0]  ;;  %v11029_v8 = vor.u32 %v13761_v61, %v11028_v14  ;;  %v10502_v61 = vld [vmem:[#allocation10 + $0x530] sm:$0xf0] }
 0x291   :  { %4156 = vmatpush.bf16.msra.mxu2 %v10789_v40  ;;  %4144 = vmatpush.bf16.msrb.mxu1 %v10357_v37  ;;  %v10693_v40 = vor.u32 %v13677_v28, %v10692_v0  ;;  %v9877_v34 = vor.u32 %v13473_v18, %v9876_v41  ;;  %v10645_v37 = vor.u32 %v13665_v10, %v10644_v35  ;;  %v13539_v0 = vld [vmem:[#allocation10 + $0x264] sm:$0xf]  ;;  %v10166_v28 = vld [vmem:[#allocation10 + $0x290] sm:$0xf0] }
 0x292   :  { %v13731_v41 = vld [vmem:[#allocation10 + $0x864] sm:$0xf]  ;;  %v10934_v18 = vld [vmem:[#allocation10 + $0x890] sm:$0xf0]  ;;  %v10169_v20 = vor.u32 %v13539_v0, %v10166_v28 }
 0x293   :  { %v10937_v35 = vor.u32 %v13731_v41, %v10934_v18  ;;  %v13623_v10 = vld [vmem:[#allocation10 + $0x504] sm:$0xf]  ;;  %v10886_v49 = vld [vmem:[#allocation10 + $0x830] sm:$0xf0] }
 0x294   :  { %4169 = vmatpush.bf16.msra.mxu3 %v11173_v55  ;;  %4131 = vmatpush.bf16.msra.mxu0 %v9973_v33  ;;  %v11077_v55 = vor.u32 %v13773_v31, %v11076_v9  ;;  %v3916_v5 = vpop.f32.mrf.mxu3  ;;  %v10982_v33 = vld [vmem:[#allocation10 + $0x8f0] sm:$0xf0]  ;;  %v13635_v9 = vld [vmem:[#allocation10 + $0x564] sm:$0xf] }
 0x295   :  { %4157 = vmatpush.bf16.msra.mxu2 %v10741_v30  ;;  %4145 = vmatpush.bf16.msrb.mxu1 %v10309_v57  ;;  %v13839_v30 = vld [vmem:[#allocation10 + $0xbc4] sm:$0xf]  ;;  %v10985_v29 = vor.u32 %v13743_v3, %v10982_v33  ;;  %v11222_v0 = vld [vmem:[#allocation10 + $0xad0] sm:$0xf0] }
 0x296   :  { %v11369_v31 = vor.u32 %v13839_v30, %v11366_v7  ;;  %v13827_v57 = vld [vmem:[#allocation10 + $0xb64] sm:$0xf]  ;;  %v10454_v7 = vld [vmem:[#allocation10 + $0x4d0] sm:$0xf0] }
 0x297   :  { %v13719_v5 = vld [vmem:[#allocation10 + $0x804] sm:$0xf] }
 0x298   :  { %4170 = vmatpush.bf16.msra.mxu3 %v11125_v51  ;;  %4132 = vmatpush.bf16.msra.mxu0 %v9925_v26  ;;  %v10601_v51 = vor.u32 %v13647_v19, %v10598_v45  ;;  %v10550_v26 = vld [vmem:[#allocation10 + $0x590] sm:$0xf0]  ;;  %v10505_v45 = vor.u32 %v13623_v10, %v10502_v61  ;;  %v10889_v3 = vor.u32 %v13719_v5, %v10886_v49  ;;  %v13515_v33 = vld [vmem:[#allocation10 + $0x1a4] sm:$0xf] }
 0x299   :  { %4158 = vmatpush.bf16.msra.mxu2 %v10693_v40  ;;  %4146 = vmatpush.bf16.msrb.mxu1 %v10261_v36  ;;  %v11318_v40 = vld [vmem:[#allocation10 + $0xb90] sm:$0xf0]  ;;  %v10553_v42 = vor.u32 %v13635_v9, %v10550_v26  ;;  %v13503_v18 = vld [vmem:[#allocation10 + $0x144] sm:$0xf] }
 0x29a   :  { %v11321_v14 = vor.u32 %v13827_v57, %v11318_v40  ;;  %v11270_v19 = vld [vmem:[#allocation10 + $0xb30] sm:$0xf0]  ;;  %v13599_v40 = vld [vmem:[#allocation10 + $0x444] sm:$0xf] }
 0x29b   :  { %v10070_v36 = vld [vmem:[#allocation10 + $0x1d0] sm:$0xf0]  ;;  %v11273_v30 = vor.u32 %v13815_v22, %v11270_v19  ;;  %v3940_v28 = vpop.f32.mrf.mxu1  ;;  %v13491_v49 = vld [vmem:[#allocation10 + $0xe4] sm:$0xf] }
 0x29c   :  { %4171 = vmatpush.bf16.msra.mxu3 %v11077_v55  ;;  %4133 = vmatpush.bf16.msra.mxu0 %v9877_v34  ;;  %v13527_v55 = vld [vmem:[#allocation10 + $0x204] sm:$0xf]  ;;  %v10073_v9 = vor.u32 %v13515_v33, %v10070_v36  ;;  %v10022_v57 = vld [vmem:[#allocation10 + $0x170] sm:$0xf0] }
 0x29d   :  { %4159 = vmatpush.bf16.msra.mxu2 %v10645_v37  ;;  %4191 = vmatpush.bf16.msra.mxu1 %v10601_v51  ;;  %v10121_v34 = vor.u32 %v13527_v55, %v10118_v53  ;;  %v13611_v37 = vld [vmem:[#allocation10 + $0x4a4] sm:$0xf]  ;;  %v3927_v51 = vpop.f32.mrf.mxu0  ;;  %v10790_v55 = vld [vmem:[#allocation10 + $0x770] sm:$0xf0] }
 0x29e   :  { %4147 = vmatmul.bf16.vlgmr.msrb.gmra.mxu1 %v15840_v32  ;;  %v10457_v26 = vor.u32 %v13611_v37, %v10454_v7  ;;  %v13791_v53 = vld [vmem:[#allocation10 + $0xa44] sm:$0xf]  ;;  %v11174_v10 = vld [vmem:[#allocation10 + $0xa70] sm:$0xf0] }
 0x29f   :  { %4134 = vmatmul.bf16.vlgmr.msra.gmra.mxu0 %v15838_v2  ;;  %v9974_v22 = vld [vmem:[#allocation10 + $0x110] sm:$0xf0]  ;;  %v13587_v19 = vld [vmem:[#allocation10 + $0x3e4] sm:$0xf] }
 0x2a0   :  { %4172 = vmatpush.bf16.msra.mxu3 %v11029_v8  ;;  %4178 = vmatpush.bf16.msrb.mxu0 %v10217_v43  ;;  %v13707_v8 = vld [vmem:[#allocation10 + $0x7a4] sm:$0xf]  ;;  %v10838_v43 = vld [vmem:[#allocation10 + $0x7d0] sm:$0xf0] }
 0x2a1   :  { %4204 = vmatpush.bf16.msrb.mxu2 %v10985_v29  ;;  %4192 = vmatpush.bf16.msra.mxu1 %v10553_v42  ;;  %v13803_v29 = vld [vmem:[#allocation10 + $0xaa4] sm:$0xf]  ;;  %v10841_v41 = vor.u32 %v13707_v8, %v10838_v43  ;;  %v10406_v42 = vld [vmem:[#allocation10 + $0x470] sm:$0xf0] }
 0x2a2   :  { %4160 = vmatmul.bf16.vlgmr.msra.gmra.mxu2 %v15844_v23  ;;  %v10409_v61 = vor.u32 %v13599_v40, %v10406_v42  ;;  %v13683_v33 = vld [vmem:[#allocation10 + $0x6e4] sm:$0xf]  ;;  %v10742_v36 = vld [vmem:[#allocation10 + $0x710] sm:$0xf0] }
 0x2a3   :  { %4173 = vmatmul.bf16.vlgmr.msra.gmra.mxu3 %v15846_v56  ;;  %v13779_v8 = vld [vmem:[#allocation10 + $0x9e4] sm:$0xf]  ;;  %v11126_v43 = vld [vmem:[#allocation10 + $0xa10] sm:$0xf0] }
 0x2a4   :  { %4217 = vmatpush.bf16.msrb.mxu3 %v11369_v31  ;;  %4179 = vmatpush.bf16.msrb.mxu0 %v10169_v20  ;;  %v3941_v31 = vadd.f32 %v3940_v28, %v3927_v51  ;;  %v11225_v20 = vor.u32 %v13803_v29, %v11222_v0  ;;  %v3942_v51 = vpop.f32.mrf.mxu1  ;;  %v9977_v29 = vor.u32 %v13491_v49, %v9974_v22  ;;  %v10310_v40 = vld [vmem:[#allocation10 + $0x3b0] sm:$0xf0]  ;;  %v13563_v49 = vld [vmem:[#allocation10 + $0x324] sm:$0xf] }
 0x2a5   :  { %4205 = vmatpush.bf16.msrb.mxu2 %v10937_v35  ;;  %4193 = vmatpush.bf16.msra.mxu1 %v10505_v45  ;;  %v13695_v35 = vld [vmem:[#allocation10 + $0x744] sm:$0xf]  ;;  %v3953_v45 = vpop.f32.mrf.mxu2  ;;  %v3929_v7 = vpop.f32.mrf.mxu0  ;;  %v10262_v22 = vld [vmem:[#allocation10 + $0x350] sm:$0xf0]  ;;  %v10988_v51 = vld [vmem:[#allocation10 + $0x8c8] sm:$0xf] }
 0x2a6   :  { %v10793_v5 = vor.u32 %v13695_v35, %v10790_v55  ;;  %v3954_v37 = vadd.f32 %v3953_v45, %v3941_v31  ;;  %v10694_v31 = vld [vmem:[#allocation10 + $0x6b0] sm:$0xf0]  ;;  %v13767_v35 = vld [vmem:[#allocation10 + $0x984] sm:$0xf]  ;;  %v10604_v7 = vld [vmem:[#allocation10 + $0x5c8] sm:$0xf] }
 0x2a7   :  { %v11078_v55 = vld [vmem:[#allocation10 + $0x9b0] sm:$0xf0] }
 0x2a8   :  { %4218 = vmatpush.bf16.msrb.mxu3 %v11321_v14  ;;  %4180 = vmatpush.bf16.msrb.mxu0 %v10121_v34  ;;  %v10025_v14 = vor.u32 %v13503_v18, %v10022_v57  ;;  %v11177_v34 = vor.u32 %v13791_v53, %v11174_v10  ;;  %v13575_v18 = vld [vmem:[#allocation10 + $0x384] sm:$0xf]  ;;  %v11129_v57 = vor.u32 %v13779_v8, %v11126_v43  ;;  %v13654_v43 = vld [vmem:[#allocation10 + $0x5f4] sm:$0xf0] }
 0x2a9   :  { %4206 = vmatpush.bf16.msrb.mxu2 %v10889_v3  ;;  %4194 = vmatpush.bf16.msra.mxu1 %v10457_v26  ;;  %v10358_v3 = vld [vmem:[#allocation10 + $0x410] sm:$0xf0]  ;;  %v13479_v26 = vld [vmem:[#allocation10 + $0x84] sm:$0xf] }
 0x2aa   :  { %v10361_v28 = vor.u32 %v13587_v19, %v10358_v3  ;;  %v13467_v10 = vld [vmem:[#allocation10 + $0x24] sm:$0xf]  ;;  %v10646_v3 = vld [vmem:[#allocation10 + $0x650] sm:$0xf0] }
 0x2ab   :  { %v13659_v19 = vld [vmem:[#allocation10 + $0x624] sm:$0xf] }
 0x2ac   :  { %4219 = vmatpush.bf16.msrb.mxu3 %v11273_v30  ;;  %4181 = vmatpush.bf16.msrb.mxu0 %v10073_v9  ;;  %v3966_v30 = vpop.f32.mrf.mxu3  ;;  %v10745_v9 = vor.u32 %v13683_v33, %v10742_v36  ;;  %v13755_v33 = vld [vmem:[#allocation10 + $0x924] sm:$0xf] }
 0x2ad   :  { %4207 = vmatpush.bf16.msrb.mxu2 %v10841_v41  ;;  %4195 = vmatpush.bf16.msra.mxu1 %v10409_v61  ;;  %v3967_v0 = vadd.f32 %v3966_v30, %v3954_v37  ;;  %v9926_v41 = vld [vmem:[#allocation10 + $0xb0] sm:$0xf0]  ;;  %v10313_v61 = vor.u32 %v13575_v18, %v10310_v40  ;;  %v3955_v45 = vpop.f32.mrf.mxu2  ;;  %v10220_v37 = vld [vmem:[#allocation10 + $0x2c8] sm:$0xf]  ;;  %v13558_v30 = vld [vmem:[#allocation10 + $0x2f4] sm:$0xf0] }
 0x2ae   :  { %v9929_v53 = vor.u32 %v13479_v26, %v9926_v41  ;;  %v13846_v26 = vld [vmem:[#allocation10 + $0xbf4] sm:$0xf0]  ;;  %v10221_v18 = vor.u32 %v13558_v30, %v10220_v37  ;;  %v11276_v30 = vld [vmem:[#allocation10 + $0xb08] sm:$0xf] }
 0x2af   :  { %v15932_v42 = vadd.f32 %v3967_v0, %v15140_v16  ;;  %v11030_v16 = vld [vmem:[#allocation10 + $0x950] sm:$0xf0]  ;;  %v10265_v0 = vor.u32 %v13563_v49, %v10262_v22  ;;  %v13534_v45 = vld [vmem:[#allocation10 + $0x234] sm:$0xf0] }
 0x2b0   :  { %4220 = vmatpush.bf16.msrb.mxu3 %v11225_v20  ;;  %4182 = vmatpush.bf16.msrb.mxu0 %v10025_v14  ;;  %v13671_v20 = vld [vmem:[#allocation10 + $0x684] sm:$0xf]  ;;  %v9878_v14 = vld [vmem:[#allocation10 + $0x50] sm:$0xf0]  ;;  %v11033_v41 = vor.u32 %v13755_v33, %v11030_v16  ;;  %v13630_v16 = vld [vmem:[#allocation10 + $0x534] sm:$0xf0] }
 0x2b1   :  { %4208 = vmatpush.bf16.msrb.mxu2 %v10793_v5  ;;  %4196 = vmatpush.bf16.msra.mxu1 %v10361_v28  ;;  %v10697_v5 = vor.u32 %v13671_v20, %v10694_v31  ;;  %v9881_v8 = vor.u32 %v13467_v10, %v9878_v14  ;;  %v10649_v28 = vor.u32 %v13659_v19, %v10646_v3  ;;  %v10172_v20 = vld [vmem:[#allocation10 + $0x268] sm:$0xf]  ;;  %v13546_v31 = vld [vmem:[#allocation10 + $0x294] sm:$0xf0] }
 0x2b2   :  { %v10940_v10 = vld [vmem:[#allocation10 + $0x868] sm:$0xf]  ;;  %v13738_v14 = vld [vmem:[#allocation10 + $0x894] sm:$0xf0]  ;;  %v10173_v49 = vor.u32 %v13546_v31, %v10172_v20 }
 0x2b3   :  { %v10941_v19 = vor.u32 %v13738_v14, %v10940_v10  ;;  %v10508_v3 = vld [vmem:[#allocation10 + $0x508] sm:$0xf]  ;;  %v13726_v37 = vld [vmem:[#allocation10 + $0x834] sm:$0xf0] }
 0x2b4   :  { %4221 = vmatpush.bf16.msrb.mxu3 %v11177_v34  ;;  %4183 = vmatpush.bf16.msrb.mxu0 %v9977_v29  ;;  %v11081_v34 = vor.u32 %v13767_v35, %v11078_v55  ;;  %v3968_v36 = vpop.f32.mrf.mxu3  ;;  %v13750_v29 = vld [vmem:[#allocation10 + $0x8f4] sm:$0xf0]  ;;  %v10556_v35 = vld [vmem:[#allocation10 + $0x568] sm:$0xf] }
 0x2b5   :  { %4209 = vmatpush.bf16.msrb.mxu2 %v10745_v9  ;;  %4197 = vmatpush.bf16.msra.mxu1 %v10313_v61  ;;  %v11372_v9 = vld [vmem:[#allocation10 + $0xbc8] sm:$0xf]  ;;  %v10989_v40 = vor.u32 %v13750_v29, %v10988_v51  ;;  %v13810_v20 = vld [vmem:[#allocation10 + $0xad4] sm:$0xf0] }
 0x2b6   :  { %v11373_v55 = vor.u32 %v13846_v26, %v11372_v9  ;;  %v11324_v61 = vld [vmem:[#allocation10 + $0xb68] sm:$0xf]  ;;  %v13618_v26 = vld [vmem:[#allocation10 + $0x4d4] sm:$0xf0] }
 0x2b7   :  { %v10892_v36 = vld [vmem:[#allocation10 + $0x808] sm:$0xf] }
 0x2b8   :  { %4222 = vmatpush.bf16.msrb.mxu3 %v11129_v57  ;;  %4184 = vmatpush.bf16.msrb.mxu0 %v9929_v53  ;;  %v10605_v57 = vor.u32 %v13654_v43, %v10604_v7  ;;  %v13642_v53 = vld [vmem:[#allocation10 + $0x594] sm:$0xf0]  ;;  %v10509_v43 = vor.u32 %v13630_v16, %v10508_v3  ;;  %v10893_v51 = vor.u32 %v13726_v37, %v10892_v36  ;;  %v10076_v29 = vld [vmem:[#allocation10 + $0x1a8] sm:$0xf] }
 0x2b9   :  { %4210 = vmatpush.bf16.msrb.mxu2 %v10697_v5  ;;  %4198 = vmatpush.bf16.msra.mxu1 %v10265_v0  ;;  %v13834_v5 = vld [vmem:[#allocation10 + $0xb94] sm:$0xf0]  ;;  %v10557_v22 = vor.u32 %v13642_v53, %v10556_v35  ;;  %v10028_v14 = vld [vmem:[#allocation10 + $0x148] sm:$0xf] }
 0x2ba   :  { %v11325_v33 = vor.u32 %v13834_v5, %v11324_v61  ;;  %v13822_v7 = vld [vmem:[#allocation10 + $0xb34] sm:$0xf0]  ;;  %v10412_v5 = vld [vmem:[#allocation10 + $0x448] sm:$0xf] }
 0x2bb   :  { %v13522_v0 = vld [vmem:[#allocation10 + $0x1d4] sm:$0xf0]  ;;  %v11277_v9 = vor.u32 %v13822_v7, %v11276_v30  ;;  %v3992_v31 = vpop.f32.mrf.mxu1  ;;  %v9980_v37 = vld [vmem:[#allocation10 + $0xe8] sm:$0xf] }
 0x2bc   :  { %4223 = vmatpush.bf16.msrb.mxu3 %v11081_v34  ;;  %4185 = vmatpush.bf16.msrb.mxu0 %v9881_v8  ;;  %v10124_v34 = vld [vmem:[#allocation10 + $0x208] sm:$0xf]  ;;  %v10077_v35 = vor.u32 %v13522_v0, %v10076_v29  ;;  %v13510_v61 = vld [vmem:[#allocation10 + $0x174] sm:$0xf0] }
 0x2bd   :  { %4211 = vmatpush.bf16.msrb.mxu2 %v10649_v28  ;;  %4243 = vmatpush.bf16.msrb.mxu1 %v10605_v57  ;;  %v10125_v8 = vor.u32 %v13534_v45, %v10124_v34  ;;  %v10460_v28 = vld [vmem:[#allocation10 + $0x4a8] sm:$0xf]  ;;  %v3979_v57 = vpop.f32.mrf.mxu0  ;;  %v13702_v34 = vld [vmem:[#allocation10 + $0x774] sm:$0xf0] }
 0x2be   :  { %4199 = vmatmul.bf16.vlgmr.msra.gmra.mxu1 %v15840_v32  ;;  %v10461_v53 = vor.u32 %v13618_v26, %v10460_v28  ;;  %v11180_v45 = vld [vmem:[#allocation10 + $0xa48] sm:$0xf]  ;;  %v13798_v3 = vld [vmem:[#allocation10 + $0xa74] sm:$0xf0] }
 0x2bf   :  { %4186 = vmatmul.bf16.vlgmr.msrb.gmra.mxu0 %v15838_v2  ;;  %v13498_v30 = vld [vmem:[#allocation10 + $0x114] sm:$0xf0]  ;;  %v10364_v7 = vld [vmem:[#allocation10 + $0x3e8] sm:$0xf] }
 0x2c0   :  { %4224 = vmatpush.bf16.msrb.mxu3 %v11033_v41  ;;  %4230 = vmatpush.bf16.msra.mxu0 %v10221_v18  ;;  %v10844_v41 = vld [vmem:[#allocation10 + $0x7a8] sm:$0xf]  ;;  %v13714_v18 = vld [vmem:[#allocation10 + $0x7d4] sm:$0xf0] }
 0x2c1   :  { %4256 = vmatpush.bf16.msra.mxu2 %v10989_v40  ;;  %4244 = vmatpush.bf16.msrb.mxu1 %v10557_v22  ;;  %v11228_v40 = vld [vmem:[#allocation10 + $0xaa8] sm:$0xf]  ;;  %v10845_v10 = vor.u32 %v13714_v18, %v10844_v41  ;;  %v13606_v22 = vld [vmem:[#allocation10 + $0x474] sm:$0xf0] }
 0x2c2   :  { %4212 = vmatmul.bf16.vlgmr.msrb.gmra.mxu2 %v15844_v23  ;;  %v10413_v16 = vor.u32 %v13606_v22, %v10412_v5  ;;  %v10748_v29 = vld [vmem:[#allocation10 + $0x6e8] sm:$0xf]  ;;  %v13690_v0 = vld [vmem:[#allocation10 + $0x714] sm:$0xf0] }
 0x2c3   :  { %4225 = vmatmul.bf16.vlgmr.msrb.gmra.mxu3 %v15846_v56  ;;  %v11132_v41 = vld [vmem:[#allocation10 + $0x9e8] sm:$0xf]  ;;  %v13786_v18 = vld [vmem:[#allocation10 + $0xa14] sm:$0xf0] }
 0x2c4   :  { %4269 = vmatpush.bf16.msra.mxu3 %v11373_v55  ;;  %4231 = vmatpush.bf16.msra.mxu0 %v10173_v49  ;;  %v3993_v55 = vadd.f32 %v3992_v31, %v3979_v57  ;;  %v11229_v49 = vor.u32 %v13810_v20, %v11228_v40  ;;  %v3994_v57 = vpop.f32.mrf.mxu1  ;;  %v9981_v40 = vor.u32 %v13498_v30, %v9980_v37  ;;  %v13582_v5 = vld [vmem:[#allocation10 + $0x3b4] sm:$0xf0]  ;;  %v10268_v37 = vld [vmem:[#allocation10 + $0x328] sm:$0xf] }
 0x2c5   :  { %4257 = vmatpush.bf16.msra.mxu2 %v10941_v19  ;;  %4245 = vmatpush.bf16.msrb.mxu1 %v10509_v43  ;;  %v10796_v19 = vld [vmem:[#allocation10 + $0x748] sm:$0xf]  ;;  %v4005_v43 = vpop.f32.mrf.mxu2  ;;  %v3981_v26 = vpop.f32.mrf.mxu0  ;;  %v13570_v30 = vld [vmem:[#allocation10 + $0x354] sm:$0xf0]  ;;  %v13744_v57 = vld [vmem:[#allocation10 + $0x8cc] sm:$0xf] }
 0x2c6   :  { %v10797_v36 = vor.u32 %v13702_v34, %v10796_v19  ;;  %v4006_v28 = vadd.f32 %v4005_v43, %v3993_v55  ;;  %v13678_v55 = vld [vmem:[#allocation10 + $0x6b4] sm:$0xf0]  ;;  %v11084_v19 = vld [vmem:[#allocation10 + $0x988] sm:$0xf]  ;;  %v13648_v26 = vld [vmem:[#allocation10 + $0x5cc] sm:$0xf] }
 0x2c7   :  { %v13774_v34 = vld [vmem:[#allocation10 + $0x9b4] sm:$0xf0] }
 0x2c8   :  { %4270 = vmatpush.bf16.msra.mxu3 %v11325_v33  ;;  %4232 = vmatpush.bf16.msra.mxu0 %v10125_v8  ;;  %v10029_v33 = vor.u32 %v13510_v61, %v10028_v14  ;;  %v11181_v8 = vor.u32 %v13798_v3, %v11180_v45  ;;  %v10316_v14 = vld [vmem:[#allocation10 + $0x388] sm:$0xf]  ;;  %v11133_v61 = vor.u32 %v13786_v18, %v11132_v41  ;;  %v10606_v18 = vld [vmem:[#allocation10 + $0x5f8] sm:$0xf0] }
 0x2c9   :  { %4258 = vmatpush.bf16.msra.mxu2 %v10893_v51  ;;  %4246 = vmatpush.bf16.msrb.mxu1 %v10461_v53  ;;  %v13594_v51 = vld [vmem:[#allocation10 + $0x414] sm:$0xf0]  ;;  %v9932_v53 = vld [vmem:[#allocation10 + $0x88] sm:$0xf] }
 0x2ca   :  { %v10365_v31 = vor.u32 %v13594_v51, %v10364_v7  ;;  %v9884_v3 = vld [vmem:[#allocation10 + $0x28] sm:$0xf]  ;;  %v13666_v51 = vld [vmem:[#allocation10 + $0x654] sm:$0xf0] }
 0x2cb   :  { %v10652_v7 = vld [vmem:[#allocation10 + $0x628] sm:$0xf] }
 0x2cc   :  { %4271 = vmatpush.bf16.msra.mxu3 %v11277_v9  ;;  %4233 = vmatpush.bf16.msra.mxu0 %v10077_v35  ;;  %v4018_v9 = vpop.f32.mrf.mxu3  ;;  %v10749_v35 = vor.u32 %v13690_v0, %v10748_v29  ;;  %v11036_v29 = vld [vmem:[#allocation10 + $0x928] sm:$0xf] }
 0x2cd   :  { %4259 = vmatpush.bf16.msra.mxu2 %v10845_v10  ;;  %4247 = vmatpush.bf16.msrb.mxu1 %v10413_v16  ;;  %v4019_v20 = vadd.f32 %v4018_v9, %v4006_v28  ;;  %v13486_v10 = vld [vmem:[#allocation10 + $0xb4] sm:$0xf0]  ;;  %v10317_v16 = vor.u32 %v13582_v5, %v10316_v14  ;;  %v4007_v43 = vpop.f32.mrf.mxu2  ;;  %v13552_v28 = vld [vmem:[#allocation10 + $0x2cc] sm:$0xf]  ;;  %v10222_v9 = vld [vmem:[#allocation10 + $0x2f8] sm:$0xf0] }
 0x2ce   :  { %v9933_v45 = vor.u32 %v13486_v10, %v9932_v53  ;;  %v11374_v53 = vld [vmem:[#allocation10 + $0xbf8] sm:$0xf0]  ;;  %v10225_v14 = vor.u32 %v13552_v28, %v10222_v9  ;;  %v13816_v9 = vld [vmem:[#allocation10 + $0xb0c] sm:$0xf] }
 0x2cf   :  { %v15939_v22 = vadd.f32 %v4019_v20, %v15328_v1  ;;  %v13762_v1 = vld [vmem:[#allocation10 + $0x954] sm:$0xf0]  ;;  %v10269_v20 = vor.u32 %v13570_v30, %v10268_v37  ;;  %v10126_v43 = vld [vmem:[#allocation10 + $0x238] sm:$0xf0] }
 0x2d0   :  { %4272 = vmatpush.bf16.msra.mxu3 %v11229_v49  ;;  %4234 = vmatpush.bf16.msra.mxu0 %v10029_v33  ;;  %v10700_v49 = vld [vmem:[#allocation10 + $0x688] sm:$0xf]  ;;  %v13474_v33 = vld [vmem:[#allocation10 + $0x54] sm:$0xf0]  ;;  %v11037_v10 = vor.u32 %v13762_v1, %v11036_v29  ;;  %v10510_v1 = vld [vmem:[#allocation10 + $0x538] sm:$0xf0] }
 0x2d1   :  { %4260 = vmatpush.bf16.msra.mxu2 %v10797_v36  ;;  %4248 = vmatpush.bf16.msrb.mxu1 %v10365_v31  ;;  %v10701_v36 = vor.u32 %v13678_v55, %v10700_v49  ;;  %v9885_v41 = vor.u32 %v13474_v33, %v9884_v3  ;;  %v10653_v31 = vor.u32 %v13666_v51, %v10652_v7  ;;  %v13540_v49 = vld [vmem:[#allocation10 + $0x26c] sm:$0xf]  ;;  %v10174_v55 = vld [vmem:[#allocation10 + $0x298] sm:$0xf0] }
 0x2d2   :  { %v13732_v3 = vld [vmem:[#allocation10 + $0x86c] sm:$0xf]  ;;  %v10942_v33 = vld [vmem:[#allocation10 + $0x898] sm:$0xf0]  ;;  %v10177_v37 = vor.u32 %v13540_v49, %v10174_v55 }
 0x2d3   :  { %v10945_v7 = vor.u32 %v13732_v3, %v10942_v33  ;;  %v13624_v51 = vld [vmem:[#allocation10 + $0x50c] sm:$0xf]  ;;  %v10894_v28 = vld [vmem:[#allocation10 + $0x838] sm:$0xf0] }
 0x2d4   :  { %4273 = vmatpush.bf16.msra.mxu3 %v11181_v8  ;;  %4235 = vmatpush.bf16.msra.mxu0 %v9981_v40  ;;  %v11085_v8 = vor.u32 %v13774_v34, %v11084_v19  ;;  %v4020_v0 = vpop.f32.mrf.mxu3  ;;  %v10990_v40 = vld [vmem:[#allocation10 + $0x8f8] sm:$0xf0]  ;;  %v13636_v19 = vld [vmem:[#allocation10 + $0x56c] sm:$0xf] }
 0x2d5   :  { %4261 = vmatpush.bf16.msra.mxu2 %v10749_v35  ;;  %4249 = vmatpush.bf16.msrb.mxu1 %v10317_v16  ;;  %v13840_v35 = vld [vmem:[#allocation10 + $0xbcc] sm:$0xf]  ;;  %v10993_v5 = vor.u32 %v13744_v57, %v10990_v40  ;;  %v11230_v49 = vld [vmem:[#allocation10 + $0xad8] sm:$0xf0] }
 0x2d6   :  { %v11377_v34 = vor.u32 %v13840_v35, %v11374_v53  ;;  %v13828_v16 = vld [vmem:[#allocation10 + $0xb6c] sm:$0xf]  ;;  %v10462_v53 = vld [vmem:[#allocation10 + $0x4d8] sm:$0xf0] }
 0x2d7   :  { %v13720_v0 = vld [vmem:[#allocation10 + $0x80c] sm:$0xf] }
 0x2d8   :  { %4274 = vmatpush.bf16.msra.mxu3 %v11133_v61  ;;  %4236 = vmatpush.bf16.msra.mxu0 %v9933_v45  ;;  %v10609_v61 = vor.u32 %v13648_v26, %v10606_v18  ;;  %v10558_v45 = vld [vmem:[#allocation10 + $0x598] sm:$0xf0]  ;;  %v10513_v18 = vor.u32 %v13624_v51, %v10510_v1  ;;  %v10897_v57 = vor.u32 %v13720_v0, %v10894_v28  ;;  %v13516_v40 = vld [vmem:[#allocation10 + $0x1ac] sm:$0xf] }
 0x2d9   :  { %4262 = vmatpush.bf16.msra.mxu2 %v10701_v36  ;;  %4250 = vmatpush.bf16.msrb.mxu1 %v10269_v20  ;;  %v11326_v36 = vld [vmem:[#allocation10 + $0xb98] sm:$0xf0]  ;;  %v10561_v30 = vor.u32 %v13636_v19, %v10558_v45  ;;  %v13504_v33 = vld [vmem:[#allocation10 + $0x14c] sm:$0xf] }
 0x2da   :  { %v11329_v29 = vor.u32 %v13828_v16, %v11326_v36  ;;  %v11278_v26 = vld [vmem:[#allocation10 + $0xb38] sm:$0xf0]  ;;  %v13600_v36 = vld [vmem:[#allocation10 + $0x44c] sm:$0xf] }
 0x2db   :  { %v10078_v20 = vld [vmem:[#allocation10 + $0x1d8] sm:$0xf0]  ;;  %v11281_v35 = vor.u32 %v13816_v9, %v11278_v26  ;;  %v4044_v55 = vpop.f32.mrf.mxu1  ;;  %v13492_v28 = vld [vmem:[#allocation10 + $0xec] sm:$0xf] }
 0x2dc   :  { %4275 = vmatpush.bf16.msra.mxu3 %v11085_v8  ;;  %4237 = vmatpush.bf16.msra.mxu0 %v9885_v41  ;;  %v13528_v8 = vld [vmem:[#allocation10 + $0x20c] sm:$0xf]  ;;  %v10081_v19 = vor.u32 %v13516_v40, %v10078_v20  ;;  %v10030_v16 = vld [vmem:[#allocation10 + $0x178] sm:$0xf0] }
 0x2dd   :  { %4263 = vmatpush.bf16.msra.mxu2 %v10653_v31  ;;  %4295 = vmatpush.bf16.msra.mxu1 %v10609_v61  ;;  %v10129_v41 = vor.u32 %v13528_v8, %v10126_v43  ;;  %v13612_v31 = vld [vmem:[#allocation10 + $0x4ac] sm:$0xf]  ;;  %v4031_v61 = vpop.f32.mrf.mxu0  ;;  %v10798_v8 = vld [vmem:[#allocation10 + $0x778] sm:$0xf0] }
 0x2de   :  { %4251 = vmatmul.bf16.vlgmr.msrb.gmra.mxu1 %v15840_v32  ;;  %v10465_v45 = vor.u32 %v13612_v31, %v10462_v53  ;;  %v13792_v43 = vld [vmem:[#allocation10 + $0xa4c] sm:$0xf]  ;;  %v11182_v51 = vld [vmem:[#allocation10 + $0xa78] sm:$0xf0] }
 0x2df   :  { %4238 = vmatmul.bf16.vlgmr.msra.gmra.mxu0 %v15838_v2  ;;  %v9982_v9 = vld [vmem:[#allocation10 + $0x118] sm:$0xf0]  ;;  %v13588_v26 = vld [vmem:[#allocation10 + $0x3ec] sm:$0xf] }
 0x2e0   :  { %4276 = vmatpush.bf16.msra.mxu3 %v11037_v10  ;;  %4282 = vmatpush.bf16.msrb.mxu0 %v10225_v14  ;;  %v13708_v10 = vld [vmem:[#allocation10 + $0x7ac] sm:$0xf]  ;;  %v10846_v14 = vld [vmem:[#allocation10 + $0x7d8] sm:$0xf0] }
 0x2e1   :  { %4308 = vmatpush.bf16.msrb.mxu2 %v10993_v5  ;;  %4296 = vmatpush.bf16.msra.mxu1 %v10561_v30  ;;  %v13804_v5 = vld [vmem:[#allocation10 + $0xaac] sm:$0xf]  ;;  %v10849_v3 = vor.u32 %v13708_v10, %v10846_v14  ;;  %v10414_v30 = vld [vmem:[#allocation10 + $0x478] sm:$0xf0] }
 0x2e2   :  { %4264 = vmatmul.bf16.vlgmr.msra.gmra.mxu2 %v15844_v23  ;;  %v10417_v1 = vor.u32 %v13600_v36, %v10414_v30  ;;  %v13684_v40 = vld [vmem:[#allocation10 + $0x6ec] sm:$0xf]  ;;  %v10750_v20 = vld [vmem:[#allocation10 + $0x718] sm:$0xf0] }
 0x2e3   :  { %4277 = vmatmul.bf16.vlgmr.msra.gmra.mxu3 %v15846_v56  ;;  %v13780_v10 = vld [vmem:[#allocation10 + $0x9ec] sm:$0xf]  ;;  %v11134_v14 = vld [vmem:[#allocation10 + $0xa18] sm:$0xf0] }
 0x2e4   :  { %4321 = vmatpush.bf16.msrb.mxu3 %v11377_v34  ;;  %4283 = vmatpush.bf16.msrb.mxu0 %v10177_v37  ;;  %v4045_v34 = vadd.f32 %v4044_v55, %v4031_v61  ;;  %v11233_v37 = vor.u32 %v13804_v5, %v11230_v49  ;;  %v4046_v61 = vpop.f32.mrf.mxu1  ;;  %v9985_v5 = vor.u32 %v13492_v28, %v9982_v9  ;;  %v10318_v36 = vld [vmem:[#allocation10 + $0x3b8] sm:$0xf0]  ;;  %v13564_v28 = vld [vmem:[#allocation10 + $0x32c] sm:$0xf] }
 0x2e5   :  { %4309 = vmatpush.bf16.msrb.mxu2 %v10945_v7  ;;  %4297 = vmatpush.bf16.msra.mxu1 %v10513_v18  ;;  %v13696_v7 = vld [vmem:[#allocation10 + $0x74c] sm:$0xf]  ;;  %v4057_v18 = vpop.f32.mrf.mxu2  ;;  %v4033_v53 = vpop.f32.mrf.mxu0  ;;  %v10270_v9 = vld [vmem:[#allocation10 + $0x358] sm:$0xf0]  ;;  %v11748_v61 = vld [vmem:[#allocation12 + $0x2e0] sm:$0xf] }
 0x2e6   :  { %v10801_v0 = vor.u32 %v13696_v7, %v10798_v8  ;;  %v4058_v31 = vadd.f32 %v4057_v18, %v4045_v34  ;;  %v10702_v34 = vld [vmem:[#allocation10 + $0x6b8] sm:$0xf0]  ;;  %v13768_v7 = vld [vmem:[#allocation10 + $0x98c] sm:$0xf]  ;;  %v11620_v53 = vld [vmem:[#allocation12 + $0x1e0] sm:$0xf] }
 0x2e7   :  { %v11086_v8 = vld [vmem:[#allocation10 + $0x9b8] sm:$0xf0] }
 0x2e8   :  { %4322 = vmatpush.bf16.msrb.mxu3 %v11329_v29  ;;  %4284 = vmatpush.bf16.msrb.mxu0 %v10129_v41  ;;  %v10033_v29 = vor.u32 %v13504_v33, %v10030_v16  ;;  %v11185_v41 = vor.u32 %v13792_v43, %v11182_v51  ;;  %v13576_v33 = vld [vmem:[#allocation10 + $0x38c] sm:$0xf]  ;;  %v11137_v16 = vor.u32 %v13780_v10, %v11134_v14  ;;  %v13909_v14 = vld [vmem:[#allocation12 + $0x1ec] sm:$0xf0] }
 0x2e9   :  { %4310 = vmatpush.bf16.msrb.mxu2 %v10897_v57  ;;  %4298 = vmatpush.bf16.msra.mxu1 %v10465_v45  ;;  %v10366_v57 = vld [vmem:[#allocation10 + $0x418] sm:$0xf0]  ;;  %v13480_v45 = vld [vmem:[#allocation10 + $0x8c] sm:$0xf] }
 0x2ea   :  { %v10369_v55 = vor.u32 %v13588_v26, %v10366_v57  ;;  %v13468_v51 = vld [vmem:[#allocation10 + $0x2c] sm:$0xf]  ;;  %v10654_v57 = vld [vmem:[#allocation10 + $0x658] sm:$0xf0] }
 0x2eb   :  { %v13660_v26 = vld [vmem:[#allocation10 + $0x62c] sm:$0xf] }
 0x2ec   :  { %4323 = vmatpush.bf16.msrb.mxu3 %v11281_v35  ;;  %4285 = vmatpush.bf16.msrb.mxu0 %v10081_v19  ;;  %v4070_v35 = vpop.f32.mrf.mxu3  ;;  %v10753_v19 = vor.u32 %v13684_v40, %v10750_v20  ;;  %v13756_v40 = vld [vmem:[#allocation10 + $0x92c] sm:$0xf] }
 0x2ed   :  { %4311 = vmatpush.bf16.msrb.mxu2 %v10849_v3  ;;  %4299 = vmatpush.bf16.msra.mxu1 %v10417_v1  ;;  %v4071_v49 = vadd.f32 %v4070_v35, %v4058_v31  ;;  %v9934_v3 = vld [vmem:[#allocation10 + $0xb8] sm:$0xf0]  ;;  %v10321_v1 = vor.u32 %v13576_v33, %v10318_v36  ;;  %v4059_v18 = vpop.f32.mrf.mxu2  ;;  %v11492_v31 = vld [vmem:[#allocation12 + $0xe0] sm:$0xf]  ;;  %v13877_v35 = vld [vmem:[#allocation12 + $0xec] sm:$0xf0] }
 0x2ee   :  { %v9937_v43 = vor.u32 %v13480_v45, %v9934_v3  ;;  %v13973_v45 = vld [vmem:[#allocation12 + $0x3ec] sm:$0xf0]  ;;  %v11493_v33 = vor.u32 %v13877_v35, %v11492_v31  ;;  %v11844_v35 = vld [vmem:[#allocation12 + $0x3a0] sm:$0xf] }
 0x2ef   :  { %v15946_v30 = vadd.f32 %v4071_v49, %v15213_v21  ;;  %v11038_v21 = vld [vmem:[#allocation10 + $0x958] sm:$0xf0]  ;;  %v10273_v49 = vor.u32 %v13564_v28, %v10270_v9  ;;  %v13869_v18 = vld [vmem:[#allocation12 + $0xac] sm:$0xf0] }
 0x2f0   :  { %4324 = vmatpush.bf16.msrb.mxu3 %v11233_v37  ;;  %4286 = vmatpush.bf16.msrb.mxu0 %v10033_v29  ;;  %v13672_v37 = vld [vmem:[#allocation10 + $0x68c] sm:$0xf]  ;;  %v9886_v29 = vld [vmem:[#allocation10 + $0x58] sm:$0xf0]  ;;  %v11041_v3 = vor.u32 %v13756_v40, %v11038_v21  ;;  %v13901_v21 = vld [vmem:[#allocation12 + $0x1ac] sm:$0xf0] }
 0x2f1   :  { %4312 = vmatpush.bf16.msrb.mxu2 %v10801_v0  ;;  %4300 = vmatpush.bf16.msra.mxu1 %v10369_v55  ;;  %v10705_v0 = vor.u32 %v13672_v37, %v10702_v34  ;;  %v9889_v10 = vor.u32 %v13468_v51, %v9886_v29  ;;  %v10657_v55 = vor.u32 %v13660_v26, %v10654_v57  ;;  %v11476_v37 = vld [vmem:[#allocation12 + $0xc0] sm:$0xf]  ;;  %v13873_v34 = vld [vmem:[#allocation12 + $0xcc] sm:$0xf0] }
 0x2f2   :  { %v11732_v51 = vld [vmem:[#allocation12 + $0x2c0] sm:$0xf]  ;;  %v13937_v29 = vld [vmem:[#allocation12 + $0x2cc] sm:$0xf0]  ;;  %v11477_v28 = vor.u32 %v13873_v34, %v11476_v37 }
 0x2f3   :  { %v11733_v26 = vor.u32 %v13937_v29, %v11732_v51  ;;  %v11588_v57 = vld [vmem:[#allocation12 + $0x1a0] sm:$0xf]  ;;  %v13933_v31 = vld [vmem:[#allocation12 + $0x2ac] sm:$0xf0] }
 0x2f4   :  { %4325 = vmatpush.bf16.msrb.mxu3 %v11185_v41  ;;  %4287 = vmatpush.bf16.msrb.mxu0 %v9985_v5  ;;  %v11089_v41 = vor.u32 %v13768_v7, %v11086_v8  ;;  %v4072_v20 = vpop.f32.mrf.mxu3  ;;  %v13941_v5 = vld [vmem:[#allocation12 + $0x2ec] sm:$0xf0]  ;;  %v11604_v7 = vld [vmem:[#allocation12 + $0x1c0] sm:$0xf] }
 0x2f5   :  { %4313 = vmatpush.bf16.msrb.mxu2 %v10753_v19  ;;  %4301 = vmatpush.bf16.msra.mxu1 %v10321_v1  ;;  %v11876_v19 = vld [vmem:[#allocation12 + $0x3e0] sm:$0xf]  ;;  %v11749_v36 = vor.u32 %v13941_v5, %v11748_v61  ;;  %v13893_v29 = vld [vmem:[#allocation12 + $0x16c] sm:$0xf0] }
 0x2f6   :  { %v11877_v8 = vor.u32 %v13973_v45, %v11876_v19  ;;  %v11860_v1 = vld [vmem:[#allocation12 + $0x3c0] sm:$0xf]  ;;  %v13897_v19 = vld [vmem:[#allocation12 + $0x18c] sm:$0xf0] }
 0x2f7   :  { %v11716_v20 = vld [vmem:[#allocation12 + $0x2a0] sm:$0xf] }
 0x2f8   :  { %4326 = vmatpush.bf16.msrb.mxu3 %v11137_v16  ;;  %4288 = vmatpush.bf16.msrb.mxu0 %v9937_v43  ;;  %v11621_v16 = vor.u32 %v13909_v14, %v11620_v53  ;;  %v13905_v43 = vld [vmem:[#allocation12 + $0x1cc] sm:$0xf0]  ;;  %v11589_v14 = vor.u32 %v13901_v21, %v11588_v57  ;;  %v11717_v61 = vor.u32 %v13933_v31, %v11716_v20  ;;  %v11444_v5 = vld [vmem:[#allocation12 + $0x80] sm:$0xf] }
 0x2f9   :  { %4314 = vmatpush.bf16.msrb.mxu2 %v10705_v0  ;;  %4302 = vmatpush.bf16.msra.mxu1 %v10273_v49  ;;  %v13969_v0 = vld [vmem:[#allocation12 + $0x3cc] sm:$0xf0]  ;;  %v11605_v9 = vor.u32 %v13905_v43, %v11604_v7  ;;  %v11572_v49 = vld [vmem:[#allocation12 + $0x180] sm:$0xf] }
 0x2fa   :  { %v11861_v40 = vor.u32 %v13969_v0, %v11860_v1  ;;  %v13965_v53 = vld [vmem:[#allocation12 + $0x3ac] sm:$0xf0]  ;;  %v11700_v45 = vld [vmem:[#allocation12 + $0x280] sm:$0xf]  ;;  %v11573_v37 = vor.u32 %v13897_v19, %v11572_v49 }
 0x2fb   :  { %v11428_v7 = vld [vmem:[#allocation12 + $0x60] sm:$0xf]  ;;  %v13925_v0 = vld [vmem:[#allocation12 + $0x26c] sm:$0xf0] }
 0x2fc   :  { %4327 = vmatpush.bf16.msrb.mxu3 %v11089_v41  ;;  %4289 = vmatpush.bf16.msrb.mxu0 %v9889_v10  ;;  %v11460_v41 = vld [vmem:[#allocation12 + $0xa0] sm:$0xf]  ;;  %v13857_v21 = vld [vmem:[#allocation12 + $0x4c] sm:$0xf0] }
 0x2fd   :  { %4315 = vmatpush.bf16.msrb.mxu2 %v10657_v55  ;;  %5140 = vmatpush.bf16.msrb.mxu1 %v11621_v16  ;;  %v11461_v10 = vor.u32 %v13869_v18, %v11460_v41  ;;  %v11845_v55 = vor.u32 %v13965_v53, %v11844_v35  ;;  %v4096_v16 = vpop.f32.mrf.mxu1  ;;  %v11556_v43 = vld [vmem:[#allocation12 + $0x160] sm:$0xf]  ;;  %v13889_v53 = vld [vmem:[#allocation12 + $0x14c] sm:$0xf0] }
 0x2fe   :  { %4303 = vmatmul.bf16.vlgmr.msra.gmra.mxu1 %v15840_v32  ;;  %v13929_v32 = vld [vmem:[#allocation12 + $0x28c] sm:$0xf0]  ;;  %v11684_v1 = vld [vmem:[#allocation12 + $0x260] sm:$0xf]  ;;  %v11557_v18 = vor.u32 %v13893_v29, %v11556_v43 }
 0x2ff   :  { %4290 = vmatmul.bf16.vlgmr.msrb.gmra.mxu0 %v15838_v2  ;;  %v13865_v2 = vld [vmem:[#allocation12 + $0x8c] sm:$0xf0]  ;;  %v11701_v34 = vor.u32 %v13929_v32, %v11700_v45  ;;  %v11685_v57 = vor.u32 %v13925_v0, %v11684_v1  ;;  %v11540_v20 = vld [vmem:[#allocation12 + $0x140] sm:$0xf] }
 0x300   :  { %4328 = vmatpush.bf16.msrb.mxu3 %v11041_v3  ;;  %5122 = vmatpush.bf16.msra.mxu0 %v11493_v33  ;;  %v4083_v3 = vpop.f32.mrf.mxu0  ;;  %v13961_v33 = vld [vmem:[#allocation12 + $0x38c] sm:$0xf0]  ;;  %v11541_v32 = vor.u32 %v13889_v53, %v11540_v20  ;;  %v11380_v29 = vld [vmem:[#allocation12] sm:$0xf]  ;;  %v11494_v53 = vld [vmem:[#allocation12 + $0xf0] sm:$0xf0] }
 0x301   :  { %5158 = vmatpush.bf16.msra.mxu2 %v11749_v36  ;;  %5141 = vmatpush.bf16.msrb.mxu1 %v11605_v9  ;;  %v4097_v36 = vadd.f32 %v4096_v16, %v4083_v3  ;;  %v11812_v9 = vld [vmem:[#allocation12 + $0x360] sm:$0xf]  ;;  %v13953_v49 = vld [vmem:[#allocation12 + $0x34c] sm:$0xf0] }
 0x302   :  { %4316 = vmatmul.bf16.vlgmr.msrb.gmra.mxu2 %v15844_v23  ;;  %v11828_v23 = vld [vmem:[#allocation12 + $0x380] sm:$0xf]  ;;  %v13949_v43 = vld [vmem:[#allocation12 + $0x32c] sm:$0xf0] }
 0x303   :  { %4329 = vmatmul.bf16.vlgmr.msrb.gmra.mxu3 %v15846_v56  ;;  %v11445_v56 = vor.u32 %v13865_v2, %v11444_v5  ;;  %v11829_v51 = vor.u32 %v13961_v33, %v11828_v23  ;;  %v11796_v2 = vld [vmem:[#allocation12 + $0x340] sm:$0xf]  ;;  %v13853_v33 = vld [vmem:[#allocation12 + $0x2c] sm:$0xf0] }
 0x304   :  { %5176 = vmatpush.bf16.msra.mxu3 %v11877_v8  ;;  %5123 = vmatpush.bf16.msra.mxu0 %v11477_v28  ;;  %v13861_v8 = vld [vmem:[#allocation12 + $0x6c] sm:$0xf0]  ;;  %v11902_v28 = vmul.f32 -1.442695, %v15908_v11  ;;  %v11396_v23 = vld [vmem:[#allocation12 + $0x20] sm:$0xf] }
 0x305   :  { %5159 = vmatpush.bf16.msra.mxu2 %v11733_v26  ;;  %5142 = vmatpush.bf16.msrb.mxu1 %v11589_v14  ;;  %v13957_v26 = vld [vmem:[#allocation12 + $0x36c] sm:$0xf0]  ;;  %v11429_v41 = vor.u32 %v13861_v8, %v11428_v7  ;;  %v4109_v35 = vpop.f32.mrf.mxu2  ;;  %v11524_v16 = vld [vmem:[#allocation12 + $0x120] sm:$0xf] }
 0x306   :  { %v11813_v31 = vor.u32 %v13957_v26, %v11812_v9  ;;  %v13921_v14 = vld [vmem:[#allocation12 + $0x24c] sm:$0xf0]  ;;  %14480 = vpow2.f32 %v11902_v28  ;;  %v4122_v11 = vpop.f32.mrf.mxu3  ;;  %v11780_v8 = vld [vmem:[#allocation12 + $0x320] sm:$0xf] }
 0x307   :  { %v13849_v9 = vld [vmem:[#allocation12 + $0xc] sm:$0xf0]  ;;  %v11508_v26 = vld [vmem:[#allocation12 + $0x100] sm:$0xf] }
 0x308   :  { %5177 = vmatpush.bf16.msra.mxu3 %v11861_v40  ;;  %5124 = vmatpush.bf16.msra.mxu0 %v11461_v10  ;;  %v11412_v40 = vld [vmem:[#allocation12 + $0x40] sm:$0xf]  ;;  %v4085_v5 = vpop.f32.mrf.mxu0 }
 0x309   :  { %5160 = vmatpush.bf16.msra.mxu2 %v11717_v61  ;;  %5143 = vmatpush.bf16.msrb.mxu1 %v11573_v37  ;;  %v11668_v10 = vld [vmem:[#allocation12 + $0x240] sm:$0xf]  ;;  %v4110_v61 = vadd.f32 %v4109_v35, %v4097_v36  ;;  %v11413_v19 = vor.u32 %v13857_v21, %v11412_v40  ;;  %v13885_v37 = vld [vmem:[#allocation12 + $0x12c] sm:$0xf0]  ;;  %v13875_v35 = vld [vmem:[#allocation12 + $0xe4] sm:$0xf] }
 0x30a   :  { %v11669_v3 = vor.u32 %v13921_v14, %v11668_v10  ;;  %v13917_v36 = vld [vmem:[#allocation12 + $0x22c] sm:$0xf0]  ;;  %v11525_v0 = vor.u32 %v13885_v37, %v11524_v16  ;;  %v11636_v40 = vld [vmem:[#allocation12 + $0x200] sm:$0xf]  ;;  %v11381_v14 = vor.u32 %v13849_v9, %v11380_v29  ;;  %v11478_v16 = vld [vmem:[#allocation12 + $0xd0] sm:$0xf0] }
 0x30b   :  { %v4123_v45 = vadd.f32 %v4122_v11, %v4110_v61  ;;  %v13913_v21 = vld [vmem:[#allocation12 + $0x20c] sm:$0xf0]  ;;  %v13907_v61 = vld [vmem:[#allocation12 + $0x1e4] sm:$0xf]  ;;  %v11622_v11 = vld [vmem:[#allocation12 + $0x1f0] sm:$0xf0] }
 0x30c   :  { %5178 = vmatpush.bf16.msra.mxu3 %v11845_v55  ;;  %5125 = vmatpush.bf16.msra.mxu0 %v11445_v56  ;;  %v4098_v55 = vpop.f32.mrf.mxu1  ;;  %v11797_v56 = vor.u32 %v13953_v49, %v11796_v2  ;;  %v14481_v1 = vpop.eup %14480  ;;  %v11637_v2 = vor.u32 %v13913_v21, %v11636_v40  ;;  %v11606_v37 = vld [vmem:[#allocation12 + $0x1d0] sm:$0xf0]  ;;  %v13967_v29 = vld [vmem:[#allocation12 + $0x3c4] sm:$0xf] }
 0x30d   :  { %5161 = vmatpush.bf16.msra.mxu2 %v11701_v34  ;;  %5144 = vmatpush.bf16.msrb.mxu1 %v11557_v18  ;;  %v11652_v34 = vld [vmem:[#allocation12 + $0x220] sm:$0xf]  ;;  %v15954_v7 = vadd.f32 %v4123_v45, %v15232_v39  ;;  %v11781_v18 = vor.u32 %v13949_v43, %v11780_v8  ;;  %v15956_v10 = vadd.f32 1.0, %v14481_v1  ;;  %v11497_v55 = vor.u32 %v13875_v35, %v11494_v53  ;;  %v11750_v45 = vld [vmem:[#allocation12 + $0x2f0] sm:$0xf0] }
 0x30e   :  { %v11653_v28 = vor.u32 %v13917_v36, %v11652_v34  ;;  %v11764_v39 = vld [vmem:[#allocation12 + $0x300] sm:$0xf]  ;;  %v4124_v20 = vpop.f32.mrf.mxu3  ;;  %v13935_v43 = vld [vmem:[#allocation12 + $0x2c4] sm:$0xf]  ;;  %v11462_v9 = vld [vmem:[#allocation12 + $0xb0] sm:$0xf0] }
 0x30f   :  { %14482 = vrcp.f32 %v15956_v10  ;;  %v11718_v20 = vld [vmem:[#allocation12 + $0x2b0] sm:$0xf0]  ;;  %vm5691_vm9 = vweird.f32 %v15956_v10 }
 0x310   :  { %5179 = vmatpush.bf16.msra.mxu3 %v11829_v51  ;;  %5126 = vmatpush.bf16.msra.mxu0 %v11429_v41  ;;  %v11397_v51 = vor.u32 %v13853_v33, %v11396_v23  ;;  %v13881_v41 = vld [vmem:[#allocation12 + $0x10c] sm:$0xf0]  ;;  %v11878_v23 = vld [vmem:[#allocation12 + $0x3f0] sm:$0xf0]  ;;  %v13871_v33 = vld [vmem:[#allocation12 + $0xc4] sm:$0xf] }
 0x311   :  { %5162 = vmatpush.bf16.msra.mxu2 %v11685_v57  ;;  %5145 = vmatpush.bf16.msrb.mxu1 %v11541_v32  ;;  %v4111_v57 = vpop.f32.mrf.mxu2  ;;  %v11509_v5 = vor.u32 %v13881_v41, %v11508_v26  ;;  %v13971_v32 = vld [vmem:[#allocation12 + $0x3e4] sm:$0xf]  ;;  %v11481_v8 = vor.u32 %v13871_v33, %v11478_v16  ;;  %v11590_v41 = vld [vmem:[#allocation12 + $0x1b0] sm:$0xf0] }
 0x312   :  { %v11881_v36 = vor.u32 %v13971_v32, %v11878_v23  ;;  %v13899_v26 = vld [vmem:[#allocation12 + $0x1a4] sm:$0xf]  ;;  %v11846_v53 = vld [vmem:[#allocation12 + $0x3b0] sm:$0xf0] }
 0x313   :  { %v11593_v35 = vor.u32 %v13899_v26, %v11590_v41  ;;  %v11702_v23 = vld [vmem:[#allocation12 + $0x290] sm:$0xf0]  ;;  %v13959_v33 = vld [vmem:[#allocation12 + $0x384] sm:$0xf] }
 0x314   :  { %5180 = vmatpush.bf16.msra.mxu3 %v11813_v31  ;;  %5127 = vmatpush.bf16.msra.mxu0 %v11413_v19  ;;  %v13945_v31 = vld [vmem:[#allocation12 + $0x30c] sm:$0xf0]  ;;  %v13939_v19 = vld [vmem:[#allocation12 + $0x2e4] sm:$0xf]  ;;  %v11686_v26 = vld [vmem:[#allocation12 + $0x270] sm:$0xf0] }
 0x315   :  { %5163 = vmatpush.bf16.msra.mxu2 %v11669_v3  ;;  %5146 = vmatpush.bf16.msrb.mxu1 %v11525_v0  ;;  %v11765_v49 = vor.u32 %v13945_v31, %v11764_v39  ;;  %v11625_v3 = vor.u32 %v13907_v61, %v11622_v11  ;;  %v11753_v34 = vor.u32 %v13939_v19, %v11750_v45  ;;  %v11862_v0 = vld [vmem:[#allocation12 + $0x3d0] sm:$0xf0]  ;;  %v15963_v57 = vpop.eup %14482  ;;  %v13931_v39 = vld [vmem:[#allocation12 + $0x2a4] sm:$0xf] }
 0x316   :  { %v11865_v40 = vor.u32 %v13967_v29, %v11862_v0  ;;  %v13963_v31 = vld [vmem:[#allocation12 + $0x3a4] sm:$0xf]  ;;  %v11446_v61 = vld [vmem:[#allocation12 + $0x90] sm:$0xf0]  ;;  %vm5692_vm0 = vweird.f32 %v15963_v57 }
 0x317   :  { %v13895_v11 = vld [vmem:[#allocation12 + $0x184] sm:$0xf]  ;;  %v11849_v45 = vor.u32 %v13963_v31, %v11846_v53  ;;  %vm15992_vm10 = vmor %vm5691_vm9, %vm5692_vm0 }
 0x318   :  { %5181 = vmatpush.bf16.msra.mxu3 %v11797_v56  ;;  %5128 = vmatpush.bf16.msra.mxu0 %v11397_v51  ;;  %v13903_v56 = vld [vmem:[#allocation12 + $0x1c4] sm:$0xf]  ;;  %v11734_v51 = vld [vmem:[#allocation12 + $0x2d0] sm:$0xf0] }
 0x319   :  { %5164 = vmatpush.bf16.msra.mxu2 %v11653_v28  ;;  %5147 = vmatpush.bf16.msrb.mxu1 %v11509_v5  ;;  %v11609_v1 = vor.u32 %v13903_v56, %v11606_v37  ;;  %v13867_v28 = vld [vmem:[#allocation12 + $0xa4] sm:$0xf]  ;;  %v11574_v5 = vld [vmem:[#allocation12 + $0x190] sm:$0xf0] }
 0x31a   :  { %v11465_v21 = vor.u32 %v13867_v28, %v11462_v9  ;;  %v11577_v56 = vor.u32 %v13895_v11, %v11574_v5  ;;  %v11830_v37 = vld [vmem:[#allocation12 + $0x390] sm:$0xf0]  ;;  %v13923_v9 = vld [vmem:[#allocation12 + $0x264] sm:$0xf] }
 0x31b   :  { %v4148_v19 = vpop.f32.mrf.mxu1  ;;  %v11833_v0 = vor.u32 %v13959_v33, %v11830_v37  ;;  %v13955_v41 = vld [vmem:[#allocation12 + $0x364] sm:$0xf] }
 0x31c   :  { %5182 = vmatpush.bf16.msra.mxu3 %v11781_v18  ;;  %5129 = vmatpush.bf16.msra.mxu0 %v11381_v14  ;;  %v11737_v18 = vor.u32 %v13935_v43, %v11734_v51  ;;  %v13863_v14 = vld [vmem:[#allocation12 + $0x84] sm:$0xf]  ;;  %v11558_v51 = vld [vmem:[#allocation12 + $0x170] sm:$0xf0] }
 0x31d   :  { %5165 = vmatpush.bf16.msra.mxu2 %v11637_v2  ;;  %5212 = vmatpush.bf16.msra.mxu1 %v11625_v3  ;;  %v5687_v2 = vmul.f32 %v15963_v57, %v15956_v10  ;;  %v11449_v32 = vor.u32 %v13863_v14, %v11446_v61  ;;  %v13927_v3 = vld [vmem:[#allocation12 + $0x284] sm:$0xf]  ;;  %v11542_v61 = vld [vmem:[#allocation12 + $0x150] sm:$0xf0] }
 0x31e   :  { %5148 = vmatmul.bf16.vlgmr.msrb.gmra.mxu1 %v15836_v47  ;;  %v13891_v43 = vld [vmem:[#allocation12 + $0x164] sm:$0xf] }
 0x31f   :  { %5130 = vmatmul.bf16.vlgmr.msra.gmra.mxu0 %v15834_v15  ;;  %v5688_v29 = vsub.f32 1.0, %v5687_v2  ;;  %v13887_v14 = vld [vmem:[#allocation12 + $0x144] sm:$0xf] }
 0x320   :  { %5183 = vmatpush.bf16.msra.mxu3 %v11765_v49  ;;  %5194 = vmatpush.bf16.msrb.mxu0 %v11497_v55  ;;  %v4135_v49 = vpop.f32.mrf.mxu0  ;;  %v11721_v55 = vor.u32 %v13931_v39, %v11718_v20  ;;  %v11414_v39 = vld [vmem:[#allocation12 + $0x50] sm:$0xf0]  ;;  %v14662_v2 = vld [vmem:[#allocation2 + $0x50] sm:$0xff] }
 0x321   :  { %5166 = vmatmul.bf16.vlgmr.msra.gmra.mxu2 %v15842_v4  ;;  %5213 = vmatpush.bf16.msra.mxu1 %v11609_v1  ;;  %v4149_v16 = vadd.f32 %v4148_v19, %v4135_v49  ;;  %v11705_v1 = vor.u32 %v13927_v3, %v11702_v23  ;;  %v15972_v49 = vpack.c.bf16 %v14662_v2, %v14662_v2  ;;  %v13919_v37 = vld [vmem:[#allocation12 + $0x244] sm:$0xf] }
 0x322   :  { %5230 = vmatpush.bf16.msrb.mxu2 %v11753_v34  ;;  %v13859_v34 = vld [vmem:[#allocation12 + $0x64] sm:$0xf]  ;;  %v5689_v3 = vmul.f32 %v15963_v57, %v5688_v29 }
 0x323   :  { %5184 = vmatmul.bf16.vlgmr.msra.gmra.mxu3 %v15849_v52  ;;  %v4150_v23 = vpop.f32.mrf.mxu1  ;;  %v13883_v29 = vld [vmem:[#allocation12 + $0x124] sm:$0xf] }
 0x324   :  { %5248 = vmatpush.bf16.msrb.mxu3 %v11881_v36  ;;  %5195 = vmatpush.bf16.msrb.mxu0 %v11481_v8  ;;  %v11430_v36 = vld [vmem:[#allocation12 + $0x70] sm:$0xf0]  ;;  %v11903_v8 = vmul.f32 -1.442695, %v15911_v6  ;;  %v13879_v2 = vld [vmem:[#allocation12 + $0x104] sm:$0xf] }
 0x325   :  { %5214 = vmatpush.bf16.msra.mxu1 %v11593_v35  ;;  %v11433_v28 = vor.u32 %v13859_v34, %v11430_v36  ;;  %v4161_v20 = vpop.f32.mrf.mxu2  ;;  %v14660_v6 = vld [vmem:[#allocation2 + $0x40] sm:$0xff]  ;;  %v14661_v35 = vld [vmem:[#allocation2 + $0x48] sm:$0xff]  ;;  %v13951_v36 = vld [vmem:[#allocation12 + $0x344] sm:$0xf] }
 0x326   :  { %5231 = vmatpush.bf16.msrb.mxu2 %v11737_v18  ;;  %v11561_v18 = vor.u32 %v13891_v43, %v11558_v51  ;;  %14484 = vpow2.f32 %v11903_v8  ;;  %v15968_v31 = vpack.c.bf16 %v14660_v6, %v14660_v6  ;;  %v15970_v53 = vpack.c.bf16 %v14661_v35, %v14661_v35  ;;  %v4174_v5 = vpop.f32.mrf.mxu3  ;;  %v11670_v34 = vld [vmem:[#allocation12 + $0x250] sm:$0xf0]  ;;  %v13947_v35 = vld [vmem:[#allocation12 + $0x324] sm:$0xf] }
 0x327   :  { %v4162_v11 = vadd.f32 %v4161_v20, %v4149_v16  ;;  %v633_v16 = vadd.f32 %v15863_v44, %v15186_v59  ;;  %v11545_v43 = vor.u32 %v13887_v14, %v11542_v61  ;;  %v11798_v51 = vld [vmem:[#allocation12 + $0x350] sm:$0xf0]  ;;  %v11673_v44 = vor.u32 %v13919_v37, %v11670_v34 }
 0x328   :  { %5249 = vmatpush.bf16.msrb.mxu3 %v11865_v40  ;;  %5196 = vmatpush.bf16.msrb.mxu0 %v11465_v21  ;;  %v11814_v40 = vld [vmem:[#allocation12 + $0x370] sm:$0xf0]  ;;  %v13855_v21 = vld [vmem:[#allocation12 + $0x44] sm:$0xf] }
 0x329   :  { %5215 = vmatpush.bf16.msra.mxu1 %v11577_v56  ;;  %v11817_v33 = vor.u32 %v13955_v41, %v11814_v40  ;;  %v11417_v56 = vor.u32 %v13855_v21, %v11414_v39  ;;  %v4175_v8 = vadd.f32 %v4174_v5, %v4162_v11  ;;  %v5697_v41 = vand.u32 2147483648, %v15956_v10  ;;  %v11654_v6 = vld [vmem:[#allocation12 + $0x230] sm:$0xf0]  ;;  %v13847_v11 = vld [vmem:[#allocation12 + $0x4] sm:$0xf] }
 0x32a   :  { %5232 = vmatpush.bf16.msrb.mxu2 %v11721_v55  ;;  %v14663_v55 = vld [vmem:[#allocation2 + $0x58] sm:$0xff]  ;;  %v5690_v21 = vadd.f32 %v15963_v57, %v5689_v3  ;;  %v11801_v39 = vor.u32 %v13951_v36, %v11798_v51  ;;  %v11782_v14 = vld [vmem:[#allocation12 + $0x330] sm:$0xf0]  ;;  %v13878_v3 = vld [vmem:[#allocation12 + $0xf4] sm:$0xf0] }
 0x32b   :  { %v15974_v19 = vpack.c.bf16 %v14663_v55, %v14663_v55  ;;  %v11382_v5 = vld [vmem:[#allocation12 + $0x10] sm:$0xf0]  ;;  %v11628_v36 = vld [vmem:[#allocation12 + $0x1e8] sm:$0xf]  ;;  %v13911_v51 = vld [vmem:[#allocation12 + $0x204] sm:$0xf] }
 0x32c   :  { %5250 = vmatpush.bf16.msrb.mxu3 %v11849_v45  ;;  %5197 = vmatpush.bf16.msrb.mxu0 %v11449_v32  ;;  %v4137_v45 = vpop.f32.mrf.mxu0  ;;  %v11689_v32 = vor.u32 %v13923_v9, %v11686_v26  ;;  %v4342_v9 = vadd.f32 %v4175_v8, %v633_v16  ;;  %v5695_v26 = vand.u32 2147483647, %v15956_v10  ;;  %v14485_v40 = vpop.eup %14484  ;;  %v13910_v16 = vld [vmem:[#allocation12 + $0x1f4] sm:$0xf0]  ;;  %v5694_v10 = vsel %vm15992_vm10, %v15963_v57, %v5690_v21 }
 0x32d   :  { %5216 = vmatpush.bf16.msra.mxu1 %v11561_v18  ;;  %v13915_v18 = vld [vmem:[#allocation12 + $0x224] sm:$0xf]  ;;  %v4163_v55 = vpop.f32.mrf.mxu2  ;;  %v11510_v45 = vld [vmem:[#allocation12 + $0x110] sm:$0xf0]  ;;  %v15988_v23 = vadd.f32 1.0, %v14485_v40  ;;  %v11785_v8 = vor.u32 %v13947_v35, %v11782_v14 }
 0x32e   :  { %5233 = vmatpush.bf16.msrb.mxu2 %v11705_v1  ;;  %v13851_v1 = vld [vmem:[#allocation12 + $0x24] sm:$0xf]  ;;  %5153 = vmatmul.bf16.gmra.mxu1 %v15970_v53  ;;  %14486 = vtanh.f32 %v4342_v9  ;;  %v4176_v37 = vpop.f32.mrf.mxu3  ;;  %v11657_v34 = vor.u32 %v13915_v18, %v11654_v6  ;;  %vm5696_vm11 = vcmp.eq.f32.partialorder %v5695_v26, 8.507059e+37  ;;  %v11629_v18 = vor.u32 %v13910_v16, %v11628_v36  ;;  %v11884_v40 = vld [vmem:[#allocation12 + $0x3e8] sm:$0xf] }
 0x32f   :  { %5135 = vmatmul.bf16.gmra.mxu0 %v15968_v31  ;;  %v13974_v6 = vld [vmem:[#allocation12 + $0x3f4] sm:$0xf0]  ;;  %v11484_v35 = vld [vmem:[#allocation12 + $0xc8] sm:$0xf]  ;;  %14488 = vrcp.f32 %v15988_v23  ;;  %vm5706_vm13 = vweird.f32 %v15988_v23 }
 0x330   :  { %5251 = vmatpush.bf16.msrb.mxu3 %v11833_v0  ;;  %5198 = vmatpush.bf16.msrb.mxu0 %v11433_v28  ;;  %v11398_v0 = vld [vmem:[#allocation12 + $0x30] sm:$0xf0]  ;;  %v13874_v14 = vld [vmem:[#allocation12 + $0xd4] sm:$0xf0]  ;;  %v11885_v26 = vor.u32 %v13974_v6, %v11884_v40  ;;  %v11596_v16 = vld [vmem:[#allocation12 + $0x1a8] sm:$0xf] }
 0x331   :  { %5171 = vmatmul.bf16.gmra.mxu2 %v15972_v49  ;;  %v11526_v28 = vld [vmem:[#allocation12 + $0x130] sm:$0xf0]  ;;  %v11401_v20 = vor.u32 %v13851_v1, %v11398_v0  ;;  %5217 = vmatpush.bf16.msra.mxu1 %v11545_v43  ;;  %v11385_v43 = vor.u32 %v13847_v11, %v11382_v5  ;;  %v13943_v0 = vld [vmem:[#allocation12 + $0x304] sm:$0xf]  ;;  %v13906_v11 = vld [vmem:[#allocation12 + $0x1d4] sm:$0xf0] }
 0x332   :  { %5234 = vmatpush.bf16.msrb.mxu2 %v11689_v32  ;;  %v11529_v61 = vor.u32 %v13883_v29, %v11526_v28  ;;  %v11500_v32 = vld [vmem:[#allocation12 + $0xe8] sm:$0xf]  ;;  %v11638_v1 = vld [vmem:[#allocation12 + $0x210] sm:$0xf0]  ;;  %v11513_v29 = vor.u32 %v13879_v2, %v11510_v45  ;;  %v13938_v2 = vld [vmem:[#allocation12 + $0x2d4] sm:$0xf0] }
 0x333   :  { %5189 = vmatmul.bf16.gmra.mxu3 %v15974_v19  ;;  %v11766_v28 = vld [vmem:[#allocation12 + $0x310] sm:$0xf0]  ;;  %v11501_v9 = vor.u32 %v13878_v3, %v11500_v32  ;;  %v11641_v57 = vor.u32 %v13911_v51, %v11638_v1  ;;  %v11740_v5 = vld [vmem:[#allocation12 + $0x2c8] sm:$0xf]  ;;  %v13970_v32 = vld [vmem:[#allocation12 + $0x3d4] sm:$0xf0]  ;;  %v11485_v3 = vor.u32 %v13874_v14, %v11484_v35 }
 0x334   :  { %5252 = vmatpush.bf16.msrb.mxu3 %v11817_v33  ;;  %5199 = vmatpush.bf16.msrb.mxu0 %v11417_v56  ;;  %v5698_v56 = vor.u32 1.1754944e-38, %v5697_v41  ;;  %v11756_v41 = vld [vmem:[#allocation12 + $0x2e8] sm:$0xf]  ;;  %v14487_v55 = vpop.eup %14486  ;;  %v11741_v37 = vor.u32 %v13938_v2, %v11740_v5  ;;  %v13870_v36 = vld [vmem:[#allocation12 + $0xb4] sm:$0xf0] }
 0x335   :  { %5218 = vmatpush.bf16.msra.mxu1 %v11529_v61  ;;  %v11612_v61 = vld [vmem:[#allocation12 + $0x1c8] sm:$0xf]  ;;  %v13934_v51 = vld [vmem:[#allocation12 + $0x2b4] sm:$0xf0]  ;;  %v11904_v35 = vmul.f32 -1.442695, %v15918_v25 }
 0x336   :  { %5235 = vmatpush.bf16.msrb.mxu2 %v11673_v44  ;;  %v13942_v44 = vld [vmem:[#allocation12 + $0x2f4] sm:$0xf0]  ;;  %v5699_v33 = vsel %vm5696_vm11, %v5698_v56, %v5694_v10  ;;  %v11868_v45 = vld [vmem:[#allocation12 + $0x3c8] sm:$0xf]  ;;  %v11613_v56 = vor.u32 %v13906_v11, %v11612_v61 }
 0x337   :  { %v15999_v21 = vmul.f32 %v14487_v55, %v5699_v33  ;;  %v11869_v10 = vor.u32 %v13970_v32, %v11868_v45  ;;  %v11852_v1 = vld [vmem:[#allocation12 + $0x3a8] sm:$0xf]  ;;  %v13898_v33 = vld [vmem:[#allocation12 + $0x194] sm:$0xf0]  ;;  %14490 = vpow2.f32 %v11904_v35 }
 0x338   :  { %5253 = vmatpush.bf16.msrb.mxu3 %v11801_v39  ;;  %5200 = vmatpush.bf16.msrb.mxu0 %v11401_v20  ;;  %v11769_v39 = vor.u32 %v13943_v0, %v11766_v28  ;;  %v11757_v20 = vor.u32 %v13942_v44, %v11756_v41  ;;  %v13966_v0 = vld [vmem:[#allocation12 + $0x3b4] sm:$0xf0]  ;;  %v11452_v44 = vld [vmem:[#allocation12 + $0x88] sm:$0xf] }
 0x339   :  { %5219 = vmatpush.bf16.msra.mxu1 %v11513_v29  ;;  %v16005_v29 = vpop.eup %14488  ;;  %v11580_v40 = vld [vmem:[#allocation12 + $0x188] sm:$0xf]  ;;  %v11853_v55 = vor.u32 %v13966_v0, %v11852_v1 }
 0x33a   :  { %5236 = vmatpush.bf16.msrb.mxu2 %v11657_v34  ;;  %v11468_v34 = vld [vmem:[#allocation12 + $0xa8] sm:$0xf]  ;;  %v11581_v2 = vor.u32 %v13898_v33, %v11580_v40  ;;  %vm5707_vm12 = vweird.f32 %v16005_v29 }
 0x33b   :  { %v11469_v28 = vor.u32 %v13870_v36, %v11468_v34  ;;  %v4200_v14 = vpop.f32.mrf.mxu1  ;;  %v11836_v61 = vld [vmem:[#allocation12 + $0x388] sm:$0xf]  ;;  %v13894_v34 = vld [vmem:[#allocation12 + $0x174] sm:$0xf0]  ;;  %vm16026_vm14 = vmor %vm5706_vm13, %vm5707_vm12 }
 0x33c   :  { %5254 = vmatpush.bf16.msrb.mxu3 %v11785_v8  ;;  %5201 = vmatpush.bf16.msrb.mxu0 %v11385_v43  ;;  %v13902_v8 = vld [vmem:[#allocation12 + $0x1b4] sm:$0xf0]  ;;  %v11724_v43 = vld [vmem:[#allocation12 + $0x2a8] sm:$0xf]  ;;  %v4187_v6 = vpop.f32.mrf.mxu0 }
 0x33d   :  { %5284 = vmatpush.bf16.msrb.mxu1 %v11629_v18  ;;  %v11725_v41 = vor.u32 %v13934_v51, %v11724_v43  ;;  %v13866_v18 = vld [vmem:[#allocation12 + $0x94] sm:$0xf0]  ;;  %v4201_v11 = vadd.f32 %v4200_v14, %v4187_v6  ;;  %v11436_v32 = vld [vmem:[#allocation12 + $0x68] sm:$0xf] }
 0x33e   :  { %5237 = vmatpush.bf16.msrb.mxu2 %v11641_v57  ;;  %5220 = vmatmul.bf16.vlgmr.msra.gmra.mxu1 %v15836_v47  ;;  %v11708_v57 = vld [vmem:[#allocation12 + $0x288] sm:$0xf]  ;;  %v11453_v5 = vor.u32 %v13866_v18, %v11452_v44  ;;  %v13954_v14 = vld [vmem:[#allocation12 + $0x354] sm:$0xf0] }
 0x33f   :  { %5202 = vmatmul.bf16.vlgmr.msrb.gmra.mxu0 %v15834_v15  ;;  %v11692_v36 = vld [vmem:[#allocation12 + $0x268] sm:$0xf] }
 0x340   :  { %5266 = vmatpush.bf16.msra.mxu0 %v11501_v9  ;;  %5255 = vmatpush.bf16.msrb.mxu3 %v11769_v39  ;;  %v11597_v9 = vor.u32 %v13902_v8, %v11596_v16  ;;  %v13930_v39 = vld [vmem:[#allocation12 + $0x294] sm:$0xf0]  ;;  %v11820_v25 = vld [vmem:[#allocation12 + $0x368] sm:$0xf] }
 0x341   :  { %5238 = vmatmul.bf16.vlgmr.msrb.gmra.mxu2 %v15842_v4  ;;  %5285 = vmatpush.bf16.msrb.mxu1 %v11613_v56  ;;  %v11709_v45 = vor.u32 %v13930_v39, %v11708_v57  ;;  %v11564_v56 = vld [vmem:[#allocation12 + $0x168] sm:$0xf]  ;;  %v13926_v16 = vld [vmem:[#allocation12 + $0x274] sm:$0xf0] }
 0x342   :  { %5302 = vmatpush.bf16.msra.mxu2 %v11757_v20  ;;  %v5702_v20 = vmul.f32 %v16005_v29, %v15988_v23  ;;  %v13958_v8 = vld [vmem:[#allocation12 + $0x374] sm:$0xf0]  ;;  %v11565_v1 = vor.u32 %v13894_v34, %v11564_v56  ;;  %v11693_v0 = vor.u32 %v13926_v16, %v11692_v36  ;;  %v11676_v33 = vld [vmem:[#allocation12 + $0x248] sm:$0xf] }
 0x343   :  { %5256 = vmatmul.bf16.vlgmr.msrb.gmra.mxu3 %v15849_v52  ;;  %v11821_v6 = vor.u32 %v13958_v8, %v11820_v25  ;;  %v13922_v57 = vld [vmem:[#allocation12 + $0x254] sm:$0xf0]  ;;  %v11804_v35 = vld [vmem:[#allocation12 + $0x348] sm:$0xf]  ;;  %v5710_v8 = vand.u32 2147483647, %v15988_v23 }
 0x344   :  { %5320 = vmatpush.bf16.msra.mxu3 %v11885_v26  ;;  %5267 = vmatpush.bf16.msra.mxu0 %v11485_v3  ;;  %v13962_v26 = vld [vmem:[#allocation12 + $0x394] sm:$0xf0]  ;;  %v4189_v40 = vpop.f32.mrf.mxu0  ;;  %v11660_v16 = vld [vmem:[#allocation12 + $0x228] sm:$0xf] }
 0x345   :  { %5286 = vmatpush.bf16.msrb.mxu1 %v11597_v9  ;;  %v13862_v3 = vld [vmem:[#allocation12 + $0x74] sm:$0xf0]  ;;  %v4213_v51 = vpop.f32.mrf.mxu2  ;;  %vm5711_vm15 = vcmp.eq.f32.partialorder %v5710_v8, 8.507059e+37  ;;  %v13872_v8 = vld [vmem:[#allocation12 + $0xcc] sm:$0xf] }
 0x346   :  { %5303 = vmatpush.bf16.msra.mxu2 %v11741_v37  ;;  %v11837_v37 = vor.u32 %v13962_v26, %v11836_v61  ;;  %v11437_v43 = vor.u32 %v13862_v3, %v11436_v32  ;;  %v13858_v9 = vld [vmem:[#allocation12 + $0x54] sm:$0xf0]  ;;  %v4214_v44 = vadd.f32 %v4213_v51, %v4201_v11  ;;  %v4226_v18 = vpop.f32.mrf.mxu3  ;;  %v662_v61 = vadd.f32 %v15865_v60, %v15405_v17  ;;  %v11404_v3 = vld [vmem:[#allocation12 + $0x28] sm:$0xf] }
 0x347   :  { %v11677_v32 = vor.u32 %v13922_v57, %v11676_v33  ;;  %v13854_v56 = vld [vmem:[#allocation12 + $0x34] sm:$0xf0]  ;;  %v11805_v60 = vor.u32 %v13954_v14, %v11804_v35  ;;  %v11644_v33 = vld [vmem:[#allocation12 + $0x208] sm:$0xf] }
 0x348   :  { %5321 = vmatpush.bf16.msra.mxu3 %v11869_v10  ;;  %5268 = vmatpush.bf16.msra.mxu0 %v11469_v28  ;;  %v5703_v10 = vsub.f32 1.0, %v5702_v20  ;;  %v11420_v28 = vld [vmem:[#allocation12 + $0x48] sm:$0xf]  ;;  %v4202_v20 = vpop.f32.mrf.mxu1  ;;  %v4227_v26 = vadd.f32 %v4226_v18, %v4214_v44  ;;  %v13886_v36 = vld [vmem:[#allocation12 + $0x134] sm:$0xf0] }
 0x349   :  { %5287 = vmatpush.bf16.msrb.mxu1 %v11581_v2  ;;  %v11421_v11 = vor.u32 %v13858_v9, %v11420_v28  ;;  %v14491_v2 = vpop.eup %14490  ;;  %v13950_v51 = vld [vmem:[#allocation12 + $0x334] sm:$0xf0]  ;;  %v11388_v9 = vld [vmem:[#allocation12 + $0x8] sm:$0xf] }
 0x34a   :  { %5304 = vmatpush.bf16.msra.mxu2 %v11725_v41  ;;  %v11548_v41 = vld [vmem:[#allocation12 + $0x148] sm:$0xf]  ;;  %v5704_v39 = vmul.f32 %v16005_v29, %v5703_v10  ;;  %v4343_v34 = vadd.f32 %v4227_v26, %v662_v61  ;;  %v13918_v10 = vld [vmem:[#allocation12 + $0x234] sm:$0xf0]  ;;  %v13876_v26 = vld [vmem:[#allocation12 + $0xec] sm:$0xf] }
 0x34b   :  { %v11661_v40 = vor.u32 %v13918_v10, %v11660_v16  ;;  %v13914_v20 = vld [vmem:[#allocation12 + $0x214] sm:$0xf0]  ;;  %v11772_v35 = vld [vmem:[#allocation12 + $0x308] sm:$0xf] }
 0x34c   :  { %5322 = vmatpush.bf16.msra.mxu3 %v11853_v55  ;;  %5269 = vmatpush.bf16.msra.mxu0 %v11453_v5  ;;  %v13890_v55 = vld [vmem:[#allocation12 + $0x154] sm:$0xf0]  ;;  %v5712_v5 = vand.u32 2147483648, %v15988_v23  ;;  %v5705_v25 = vadd.f32 %v16005_v29, %v5704_v39  ;;  %14492 = vtanh.f32 %v4343_v34  ;;  %v11405_v23 = vor.u32 %v13854_v56, %v11404_v3  ;;  %v11758_v3 = vld [vmem:[#allocation12 + $0x2f8] sm:$0xf0] }
 0x34d   :  { %5288 = vmatpush.bf16.msrb.mxu1 %v11565_v1  ;;  %v16022_v1 = vadd.f32 1.0, %v14491_v2  ;;  %v4215_v44 = vpop.f32.mrf.mxu2  ;;  %v13946_v14 = vld [vmem:[#allocation12 + $0x314] sm:$0xf0]  ;;  %v13972_v34 = vld [vmem:[#allocation12 + $0x3ec] sm:$0xf] }
 0x34e   :  { %5305 = vmatpush.bf16.msra.mxu2 %v11709_v45  ;;  %v11549_v45 = vor.u32 %v13890_v55, %v11548_v41  ;;  %5225 = vmatmul.bf16.gmra.mxu1 %v15970_v53  ;;  %v5713_v28 = vor.u32 1.1754944e-38, %v5712_v5  ;;  %v13850_v41 = vld [vmem:[#allocation12 + $0x14] sm:$0xf0]  ;;  %v4228_v57 = vpop.f32.mrf.mxu3  ;;  %v5709_v61 = vsel %vm16026_vm14, %v16005_v29, %v5705_v25  ;;  %v11502_v5 = vld [vmem:[#allocation12 + $0xf8] sm:$0xf0]  ;;  %v11773_v10 = vor.u32 %v13946_v14, %v11772_v35 }
 0x34f   :  { %5207 = vmatmul.bf16.gmra.mxu0 %v15968_v31  ;;  %v13882_v55 = vld [vmem:[#allocation12 + $0x114] sm:$0xf0]  ;;  %v11389_v2 = vor.u32 %v13850_v41, %v11388_v9  ;;  %v11505_v29 = vor.u32 %v13876_v26, %v11502_v5  ;;  %14494 = vrcp.f32 %v16022_v1  ;;  %v13904_v9 = vld [vmem:[#allocation12 + $0x1cc] sm:$0xf]  ;;  %v11614_v41 = vld [vmem:[#allocation12 + $0x1d8] sm:$0xf0]  ;;  %vm5721_vm2 = vweird.f32 %v16022_v1 }
 0x350   :  { %5323 = vmatpush.bf16.msra.mxu3 %v11837_v37  ;;  %5270 = vmatpush.bf16.msra.mxu0 %v11437_v43  ;;  %v11532_v37 = vld [vmem:[#allocation12 + $0x128] sm:$0xf]  ;;  %v5714_v16 = vsel %vm5711_vm15, %v5713_v28, %v5709_v61  ;;  %v13936_v28 = vld [vmem:[#allocation12 + $0x2cc] sm:$0xf]  ;;  %v11742_v44 = vld [vmem:[#allocation12 + $0x2d8] sm:$0xf0] }
 0x351   :  { %5243 = vmatmul.bf16.gmra.mxu2 %v15972_v49  ;;  %v11788_v43 = vld [vmem:[#allocation12 + $0x328] sm:$0xf]  ;;  %5289 = vmatpush.bf16.msrb.mxu1 %v11549_v45  ;;  %v11533_v18 = vor.u32 %v13886_v36, %v11532_v37  ;;  %v11630_v45 = vld [vmem:[#allocation12 + $0x1f8] sm:$0xf0]  ;;  %v11645_v37 = vor.u32 %v13914_v20, %v11644_v33  ;;  %v11617_v33 = vor.u32 %v13904_v9, %v11614_v41  ;;  %v13900_v35 = vld [vmem:[#allocation12 + $0x1ac] sm:$0xf] }
 0x352   :  { %5306 = vmatpush.bf16.msra.mxu2 %v11693_v0  ;;  %v11789_v39 = vor.u32 %v13950_v51, %v11788_v43  ;;  %v14493_v36 = vpop.eup %14492  ;;  %v11745_v57 = vor.u32 %v13936_v28, %v11742_v44  ;;  %v11470_v20 = vld [vmem:[#allocation12 + $0xb8] sm:$0xf0]  ;;  %v13932_v26 = vld [vmem:[#allocation12 + $0x2ac] sm:$0xf] }
 0x353   :  { %5261 = vmatmul.bf16.gmra.mxu3 %v15974_v19  ;;  %v16035_v25 = vmul.f32 %v14493_v36, %v5714_v16  ;;  %v11598_v61 = vld [vmem:[#allocation12 + $0x1b8] sm:$0xf0]  ;;  %v13896_v16 = vld [vmem:[#allocation12 + $0x18c] sm:$0xf] }
 0x354   :  { %5324 = vmatpush.bf16.msra.mxu3 %v11821_v6  ;;  %5271 = vmatpush.bf16.msra.mxu0 %v11421_v11  ;;  %v11516_v6 = vld [vmem:[#allocation12 + $0x108] sm:$0xf]  ;;  %v13908_v11 = vld [vmem:[#allocation12 + $0x1ec] sm:$0xf]  ;;  %v11726_v5 = vld [vmem:[#allocation12 + $0x2b8] sm:$0xf0] }
 0x355   :  { %5290 = vmatpush.bf16.msrb.mxu1 %v11533_v18  ;;  %v11517_v56 = vor.u32 %v13882_v55, %v11516_v6  ;;  %v11633_v43 = vor.u32 %v13908_v11, %v11630_v45  ;;  %v13968_v18 = vld [vmem:[#allocation12 + $0x3cc] sm:$0xf]  ;;  %v16037_v55 = vpop.eup %14494  ;;  %v11454_v36 = vld [vmem:[#allocation12 + $0x98] sm:$0xf0] }
 0x356   :  { %5307 = vmatpush.bf16.msra.mxu2 %v11677_v32  ;;  %v13940_v32 = vld [vmem:[#allocation12 + $0x2ec] sm:$0xf]  ;;  %v5717_v45 = vmul.f32 %v16037_v55, %v16022_v1  ;;  %v11838_v9 = vld [vmem:[#allocation12 + $0x398] sm:$0xf0]  ;;  %vm5722_vm1 = vweird.f32 %v16037_v55 }
 0x357   :  { %v11761_v51 = vor.u32 %v13940_v32, %v11758_v3  ;;  %v13964_v11 = vld [vmem:[#allocation12 + $0x3ac] sm:$0xf]  ;;  %vm16061_vm3 = vmor %vm5721_vm2, %vm5722_vm1 }
 0x358   :  { %5325 = vmatpush.bf16.msra.mxu3 %v11805_v60  ;;  %5272 = vmatpush.bf16.msra.mxu0 %v11405_v23  ;;  %v11886_v60 = vld [vmem:[#allocation12 + $0x3f8] sm:$0xf0]  ;;  %v5718_v41 = vsub.f32 1.0, %v5717_v45 }
 0x359   :  { %v11889_v0 = vor.u32 %v13972_v34, %v11886_v60  ;;  %5291 = vmatpush.bf16.msrb.mxu1 %v11517_v56  ;;  %v11486_v23 = vld [vmem:[#allocation12 + $0xd8] sm:$0xf0]  ;;  %v11729_v34 = vor.u32 %v13932_v26, %v11726_v5  ;;  %v13864_v60 = vld [vmem:[#allocation12 + $0x8c] sm:$0xf] }
 0x35a   :  { %5308 = vmatpush.bf16.msra.mxu2 %v11661_v40  ;;  %v11870_v40 = vld [vmem:[#allocation12 + $0x3d8] sm:$0xf0]  ;;  %v11489_v6 = vor.u32 %v13872_v8, %v11486_v23  ;;  %v11905_v8 = vmul.f32 -1.442695, %v15925_v12  ;;  %v13960_v23 = vld [vmem:[#allocation12 + $0x38c] sm:$0xf]  ;;  %v11457_v28 = vor.u32 %v13864_v60, %v11454_v36  ;;  %v5719_v45 = vmul.f32 %v16037_v55, %v5718_v41 }
 0x35b   :  { %v11873_v14 = vor.u32 %v13968_v18, %v11870_v40  ;;  %v4252_v56 = vpop.f32.mrf.mxu1  ;;  %v13860_v40 = vld [vmem:[#allocation12 + $0x6c] sm:$0xf]  ;;  %v691_v36 = vadd.f32 %v15867_v58, %v15298_v63 }
 0x35c   :  { %5326 = vmatpush.bf16.msra.mxu3 %v11789_v39  ;;  %5273 = vmatpush.bf16.msra.mxu0 %v11389_v2  ;;  %v13868_v39 = vld [vmem:[#allocation12 + $0xac] sm:$0xf]  ;;  %v11854_v2 = vld [vmem:[#allocation12 + $0x3b8] sm:$0xf0]  ;;  %v4239_v32 = vpop.f32.mrf.mxu0  ;;  %14496 = vpow2.f32 %v11905_v8 }
 0x35d   :  { %5356 = vmatpush.bf16.msra.mxu1 %v11633_v43  ;;  %v11473_v3 = vor.u32 %v13868_v39, %v11470_v20  ;;  %v11582_v43 = vld [vmem:[#allocation12 + $0x198] sm:$0xf0]  ;;  %v13924_v20 = vld [vmem:[#allocation12 + $0x26c] sm:$0xf] }
 0x35e   :  { %5309 = vmatpush.bf16.msra.mxu2 %v11645_v37  ;;  %5292 = vmatmul.bf16.vlgmr.msrb.gmra.mxu1 %v15836_v47  ;;  %v11601_v37 = vor.u32 %v13900_v35, %v11598_v61  ;;  %v11585_v44 = vor.u32 %v13896_v16, %v11582_v43  ;;  %v11566_v39 = vld [vmem:[#allocation12 + $0x178] sm:$0xf0]  ;;  %v13956_v12 = vld [vmem:[#allocation12 + $0x36c] sm:$0xf] }
 0x35f   :  { %5274 = vmatmul.bf16.vlgmr.msra.gmra.mxu0 %v15834_v15  ;;  %v11694_v35 = vld [vmem:[#allocation12 + $0x278] sm:$0xf0]  ;;  %v13888_v60 = vld [vmem:[#allocation12 + $0x14c] sm:$0xf] }
 0x360   :  { %5327 = vmatpush.bf16.msra.mxu3 %v11773_v10  ;;  %5338 = vmatpush.bf16.msrb.mxu0 %v11505_v29  ;;  %v4253_v10 = vadd.f32 %v4252_v56, %v4239_v32  ;;  %v11857_v29 = vor.u32 %v13964_v11, %v11854_v2  ;;  %v11822_v61 = vld [vmem:[#allocation12 + $0x378] sm:$0xf0]  ;;  %v11697_v56 = vor.u32 %v13924_v20, %v11694_v35  ;;  %v13920_v43 = vld [vmem:[#allocation12 + $0x24c] sm:$0xf] }
 0x361   :  { %5310 = vmatmul.bf16.vlgmr.msra.gmra.mxu2 %v15842_v4  ;;  %5357 = vmatpush.bf16.msra.mxu1 %v11617_v33  ;;  %v13892_v33 = vld [vmem:[#allocation12 + $0x16c] sm:$0xf]  ;;  %v11806_v8 = vld [vmem:[#allocation12 + $0x358] sm:$0xf0] }
 0x362   :  { %5374 = vmatpush.bf16.msrb.mxu2 %v11761_v51  ;;  %v13928_v51 = vld [vmem:[#allocation12 + $0x28c] sm:$0xf]  ;;  %v11662_v35 = vld [vmem:[#allocation12 + $0x238] sm:$0xf0] }
 0x363   :  { %5328 = vmatmul.bf16.vlgmr.msra.gmra.mxu3 %v15849_v52  ;;  %v4254_v32 = vpop.f32.mrf.mxu1  ;;  %v13916_v20 = vld [vmem:[#allocation12 + $0x22c] sm:$0xf] }
 0x364   :  { %5392 = vmatpush.bf16.msrb.mxu3 %v11889_v0  ;;  %5339 = vmatpush.bf16.msrb.mxu0 %v11489_v6  ;;  %v11710_v0 = vld [vmem:[#allocation12 + $0x298] sm:$0xf0]  ;;  %v4241_v11 = vpop.f32.mrf.mxu0 }
 0x365   :  { %5358 = vmatpush.bf16.msra.mxu1 %v11601_v37  ;;  %v11713_v18 = vor.u32 %v13928_v51, %v11710_v0  ;;  %v11438_v6 = vld [vmem:[#allocation12 + $0x78] sm:$0xf0]  ;;  %v13856_v37 = vld [vmem:[#allocation12 + $0x4c] sm:$0xf] }
 0x366   :  { %5375 = vmatpush.bf16.msrb.mxu2 %v11745_v57  ;;  %v11841_v57 = vor.u32 %v13960_v23, %v11838_v9  ;;  %v4278_v5 = vpop.f32.mrf.mxu3  ;;  %v11441_v2 = vor.u32 %v13860_v40, %v11438_v6  ;;  %v11678_v51 = vld [vmem:[#allocation12 + $0x258] sm:$0xf0]  ;;  %v13952_v0 = vld [vmem:[#allocation12 + $0x34c] sm:$0xf]  ;;  %v5727_v9 = vand.u32 2147483648, %v16022_v1 }
 0x367   :  { %v13852_v40 = vld [vmem:[#allocation12 + $0x2c] sm:$0xf]  ;;  %v11406_v6 = vld [vmem:[#allocation12 + $0x38] sm:$0xf0] }
 0x368   :  { %5393 = vmatpush.bf16.msrb.mxu3 %v11873_v14  ;;  %5340 = vmatpush.bf16.msrb.mxu0 %v11473_v3  ;;  %v4265_v14 = vpop.f32.mrf.mxu2  ;;  %v11569_v3 = vor.u32 %v13892_v33, %v11566_v39  ;;  %v13884_v33 = vld [vmem:[#allocation12 + $0x12c] sm:$0xf]  ;;  %v11534_v39 = vld [vmem:[#allocation12 + $0x138] sm:$0xf0] }
 0x369   :  { %v4266_v26 = vadd.f32 %v4265_v14, %v4253_v10  ;;  %5359 = vmatpush.bf16.msra.mxu1 %v11585_v44  ;;  %v11825_v10 = vor.u32 %v13956_v12, %v11822_v61  ;;  %v5720_v44 = vadd.f32 %v16037_v55, %v5719_v45  ;;  %v5725_v14 = vand.u32 2147483647, %v16022_v1  ;;  %v13948_v61 = vld [vmem:[#allocation12 + $0x32c] sm:$0xf] }
 0x36a   :  { %5376 = vmatpush.bf16.msrb.mxu2 %v11729_v34  ;;  %v11422_v34 = vld [vmem:[#allocation12 + $0x58] sm:$0xf0]  ;;  %v11409_v1 = vor.u32 %v13852_v40, %v11406_v6 }
 0x36b   :  { %v4279_v16 = vadd.f32 %v4278_v5, %v4266_v26  ;;  %v11425_v41 = vor.u32 %v13856_v37, %v11422_v34  ;;  %v11790_v26 = vld [vmem:[#allocation12 + $0x338] sm:$0xf0]  ;;  %v5724_v32 = vsel %vm16061_vm3, %v16037_v55, %v5720_v44  ;;  %v13848_v37 = vld [vmem:[#allocation12 + $0xc] sm:$0xf]  ;;  %vm5726_vm5 = vcmp.eq.f32.partialorder %v5725_v14, 8.507059e+37 }
 0x36c   :  { %5394 = vmatpush.bf16.msrb.mxu3 %v11857_v29  ;;  %5341 = vmatpush.bf16.msrb.mxu0 %v11457_v28  ;;  %v11550_v29 = vld [vmem:[#allocation12 + $0x158] sm:$0xf0]  ;;  %v14497_v28 = vpop.eup %14496 }
 0x36d   :  { %v4344_v23 = vadd.f32 %v4279_v16, %v691_v36  ;;  %5360 = vmatpush.bf16.msra.mxu1 %v11569_v3  ;;  %v11553_v58 = vor.u32 %v13888_v60, %v11550_v29  ;;  %v16057_v5 = vadd.f32 1.0, %v14497_v28  ;;  %v11537_v3 = vor.u32 %v13884_v33, %v11534_v39  ;;  %v11390_v34 = vld [vmem:[#allocation12 + $0x18] sm:$0xf0]  ;;  %v13880_v60 = vld [vmem:[#allocation12 + $0x10c] sm:$0xf] }
 0x36e   :  { %5377 = vmatpush.bf16.msrb.mxu2 %v11713_v18  ;;  %v11681_v18 = vor.u32 %v13920_v43, %v11678_v51  ;;  %5297 = vmatmul.bf16.gmra.mxu1 %v15970_v53  ;;  %v4280_v45 = vpop.f32.mrf.mxu3  ;;  %v11793_v36 = vor.u32 %v13948_v61, %v11790_v26  ;;  %v11518_v16 = vld [vmem:[#allocation12 + $0x118] sm:$0xf0]  ;;  %v13944_v43 = vld [vmem:[#allocation12 + $0x30c] sm:$0xf] }
 0x36f   :  { %14498 = vtanh.f32 %v4344_v23  ;;  %5279 = vmatmul.bf16.gmra.mxu0 %v15968_v31  ;;  %v11646_v29 = vld [vmem:[#allocation12 + $0x218] sm:$0xf0]  ;;  %v11393_v23 = vor.u32 %v13848_v37, %v11390_v34  ;;  %vm5736_vm9 = vweird.f32 %v16057_v5 }
 0x370   :  { %5395 = vmatpush.bf16.msrb.mxu3 %v11841_v57  ;;  %5342 = vmatpush.bf16.msrb.mxu0 %v11441_v2  ;;  %v11809_v57 = vor.u32 %v13952_v0, %v11806_v8  ;;  %v4267_v12 = vpop.f32.mrf.mxu2  ;;  %v5728_v2 = vor.u32 1.1754944e-38, %v5727_v9  ;;  %v11774_v51 = vld [vmem:[#allocation12 + $0x318] sm:$0xf0]  ;;  %v11521_v9 = vor.u32 %v13880_v60, %v11518_v16  ;;  %14500 = vrcp.f32 %v16057_v5 }
 0x371   :  { %5315 = vmatmul.bf16.gmra.mxu2 %v15972_v49  ;;  %5361 = vmatpush.bf16.msra.mxu1 %v11553_v58  ;;  %v11777_v28 = vor.u32 %v13944_v43, %v11774_v51  ;;  %v16088_v37 = vld [vmem:[#allocation9 + $0x8] sm:$0xff] }
 0x372   :  { %5378 = vmatpush.bf16.msrb.mxu2 %v11697_v56  ;;  %v11665_v56 = vor.u32 %v13916_v20, %v11662_v35  ;;  %v5729_v8 = vsel %vm5726_vm5, %v5728_v2, %v5724_v32  ;;  %v348_v34 = vperm.slane %v16088_v37, 4 }
 0x373   :  { %5333 = vmatmul.bf16.gmra.mxu3 %v15974_v19 }
 0x374   :  { %5396 = vmatpush.bf16.msrb.mxu3 %v11825_v10  ;;  %5343 = vmatpush.bf16.msrb.mxu0 %v11425_v41  ;;  %v13912_v10 = vld [vmem:[#allocation12 + $0x20c] sm:$0xf] }
 0x375   :  { %v14499_v0 = vpop.eup %14498  ;;  %5362 = vmatpush.bf16.msra.mxu1 %v11537_v3  ;;  %v11649_v41 = vor.u32 %v13912_v10, %v11646_v29 }
 0x376   :  { %5379 = vmatpush.bf16.msrb.mxu2 %v11681_v18  ;;  %v16069_v55 = vmul.f32 %v14499_v0, %v5729_v8  ;;  %v14501_v44 = vpop.eup %14500 }
 0x377   :  { %v5732_v18 = vmul.f32 %v14501_v44, %v16057_v5  ;;  %vm5737_vm0 = vweird.f32 %v14501_v44 }
 0x378   :  { %5397 = vmatpush.bf16.msrb.mxu3 %v11809_v57  ;;  %5344 = vmatpush.bf16.msrb.mxu0 %v11409_v1  ;;  %vm5738_vm10 = vmor %vm5736_vm9, %vm5737_vm0 }
 0x379   :  { %5363 = vmatpush.bf16.msra.mxu1 %v11521_v9  ;;  %v5733_v33 = vsub.f32 1.0, %v5732_v18 }
 0x37a   :  { %5380 = vmatpush.bf16.msrb.mxu2 %v11665_v56 }
 0x37b   :  { %v4304_v40 = vpop.f32.mrf.mxu1  ;;  %v5734_v14 = vmul.f32 %v14501_v44, %v5733_v33 }
 0x37c   :  { %5398 = vmatpush.bf16.msrb.mxu3 %v11793_v36  ;;  %5345 = vmatpush.bf16.msrb.mxu0 %v11393_v23  ;;  %v4291_v58 = vpop.f32.mrf.mxu0 }
 0x37d   :  { %v4305_v6 = vadd.f32 %v4304_v40, %v4291_v58  ;;  %v5735_v11 = vadd.f32 %v14501_v44, %v5734_v14 }
 0x37e   :  { %5381 = vmatpush.bf16.msrb.mxu2 %v11649_v41  ;;  %5364 = vmatmul.bf16.vlgmr.msra.gmra.mxu1 %v15836_v47  ;;  %v5742_v47 = vand.u32 2147483648, %v16057_v5 }
 0x37f   :  { %5346 = vmatmul.bf16.vlgmr.msrb.gmra.mxu0 %v15834_v15  ;;  %v720_v15 = vadd.f32 %v15869_v48, %v15339_v24  ;;  %v5739_v45 = vsel %vm5738_vm10, %v14501_v44, %v5735_v11 }
 0x380   :  { %5399 = vmatpush.bf16.msrb.mxu3 %v11777_v28  ;;  %v5743_v48 = vor.u32 1.1754944e-38, %v5742_v47 }
 0x381   :  { %5382 = vmatmul.bf16.vlgmr.msrb.gmra.mxu2 %v15842_v4  ;;  %v5740_v4 = vand.u32 2147483647, %v16057_v5 }
 0x383   :  { %5400 = vmatmul.bf16.vlgmr.msrb.gmra.mxu3 %v15849_v52  ;;  %v4306_v12 = vpop.f32.mrf.mxu1  ;;  %vm5741_vm11 = vcmp.eq.f32.partialorder %v5740_v4, 8.507059e+37 }
 0x384   :  { %v4293_v35 = vpop.f32.mrf.mxu0  ;;  %v5744_v32 = vsel %vm5741_vm11, %v5743_v48, %v5739_v45 }
 0x385   :  { %v4317_v57 = vpop.f32.mrf.mxu2 }
 0x386   :  { %v4318_v39 = vadd.f32 %v4317_v57, %v4305_v6  ;;  %v4330_v20 = vpop.f32.mrf.mxu3  ;;  %v11906_v6 = vmul.f32 -1.442695, %v15932_v42 }
 0x388   :  { %v4331_v61 = vadd.f32 %v4330_v20, %v4318_v39 }
 0x38a   :  { %v4345_v26 = vadd.f32 %v4331_v61, %v720_v15 }
 0x38c   :  { %14502 = vtanh.f32 %v4345_v26 }
 0x38d   :  { %v4319_v52 = vpop.f32.mrf.mxu2 }
 0x38e   :  { %v4332_v2 = vpop.f32.mrf.mxu3  ;;  %5369 = vmatmul.bf16.gmra.mxu1 %v15970_v53 }
 0x38f   :  { %5351 = vmatmul.bf16.gmra.mxu0 %v15968_v31 }
 0x391   :  { %5387 = vmatmul.bf16.gmra.mxu2 %v15972_v49  ;;  %v747_v49 = vadd.f32 %v15887_v13, %v348_v34 }
 0x392   :  { %v14503_v1 = vpop.eup %14502 }
 0x393   :  { %5405 = vmatmul.bf16.gmra.mxu3 %v15974_v19  ;;  %v16086_v3 = vmul.f32 %v14503_v1, %v5744_v32 }
 0x39b   :  { %v5149_v5 = vpop.f32.mrf.mxu1 }
 0x39c   :  { %v5131_v56 = vpop.f32.mrf.mxu0 }
 0x39d   :  { %v5150_v31 = vadd.f32 %v5149_v5, %v5131_v56  ;;  %v349_v56 = vperm.slane %v16088_v37, 5 }
 0x3a3   :  { %v5151_v10 = vpop.f32.mrf.mxu1 }
 0x3a4   :  { %v5167_v60 = vpop.f32.mrf.mxu2  ;;  %v5133_v16 = vpop.f32.mrf.mxu0 }
 0x3a5   :  { %v5168_v36 = vadd.f32 %v5167_v60, %v5150_v31  ;;  %v5152_v51 = vadd.f32 %v5151_v10, %v5133_v16  ;;  %v16113_v10 = vadd.f32 %v15889_v54, %v349_v56 }
 0x3a6   :  { %v5185_v53 = vpop.f32.mrf.mxu3 }
 0x3a7   :  { %v5186_v19 = vadd.f32 %v5185_v53, %v5168_v36 }
 0x3a9   :  { %v5410_v29 = vadd.f32 %v5186_v19, %v747_v49 }
 0x3ab   :  { %v11890_v43 = vmul.f32 -1.442695, %v5410_v29  ;;  %v5154_v44 = vpop.f32.mrf.mxu1 }
 0x3ac   :  { %v5169_v0 = vpop.f32.mrf.mxu2  ;;  %v5136_v28 = vpop.f32.mrf.mxu0 }
 0x3ad   :  { %14504 = vpow2.f32 %v11890_v43  ;;  %v5170_v8 = vadd.f32 %v5169_v0, %v5152_v51  ;;  %v5155_v40 = vadd.f32 %v5154_v44, %v5136_v28 }
 0x3ae   :  { %v5187_v23 = vpop.f32.mrf.mxu3 }
 0x3af   :  { %v5188_v9 = vadd.f32 %v5187_v23, %v5170_v8 }
 0x3b1   :  { %v5494_v41 = vadd.f32 %v5188_v9, %v747_v49 }
 0x3b3   :  { %v14505_v58 = vpop.eup %14504  ;;  %v11894_v18 = vmul.f32 -1.442695, %v5494_v41  ;;  %v5156_v12 = vpop.f32.mrf.mxu1 }
 0x3b4   :  { %v16095_v13 = vadd.f32 1.0, %v14505_v58  ;;  %v5172_v33 = vpop.f32.mrf.mxu2  ;;  %v5138_v14 = vpop.f32.mrf.mxu0 }
 0x3b5   :  { %14506 = vpow2.f32 %v11894_v18  ;;  %v5173_v57 = vadd.f32 %v5172_v33, %v5155_v40 }
 0x3b6   :  { %v5190_v39 = vpop.f32.mrf.mxu3  ;;  %14508 = vrcp.f32 %v16095_v13  ;;  %v5439_v51 = vand.u32 2147483647, %v16095_v13  ;;  %v5441_v54 = vand.u32 2147483648, %v16095_v13  ;;  %vm5435_vm1 = vweird.f32 %v16095_v13 }
 0x3b7   :  { %v5191_v20 = vadd.f32 %v5190_v39, %v5173_v57  ;;  %14510 = vpow2.f32 %v11906_v6 }
 0x3b8   :  { %vm16138_vm3 = vcmp.eq.f32.partialorder %v5439_v51, 8.507059e+37  ;;  %v1390_v51 = vld [vmem:[#allocation3 + $0x40] sm:$0xff] }
 0x3b9   :  { %v5582_v35 = vadd.f32 %v5191_v20, %v747_v49 }
 0x3bb   :  { %v14507_v15 = vpop.eup %14506  ;;  %v11898_v61 = vmul.f32 -1.442695, %v5582_v35  ;;  %v5221_v60 = vpop.f32.mrf.mxu1 }
 0x3bc   :  { %v16098_v26 = vpop.eup %14508  ;;  %v5510_v11 = vadd.f32 1.0, %v14507_v15  ;;  %v5174_v47 = vpop.f32.mrf.mxu2 }
 0x3bd   :  { %14512 = vpow2.f32 %v11898_v61  ;;  %v14511_v4 = vpop.eup %14510  ;;  %v5431_v52 = vmul.f32 %v16098_v26, %v16095_v13  ;;  %v5203_v31 = vpop.f32.mrf.mxu0  ;;  %vm5436_vm13 = vweird.f32 %v16098_v26 }
 0x3be   :  { %v5192_v42 = vpop.f32.mrf.mxu3  ;;  %14514 = vrcp.f32 %v5510_v11  ;;  %v16102_v2 = vadd.f32 1.0, %v14511_v4  ;;  %v5222_v49 = vadd.f32 %v5221_v60, %v5203_v31  ;;  %v5523_v0 = vand.u32 2147483647, %v5510_v11  ;;  %vm16134_vm2 = vmor %vm5435_vm1, %vm5436_vm13  ;;  %v1386_v31 = vld [vmem:[#allocation3 + $0x20] sm:$0xff] }
 0x3bf   :  { %v5432_v48 = vsub.f32 1.0, %v5431_v52  ;;  %v5525_v8 = vand.u32 2147483648, %v5510_v11  ;;  %vm5519_vm14 = vweird.f32 %v5510_v11  ;;  %v5442_v42 = vor.u32 1.1754944e-38, %v5441_v54 }
 0x3c0   :  { %14516 = vrcp.f32 %v16102_v2  ;;  %vm5524_vm5 = vcmp.eq.f32.partialorder %v5523_v0, 8.507059e+37  ;;  %vm5767_vm13 = vweird.f32 %v16102_v2 }
 0x3c1   :  { %v5433_v36 = vmul.f32 %v16098_v26, %v5432_v48  ;;  %v5526_v13 = vor.u32 1.1754944e-38, %v5525_v8 }
 0x3c3   :  { %v14513_v45 = vpop.eup %14512  ;;  %v5434_v9 = vadd.f32 %v16098_v26, %v5433_v36  ;;  %v5223_v35 = vpop.f32.mrf.mxu1 }
 0x3c4   :  { %v14515_v1 = vpop.eup %14514  ;;  %v16104_v32 = vadd.f32 1.0, %v14513_v45  ;;  %v5239_v19 = vpop.f32.mrf.mxu2 }
 0x3c5   :  { %v5515_v5 = vmul.f32 %v14515_v1, %v5510_v11  ;;  %vm5520_vm12 = vweird.f32 %v14515_v1  ;;  %v5240_v43 = vadd.f32 %v5239_v19, %v5222_v49  ;;  %v5205_v20 = vpop.f32.mrf.mxu0  ;;  %v5438_v14 = vsel %vm16134_vm2, %v16098_v26, %v5434_v9  ;;  %v1382_v49 = vld [vmem:[#allocation3] sm:$0xff] }
 0x3c6   :  { %14518 = vrcp.f32 %v16104_v32  ;;  %v5257_v16 = vpop.f32.mrf.mxu3  ;;  %v16117_v23 = vpop.eup %14516  ;;  %vm16121_vm15 = vmor %vm5519_vm14, %vm5520_vm12  ;;  %v5224_v61 = vadd.f32 %v5223_v35, %v5205_v20  ;;  %v5611_v52 = vand.u32 2147483647, %v16104_v32  ;;  %v5613_v45 = vand.u32 2147483648, %v16104_v32 }
 0x3c7   :  { %v5516_v53 = vsub.f32 1.0, %v5515_v5  ;;  %v5258_v28 = vadd.f32 %v5257_v16, %v5240_v43  ;;  %v5763_v33 = vmul.f32 %v16117_v23, %v16102_v2  ;;  %v5443_v5 = vsel %vm16138_vm3, %v5442_v42, %v5438_v14 }
 0x3c8   :  { %vm5607_vm9 = vweird.f32 %v16104_v32  ;;  %v5614_v19 = vor.u32 1.1754944e-38, %v5613_v45  ;;  %v5490_v16 = vmul.f32 %v5443_v5, %v1382_v49  ;;  %vm5612_vm11 = vcmp.eq.f32.partialorder %v5611_v52, 8.507059e+37 }
 0x3c9   :  { %v5517_v29 = vmul.f32 %v14515_v1, %v5516_v53  ;;  %v5411_v6 = vadd.f32 %v5258_v28, %v16113_v10  ;;  %v5764_v53 = vsub.f32 1.0, %v5763_v33  ;;  %v11907_v33 = vmul.f32 -1.442695, %v15939_v22 }
 0x3ca   :  { %vm5768_vm12 = vweird.f32 %v16117_v23  ;;  %v5773_v14 = vand.u32 2147483648, %v16102_v2 }
 0x3cb   :  { %v5518_v41 = vadd.f32 %v14515_v1, %v5517_v29  ;;  %v11891_v15 = vmul.f32 -1.442695, %v5411_v6  ;;  %v5226_v9 = vpop.f32.mrf.mxu1  ;;  %v5765_v6 = vmul.f32 %v16117_v23, %v5764_v53  ;;  %vm5769_vm14 = vmor %vm5767_vm13, %vm5768_vm12 }
 0x3cc   :  { %v14519_v44 = vpop.eup %14518  ;;  %v5241_v11 = vpop.f32.mrf.mxu2 }
 0x3cd   :  { %v5522_v18 = vsel %vm16121_vm15, %v14515_v1, %v5518_v41  ;;  %v5603_v40 = vmul.f32 %v14519_v44, %v16104_v32  ;;  %vm5608_vm0 = vweird.f32 %v14519_v44  ;;  %14520 = vpow2.f32 %v11891_v15  ;;  %v5208_v8 = vpop.f32.mrf.mxu0 }
 0x3ce   :  { %v5259_v47 = vpop.f32.mrf.mxu3  ;;  %v5527_v4 = vsel %vm5524_vm5, %v5526_v13, %v5522_v18  ;;  %v5242_v1 = vadd.f32 %v5241_v11, %v5224_v61  ;;  %vm5609_vm10 = vmor %vm5607_vm9, %vm5608_vm0  ;;  %v5227_v18 = vadd.f32 %v5226_v9, %v5208_v8  ;;  %v5766_v35 = vadd.f32 %v16117_v23, %v5765_v6 }
 0x3cf   :  { %v5604_v12 = vsub.f32 1.0, %v5603_v40  ;;  %v5574_v26 = vmul.f32 %v5527_v4, %v1386_v31 }
 0x3d0   :  { %v5260_v36 = vadd.f32 %v5259_v47, %v5242_v1  ;;  %v5770_v52 = vsel %vm5769_vm14, %v16117_v23, %v5766_v35 }
 0x3d1   :  { %v5605_v48 = vmul.f32 %v14519_v44, %v5604_v12  ;;  %v5578_v28 = vadd.f32 %v5574_v26, %v5490_v16  ;;  %v5771_v12 = vand.u32 2147483647, %v16102_v2 }
 0x3d2   :  { %v5495_v43 = vadd.f32 %v5260_v36, %v16113_v10 }
 0x3d3   :  { %v5606_v60 = vadd.f32 %v14519_v44, %v5605_v48  ;;  %v14521_v41 = vpop.eup %14520  ;;  %v5228_v61 = vpop.f32.mrf.mxu1  ;;  %v5774_v48 = vor.u32 1.1754944e-38, %v5773_v14  ;;  %vm5772_vm15 = vcmp.eq.f32.partialorder %v5771_v12, 8.507059e+37 }
 0x3d4   :  { %v11895_v58 = vmul.f32 -1.442695, %v5495_v43  ;;  %v5244_v32 = vpop.f32.mrf.mxu2  ;;  %v16153_v57 = vadd.f32 1.0, %v14521_v41 }
 0x3d5   :  { %v5610_v29 = vsel %vm5609_vm10, %v14519_v44, %v5606_v60  ;;  %v5245_v39 = vadd.f32 %v5244_v32, %v5227_v18  ;;  %v5210_v15 = vpop.f32.mrf.mxu0  ;;  %v5775_v5 = vsel %vm5772_vm15, %v5774_v48, %v5770_v52 }
 0x3d6   :  { %v5615_v0 = vsel %vm5612_vm11, %v5614_v19, %v5610_v29  ;;  %v5262_v40 = vpop.f32.mrf.mxu3  ;;  %14522 = vpow2.f32 %v11895_v58  ;;  %v350_v29 = vperm.slane %v16088_v37, 6  ;;  %vm5450_vm0 = vweird.f32 %v16153_v57 }
 0x3d7   :  { %v5662_v54 = vmul.f32 %v5615_v0, %v1390_v51  ;;  %14524 = vrcp.f32 %v16153_v57  ;;  %v5263_v20 = vadd.f32 %v5262_v40, %v5245_v39  ;;  %v5456_v39 = vand.u32 2147483648, %v16153_v57 }
 0x3d8   :  { %14526 = vpow2.f32 %v11907_v33 }
 0x3d9   :  { %v5666_v44 = vadd.f32 %v5662_v54, %v5578_v28  ;;  %v5583_v22 = vadd.f32 %v5263_v20, %v16113_v10  ;;  %v5454_v28 = vand.u32 2147483647, %v16153_v57 }
 0x3db   :  { %v16157_v13 = vadd.f32 %v15999_v21, %v5666_v44  ;;  %v11899_v11 = vmul.f32 -1.442695, %v5583_v22  ;;  %v5293_v51 = vpop.f32.mrf.mxu1  ;;  %v16190_v44 = vadd.f32 %v15893_v62, %v350_v29  ;;  %vm16204_vm10 = vcmp.eq.f32.partialorder %v5454_v28, 8.507059e+37 }
 0x3dc   :  { %v14523_v21 = vpop.eup %14522  ;;  %v5246_v47 = vpop.f32.mrf.mxu2 }
 0x3dd   :  { %14528 = vtanh.f32 %v16157_v13  ;;  %v16166_v4 = vpop.eup %14524  ;;  %v5511_v45 = vadd.f32 1.0, %v14523_v21  ;;  %v5275_v43 = vpop.f32.mrf.mxu0 }
 0x3de   :  { %v5264_v42 = vpop.f32.mrf.mxu3  ;;  %14530 = vpow2.f32 %v11899_v11  ;;  %v14527_v1 = vpop.eup %14526  ;;  %v5446_v2 = vmul.f32 %v16166_v4, %v16153_v57  ;;  %v5294_v8 = vadd.f32 %v5293_v51, %v5275_v43  ;;  %vm5451_vm2 = vweird.f32 %v16166_v4  ;;  %v1383_v43 = vld [vmem:[#allocation3 + $0x8] sm:$0xff] }
 0x3df   :  { %14532 = vrcp.f32 %v5511_v45  ;;  %v16173_v26 = vadd.f32 1.0, %v14527_v1  ;;  %vm5534_vm3 = vweird.f32 %v5511_v45  ;;  %v5540_v54 = vand.u32 2147483648, %v5511_v45  ;;  %vm16200_vm9 = vmor %vm5450_vm0, %vm5451_vm2 }
 0x3e0   :  { %v5447_v36 = vsub.f32 1.0, %v5446_v2  ;;  %v5538_v40 = vand.u32 2147483647, %v5511_v45  ;;  %v5457_v11 = vor.u32 1.1754944e-38, %v5456_v39 }
 0x3e1   :  { %14534 = vrcp.f32 %v16173_v26  ;;  %v5541_v15 = vor.u32 1.1754944e-38, %v5540_v54  ;;  %vm5782_vm2 = vweird.f32 %v16173_v26 }
 0x3e2   :  { %v5448_v19 = vmul.f32 %v16166_v4, %v5447_v36  ;;  %vm5539_vm11 = vcmp.eq.f32.partialorder %v5538_v40, 8.507059e+37  ;;  %v1387_v36 = vld [vmem:[#allocation3 + $0x28] sm:$0xff] }
 0x3e3   :  { %v14529_v10 = vpop.eup %14528  ;;  %v5295_v48 = vpop.f32.mrf.mxu1 }
 0x3e4   :  { %v16171_v31 = vmul.f32 %v14529_v10, %v5775_v5  ;;  %v14531_v60 = vpop.eup %14530  ;;  %v5311_v9 = vpop.f32.mrf.mxu2  ;;  %v5449_v18 = vadd.f32 %v16166_v4, %v5448_v19 }
 0x3e5   :  { %v14533_v23 = vpop.eup %14532  ;;  %v16176_v53 = vadd.f32 1.0, %v14531_v60  ;;  %v5312_v6 = vadd.f32 %v5311_v9, %v5294_v8 }
 0x3e6   :  { %5870 = vst [vmem:[#allocation1] sm:$0xff] %v16171_v31  ;;  %v5530_v49 = vmul.f32 %v14533_v23, %v5511_v45  ;;  %vm5535_vm1 = vweird.f32 %v14533_v23  ;;  %v5329_v41 = vpop.f32.mrf.mxu3  ;;  %v5453_v57 = vsel %vm16200_vm9, %v16166_v4, %v5449_v18  ;;  %v5277_v45 = vpop.f32.mrf.mxu0 }
 0x3e7   :  { %14536 = vrcp.f32 %v16176_v53  ;;  %v16184_v58 = vpop.eup %14534  ;;  %vm5536_vm5 = vmor %vm5534_vm3, %vm5535_vm1  ;;  %v5330_v14 = vadd.f32 %v5329_v41, %v5312_v6  ;;  %v5626_v42 = vand.u32 2147483647, %v16176_v53  ;;  %v5628_v52 = vand.u32 2147483648, %v16176_v53  ;;  %v1391_v41 = vld [vmem:[#allocation3 + $0x48] sm:$0xff] }
 0x3e8   :  { %v5531_v16 = vsub.f32 1.0, %v5530_v49  ;;  %v5778_v22 = vmul.f32 %v16184_v58, %v16173_v26  ;;  %v5296_v5 = vadd.f32 %v5295_v48, %v5277_v45  ;;  %v5458_v4 = vsel %vm16204_vm10, %v5457_v11, %v5453_v57 }
 0x3e9   :  { %v5412_v21 = vadd.f32 %v5330_v14, %v16190_v44  ;;  %vm5622_vm13 = vweird.f32 %v16176_v53  ;;  %v5629_v51 = vor.u32 1.1754944e-38, %v5628_v52  ;;  %vm5627_vm15 = vcmp.eq.f32.partialorder %v5626_v42, 8.507059e+37 }
 0x3ea   :  { %v5532_v0 = vmul.f32 %v14533_v23, %v5531_v16  ;;  %v5779_v16 = vsub.f32 1.0, %v5778_v22  ;;  %vm5783_vm1 = vweird.f32 %v16184_v58 }
 0x3eb   :  { %v11892_v10 = vmul.f32 -1.442695, %v5412_v21  ;;  %v5298_v6 = vpop.f32.mrf.mxu1  ;;  %v5788_v21 = vand.u32 2147483648, %v16173_v26  ;;  %vm5784_vm3 = vmor %vm5782_vm2, %vm5783_vm1 }
 0x3ec   :  { %v5533_v32 = vadd.f32 %v14533_v23, %v5532_v0  ;;  %v5313_v2 = vpop.f32.mrf.mxu2  ;;  %v5491_v0 = vmul.f32 %v5458_v4, %v1383_v43 }
 0x3ed   :  { %v14537_v33 = vpop.eup %14536  ;;  %14538 = vpow2.f32 %v11892_v10  ;;  %v5314_v19 = vadd.f32 %v5313_v2, %v5296_v5  ;;  %v5789_v48 = vor.u32 1.1754944e-38, %v5788_v21 }
 0x3ee   :  { %v5537_v20 = vsel %vm5536_vm5, %v14533_v23, %v5533_v32  ;;  %v5618_v35 = vmul.f32 %v14537_v33, %v16176_v53  ;;  %vm5623_vm12 = vweird.f32 %v14537_v33  ;;  %v5331_v60 = vpop.f32.mrf.mxu3  ;;  %v5780_v53 = vmul.f32 %v16184_v58, %v5779_v16  ;;  %v5280_v40 = vpop.f32.mrf.mxu0 }
 0x3ef   :  { %v5542_v47 = vsel %vm5539_vm11, %v5541_v15, %v5537_v20  ;;  %vm5624_vm14 = vmor %vm5622_vm13, %vm5623_vm12  ;;  %v5332_v9 = vadd.f32 %v5331_v60, %v5314_v19  ;;  %v5299_v14 = vadd.f32 %v5298_v6, %v5280_v40 }
 0x3f0   :  { %v5619_v61 = vsub.f32 1.0, %v5618_v35  ;;  %v5575_v23 = vmul.f32 %v5542_v47, %v1387_v36 }
 0x3f1   :  { %v5496_v32 = vadd.f32 %v5332_v9, %v16190_v44 }
 0x3f2   :  { %v5620_v1 = vmul.f32 %v14537_v33, %v5619_v61  ;;  %v5579_v54 = vadd.f32 %v5575_v23, %v5491_v0  ;;  %v5781_v61 = vadd.f32 %v16184_v58, %v5780_v53 }
 0x3f3   :  { %v14539_v39 = vpop.eup %14538  ;;  %v11896_v35 = vmul.f32 -1.442695, %v5496_v32  ;;  %v5300_v52 = vpop.f32.mrf.mxu1 }
 0x3f4   :  { %v5621_v49 = vadd.f32 %v14537_v33, %v5620_v1  ;;  %v5316_v22 = vpop.f32.mrf.mxu2  ;;  %v16220_v62 = vadd.f32 1.0, %v14539_v39  ;;  %v5785_v47 = vsel %vm5784_vm3, %v16184_v58, %v5781_v61 }
 0x3f5   :  { %14540 = vpow2.f32 %v11896_v35  ;;  %v5317_v57 = vadd.f32 %v5316_v22, %v5299_v14 }
 0x3f6   :  { %v5625_v8 = vsel %vm5624_vm14, %v14537_v33, %v5621_v49  ;;  %v5334_v12 = vpop.f32.mrf.mxu3  ;;  %v11908_v33 = vmul.f32 -1.442695, %v15946_v30  ;;  %14542 = vrcp.f32 %v16220_v62  ;;  %v5786_v30 = vand.u32 2147483647, %v16173_v26  ;;  %v5282_v42 = vpop.f32.mrf.mxu0 }
 0x3f7   :  { %v5630_v28 = vsel %vm5627_vm15, %v5629_v51, %v5625_v8  ;;  %v5335_v11 = vadd.f32 %v5334_v12, %v5317_v57  ;;  %v351_v51 = vperm.slane %v16088_v37, 7  ;;  %v5469_v39 = vand.u32 2147483647, %v16220_v62 }
 0x3f8   :  { %v5663_v18 = vmul.f32 %v5630_v28, %v1391_v41  ;;  %vm5787_vm5 = vcmp.eq.f32.partialorder %v5786_v30, 8.507059e+37  ;;  %vm5465_vm12 = vweird.f32 %v16220_v62  ;;  %v11909_v42 = vmul.f32 -1.442695, %v15954_v7 }
 0x3f9   :  { %v5790_v36 = vsel %vm5787_vm5, %v5789_v48, %v5785_v47  ;;  %v16252_v53 = vadd.f32 %v15891_v50, %v351_v51  ;;  %v5471_v50 = vand.u32 2147483648, %v16220_v62  ;;  %vm16277_vm14 = vcmp.eq.f32.partialorder %v5469_v39, 8.507059e+37  ;;  %v1392_v39 = vld [vmem:[#allocation3 + $0x50] sm:$0xff] }
 0x3fa   :  { %v5667_v20 = vadd.f32 %v5663_v18, %v5579_v54 }
 0x3fb   :  { %v14541_v45 = vpop.eup %14540  ;;  %v5365_v9 = vpop.f32.mrf.mxu1 }
 0x3fc   :  { %v16223_v15 = vadd.f32 %v16035_v25, %v5667_v20  ;;  %v5584_v25 = vadd.f32 %v5335_v11, %v16190_v44  ;;  %v5318_v10 = vpop.f32.mrf.mxu2  ;;  %v16234_v2 = vpop.eup %14542  ;;  %v5512_v60 = vadd.f32 1.0, %v14541_v45 }
 0x3fd   :  { %v5461_v58 = vmul.f32 %v16234_v2, %v16220_v62  ;;  %vm5466_vm9 = vweird.f32 %v16234_v2 }
 0x3fe   :  { %14544 = vtanh.f32 %v16223_v15  ;;  %v11900_v1 = vmul.f32 -1.442695, %v5584_v25  ;;  %v5336_v5 = vpop.f32.mrf.mxu3  ;;  %v5347_v8 = vpop.f32.mrf.mxu0  ;;  %v5553_v20 = vand.u32 2147483647, %v5512_v60  ;;  %v5555_v35 = vand.u32 2147483648, %v5512_v60  ;;  %vm16273_vm13 = vmor %vm5465_vm12, %vm5466_vm9 }
 0x3ff   :  { %14546 = vpow2.f32 %v11908_v33  ;;  %v5462_v19 = vsub.f32 1.0, %v5461_v58  ;;  %v5366_v54 = vadd.f32 %v5365_v9, %v5347_v8  ;;  %vm5549_vm10 = vweird.f32 %v5512_v60  ;;  %v1388_v8 = vld [vmem:[#allocation3 + $0x30] sm:$0xff] }
 0x400   :  { %14548 = vpow2.f32 %v11900_v1  ;;  %vm5554_vm15 = vcmp.eq.f32.partialorder %v5553_v20, 8.507059e+37  ;;  %v5556_v62 = vor.u32 1.1754944e-38, %v5555_v35 }
 0x401   :  { %14550 = vrcp.f32 %v5512_v60  ;;  %v5463_v41 = vmul.f32 %v16234_v2, %v5462_v19 }
 0x403   :  { %v5464_v22 = vadd.f32 %v16234_v2, %v5463_v41  ;;  %v5367_v45 = vpop.f32.mrf.mxu1 }
 0x404   :  { %v14545_v4 = vpop.eup %14544  ;;  %v5383_v18 = vpop.f32.mrf.mxu2 }
 0x405   :  { %v14547_v26 = vpop.eup %14546  ;;  %v16236_v23 = vmul.f32 %v14545_v4, %v5790_v36  ;;  %v5384_v6 = vadd.f32 %v5383_v18, %v5366_v54  ;;  %v5468_v48 = vsel %vm16273_vm13, %v16234_v2, %v5464_v22  ;;  %v5472_v36 = vor.u32 1.1754944e-38, %v5471_v50  ;;  %v1384_v54 = vld [vmem:[#allocation3 + $0x10] sm:$0xff] }
 0x406   :  { %v16241_v44 = vadd.f32 1.0, %v14547_v26  ;;  %v14549_v49 = vpop.eup %14548  ;;  %v5401_v32 = vpop.f32.mrf.mxu3 }
 0x407   :  { %5871 = vst [vmem:[#allocation1 + $0x9] sm:$0xff] %v16236_v23  ;;  %v14551_v16 = vpop.eup %14550  ;;  %v16243_v43 = vadd.f32 1.0, %v14549_v49  ;;  %v5402_v33 = vadd.f32 %v5401_v32, %v5384_v6  ;;  %v5349_v52 = vpop.f32.mrf.mxu0 }
 0x408   :  { %14552 = vrcp.f32 %v16241_v44  ;;  %v5545_v0 = vmul.f32 %v14551_v16, %v5512_v60  ;;  %vm5550_vm0 = vweird.f32 %v14551_v16  ;;  %v5368_v5 = vadd.f32 %v5367_v45, %v5349_v52 }
 0x409   :  { %14554 = vrcp.f32 %v16243_v43  ;;  %vm16260_vm11 = vmor %vm5549_vm10, %vm5550_vm0  ;;  %v5413_v30 = vadd.f32 %v5402_v33, %v16252_v53  ;;  %v5641_v58 = vand.u32 2147483647, %v16243_v43  ;;  %v5643_v49 = vand.u32 2147483648, %v16243_v43 }
 0x40a   :  { %v5546_v28 = vsub.f32 1.0, %v5545_v0  ;;  %v5473_v0 = vsel %vm16277_vm14, %v5472_v36, %v5468_v48  ;;  %vm5637_vm2 = vweird.f32 %v16243_v43  ;;  %v5803_v48 = vand.u32 2147483648, %v16241_v44 }
 0x40b   :  { %v11893_v10 = vmul.f32 -1.442695, %v5413_v30  ;;  %v5644_v18 = vor.u32 1.1754944e-38, %v5643_v49  ;;  %v5492_v32 = vmul.f32 %v5473_v0, %v1384_v54  ;;  %vm5642_vm5 = vcmp.eq.f32.partialorder %v5641_v58, 8.507059e+37  ;;  %v5370_v22 = vpop.f32.mrf.mxu1 }
 0x40c   :  { %v5547_v40 = vmul.f32 %v14551_v16, %v5546_v28  ;;  %v5385_v60 = vpop.f32.mrf.mxu2  ;;  %vm5797_vm9 = vweird.f32 %v16241_v44  ;;  %v5801_v7 = vand.u32 2147483647, %v16241_v44 }
 0x40d   :  { %14556 = vpow2.f32 %v11893_v10 }
 0x40e   :  { %v16256_v14 = vpop.eup %14552  ;;  %v5548_v12 = vadd.f32 %v14551_v16, %v5547_v40  ;;  %v5403_v4 = vpop.f32.mrf.mxu3 }
 0x40f   :  { %v14555_v57 = vpop.eup %14554  ;;  %v5793_v25 = vmul.f32 %v16256_v14, %v16241_v44  ;;  %v5352_v35 = vpop.f32.mrf.mxu0  ;;  %vm5798_vm0 = vweird.f32 %v16256_v14 }
 0x410   :  { %v5552_v21 = vsel %vm16260_vm11, %v14551_v16, %v5548_v12  ;;  %v5633_v11 = vmul.f32 %v14555_v57, %v16243_v43  ;;  %vm5638_vm1 = vweird.f32 %v14555_v57  ;;  %v5386_v16 = vadd.f32 %v5385_v60, %v5368_v5  ;;  %vm5799_vm10 = vmor %vm5797_vm9, %vm5798_vm0 }
 0x411   :  { %v5557_v26 = vsel %vm5554_vm15, %v5556_v62, %v5552_v21  ;;  %v5794_v28 = vsub.f32 1.0, %v5793_v25  ;;  %vm5639_vm3 = vmor %vm5637_vm2, %vm5638_vm1  ;;  %v5371_v21 = vadd.f32 %v5370_v22, %v5352_v35  ;;  %vm5802_vm11 = vcmp.eq.f32.partialorder %v5801_v7, 8.507059e+37  ;;  %v1389_v7 = vld [vmem:[#allocation3 + $0x38] sm:$0xff] }
 0x412   :  { %v5634_v1 = vsub.f32 1.0, %v5633_v11  ;;  %v5576_v2 = vmul.f32 %v5557_v26, %v1388_v8  ;;  %v5404_v41 = vadd.f32 %v5403_v4, %v5386_v16 }
 0x413   :  { %v14557_v12 = vpop.eup %14556  ;;  %v5795_v30 = vmul.f32 %v16256_v14, %v5794_v28  ;;  %v5372_v5 = vpop.f32.mrf.mxu1 }
 0x414   :  { %v5635_v19 = vmul.f32 %v14555_v57, %v5634_v1  ;;  %v5497_v6 = vadd.f32 %v5404_v41, %v16252_v53  ;;  %v5580_v33 = vadd.f32 %v5576_v2, %v5492_v32  ;;  %v5388_v43 = vpop.f32.mrf.mxu2  ;;  %v16291_v25 = vadd.f32 1.0, %v14557_v12 }
 0x415   :  { %v5796_v45 = vadd.f32 %v16256_v14, %v5795_v30 }
 0x416   :  { %v5636_v9 = vadd.f32 %v14555_v57, %v5635_v19  ;;  %v11897_v61 = vmul.f32 -1.442695, %v5497_v6  ;;  %v5406_v11 = vpop.f32.mrf.mxu3  ;;  %v5804_v19 = vor.u32 1.1754944e-38, %v5803_v48  ;;  %v5486_v12 = vand.u32 2147483648, %v16291_v25 }
 0x417   :  { %v5354_v10 = vpop.f32.mrf.mxu0  ;;  %v5800_v58 = vsel %vm5799_vm10, %v16256_v14, %v5796_v45  ;;  %vm5480_vm1 = vweird.f32 %v16291_v25 }
 0x418   :  { %v5640_v40 = vsel %vm5639_vm3, %v14555_v57, %v5636_v9  ;;  %14558 = vpow2.f32 %v11897_v61  ;;  %v5389_v57 = vadd.f32 %v5388_v43, %v5371_v21  ;;  %v5805_v16 = vsel %vm5802_vm11, %v5804_v19, %v5800_v58 }
 0x419   :  { %v5645_v20 = vsel %vm5642_vm5, %v5644_v18, %v5640_v40  ;;  %14560 = vrcp.f32 %v16291_v25 }
 0x41a   :  { %v5664_v50 = vmul.f32 %v5645_v20, %v1392_v39  ;;  %v5407_v52 = vadd.f32 %v5406_v11, %v5389_v57  ;;  %v5487_v57 = vor.u32 1.1754944e-38, %v5486_v12 }
 0x41c   :  { %v5668_v47 = vadd.f32 %v5664_v50, %v5580_v33  ;;  %v5585_v1 = vadd.f32 %v5407_v52, %v16252_v53  ;;  %v5390_v4 = vpop.f32.mrf.mxu2  ;;  %v5484_v50 = vand.u32 2147483647, %v16291_v25 }
 0x41e   :  { %v16296_v62 = vadd.f32 %v16069_v55, %v5668_v47  ;;  %v14559_v55 = vpop.eup %14558  ;;  %v11901_v60 = vmul.f32 -1.442695, %v5585_v1  ;;  %v5408_v36 = vpop.f32.mrf.mxu3  ;;  %vm5485_vm5 = vcmp.eq.f32.partialorder %v5484_v50, 8.507059e+37 }
 0x41f   :  { %v14561_v26 = vpop.eup %14560  ;;  %v5513_v49 = vadd.f32 1.0, %v14559_v55  ;;  %v1385_v55 = vld [vmem:[#allocation3 + $0x18] sm:$0xff] }
 0x420   :  { %14562 = vtanh.f32 %v16296_v62  ;;  %v5476_v44 = vmul.f32 %v14561_v26, %v16291_v25  ;;  %vm5481_vm13 = vweird.f32 %v14561_v26 }
 0x421   :  { %14564 = vpow2.f32 %v11909_v42  ;;  %v5570_v6 = vand.u32 2147483648, %v5513_v49  ;;  %vm5564_vm14 = vweird.f32 %v5513_v49  ;;  %v5568_v35 = vand.u32 2147483647, %v5513_v49  ;;  %vm5482_vm2 = vmor %vm5480_vm1, %vm5481_vm13 }
 0x422   :  { %14566 = vpow2.f32 %v11901_v60  ;;  %v5477_v41 = vsub.f32 1.0, %v5476_v44 }
 0x423   :  { %14568 = vrcp.f32 %v5513_v49  ;;  %v5571_v43 = vor.u32 1.1754944e-38, %v5570_v6  ;;  %vm5569_vm3 = vcmp.eq.f32.partialorder %v5568_v35, 8.507059e+37  ;;  %v14035_v6 = vld [vmem:[#allocation10 + $0x2cc] sm:$0xf0] }
 0x424   :  { %v5478_v18 = vmul.f32 %v14561_v26, %v5477_v41  ;;  %v14099_v35 = vld [vmem:[#allocation10 + $0x5cc] sm:$0xf0] }
 0x426   :  { %v14563_v53 = vpop.eup %14562  ;;  %v5479_v39 = vadd.f32 %v14561_v26, %v5478_v18  ;;  %v5846_v18 = vrot.slane %v16236_v23, 7 }
 0x427   :  { %v14565_v0 = vpop.eup %14564  ;;  %v16307_v8 = vmul.f32 %v14563_v53, %v5805_v16 }
 0x428   :  { %v14567_v2 = vpop.eup %14566  ;;  %v16310_v9 = vadd.f32 1.0, %v14565_v0  ;;  %v5483_v11 = vsel %vm5482_vm2, %v14561_v26, %v5479_v39  ;;  %v1393_v26 = vld [vmem:[#allocation3 + $0x58] sm:$0xff] }
 0x429   :  { %5872 = vst [vmem:[#allocation1 + $0x12] sm:$0xff] %v16307_v8  ;;  %v14569_v28 = vpop.eup %14568  ;;  %v5601_v14 = vadd.f32 1.0, %v14567_v2  ;;  %v5488_v1 = vsel %vm5485_vm5, %v5487_v57, %v5483_v11  ;;  %v5860_v2 = vrot.slane %v16223_v15, 7  ;;  %v14227_v11 = vld [vmem:[#allocation10 + $0xbcc] sm:$0xf0] }
 0x42a   :  { %v5560_v54 = vmul.f32 %v14569_v28, %v5513_v49  ;;  %vm5565_vm12 = vweird.f32 %v14569_v28  ;;  %v5493_v4 = vmul.f32 %v5488_v1, %v1385_v55  ;;  %v5816_v16 = vand.u32 2147483647, %v16310_v9  ;;  %v12872_v55 = vld [vmem:[#allocation10 + $0xb40] sm:$0xf] }
 0x42b   :  { %14570 = vrcp.f32 %v5601_v14  ;;  %vm5566_vm15 = vmor %vm5564_vm14, %vm5565_vm12  ;;  %v5658_v52 = vand.u32 2147483648, %v5601_v14  ;;  %v5656_v48 = vand.u32 2147483647, %v5601_v14  ;;  %vm5652_vm9 = vweird.f32 %v5601_v14 }
 0x42c   :  { %14572 = vrcp.f32 %v16310_v9  ;;  %v5561_v32 = vsub.f32 1.0, %v5560_v54  ;;  %v5818_v44 = vand.u32 2147483648, %v16310_v9  ;;  %vm5812_vm13 = vweird.f32 %v16310_v9 }
 0x42d   :  { %v5659_v60 = vor.u32 1.1754944e-38, %v5658_v52  ;;  %vm5657_vm11 = vcmp.eq.f32.partialorder %v5656_v48, 8.507059e+37  ;;  %vm16330_vm14 = vcmp.eq.f32.partialorder %v5816_v16, 8.507059e+37  ;;  %v5863_v12 = vsel %vm1176_vm4, %v16157_v13, %v5860_v2  ;;  %v12104_v52 = vld [vmem:[#allocation10 + $0x240] sm:$0xf] }
 0x42e   :  { %v5562_v40 = vmul.f32 %v14569_v28, %v5561_v32  ;;  %v5819_v54 = vor.u32 1.1754944e-38, %v5818_v44  ;;  %v12360_v48 = vld [vmem:[#allocation10 + $0x540] sm:$0xf]  ;;  %v5847_v1 = vrot.slane %v16307_v8, 6  ;;  %v14147_v32 = vld [vmem:[#allocation10 + $0x80c] sm:$0xf0] }
 0x42f   :  { %v12328_v44 = vld [vmem:[#allocation10 + $0x4e0] sm:$0xf] }
 0x430   :  { %v5563_v20 = vadd.f32 %v14569_v28, %v5562_v40  ;;  %v12136_v40 = vld [vmem:[#allocation10 + $0x2a0] sm:$0xf] }
 0x431   :  { %v14571_v22 = vpop.eup %14570  ;;  %v12137_v39 = vor.u32 %v14035_v6, %v12136_v40  ;;  %v12584_v2 = vld [vmem:[#allocation10 + $0x7e0] sm:$0xf] }
 0x432   :  { %v16314_v33 = vpop.eup %14572  ;;  %v5567_v61 = vsel %vm5566_vm15, %v14569_v28, %v5563_v20  ;;  %v5648_v21 = vmul.f32 %v14571_v22, %v5601_v14  ;;  %vm5653_vm0 = vweird.f32 %v14571_v22  ;;  %v12392_v20 = vld [vmem:[#allocation10 + $0x5a0] sm:$0xf] }
 0x433   :  { %v5808_v47 = vmul.f32 %v16314_v33, %v16310_v9  ;;  %v5572_v42 = vsel %vm5569_vm3, %v5571_v43, %v5567_v61  ;;  %vm5654_vm10 = vmor %vm5652_vm9, %vm5653_vm0  ;;  %vm5813_vm12 = vweird.f32 %v16314_v33  ;;  %v5861_v9 = vrot.slane %v16296_v62, 6  ;;  %v12904_v43 = vld [vmem:[#allocation10 + $0xba0] sm:$0xf]  ;;  %7522 = vmatpush.bf16.msra.mxu0 %v12137_v39  ;;  %v14011_v39 = vld [vmem:[#allocation10 + $0x1ac] sm:$0xf0] }
 0x434   :  { %v5649_v30 = vsub.f32 1.0, %v5648_v21  ;;  %v5577_v25 = vmul.f32 %v5572_v42, %v1389_v7  ;;  %vm16335_vm15 = vmor %vm5812_vm13, %vm5813_vm12  ;;  %v12393_v61 = vor.u32 %v14099_v35, %v12392_v20  ;;  %v14163_v21 = vld [vmem:[#allocation10 + $0x8cc] sm:$0xf0]  ;;  %v12905_v42 = vor.u32 %v14227_v11, %v12904_v43  ;;  %v12040_v6 = vld [vmem:[#allocation10 + $0x180] sm:$0xf] }
 0x435   :  { %v5809_v5 = vsub.f32 1.0, %v5808_v47  ;;  %v12296_v20 = vld [vmem:[#allocation10 + $0x480] sm:$0xf]  ;;  %v14075_v35 = vld [vmem:[#allocation10 + $0x4ac] sm:$0xf0] }
 0x436   :  { %v5650_v45 = vmul.f32 %v14571_v22, %v5649_v30  ;;  %v5581_v49 = vadd.f32 %v5577_v25, %v5493_v4  ;;  %7535 = vmatpush.bf16.msrb.mxu1 %v12393_v61  ;;  %v14091_v25 = vld [vmem:[#allocation10 + $0x56c] sm:$0xf0]  ;;  %7561 = vmatpush.bf16.msra.mxu3 %v12905_v42  ;;  %v12041_v61 = vor.u32 %v14011_v39, %v12040_v6  ;;  %v12808_v43 = vld [vmem:[#allocation10 + $0xa80] sm:$0xf] }
 0x437   :  { %v5810_v53 = vmul.f32 %v16314_v33, %v5809_v5  ;;  %v14155_v5 = vld [vmem:[#allocation10 + $0x86c] sm:$0xf0]  ;;  %v12456_v6 = vld [vmem:[#allocation10 + $0x660] sm:$0xf] }
 0x438   :  { %v5651_v10 = vadd.f32 %v14571_v22, %v5650_v45  ;;  %v14027_v45 = vld [vmem:[#allocation10 + $0x26c] sm:$0xf0] }
 0x439   :  { %v5811_v28 = vadd.f32 %v16314_v33, %v5810_v53  ;;  %v12105_v7 = vor.u32 %v14027_v45, %v12104_v52  ;;  %v14203_v11 = vld [vmem:[#allocation10 + $0xaac] sm:$0xf0]  ;;  %v12264_v52 = vld [vmem:[#allocation10 + $0x420] sm:$0xf] }
 0x43a   :  { %v5655_v36 = vsel %vm5654_vm10, %v14571_v22, %v5651_v10  ;;  %v12648_v22 = vld [vmem:[#allocation10 + $0x8a0] sm:$0xf]  ;;  %v12361_v10 = vor.u32 %v14091_v25, %v12360_v48  ;;  %v14003_v42 = vld [vmem:[#allocation10 + $0x14c] sm:$0xf0]  ;;  %v12809_v45 = vor.u32 %v14203_v11, %v12808_v43 }
 0x43b   :  { %v5660_v58 = vsel %vm5657_vm11, %v5659_v60, %v5655_v36  ;;  %v5815_v30 = vsel %vm16335_vm15, %v16314_v33, %v5811_v28  ;;  %v12649_v57 = vor.u32 %v14163_v21, %v12648_v22  ;;  %v12616_v33 = vld [vmem:[#allocation10 + $0x840] sm:$0xf]  ;;  %7523 = vmatpush.bf16.msra.mxu0 %v12105_v7  ;;  %v14139_v21 = vld [vmem:[#allocation10 + $0x7ac] sm:$0xf0] }
 0x43c   :  { %v5665_v19 = vmul.f32 %v5660_v58, %v1393_v26  ;;  %v5820_v4 = vsel %vm16330_vm14, %v5819_v54, %v5815_v30  ;;  %v12617_v36 = vor.u32 %v14155_v5, %v12616_v33  ;;  %v14219_v26 = vld [vmem:[#allocation10 + $0xb6c] sm:$0xf0]  ;;  %v12072_v58 = vld [vmem:[#allocation10 + $0x1e0] sm:$0xf]  ;;  %7536 = vmatpush.bf16.msrb.mxu1 %v12361_v10  ;;  %v12585_v54 = vor.u32 %v14147_v32, %v12584_v2 }
 0x43d   :  { %7548 = vmatpush.bf16.msra.mxu2 %v12649_v57  ;;  %v12873_v53 = vor.u32 %v14219_v26, %v12872_v55  ;;  %v12552_v22 = vld [vmem:[#allocation10 + $0x780] sm:$0xf]  ;;  %v14067_v48 = vld [vmem:[#allocation10 + $0x44c] sm:$0xf0] }
 0x43e   :  { %v5669_v0 = vadd.f32 %v5665_v19, %v5581_v49  ;;  %v14019_v49 = vld [vmem:[#allocation10 + $0x20c] sm:$0xf0]  ;;  %v12008_v57 = vld [vmem:[#allocation10 + $0x120] sm:$0xf] }
 0x43f   :  { %v12073_v16 = vor.u32 %v14019_v49, %v12072_v58  ;;  %7562 = vmatpush.bf16.msra.mxu3 %v12873_v53  ;;  %v14131_v7 = vld [vmem:[#allocation10 + $0x74c] sm:$0xf0]  ;;  %v12776_v25 = vld [vmem:[#allocation10 + $0xa20] sm:$0xf]  ;;  %v12009_v10 = vor.u32 %v14003_v42, %v12008_v57 }
 0x440   :  { %v16327_v41 = vadd.f32 %v16086_v3, %v5669_v0  ;;  %v14083_v0 = vld [vmem:[#allocation10 + $0x50c] sm:$0xf0]  ;;  %v11976_v5 = vld [vmem:[#allocation10 + $0xc0] sm:$0xf] }
 0x441   :  { %v12329_v28 = vor.u32 %v14083_v0, %v12328_v44  ;;  %7549 = vmatpush.bf16.msra.mxu2 %v12617_v36  ;;  %7524 = vmatpush.bf16.msra.mxu0 %v12073_v16  ;;  %v14195_v33 = vld [vmem:[#allocation10 + $0xa4c] sm:$0xf0]  ;;  %v12232_v36 = vld [vmem:[#allocation10 + $0x3c0] sm:$0xf] }
 0x442   :  { %14574 = vtanh.f32 %v16327_v41  ;;  %v5862_v3 = vrot.slane %v16327_v41, 5  ;;  %v13995_v55 = vld [vmem:[#allocation10 + $0xec] sm:$0xf0]  ;;  %v12777_v49 = vor.u32 %v14195_v33, %v12776_v25  ;;  %v12488_v53 = vld [vmem:[#allocation10 + $0x6c0] sm:$0xf] }
 0x443   :  { %7537 = vmatpush.bf16.msrb.mxu1 %v12329_v28  ;;  %v14059_v26 = vld [vmem:[#allocation10 + $0x3ec] sm:$0xf0]  ;;  %v12744_v44 = vld [vmem:[#allocation10 + $0x9c0] sm:$0xf]  ;;  %v11977_v2 = vor.u32 %v13995_v55, %v11976_v5  ;;  %v12650_v33 = vld [vmem:[#allocation10 + $0x8d0] sm:$0xf0] }
 0x444   :  { %v5864_v50 = vsel %vm1178_vm6, %v5861_v9, %v5862_v3  ;;  %v12840_v9 = vld [vmem:[#allocation10 + $0xae0] sm:$0xf]  ;;  %v14211_v3 = vld [vmem:[#allocation10 + $0xb0c] sm:$0xf0] }
 0x445   :  { %v5865_v47 = vsel %vm1180_vm7, %v5863_v12, %v5864_v50  ;;  %v12841_v40 = vor.u32 %v14211_v3, %v12840_v9  ;;  %v5849_v12 = vsel %vm1176_vm4, %v16171_v31, %v5846_v18  ;;  %7550 = vmatpush.bf16.msra.mxu2 %v12585_v54  ;;  %v12553_v18 = vor.u32 %v14139_v21, %v12552_v22  ;;  %v14123_v16 = vld [vmem:[#allocation10 + $0x6ec] sm:$0xf0]  ;;  %v11944_v28 = vld [vmem:[#allocation10 + $0x60] sm:$0xf] }
 0x446   :  { %5868 = vst.msk [vmem:[#allocation3 + $0x60] ss:$8 sm:$0xf] %vm15678_vm8, %v5865_v47  ;;  %v12297_v47 = vor.u32 %v14075_v35, %v12296_v20  ;;  %7525 = vmatpush.bf16.msra.mxu0 %v12041_v61  ;;  %v14187_v0 = vld [vmem:[#allocation10 + $0x9ec] sm:$0xf0]  ;;  %v12233_v9 = vor.u32 %v14059_v26, %v12232_v36  ;;  %v12489_v54 = vor.u32 %v14123_v16, %v12488_v53 }
 0x447   :  { %7563 = vmatpush.bf16.msra.mxu3 %v12841_v40  ;;  %v13987_v32 = vld [vmem:[#allocation10 + $0x8c] sm:$0xf0]  ;;  %v12200_v3 = vld [vmem:[#allocation10 + $0x360] sm:$0xf]  ;;  %v12745_v40 = vor.u32 %v14187_v0, %v12744_v44  ;;  %v12906_v26 = vld [vmem:[#allocation10 + $0xbd0] sm:$0xf0] }
 0x448   :  { %v14575_v60 = vpop.eup %14574  ;;  %7538 = vmatpush.bf16.msrb.mxu1 %v12297_v47  ;;  %v14115_v39 = vld [vmem:[#allocation10 + $0x68c] sm:$0xf0]  ;;  %v12712_v20 = vld [vmem:[#allocation10 + $0x960] sm:$0xf]  ;;  %v11945_v22 = vor.u32 %v13987_v32, %v11944_v28  ;;  %v12106_v16 = vld [vmem:[#allocation10 + $0x270] sm:$0xf0] }
 0x449   :  { %v16354_v19 = vmul.f32 %v14575_v60, %v5820_v4  ;;  %v12265_v4 = vor.u32 %v14067_v48, %v12264_v52  ;;  %7551 = vmatpush.bf16.msra.mxu2 %v12553_v18  ;;  %v14179_v35 = vld [vmem:[#allocation10 + $0x98c] sm:$0xf0]  ;;  %v12168_v61 = vld [vmem:[#allocation10 + $0x300] sm:$0xf]  ;;  %v12457_v47 = vor.u32 %v14115_v39, %v12456_v6  ;;  %v14031_v18 = vld [vmem:[#allocation10 + $0x2a4] sm:$0xf] }
 0x44a   :  { %7526 = vmatpush.bf16.msra.mxu0 %v12009_v10  ;;  %v14043_v43 = vld [vmem:[#allocation10 + $0x32c] sm:$0xf0]  ;;  %v12424_v11 = vld [vmem:[#allocation10 + $0x600] sm:$0xf]  ;;  %v12713_v57 = vor.u32 %v14179_v35, %v12712_v20  ;;  %v14095_v48 = vld [vmem:[#allocation10 + $0x5a4] sm:$0xf] }
 0x44b   :  { %v5848_v14 = vrot.slane %v16354_v19, 5  ;;  %5873 = vst [vmem:[#allocation1 + $0x1b] sm:$0xff] %v16354_v19  ;;  %7564 = vmatpush.bf16.msra.mxu3 %v12809_v45  ;;  %v12680_v42 = vld [vmem:[#allocation10 + $0x900] sm:$0xf]  ;;  %v14171_v52 = vld [vmem:[#allocation10 + $0x92c] sm:$0xf0]  ;;  %v12169_v5 = vor.u32 %v14043_v43, %v12168_v61 }
 0x44c   :  { %7539 = vmatpush.bf16.msrb.mxu1 %v12265_v4  ;;  %v12138_v45 = vld [vmem:[#allocation10 + $0x2d0] sm:$0xf0]  ;;  %v14159_v10 = vld [vmem:[#allocation10 + $0x8a4] sm:$0xf]  ;;  %v12681_v36 = vor.u32 %v14171_v52, %v12680_v42 }
 0x44d   :  { %v5850_v50 = vsel %vm1178_vm6, %v5847_v1, %v5848_v14  ;;  %v12520_v1 = vld [vmem:[#allocation10 + $0x720] sm:$0xf]  ;;  %v14051_v14 = vld [vmem:[#allocation10 + $0x38c] sm:$0xf0]  ;;  %v12141_v55 = vor.u32 %v14031_v18, %v12138_v45  ;;  %v12653_v53 = vor.u32 %v14159_v10, %v12650_v33  ;;  %v14087_v44 = vld [vmem:[#allocation10 + $0x544] sm:$0xf] }
 0x44e   :  { %v5851_v30 = vsel %vm1180_vm7, %v5849_v12, %v5850_v50  ;;  %v12521_v58 = vor.u32 %v14131_v7, %v12520_v1  ;;  %7527 = vmatpush.bf16.msra.mxu0 %v11977_v2  ;;  %v11912_v12 = vld [vmem:[#allocation10] sm:$0xf]  ;;  %v13979_v50 = vld [vmem:[#allocation10 + $0x2c] sm:$0xf0]  ;;  %v12201_v21 = vor.u32 %v14051_v14, %v12200_v3  ;;  %v12394_v1 = vld [vmem:[#allocation10 + $0x5d0] sm:$0xf0] }
 0x44f   :  { %5854 = vst.msk [vmem:[#allocation2 + $0x60] ss:$8 sm:$0xf] %vm15678_vm8, %v5851_v30  ;;  %7565 = vmatpush.bf16.msra.mxu3 %v12777_v49  ;;  %v14107_v30 = vld [vmem:[#allocation10 + $0x62c] sm:$0xf0]  ;;  %v11913_v25 = vor.u32 %v13979_v50, %v11912_v12  ;;  %v12397_v49 = vor.u32 %v14095_v48, %v12394_v1 }
 0x450   :  { %7552 = vmatpush.bf16.msra.mxu2 %v12521_v58  ;;  %7540 = vmatpush.bf16.msrb.mxu1 %v12233_v9  ;;  %v12425_v4 = vor.u32 %v14107_v30, %v12424_v11  ;;  %v14023_v58 = vld [vmem:[#allocation10 + $0x244] sm:$0xf]  ;;  %v12362_v2 = vld [vmem:[#allocation10 + $0x570] sm:$0xf0] }
 0x451   :  { %v14151_v28 = vld [vmem:[#allocation10 + $0x844] sm:$0xf]  ;;  %v12109_v32 = vor.u32 %v14023_v58, %v12106_v16  ;;  %v12618_v9 = vld [vmem:[#allocation10 + $0x870] sm:$0xf0]  ;;  %v12365_v6 = vor.u32 %v14087_v44, %v12362_v2 }
 0x452   :  { %v5875_v60 = vld [vmem:[#allocation1 + $0x1] ss:$9 sm:$0xff]  ;;  %7528 = vmatpush.bf16.msra.mxu0 %v11945_v22  ;;  %v12621_v39 = vor.u32 %v14151_v28, %v12618_v9 }
 0x453   :  { %5880 = vst [vmem:[#allocation1] sm:$0xff] %v16157_v13  ;;  %7566 = vmatpush.bf16.msra.mxu3 %v12745_v40  ;;  %v14215_v3 = vld [vmem:[#allocation10 + $0xb44] sm:$0xf]  ;;  %v12874_v14 = vld [vmem:[#allocation10 + $0xb70] sm:$0xf0] }
 0x454   :  { %5881 = vst [vmem:[#allocation1 + $0x9] sm:$0xff] %v16223_v15  ;;  %7553 = vmatpush.bf16.msra.mxu2 %v12489_v54  ;;  %7541 = vmatpush.bf16.msrb.mxu1 %v12201_v21  ;;  %v14015_v54 = vld [vmem:[#allocation10 + $0x1e4] sm:$0xf]  ;;  %v12074_v40 = vld [vmem:[#allocation10 + $0x210] sm:$0xf0]  ;;  %v12877_v35 = vor.u32 %v14215_v3, %v12874_v14 }
 0x455   :  { %5882 = vst [vmem:[#allocation1 + $0x12] sm:$0xff] %v16296_v62  ;;  %v14079_v20 = vld [vmem:[#allocation10 + $0x4e4] sm:$0xf]  ;;  %v12330_v22 = vld [vmem:[#allocation10 + $0x510] sm:$0xf0]  ;;  %v12077_v61 = vor.u32 %v14015_v54, %v12074_v40 }
 0x456   :  { %5883 = vst [vmem:[#allocation1 + $0x1b] sm:$0xff] %v16327_v41  ;;  %7529 = vmatpush.bf16.msra.mxu0 %v11913_v25  ;;  %v14143_v12 = vld [vmem:[#allocation10 + $0x7e4] sm:$0xf]  ;;  %v12586_v50 = vld [vmem:[#allocation10 + $0x810] sm:$0xf0] }
 0x457   :  { %5878 = vst.msk [vmem:[#allocation2 + $0x80] ss:$8 sm:$0xf] %vm15678_vm8, %v5875_v60  ;;  %v14223_v60 = vld [vmem:[#allocation10 + $0xba4] sm:$0xf]  ;;  %7567 = vmatpush.bf16.msra.mxu3 %v12713_v57  ;;  %v12589_v57 = vor.u32 %v14143_v12, %v12586_v50 }
 0x458   :  { %7554 = vmatpush.bf16.msra.mxu2 %v12457_v47  ;;  %v12909_v0 = vor.u32 %v14223_v60, %v12906_v26  ;;  %7542 = vmatpush.bf16.msrb.mxu1 %v12169_v5  ;;  %v14207_v21 = vld [vmem:[#allocation10 + $0xae4] sm:$0xf]  ;;  %v12842_v43 = vld [vmem:[#allocation10 + $0xb10] sm:$0xf0]  ;;  %v12333_v47 = vor.u32 %v14079_v20, %v12330_v22 }
 0x459   :  { %v14007_v11 = vld [vmem:[#allocation10 + $0x184] sm:$0xf]  ;;  %v12042_v30 = vld [vmem:[#allocation10 + $0x1b0] sm:$0xf0]  ;;  %v12845_v52 = vor.u32 %v14207_v21, %v12842_v43 }
 0x45a   :  { %7574 = vmatpush.bf16.msrb.mxu0 %v12141_v55  ;;  %v14071_v42 = vld [vmem:[#allocation10 + $0x484] sm:$0xf]  ;;  %v12298_v18 = vld [vmem:[#allocation10 + $0x4b0] sm:$0xf0]  ;;  %v12045_v1 = vor.u32 %v14007_v11, %v12042_v30 }
 0x45b   :  { %7568 = vmatpush.bf16.msra.mxu3 %v12681_v36  ;;  %v14135_v45 = vld [vmem:[#allocation10 + $0x784] sm:$0xf]  ;;  %v12554_v48 = vld [vmem:[#allocation10 + $0x7b0] sm:$0xf0]  ;;  %v12301_v5 = vor.u32 %v14071_v42, %v12298_v18 }
 0x45c   :  { %7555 = vmatpush.bf16.msra.mxu2 %v12425_v4  ;;  %7587 = vmatpush.bf16.msra.mxu1 %v12397_v49  ;;  %v12810_v25 = vld [vmem:[#allocation10 + $0xab0] sm:$0xf0]  ;;  %v13999_v10 = vld [vmem:[#allocation10 + $0x124] sm:$0xf]  ;;  %v12557_v55 = vor.u32 %v14135_v45, %v12554_v48 }
 0x45d   :  { %v5885_v7 = vld [vmem:[#allocation1 + $0x1] ss:$9 sm:$0xff] }
 0x45e   :  { %5888 = vst.msk [vmem:[#allocation3 + $0x80] ss:$8 sm:$0xf] %vm15678_vm8, %v5885_v7  ;;  %7575 = vmatpush.bf16.msrb.mxu0 %v12109_v32  ;;  %v14199_v7 = vld [vmem:[#allocation10 + $0xa84] sm:$0xf] }
 0x45f   :  { %5890 = vst [vmem:[#allocation1] sm:$0xff] %v16171_v31  ;;  %7613 = vmatpush.bf16.msrb.mxu3 %v12909_v0  ;;  %v12010_v33 = vld [vmem:[#allocation10 + $0x150] sm:$0xf0]  ;;  %v14063_v60 = vld [vmem:[#allocation10 + $0x424] sm:$0xf]  ;;  %v12813_v4 = vor.u32 %v14199_v7, %v12810_v25 }
 0x460   :  { %5891 = vst [vmem:[#allocation1 + $0x9] sm:$0xff] %v16236_v23  ;;  %7600 = vmatpush.bf16.msrb.mxu2 %v12653_v53  ;;  %7588 = vmatpush.bf16.msra.mxu1 %v12365_v6  ;;  %v12266_v36 = vld [vmem:[#allocation10 + $0x450] sm:$0xf0]  ;;  %v14127_v26 = vld [vmem:[#allocation10 + $0x724] sm:$0xf]  ;;  %v12013_v49 = vor.u32 %v13999_v10, %v12010_v33 }
 0x461   :  { %5892 = vst [vmem:[#allocation1 + $0x12] sm:$0xff] %v16307_v8  ;;  %v12522_v58 = vld [vmem:[#allocation10 + $0x750] sm:$0xf0]  ;;  %v14191_v53 = vld [vmem:[#allocation10 + $0xa24] sm:$0xf]  ;;  %v12269_v2 = vor.u32 %v14063_v60, %v12266_v36 }
 0x462   :  { %5893 = vst [vmem:[#allocation1 + $0x1b] sm:$0xff] %v16354_v19  ;;  %7576 = vmatpush.bf16.msrb.mxu0 %v12077_v61  ;;  %v12778_v16 = vld [vmem:[#allocation10 + $0xa50] sm:$0xf0]  ;;  %v13991_v44 = vld [vmem:[#allocation10 + $0xc4] sm:$0xf]  ;;  %v12525_v28 = vor.u32 %v14127_v26, %v12522_v58 }
 0x463   :  { %7614 = vmatpush.bf16.msrb.mxu3 %v12877_v35  ;;  %v11978_v0 = vld [vmem:[#allocation10 + $0xf0] sm:$0xf0]  ;;  %v14055_v32 = vld [vmem:[#allocation10 + $0x3c4] sm:$0xf]  ;;  %v12781_v9 = vor.u32 %v14191_v53, %v12778_v16 }
 0x464   :  { %7601 = vmatpush.bf16.msrb.mxu2 %v12621_v39  ;;  %7589 = vmatpush.bf16.msra.mxu1 %v12333_v47  ;;  %v12234_v3 = vld [vmem:[#allocation10 + $0x3f0] sm:$0xf0]  ;;  %v14119_v14 = vld [vmem:[#allocation10 + $0x6c4] sm:$0xf]  ;;  %v11981_v40 = vor.u32 %v13991_v44, %v11978_v0 }
 0x465   :  { %v12490_v54 = vld [vmem:[#allocation10 + $0x6f0] sm:$0xf0]  ;;  %v14183_v6 = vld [vmem:[#allocation10 + $0x9c4] sm:$0xf]  ;;  %v12237_v50 = vor.u32 %v14055_v32, %v12234_v3  ;;  %v12400_v32 = vld [vmem:[#allocation10 + $0x5a8] sm:$0xf] }
 0x466   :  { %7577 = vmatpush.bf16.msrb.mxu0 %v12045_v1  ;;  %v12746_v39 = vld [vmem:[#allocation10 + $0x9f0] sm:$0xf0]  ;;  %v13983_v20 = vld [vmem:[#allocation10 + $0x64] sm:$0xf]  ;;  %v12493_v61 = vor.u32 %v14119_v14, %v12490_v54  ;;  %v14100_v14 = vld [vmem:[#allocation10 + $0x5d4] sm:$0xf0] }
 0x467   :  { %7615 = vmatpush.bf16.msrb.mxu3 %v12845_v52  ;;  %v11946_v35 = vld [vmem:[#allocation10 + $0x90] sm:$0xf0]  ;;  %v14047_v22 = vld [vmem:[#allocation10 + $0x364] sm:$0xf]  ;;  %v12749_v43 = vor.u32 %v14183_v6, %v12746_v39  ;;  %v14164_v54 = vld [vmem:[#allocation10 + $0x8d4] sm:$0xf0] }
 0x468   :  { %7602 = vmatpush.bf16.msrb.mxu2 %v12589_v57  ;;  %7590 = vmatpush.bf16.msra.mxu1 %v12301_v5  ;;  %v12202_v21 = vld [vmem:[#allocation10 + $0x390] sm:$0xf0]  ;;  %v14111_v11 = vld [vmem:[#allocation10 + $0x664] sm:$0xf]  ;;  %v11949_v47 = vor.u32 %v13983_v20, %v11946_v35 }
 0x469   :  { %v5895_v12 = vld [vmem:[#allocation1 + $0x2] ss:$9 sm:$0xff]  ;;  %v12205_v45 = vor.u32 %v14047_v22, %v12202_v21  ;;  %v14228_v21 = vld [vmem:[#allocation10 + $0xbd4] sm:$0xf0] }
 0x46a   :  { %7578 = vmatpush.bf16.msrb.mxu0 %v12013_v49  ;;  %5898 = vst.msk [vmem:[#allocation2 + $0x61] ss:$8 sm:$0xf] %vm15678_vm8, %v5895_v12  ;;  %v12458_v30 = vld [vmem:[#allocation10 + $0x690] sm:$0xf0] }
 0x46b   :  { %7616 = vmatpush.bf16.msrb.mxu3 %v12813_v4  ;;  %5900 = vst [vmem:[#allocation1] sm:$0xff] %v16157_v13  ;;  %v14175_v57 = vld [vmem:[#allocation10 + $0x964] sm:$0xf]  ;;  %v12714_v42 = vld [vmem:[#allocation10 + $0x990] sm:$0xf0]  ;;  %v12461_v48 = vor.u32 %v14111_v11, %v12458_v30 }
 0x46c   :  { %7603 = vmatpush.bf16.msrb.mxu2 %v12557_v55  ;;  %7591 = vmatpush.bf16.msra.mxu1 %v12269_v2  ;;  %5901 = vst [vmem:[#allocation1 + $0x9] sm:$0xff] %v16223_v15  ;;  %v13975_v52 = vld [vmem:[#allocation10 + $0x4] sm:$0xf]  ;;  %v11914_v18 = vld [vmem:[#allocation10 + $0x30] sm:$0xf0]  ;;  %v12717_v7 = vor.u32 %v14175_v57, %v12714_v42  ;;  %v12401_v42 = vor.u32 %v14100_v14, %v12400_v32 }
 0x46d   :  { %5902 = vst [vmem:[#allocation1 + $0x12] sm:$0xff] %v16296_v62  ;;  %v14039_v1 = vld [vmem:[#allocation10 + $0x304] sm:$0xf]  ;;  %v12170_v25 = vld [vmem:[#allocation10 + $0x330] sm:$0xf0]  ;;  %v11917_v5 = vor.u32 %v13975_v52, %v11914_v18 }
 0x46e   :  { %7579 = vmatpush.bf16.msrb.mxu0 %v11981_v40  ;;  %5903 = vst [vmem:[#allocation1 + $0x1b] sm:$0xff] %v16327_v41  ;;  %v14103_v10 = vld [vmem:[#allocation10 + $0x604] sm:$0xf]  ;;  %v12426_v33 = vld [vmem:[#allocation10 + $0x630] sm:$0xf0]  ;;  %v12173_v4 = vor.u32 %v14039_v1, %v12170_v25 }
 0x46f   :  { %7617 = vmatpush.bf16.msrb.mxu3 %v12781_v9  ;;  %v14167_v55 = vld [vmem:[#allocation10 + $0x904] sm:$0xf]  ;;  %v12682_v60 = vld [vmem:[#allocation10 + $0x930] sm:$0xf0]  ;;  %v12429_v36 = vor.u32 %v14103_v10, %v12426_v33  ;;  %v12112_v52 = vld [vmem:[#allocation10 + $0x248] sm:$0xf] }
 0x470   :  { %7604 = vmatpush.bf16.msrb.mxu2 %v12525_v28  ;;  %7592 = vmatpush.bf16.msra.mxu1 %v12237_v50  ;;  %v12685_v26 = vor.u32 %v14167_v55, %v12682_v60  ;;  %v14036_v28 = vld [vmem:[#allocation10 + $0x2d4] sm:$0xf0]  ;;  %v12624_v10 = vld [vmem:[#allocation10 + $0x848] sm:$0xf] }
 0x471   :  { %v16406_v44 = vld [vmem:[#allocation2 + $0x60] sm:$0xff]  ;;  %v16418_v0 = vld [vmem:[#allocation2 + $0x70] sm:$0xff]  ;;  %v16420_v2 = vld [vmem:[#allocation2 + $0x78] sm:$0xff] }
 0x472   :  { %7580 = vmatpush.bf16.msrb.mxu0 %v11949_v47  ;;  %v14028_v18 = vld [vmem:[#allocation10 + $0x274] sm:$0xf0]  ;;  %v12848_v32 = vld [vmem:[#allocation10 + $0xae8] sm:$0xf] }
 0x473   :  { %7618 = vmatpush.bf16.msrb.mxu3 %v12749_v43  ;;  %v14092_v25 = vld [vmem:[#allocation10 + $0x574] sm:$0xf0]  ;;  %v12113_v60 = vor.u32 %v14028_v18, %v12112_v52  ;;  %v12048_v14 = vld [vmem:[#allocation10 + $0x188] sm:$0xf] }
 0x474   :  { %7605 = vmatpush.bf16.msrb.mxu2 %v12493_v61  ;;  %7593 = vmatpush.bf16.msra.mxu1 %v12205_v45  ;;  %v12912_v61 = vld [vmem:[#allocation10 + $0xba8] sm:$0xf]  ;;  %v14156_v33 = vld [vmem:[#allocation10 + $0x874] sm:$0xf0] }
 0x475   :  { %v5905_v58 = vld [vmem:[#allocation1 + $0x2] ss:$9 sm:$0xff]  ;;  %v12913_v1 = vor.u32 %v14228_v21, %v12912_v61  ;;  %v14220_v55 = vld [vmem:[#allocation10 + $0xb74] sm:$0xf0] }
 0x476   :  { %7581 = vmatpush.bf16.msrb.mxu0 %v11917_v5  ;;  %5910 = vst [vmem:[#allocation1] sm:$0xff] %v16171_v31  ;;  %v12880_v5 = vld [vmem:[#allocation10 + $0xb48] sm:$0xf]  ;;  %v14068_v18 = vld [vmem:[#allocation10 + $0x454] sm:$0xf0] }
 0x477   :  { %7619 = vmatpush.bf16.msrb.mxu3 %v12717_v7  ;;  %5911 = vst [vmem:[#allocation1 + $0x9] sm:$0xff] %v16236_v23  ;;  %v12368_v7 = vld [vmem:[#allocation10 + $0x548] sm:$0xf] }
 0x478   :  { %7606 = vmatpush.bf16.msrb.mxu2 %v12461_v48  ;;  %7594 = vmatpush.bf16.msra.mxu1 %v12173_v4  ;;  %5912 = vst [vmem:[#allocation1 + $0x12] sm:$0xff] %v16307_v8  ;;  %v12369_v4 = vor.u32 %v14092_v25, %v12368_v7  ;;  %v12016_v21 = vld [vmem:[#allocation10 + $0x128] sm:$0xf]  ;;  %v14196_v25 = vld [vmem:[#allocation10 + $0xa54] sm:$0xf0] }
 0x479   :  { %5913 = vst [vmem:[#allocation1 + $0x1b] sm:$0xff] %v16354_v19  ;;  %v12272_v52 = vld [vmem:[#allocation10 + $0x428] sm:$0xf] }
 0x47a   :  { %5908 = vst.msk [vmem:[#allocation3 + $0x61] ss:$8 sm:$0xf] %vm15678_vm8, %v5905_v58  ;;  %v12625_v58 = vor.u32 %v14156_v33, %v12624_v10  ;;  %v12784_v7 = vld [vmem:[#allocation10 + $0xa28] sm:$0xf]  ;;  %v12273_v33 = vor.u32 %v14068_v18, %v12272_v52 }
 0x47b   :  { %7620 = vmatpush.bf16.msrb.mxu3 %v12685_v26  ;;  %v14020_v26 = vld [vmem:[#allocation10 + $0x214] sm:$0xf0]  ;;  %v14032_v52 = vld [vmem:[#allocation10 + $0x2ac] sm:$0xf]  ;;  %v12146_v18 = vld [vmem:[#allocation10 + $0x2d8] sm:$0xf0] }
 0x47c   :  { %7607 = vmatpush.bf16.msrb.mxu2 %v12429_v36  ;;  %v12080_v36 = vld [vmem:[#allocation10 + $0x1e8] sm:$0xf] }
 0x480   :  { %v5915_v49 = vld [vmem:[#allocation1 + $0x3] ss:$9 sm:$0xff] }
 0x481   :  { %5918 = vst.msk [vmem:[#allocation2 + $0x81] ss:$8 sm:$0xf] %vm15678_vm8, %v5915_v49  ;;  %v12881_v49 = vor.u32 %v14220_v55, %v12880_v5  ;;  %v11984_v5 = vld [vmem:[#allocation10 + $0xc8] sm:$0xf] }
 0x482   :  { %5920 = vst [vmem:[#allocation1] sm:$0xff] %v16157_v13  ;;  %v13996_v55 = vld [vmem:[#allocation10 + $0xf4] sm:$0xf0] }
 0x483   :  { %5921 = vst [vmem:[#allocation1 + $0x9] sm:$0xff] %v16223_v15 }
 0x484   :  { %5922 = vst [vmem:[#allocation1 + $0x12] sm:$0xff] %v16296_v62 }
 0x485   :  { %5923 = vst [vmem:[#allocation1 + $0x1b] sm:$0xff] %v16327_v41 }
 0x48c   :  { %v5925_v53 = vld [vmem:[#allocation1 + $0x3] ss:$9 sm:$0xff] }
 0x48d   :  { %5930 = vst [vmem:[#allocation1] sm:$0xff] %v16171_v31  ;;  %v16408_v31 = vld [vmem:[#allocation2 + $0x80] sm:$0xff] }
 0x48e   :  { %5931 = vst [vmem:[#allocation1 + $0x9] sm:$0xff] %v16236_v23  ;;  %v16411_v23 = vld [vmem:[#allocation2 + $0x68] sm:$0xff] }
 0x48f   :  { %5932 = vst [vmem:[#allocation1 + $0x12] sm:$0xff] %v16307_v8  ;;  %v16413_v8 = vld [vmem:[#allocation2 + $0x88] sm:$0xff] }
 0x490   :  { %5933 = vst [vmem:[#allocation1 + $0x1b] sm:$0xff] %v16354_v19  ;;  %v16415_v19 = vld [vmem:[#allocation2 + $0x90] sm:$0xff]  ;;  %v5975_v9 = vadd.f32 %v16413_v8, %v16411_v23 }
 0x491   :  { %5928 = vst.msk [vmem:[#allocation3 + $0x81] ss:$8 sm:$0xf] %vm15678_vm8, %v5925_v53  ;;  %v5976_v3 = vadd.f32 %v16415_v19, %v16418_v0  ;;  %v12336_v53 = vld [vmem:[#allocation10 + $0x4e8] sm:$0xf] }
 0x497   :  { %v5935_v16 = vld [vmem:[#allocation1 + $0x4] ss:$9 sm:$0xff] }
 0x498   :  { %5938 = vst.msk [vmem:[#allocation2 + $0xa1] ss:$8 sm:$0xf] %vm15678_vm8, %v5935_v16  ;;  %v14084_v16 = vld [vmem:[#allocation10 + $0x514] sm:$0xf0] }
 0x499   :  { %5940 = vst [vmem:[#allocation1] sm:$0xff] %v16157_v13  ;;  %v16422_v13 = vld [vmem:[#allocation2 + $0x98] sm:$0xff] }
 0x49a   :  { %5941 = vst [vmem:[#allocation1 + $0x9] sm:$0xff] %v16223_v15  ;;  %v12144_v15 = vld [vmem:[#allocation10 + $0x2a8] sm:$0xf]  ;;  %v5977_v20 = vadd.f32 %v16422_v13, %v16420_v2 }
 0x49b   :  { %5942 = vst [vmem:[#allocation1 + $0x12] sm:$0xff] %v16296_v62  ;;  %v5974_v62 = vadd.f32 %v16408_v31, %v16406_v44  ;;  %v12145_v11 = vor.u32 %v14036_v28, %v12144_v15  ;;  %v12592_v15 = vld [vmem:[#allocation10 + $0x7e8] sm:$0xf]  ;;  %v14148_v28 = vld [vmem:[#allocation10 + $0x814] sm:$0xf0] }
 0x49c   :  { %5943 = vst [vmem:[#allocation1 + $0x1b] sm:$0xff] %v16327_v41  ;;  %v12656_v41 = vld [vmem:[#allocation10 + $0x8a8] sm:$0xf] }
 0x49d   :  { %v12657_v48 = vor.u32 %v14164_v54, %v12656_v41  ;;  %v14012_v41 = vld [vmem:[#allocation10 + $0x1b4] sm:$0xf0]  ;;  %v12593_v54 = vor.u32 %v14148_v28, %v12592_v15  ;;  %v11985_v15 = vor.u32 %v13996_v55, %v11984_v5 }
 0x49f   :  { %v5958_v40 = vld [vmem:[#allocation2 + $0xa0] sm:$0xff]  ;;  %v5959_v6 = vld [vmem:[#allocation2 + $0xa8] sm:$0xff]  ;;  %v5960_v39 = vld [vmem:[#allocation2 + $0xb0] sm:$0xff] }
 0x4a0   :  { %v5978_v35 = vadd.f32 %v5974_v62, %v5958_v40  ;;  %v5979_v22 = vadd.f32 %v5975_v9, %v5959_v6  ;;  %v5980_v12 = vadd.f32 %v5976_v3, %v5960_v39  ;;  %v5961_v50 = vld [vmem:[#allocation2 + $0xb8] sm:$0xff]  ;;  %v14212_v62 = vld [vmem:[#allocation10 + $0xb14] sm:$0xf0]  ;;  %v12081_v9 = vor.u32 %v14020_v26, %v12080_v36 }
 0x4a1   :  { %v5981_v43 = vadd.f32 %v5977_v20, %v5961_v50  ;;  %v12337_v3 = vor.u32 %v14084_v16, %v12336_v53  ;;  %v12849_v40 = vor.u32 %v14212_v62, %v12848_v32  ;;  %v12304_v6 = vld [vmem:[#allocation10 + $0x488] sm:$0xf]  ;;  %v14076_v39 = vld [vmem:[#allocation10 + $0x4b4] sm:$0xf0]  ;;  %v12049_v50 = vor.u32 %v14012_v41, %v12048_v14 }
 0x4a2   :  { %v16432_v30 = vpack.c.bf16 %v5978_v35, %v5978_v35  ;;  %v16434_v47 = vpack.c.bf16 %v5979_v22, %v5979_v22  ;;  %v16436_v57 = vpack.c.bf16 %v5980_v12, %v5980_v12  ;;  %v12560_v20 = vld [vmem:[#allocation10 + $0x788] sm:$0xf]  ;;  %v14140_v35 = vld [vmem:[#allocation10 + $0x7b4] sm:$0xf0]  ;;  %v12305_v61 = vor.u32 %v14076_v39, %v12304_v6 }
 0x4a3   :  { %v16438_v45 = vpack.c.bf16 %v5981_v43, %v5981_v43  ;;  %v12816_v22 = vld [vmem:[#allocation10 + $0xa88] sm:$0xf]  ;;  %v14204_v12 = vld [vmem:[#allocation10 + $0xab4] sm:$0xf0] }
 0x4a4   :  { %7530 = vmatmul.bf16.vlgmr.msra.gmra.mxu0 %v16432_v30  ;;  %7543 = vmatmul.bf16.vlgmr.msrb.gmra.mxu1 %v16434_v47  ;;  %v14004_v43 = vld [vmem:[#allocation10 + $0x154] sm:$0xf0]  ;;  %v12240_v36 = vld [vmem:[#allocation10 + $0x3c8] sm:$0xf] }
 0x4a5   :  { %7556 = vmatmul.bf16.vlgmr.msra.gmra.mxu2 %v16436_v57  ;;  %7569 = vmatmul.bf16.vlgmr.msra.gmra.mxu3 %v16438_v45  ;;  %v12017_v10 = vor.u32 %v14004_v43, %v12016_v21  ;;  %v14060_v26 = vld [vmem:[#allocation10 + $0x3f4] sm:$0xf0]  ;;  %v12752_v53 = vld [vmem:[#allocation10 + $0x9c8] sm:$0xf] }
 0x4a6   :  { %7626 = vmatpush.bf16.msra.mxu0 %v12145_v11  ;;  %7639 = vmatpush.bf16.msrb.mxu1 %v12401_v42  ;;  %v12561_v11 = vor.u32 %v14140_v35, %v12560_v20  ;;  %v12817_v42 = vor.u32 %v14204_v12, %v12816_v22  ;;  %v14188_v16 = vld [vmem:[#allocation10 + $0x9f4] sm:$0xf0]  ;;  %v12241_v28 = vor.u32 %v14060_v26, %v12240_v36  ;;  %v11952_v32 = vld [vmem:[#allocation10 + $0x68] sm:$0xf]  ;;  %v14024_v36 = vld [vmem:[#allocation10 + $0x24c] sm:$0xf] }
 0x4a7   :  { %7652 = vmatpush.bf16.msra.mxu2 %v12657_v48  ;;  %7665 = vmatpush.bf16.msra.mxu3 %v12913_v1  ;;  %v12528_v48 = vld [vmem:[#allocation10 + $0x728] sm:$0xf]  ;;  %v14132_v1 = vld [vmem:[#allocation10 + $0x754] sm:$0xf0]  ;;  %v16450_v20 = vpack.c.bf16 %v16408_v31, %v16406_v44  ;;  %v16454_v35 = vpack.c.bf16 %v16413_v8, %v16411_v23  ;;  %v16458_v22 = vpack.c.bf16 %v16415_v19, %v16418_v0  ;;  %v12114_v26 = vld [vmem:[#allocation10 + $0x278] sm:$0xf0] }
 0x4a8   :  { %v13988_v62 = vld [vmem:[#allocation10 + $0x94] sm:$0xf0]  ;;  %v12208_v14 = vld [vmem:[#allocation10 + $0x368] sm:$0xf]  ;;  %v16462_v12 = vpack.c.bf16 %v16422_v13, %v16420_v2  ;;  %v14096_v2 = vld [vmem:[#allocation10 + $0x5ac] sm:$0xf] }
 0x4a9   :  { %v14052_v41 = vld [vmem:[#allocation10 + $0x394] sm:$0xf0]  ;;  %v12720_v6 = vld [vmem:[#allocation10 + $0x968] sm:$0xf]  ;;  %v12402_v13 = vld [vmem:[#allocation10 + $0x5d8] sm:$0xf0] }
 0x4aa   :  { %7627 = vmatpush.bf16.msra.mxu0 %v12113_v60  ;;  %7640 = vmatpush.bf16.msrb.mxu1 %v12369_v4  ;;  %v12529_v60 = vor.u32 %v14132_v1, %v12528_v48  ;;  %v12785_v4 = vor.u32 %v14196_v25, %v12784_v7  ;;  %v14180_v39 = vld [vmem:[#allocation10 + $0x994] sm:$0xf0]  ;;  %v12209_v21 = vor.u32 %v14052_v41, %v12208_v14  ;;  %v12176_v44 = vld [vmem:[#allocation10 + $0x308] sm:$0xf]  ;;  %v14160_v48 = vld [vmem:[#allocation10 + $0x8ac] sm:$0xf] }
 0x4ab   :  { %7653 = vmatpush.bf16.msra.mxu2 %v12625_v58  ;;  %7666 = vmatpush.bf16.msra.mxu3 %v12881_v49  ;;  %v12496_v58 = vld [vmem:[#allocation10 + $0x6c8] sm:$0xf]  ;;  %v14124_v49 = vld [vmem:[#allocation10 + $0x6f4] sm:$0xf0]  ;;  %v12721_v8 = vor.u32 %v14180_v39, %v12720_v6  ;;  %v12658_v25 = vld [vmem:[#allocation10 + $0x8d8] sm:$0xf0] }
 0x4ac   :  { %v13980_v43 = vld [vmem:[#allocation10 + $0x34] sm:$0xf0]  ;;  %v12688_v19 = vld [vmem:[#allocation10 + $0x908] sm:$0xf]  ;;  %v14016_v14 = vld [vmem:[#allocation10 + $0x1ec] sm:$0xf] }
 0x4ad   :  { %v14044_v31 = vld [vmem:[#allocation10 + $0x334] sm:$0xf0]  ;;  %v12082_v41 = vld [vmem:[#allocation10 + $0x218] sm:$0xf0]  ;;  %v14080_v6 = vld [vmem:[#allocation10 + $0x4ec] sm:$0xf] }
 0x4ae   :  { %7628 = vmatpush.bf16.msra.mxu0 %v12081_v9  ;;  %7641 = vmatpush.bf16.msrb.mxu1 %v12337_v3  ;;  %v12497_v9 = vor.u32 %v14124_v49, %v12496_v58  ;;  %v12753_v3 = vor.u32 %v14188_v16, %v12752_v53  ;;  %v14172_v0 = vld [vmem:[#allocation10 + $0x934] sm:$0xf0]  ;;  %v12177_v7 = vor.u32 %v14044_v31, %v12176_v44  ;;  %v14088_v53 = vld [vmem:[#allocation10 + $0x54c] sm:$0xf]  ;;  %v12370_v16 = vld [vmem:[#allocation10 + $0x578] sm:$0xf0] }
 0x4af   :  { %7654 = vmatpush.bf16.msra.mxu2 %v12593_v54  ;;  %7667 = vmatpush.bf16.msra.mxu3 %v12849_v40  ;;  %v12464_v54 = vld [vmem:[#allocation10 + $0x668] sm:$0xf]  ;;  %v14116_v40 = vld [vmem:[#allocation10 + $0x694] sm:$0xf0]  ;;  %v12689_v55 = vor.u32 %v14172_v0, %v12688_v19  ;;  %v12661_v58 = vor.u32 %v14160_v48, %v12658_v25  ;;  %v12338_v39 = vld [vmem:[#allocation10 + $0x518] sm:$0xf0] }
 0x4b0   :  { %v12465_v23 = vor.u32 %v14116_v40, %v12464_v54  ;;  %v14008_v44 = vld [vmem:[#allocation10 + $0x18c] sm:$0xf]  ;;  %v12050_v31 = vld [vmem:[#allocation10 + $0x1b8] sm:$0xf0] }
 0x4b1   :  { %v5945_v19 = vld [vmem:[#allocation1 + $0x4] ss:$9 sm:$0xff] }
 0x4b2   :  { %7629 = vmatpush.bf16.msra.mxu0 %v12049_v50  ;;  %7642 = vmatpush.bf16.msrb.mxu1 %v12305_v61  ;;  %v11920_v50 = vld [vmem:[#allocation10 + $0x8] sm:$0xf]  ;;  %v11953_v61 = vor.u32 %v13988_v62, %v11952_v32  ;;  %v14216_v32 = vld [vmem:[#allocation10 + $0xb4c] sm:$0xf]  ;;  %v12882_v62 = vld [vmem:[#allocation10 + $0xb78] sm:$0xf0] }
 0x4b3   :  { %7655 = vmatpush.bf16.msra.mxu2 %v12561_v11  ;;  %7668 = vmatpush.bf16.msra.mxu3 %v12817_v42  ;;  %v12432_v11 = vld [vmem:[#allocation10 + $0x608] sm:$0xf]  ;;  %v14108_v42 = vld [vmem:[#allocation10 + $0x634] sm:$0xf0]  ;;  %v11921_v1 = vor.u32 %v13980_v43, %v11920_v50  ;;  %v12885_v40 = vor.u32 %v14216_v32, %v12882_v62  ;;  %v14144_v50 = vld [vmem:[#allocation10 + $0x7ec] sm:$0xf] }
 0x4b4   :  { %7582 = vmatmul.bf16.vlgmr.msrb.gmra.mxu0 %v16432_v30  ;;  %7595 = vmatmul.bf16.vlgmr.msra.gmra.mxu1 %v16434_v47  ;;  %v12433_v5 = vor.u32 %v14108_v42, %v12432_v11  ;;  %v12850_v43 = vld [vmem:[#allocation10 + $0xb18] sm:$0xf0]  ;;  %v14072_v11 = vld [vmem:[#allocation10 + $0x48c] sm:$0xf] }
 0x4b5   :  { %7608 = vmatmul.bf16.vlgmr.msrb.gmra.mxu2 %v16436_v57  ;;  %7621 = vmatmul.bf16.vlgmr.msrb.gmra.mxu3 %v16438_v45  ;;  %v12306_v42 = vld [vmem:[#allocation10 + $0x4b8] sm:$0xf0]  ;;  %5948 = vst.msk [vmem:[#allocation3 + $0xa1] ss:$8 sm:$0xf] %vm15678_vm8, %v5945_v19 }
 0x4b6   :  { %7630 = vmatpush.bf16.msra.mxu0 %v12017_v10  ;;  %7643 = vmatpush.bf16.msrb.mxu1 %v12273_v33  ;;  %v14224_v10 = vld [vmem:[#allocation10 + $0xbac] sm:$0xf]  ;;  %v12914_v33 = vld [vmem:[#allocation10 + $0xbd8] sm:$0xf0] }
 0x4b7   :  { %7656 = vmatpush.bf16.msra.mxu2 %v12529_v60  ;;  %7669 = vmatpush.bf16.msra.mxu3 %v12785_v4  ;;  %v12149_v60 = vor.u32 %v14032_v52, %v12146_v18  ;;  %v12405_v4 = vor.u32 %v14096_v2, %v12402_v13  ;;  %v12917_v49 = vor.u32 %v14224_v10, %v12914_v33  ;;  %v14136_v18 = vld [vmem:[#allocation10 + $0x78c] sm:$0xf]  ;;  %v12562_v2 = vld [vmem:[#allocation10 + $0x7b8] sm:$0xf0] }
 0x4b8   :  { %v14200_v13 = vld [vmem:[#allocation10 + $0xa8c] sm:$0xf]  ;;  %v12818_v48 = vld [vmem:[#allocation10 + $0xab8] sm:$0xf0]  ;;  %v12565_v33 = vor.u32 %v14136_v18, %v12562_v2 }
 0x4b9   :  { %v14000_v25 = vld [vmem:[#allocation10 + $0x12c] sm:$0xf]  ;;  %v12018_v10 = vld [vmem:[#allocation10 + $0x158] sm:$0xf0] }
 0x4ba   :  { %7631 = vmatpush.bf16.msra.mxu0 %v11985_v15  ;;  %7644 = vmatpush.bf16.msrb.mxu1 %v12241_v28  ;;  %v14152_v15 = vld [vmem:[#allocation10 + $0x84c] sm:$0xf]  ;;  %v12626_v28 = vld [vmem:[#allocation10 + $0x878] sm:$0xf0] }
 0x4bb   :  { %7657 = vmatpush.bf16.msra.mxu2 %v12497_v9  ;;  %7670 = vmatpush.bf16.msra.mxu3 %v12753_v3  ;;  %v12117_v9 = vor.u32 %v14024_v36, %v12114_v26  ;;  %v12373_v3 = vor.u32 %v14088_v53, %v12370_v16  ;;  %v12629_v54 = vor.u32 %v14152_v15, %v12626_v28  ;;  %v12530_v36 = vld [vmem:[#allocation10 + $0x758] sm:$0xf0]  ;;  %v14192_v26 = vld [vmem:[#allocation10 + $0xa2c] sm:$0xf] }
 0x4bc   :  { %v13992_v53 = vld [vmem:[#allocation10 + $0xcc] sm:$0xf]  ;;  %v11986_v16 = vld [vmem:[#allocation10 + $0xf8] sm:$0xf0]  ;;  %v12789_v28 = vor.u32 %v14192_v26, %v12786_v27  ;;  %v14165_v26 = vld [vmem:[#allocation10 + $0x8ec] sm:$0xf0] }
 0x4bd   :  { %v14056_v32 = vld [vmem:[#allocation10 + $0x3cc] sm:$0xf]  ;;  %v12242_v62 = vld [vmem:[#allocation10 + $0x3f8] sm:$0xf0]  ;;  %v12920_v27 = vld [vmem:[#allocation10 + $0xbc0] sm:$0xf] }
 0x4be   :  { %7632 = vmatpush.bf16.msra.mxu0 %v11953_v61  ;;  %7645 = vmatpush.bf16.msrb.mxu1 %v12209_v21  ;;  %v12594_v61 = vld [vmem:[#allocation10 + $0x818] sm:$0xf0]  ;;  %v14208_v21 = vld [vmem:[#allocation10 + $0xaec] sm:$0xf] }
 0x4bf   :  { %7658 = vmatpush.bf16.msra.mxu2 %v12465_v23  ;;  %7671 = vmatpush.bf16.msra.mxu3 %v12721_v8  ;;  %v12085_v23 = vor.u32 %v14016_v14, %v12082_v41  ;;  %v12341_v8 = vor.u32 %v14080_v6, %v12338_v39  ;;  %v12597_v0 = vor.u32 %v14144_v50, %v12594_v61  ;;  %v14184_v14 = vld [vmem:[#allocation10 + $0x9cc] sm:$0xf]  ;;  %v12754_v41 = vld [vmem:[#allocation10 + $0x9f8] sm:$0xf0] }
 0x4c0   :  { %v12853_v52 = vor.u32 %v14208_v21, %v12850_v43  ;;  %v13984_v6 = vld [vmem:[#allocation10 + $0x6c] sm:$0xf]  ;;  %v11954_v39 = vld [vmem:[#allocation10 + $0x98] sm:$0xf0]  ;;  %v12757_v61 = vor.u32 %v14184_v14, %v12754_v41  ;;  %v14093_v14 = vld [vmem:[#allocation10 + $0x58c] sm:$0xf0] }
 0x4c1   :  { %v14048_v21 = vld [vmem:[#allocation10 + $0x36c] sm:$0xf]  ;;  %v12210_v43 = vld [vmem:[#allocation10 + $0x398] sm:$0xf0]  ;;  %v12632_v41 = vld [vmem:[#allocation10 + $0x860] sm:$0xf] }
 0x4c2   :  { %7633 = vmatpush.bf16.msra.mxu0 %v11921_v1  ;;  %7646 = vmatpush.bf16.msrb.mxu1 %v12177_v7  ;;  %v12053_v1 = vor.u32 %v14008_v44, %v12050_v31  ;;  %v12309_v7 = vor.u32 %v14072_v11, %v12306_v42  ;;  %v14112_v44 = vld [vmem:[#allocation10 + $0x66c] sm:$0xf]  ;;  %v12466_v31 = vld [vmem:[#allocation10 + $0x698] sm:$0xf0]  ;;  %v11957_v42 = vor.u32 %v13984_v6, %v11954_v39  ;;  %v14221_v6 = vld [vmem:[#allocation10 + $0xb8c] sm:$0xf0] }
 0x4c3   :  { %7659 = vmatpush.bf16.msra.mxu2 %v12433_v5  ;;  %7672 = vmatpush.bf16.msra.mxu3 %v12689_v55  ;;  %v12821_v5 = vor.u32 %v14200_v13, %v12818_v48  ;;  %v14064_v55 = vld [vmem:[#allocation10 + $0x42c] sm:$0xf]  ;;  %v12213_v19 = vor.u32 %v14048_v21, %v12210_v43  ;;  %v12178_v18 = vld [vmem:[#allocation10 + $0x338] sm:$0xf0]  ;;  %v12469_v2 = vor.u32 %v14112_v44, %v12466_v31  ;;  %v14021_v21 = vld [vmem:[#allocation10 + $0x22c] sm:$0xf0] }
 0x4c4   :  { %v13976_v11 = vld [vmem:[#allocation10 + $0xc] sm:$0xf]  ;;  %v12344_v31 = vld [vmem:[#allocation10 + $0x500] sm:$0xf] }
 0x4c5   :  { %7634 = vmatmul.bf16.vlgmr.msra.gmra.mxu0 %v16432_v30  ;;  %7647 = vmatmul.bf16.vlgmr.msrb.gmra.mxu1 %v16434_v47  ;;  %v14104_v48 = vld [vmem:[#allocation10 + $0x60c] sm:$0xf] }
 0x4c6   :  { %7678 = vmatpush.bf16.msrb.mxu0 %v12149_v60  ;;  %7691 = vmatpush.bf16.msra.mxu1 %v12405_v4  ;;  %v12274_v60 = vld [vmem:[#allocation10 + $0x458] sm:$0xf0]  ;;  %v14128_v4 = vld [vmem:[#allocation10 + $0x72c] sm:$0xf] }
 0x4c7   :  { %7704 = vmatpush.bf16.msrb.mxu2 %v12661_v58  ;;  %7717 = vmatpush.bf16.msrb.mxu3 %v12917_v49  ;;  %v12021_v58 = vor.u32 %v14000_v25, %v12018_v10  ;;  %v12277_v49 = vor.u32 %v14064_v55, %v12274_v60  ;;  %v12533_v15 = vor.u32 %v14128_v4, %v12530_v36  ;;  %v12690_v25 = vld [vmem:[#allocation10 + $0x938] sm:$0xf0]  ;;  %v12152_v10 = vld [vmem:[#allocation10 + $0x2c0] sm:$0xf]  ;;  %v14101_v55 = vld [vmem:[#allocation10 + $0x5ec] sm:$0xf0] }
 0x4c8   :  { %7660 = vmatmul.bf16.vlgmr.msra.gmra.mxu2 %v16436_v57  ;;  %7673 = vmatmul.bf16.vlgmr.msra.gmra.mxu3 %v16438_v45  ;;  %v12664_v60 = vld [vmem:[#allocation10 + $0x8c0] sm:$0xf] }
 0x4ca   :  { %7679 = vmatpush.bf16.msrb.mxu0 %v12117_v9  ;;  %7692 = vmatpush.bf16.msra.mxu1 %v12373_v3  ;;  %v14120_v9 = vld [vmem:[#allocation10 + $0x6cc] sm:$0xf]  ;;  %v12498_v3 = vld [vmem:[#allocation10 + $0x6f8] sm:$0xf0] }
 0x4cb   :  { %7705 = vmatpush.bf16.msrb.mxu2 %v12629_v54  ;;  %7718 = vmatpush.bf16.msrb.mxu3 %v12885_v40  ;;  %v11989_v54 = vor.u32 %v13992_v53, %v11986_v16  ;;  %v12245_v40 = vor.u32 %v14056_v32, %v12242_v62  ;;  %v12501_v50 = vor.u32 %v14120_v9, %v12498_v3  ;;  %v14029_v32 = vld [vmem:[#allocation10 + $0x28c] sm:$0xf0]  ;;  %v12376_v3 = vld [vmem:[#allocation10 + $0x560] sm:$0xf] }
 0x4cc   :  { %v12665_v62 = vor.u32 %v14165_v26, %v12664_v60 }
 0x4ce   :  { %7680 = vmatpush.bf16.msrb.mxu0 %v12085_v23  ;;  %7693 = vmatpush.bf16.msra.mxu1 %v12341_v8  ;;  %v14176_v23 = vld [vmem:[#allocation10 + $0x96c] sm:$0xf]  ;;  %v12722_v8 = vld [vmem:[#allocation10 + $0x998] sm:$0xf0] }
 0x4cf   :  { %7706 = vmatpush.bf16.msrb.mxu2 %v12597_v0  ;;  %7719 = vmatpush.bf16.msrb.mxu3 %v12853_v52  ;;  %v11922_v0 = vld [vmem:[#allocation10 + $0x38] sm:$0xf0]  ;;  %v14040_v52 = vld [vmem:[#allocation10 + $0x30c] sm:$0xf]  ;;  %v12725_v13 = vor.u32 %v14176_v23, %v12722_v8  ;;  %v14085_v23 = vld [vmem:[#allocation10 + $0x52c] sm:$0xf0] }
 0x4d0   :  { %v11925_v4 = vor.u32 %v13976_v11, %v11922_v0  ;;  %v12181_v36 = vor.u32 %v14040_v52, %v12178_v18  ;;  %v12600_v8 = vld [vmem:[#allocation10 + $0x800] sm:$0xf]  ;;  %v14149_v11 = vld [vmem:[#allocation10 + $0x82c] sm:$0xf0]  ;;  %v12345_v52 = vor.u32 %v14085_v23, %v12344_v31 }
 0x4d1   :  { %v12056_v18 = vld [vmem:[#allocation10 + $0x1a0] sm:$0xf]  ;;  %v13989_v31 = vld [vmem:[#allocation10 + $0xac] sm:$0xf0] }
 0x4d2   :  { %7681 = vmatpush.bf16.msrb.mxu0 %v12053_v1  ;;  %7694 = vmatpush.bf16.msra.mxu1 %v12309_v7  ;;  %v12434_v1 = vld [vmem:[#allocation10 + $0x638] sm:$0xf0]  ;;  %v14168_v7 = vld [vmem:[#allocation10 + $0x90c] sm:$0xf] }
 0x4d3   :  { %7707 = vmatpush.bf16.msrb.mxu2 %v12565_v33  ;;  %7720 = vmatpush.bf16.msrb.mxu3 %v12821_v5  ;;  %v14037_v33 = vld [vmem:[#allocation10 + $0x2ec] sm:$0xf0]  ;;  %v12408_v5 = vld [vmem:[#allocation10 + $0x5c0] sm:$0xf]  ;;  %v12693_v53 = vor.u32 %v14168_v7, %v12690_v25 }
 0x4d4   :  { %v12153_v16 = vor.u32 %v14037_v33, %v12152_v10  ;;  %v14077_v7 = vld [vmem:[#allocation10 + $0x4cc] sm:$0xf0]  ;;  %v12568_v25 = vld [vmem:[#allocation10 + $0x7a0] sm:$0xf] }
 0x4d5   :  { %v14141_v10 = vld [vmem:[#allocation10 + $0x7cc] sm:$0xf0]  ;;  %v12824_v33 = vld [vmem:[#allocation10 + $0xaa0] sm:$0xf] }
 0x4d6   :  { %7682 = vmatpush.bf16.msrb.mxu0 %v12021_v58  ;;  %7695 = vmatpush.bf16.msra.mxu1 %v12277_v49  ;;  %v14229_v58 = vld [vmem:[#allocation10 + $0xbec] sm:$0xf0]  ;;  %v12437_v49 = vor.u32 %v14104_v48, %v12434_v1  ;;  %v12312_v1 = vld [vmem:[#allocation10 + $0x4a0] sm:$0xf]  ;;  %v12569_v26 = vor.u32 %v14141_v10, %v12568_v25 }
 0x4d7   :  { %7708 = vmatpush.bf16.msrb.mxu2 %v12533_v15  ;;  %7721 = vmatpush.bf16.msrb.mxu3 %v12789_v28  ;;  %v12409_v15 = vor.u32 %v14101_v55, %v12408_v5  ;;  %v12120_v28 = vld [vmem:[#allocation10 + $0x260] sm:$0xf]  ;;  %v12921_v9 = vor.u32 %v14229_v58, %v12920_v27  ;;  %v14205_v5 = vld [vmem:[#allocation10 + $0xacc] sm:$0xf0]  ;;  %v12313_v60 = vor.u32 %v14077_v7, %v12312_v1 }
 0x4d8   :  { %v12121_v39 = vor.u32 %v14029_v32, %v12120_v28  ;;  %v12825_v27 = vor.u32 %v14205_v5, %v12824_v33  ;;  %v12280_v58 = vld [vmem:[#allocation10 + $0x440] sm:$0xf]  ;;  %v14197_v28 = vld [vmem:[#allocation10 + $0xa6c] sm:$0xf0] }
 0x4d9   :  { %v13981_v1 = vld [vmem:[#allocation10 + $0x4c] sm:$0xf0]  ;;  %v12184_v7 = vld [vmem:[#allocation10 + $0x320] sm:$0xf] }
 0x4da   :  { %7683 = vmatpush.bf16.msrb.mxu0 %v11989_v54  ;;  %7696 = vmatpush.bf16.msra.mxu1 %v12245_v40  ;;  %v14157_v54 = vld [vmem:[#allocation10 + $0x88c] sm:$0xf0]  ;;  %v12888_v40 = vld [vmem:[#allocation10 + $0xb60] sm:$0xf] }
 0x4db   :  { %7709 = vmatpush.bf16.msrb.mxu2 %v12501_v50  ;;  %7722 = vmatpush.bf16.msrb.mxu3 %v12757_v61  ;;  %v12377_v50 = vor.u32 %v14093_v14, %v12376_v3  ;;  %v12088_v61 = vld [vmem:[#allocation10 + $0x200] sm:$0xf]  ;;  %v12633_v43 = vor.u32 %v14157_v54, %v12632_v41  ;;  %v12889_v44 = vor.u32 %v14221_v6, %v12888_v40  ;;  %v13997_v3 = vld [vmem:[#allocation10 + $0x10c] sm:$0xf0] }
 0x4dc   :  { %v12089_v0 = vor.u32 %v14021_v21, %v12088_v61  ;;  %v12248_v54 = vld [vmem:[#allocation10 + $0x3e0] sm:$0xf]  ;;  %v14061_v40 = vld [vmem:[#allocation10 + $0x40c] sm:$0xf0] }
 0x4dd   :  { %v12504_v6 = vld [vmem:[#allocation10 + $0x6e0] sm:$0xf]  ;;  %v14189_v61 = vld [vmem:[#allocation10 + $0xa0c] sm:$0xf0] }
 0x4de   :  { %7684 = vmatpush.bf16.msrb.mxu0 %v11957_v42  ;;  %7697 = vmatpush.bf16.msra.mxu1 %v12213_v19  ;;  %v12856_v42 = vld [vmem:[#allocation10 + $0xb00] sm:$0xf]  ;;  %v14213_v19 = vld [vmem:[#allocation10 + $0xb2c] sm:$0xf0] }
 0x4df   :  { %7710 = vmatpush.bf16.msrb.mxu2 %v12469_v2  ;;  %7723 = vmatpush.bf16.msrb.mxu3 %v12725_v13  ;;  %v14013_v2 = vld [vmem:[#allocation10 + $0x1cc] sm:$0xf0]  ;;  %v12601_v13 = vor.u32 %v14149_v11, %v12600_v8  ;;  %v12857_v48 = vor.u32 %v14213_v19, %v12856_v42  ;;  %v12216_v11 = vld [vmem:[#allocation10 + $0x380] sm:$0xf] }
 0x4e0   :  { %v12057_v55 = vor.u32 %v14013_v2, %v12056_v18  ;;  %v14053_v42 = vld [vmem:[#allocation10 + $0x3ac] sm:$0xf0]  ;;  %v12472_v19 = vld [vmem:[#allocation10 + $0x680] sm:$0xf] }
 0x4e1   :  { %v14181_v18 = vld [vmem:[#allocation10 + $0x9ac] sm:$0xf0]  ;;  %v11928_v2 = vld [vmem:[#allocation10 + $0x20] sm:$0xf] }
 0x4e2   :  { %7685 = vmatpush.bf16.msrb.mxu0 %v11925_v4  ;;  %7698 = vmatpush.bf16.msra.mxu1 %v12181_v36  ;;  %v12024_v4 = vld [vmem:[#allocation10 + $0x140] sm:$0xf]  ;;  %v14005_v36 = vld [vmem:[#allocation10 + $0x16c] sm:$0xf0] }
 0x4e3   :  { %7711 = vmatpush.bf16.msrb.mxu2 %v12437_v49  ;;  %7724 = vmatpush.bf16.msrb.mxu3 %v12693_v53  ;;  %v14069_v49 = vld [vmem:[#allocation10 + $0x46c] sm:$0xf0]  ;;  %v12536_v53 = vld [vmem:[#allocation10 + $0x740] sm:$0xf]  ;;  %v12025_v32 = vor.u32 %v14005_v36, %v12024_v4  ;;  %v14033_v36 = vld [vmem:[#allocation10 + $0x2c4] sm:$0xf] }
 0x4e4   :  { %v14045_v25 = vld [vmem:[#allocation10 + $0x34c] sm:$0xf0]  ;;  %v12440_v5 = vld [vmem:[#allocation10 + $0x620] sm:$0xf] }
 0x4e5   :  { %7686 = vmatmul.bf16.vlgmr.msrb.gmra.mxu0 %v16432_v30  ;;  %7699 = vmatmul.bf16.vlgmr.msra.gmra.mxu1 %v16434_v47  ;;  %v14173_v4 = vld [vmem:[#allocation10 + $0x94c] sm:$0xf0] }
 0x4e6   :  { %7730 = vmatpush.bf16.msra.mxu0 %v12153_v16  ;;  %7743 = vmatpush.bf16.msrb.mxu1 %v12409_v15  ;;  %v14133_v16 = vld [vmem:[#allocation10 + $0x76c] sm:$0xf0]  ;;  %v12792_v15 = vld [vmem:[#allocation10 + $0xa40] sm:$0xf] }
 0x4e7   :  { %7756 = vmatpush.bf16.msra.mxu2 %v12665_v62  ;;  %7769 = vmatpush.bf16.msra.mxu3 %v12921_v9  ;;  %v12281_v62 = vor.u32 %v14069_v49, %v12280_v58  ;;  %v11992_v9 = vld [vmem:[#allocation10 + $0xe0] sm:$0xf]  ;;  %v12537_v14 = vor.u32 %v14133_v16, %v12536_v53  ;;  %v12793_v41 = vor.u32 %v14197_v28, %v12792_v15  ;;  %v12410_v58 = vld [vmem:[#allocation10 + $0x5f0] sm:$0xf0]  ;;  %v14161_v49 = vld [vmem:[#allocation10 + $0x8c4] sm:$0xf] }
 0x4e8   :  { %7712 = vmatmul.bf16.vlgmr.msrb.gmra.mxu2 %v16436_v57  ;;  %7725 = vmatmul.bf16.vlgmr.msrb.gmra.mxu3 %v16438_v45  ;;  %v11993_v21 = vor.u32 %v13997_v3, %v11992_v9  ;;  %v11929_v53 = vor.u32 %v13981_v1, %v11928_v2  ;;  %v12185_v16 = vor.u32 %v14045_v25, %v12184_v7  ;;  %v12666_v15 = vld [vmem:[#allocation10 + $0x8f0] sm:$0xf0]  ;;  %v14225_v28 = vld [vmem:[#allocation10 + $0xbc4] sm:$0xf] }
 0x4e9   :  { %v12602_v2 = vld [vmem:[#allocation10 + $0x830] sm:$0xf0]  ;;  %v14009_v25 = vld [vmem:[#allocation10 + $0x1a4] sm:$0xf] }
 0x4ea   :  { %7731 = vmatpush.bf16.msra.mxu0 %v12121_v39  ;;  %7744 = vmatpush.bf16.msrb.mxu1 %v12377_v50  ;;  %v14125_v39 = vld [vmem:[#allocation10 + $0x70c] sm:$0xf0]  ;;  %v12760_v50 = vld [vmem:[#allocation10 + $0x9e0] sm:$0xf] }
 0x4eb   :  { %7757 = vmatpush.bf16.msra.mxu2 %v12633_v43  ;;  %7770 = vmatpush.bf16.msra.mxu3 %v12889_v44  ;;  %v12249_v43 = vor.u32 %v14061_v40, %v12248_v54  ;;  %v11960_v44 = vld [vmem:[#allocation10 + $0x80] sm:$0xf]  ;;  %v12505_v23 = vor.u32 %v14125_v39, %v12504_v6  ;;  %v12761_v8 = vor.u32 %v14189_v61, %v12760_v50  ;;  %v12122_v54 = vld [vmem:[#allocation10 + $0x290] sm:$0xf0]  ;;  %v14089_v39 = vld [vmem:[#allocation10 + $0x564] sm:$0xf] }
 0x4ec   :  { %v12669_v40 = vor.u32 %v14161_v49, %v12666_v15  ;;  %v12378_v50 = vld [vmem:[#allocation10 + $0x590] sm:$0xf0]  ;;  %v14153_v61 = vld [vmem:[#allocation10 + $0x864] sm:$0xf] }
 0x4ee   :  { %7732 = vmatpush.bf16.msra.mxu0 %v12089_v0  ;;  %7745 = vmatpush.bf16.msrb.mxu1 %v12345_v52  ;;  %v14117_v0 = vld [vmem:[#allocation10 + $0x6ac] sm:$0xf0]  ;;  %v12728_v52 = vld [vmem:[#allocation10 + $0x980] sm:$0xf] }
 0x4ef   :  { %7758 = vmatpush.bf16.msra.mxu2 %v12601_v13  ;;  %7771 = vmatpush.bf16.msra.mxu3 %v12857_v48  ;;  %v11961_v13 = vor.u32 %v13989_v31, %v11960_v44  ;;  %v12217_v48 = vor.u32 %v14053_v42, %v12216_v11  ;;  %v12473_v10 = vor.u32 %v14117_v0, %v12472_v19  ;;  %v12890_v44 = vld [vmem:[#allocation10 + $0xb90] sm:$0xf0]  ;;  %v14081_v0 = vld [vmem:[#allocation10 + $0x504] sm:$0xf] }
 0x4f0   :  { %v12729_v33 = vor.u32 %v14181_v18, %v12728_v52  ;;  %v12090_v11 = vld [vmem:[#allocation10 + $0x230] sm:$0xf0]  ;;  %v14145_v18 = vld [vmem:[#allocation10 + $0x804] sm:$0xf] }
 0x4f1   :  { %v12346_v52 = vld [vmem:[#allocation10 + $0x530] sm:$0xf0] }
 0x4f2   :  { %7733 = vmatpush.bf16.msra.mxu0 %v12057_v55  ;;  %7746 = vmatpush.bf16.msrb.mxu1 %v12313_v60  ;;  %v14109_v55 = vld [vmem:[#allocation10 + $0x64c] sm:$0xf0]  ;;  %v12696_v60 = vld [vmem:[#allocation10 + $0x920] sm:$0xf]  ;;  %v12349_v7 = vor.u32 %v14081_v0, %v12346_v52  ;;  %v11962_v0 = vld [vmem:[#allocation10 + $0xb0] sm:$0xf0] }
 0x4f3   :  { %7759 = vmatpush.bf16.msra.mxu2 %v12569_v26  ;;  %7772 = vmatpush.bf16.msra.mxu3 %v12825_v27  ;;  %v12154_v26 = vld [vmem:[#allocation10 + $0x2f0] sm:$0xf0]  ;;  %v14097_v27 = vld [vmem:[#allocation10 + $0x5c4] sm:$0xf]  ;;  %v12697_v9 = vor.u32 %v14173_v4, %v12696_v60 }
 0x4f4   :  { %v12157_v3 = vor.u32 %v14033_v36, %v12154_v26  ;;  %v12314_v60 = vld [vmem:[#allocation10 + $0x4d0] sm:$0xf0]  ;;  %v14137_v4 = vld [vmem:[#allocation10 + $0x7a4] sm:$0xf] }
 0x4f5   :  { %v12570_v36 = vld [vmem:[#allocation10 + $0x7d0] sm:$0xf0]  ;;  %v14201_v26 = vld [vmem:[#allocation10 + $0xaa4] sm:$0xf] }
 0x4f6   :  { %7734 = vmatpush.bf16.msra.mxu0 %v12025_v32  ;;  %7747 = vmatpush.bf16.msrb.mxu1 %v12281_v62  ;;  %v12922_v32 = vld [vmem:[#allocation10 + $0xbf0] sm:$0xf0]  ;;  %v12441_v62 = vor.u32 %v14109_v55, %v12440_v5  ;;  %v14073_v55 = vld [vmem:[#allocation10 + $0x4a4] sm:$0xf]  ;;  %v12573_v15 = vor.u32 %v14137_v4, %v12570_v36 }
 0x4f7   :  { %7760 = vmatpush.bf16.msra.mxu2 %v12537_v14  ;;  %7773 = vmatpush.bf16.msra.mxu3 %v12793_v41  ;;  %v12413_v14 = vor.u32 %v14097_v27, %v12410_v58  ;;  %v14025_v41 = vld [vmem:[#allocation10 + $0x264] sm:$0xf]  ;;  %v12925_v6 = vor.u32 %v14225_v28, %v12922_v32  ;;  %v12826_v27 = vld [vmem:[#allocation10 + $0xad0] sm:$0xf0]  ;;  %v12317_v49 = vor.u32 %v14073_v55, %v12314_v60 }
 0x4f8   :  { %v12125_v31 = vor.u32 %v14025_v41, %v12122_v54  ;;  %v12829_v28 = vor.u32 %v14201_v26, %v12826_v27  ;;  %v14065_v32 = vld [vmem:[#allocation10 + $0x444] sm:$0xf]  ;;  %v12794_v41 = vld [vmem:[#allocation10 + $0xa70] sm:$0xf0] }
 0x4f9   :  { %v11930_v55 = vld [vmem:[#allocation10 + $0x50] sm:$0xf0]  ;;  %v14041_v60 = vld [vmem:[#allocation10 + $0x324] sm:$0xf] }
 0x4fa   :  { %7735 = vmatpush.bf16.msra.mxu0 %v11993_v21  ;;  %7748 = vmatpush.bf16.msrb.mxu1 %v12249_v43  ;;  %v12634_v21 = vld [vmem:[#allocation10 + $0x890] sm:$0xf0]  ;;  %v14217_v43 = vld [vmem:[#allocation10 + $0xb64] sm:$0xf] }
 0x4fb   :  { %7761 = vmatpush.bf16.msra.mxu2 %v12505_v23  ;;  %7774 = vmatpush.bf16.msra.mxu3 %v12761_v8  ;;  %v12381_v23 = vor.u32 %v14089_v39, %v12378_v50  ;;  %v14017_v8 = vld [vmem:[#allocation10 + $0x204] sm:$0xf]  ;;  %v12637_v42 = vor.u32 %v14153_v61, %v12634_v21  ;;  %v12893_v19 = vor.u32 %v14217_v43, %v12890_v44  ;;  %v11994_v39 = vld [vmem:[#allocation10 + $0x110] sm:$0xf0] }
 0x4fc   :  { %v12093_v1 = vor.u32 %v14017_v8, %v12090_v11  ;;  %v14057_v21 = vld [vmem:[#allocation10 + $0x3e4] sm:$0xf]  ;;  %v12250_v43 = vld [vmem:[#allocation10 + $0x410] sm:$0xf0] }
 0x4fd   :  { %v14121_v44 = vld [vmem:[#allocation10 + $0x6e4] sm:$0xf]  ;;  %v12762_v8 = vld [vmem:[#allocation10 + $0xa10] sm:$0xf0] }
 0x4fe   :  { %7736 = vmatpush.bf16.msra.mxu0 %v11961_v13  ;;  %7749 = vmatpush.bf16.msrb.mxu1 %v12217_v48  ;;  %v14209_v13 = vld [vmem:[#allocation10 + $0xb04] sm:$0xf]  ;;  %v12858_v48 = vld [vmem:[#allocation10 + $0xb30] sm:$0xf0] }
 0x4ff   :  { %7762 = vmatpush.bf16.msra.mxu2 %v12473_v10  ;;  %7775 = vmatpush.bf16.msra.mxu3 %v12729_v33  ;;  %v12058_v10 = vld [vmem:[#allocation10 + $0x1d0] sm:$0xf0]  ;;  %v12605_v33 = vor.u32 %v14145_v18, %v12602_v2  ;;  %v12861_v5 = vor.u32 %v14209_v13, %v12858_v48  ;;  %v14049_v2 = vld [vmem:[#allocation10 + $0x384] sm:$0xf] }
 0x500   :  { %v12061_v58 = vor.u32 %v14009_v25, %v12058_v10  ;;  %v12218_v13 = vld [vmem:[#allocation10 + $0x3b0] sm:$0xf0]  ;;  %v14113_v48 = vld [vmem:[#allocation10 + $0x684] sm:$0xf] }
 0x501   :  { %v12730_v25 = vld [vmem:[#allocation10 + $0x9b0] sm:$0xf0]  ;;  %v13977_v10 = vld [vmem:[#allocation10 + $0x24] sm:$0xf] }
 0x502   :  { %7737 = vmatpush.bf16.msra.mxu0 %v11929_v53  ;;  %7750 = vmatpush.bf16.msrb.mxu1 %v12185_v16  ;;  %v14001_v53 = vld [vmem:[#allocation10 + $0x144] sm:$0xf]  ;;  %v12026_v16 = vld [vmem:[#allocation10 + $0x170] sm:$0xf0] }
 0x503   :  { %7763 = vmatpush.bf16.msra.mxu2 %v12441_v62  ;;  %7776 = vmatpush.bf16.msra.mxu3 %v12697_v9  ;;  %v12282_v62 = vld [vmem:[#allocation10 + $0x470] sm:$0xf0]  ;;  %v14129_v9 = vld [vmem:[#allocation10 + $0x744] sm:$0xf]  ;;  %v12029_v54 = vor.u32 %v14001_v53, %v12026_v16  ;;  %v12160_v16 = vld [vmem:[#allocation10 + $0x2c8] sm:$0xf] }
 0x504   :  { %v12186_v4 = vld [vmem:[#allocation10 + $0x350] sm:$0xf0]  ;;  %v14105_v27 = vld [vmem:[#allocation10 + $0x624] sm:$0xf] }
 0x505   :  { %7738 = vmatmul.bf16.vlgmr.msra.gmra.mxu0 %v16432_v30  ;;  %7751 = vmatmul.bf16.vlgmr.msrb.gmra.mxu1 %v16434_v47  ;;  %v12698_v53 = vld [vmem:[#allocation10 + $0x950] sm:$0xf0] }
 0x506   :  { %7782 = vmatpush.bf16.msrb.mxu0 %v12157_v3  ;;  %7795 = vmatpush.bf16.msra.mxu1 %v12413_v14  ;;  %v12538_v3 = vld [vmem:[#allocation10 + $0x770] sm:$0xf0]  ;;  %v14193_v14 = vld [vmem:[#allocation10 + $0xa44] sm:$0xf] }
 0x507   :  { %7808 = vmatpush.bf16.msrb.mxu2 %v12669_v40  ;;  %7821 = vmatpush.bf16.msrb.mxu3 %v12925_v6  ;;  %v12285_v40 = vor.u32 %v14065_v32, %v12282_v62  ;;  %v13993_v6 = vld [vmem:[#allocation10 + $0xe4] sm:$0xf]  ;;  %v12541_v50 = vor.u32 %v14129_v9, %v12538_v3  ;;  %v12797_v61 = vor.u32 %v14193_v14, %v12794_v41  ;;  %v14102_v32 = vld [vmem:[#allocation10 + $0x5f4] sm:$0xf0]  ;;  %v12672_v62 = vld [vmem:[#allocation10 + $0x8c8] sm:$0xf] }
 0x508   :  { %7764 = vmatmul.bf16.vlgmr.msra.gmra.mxu2 %v16436_v57  ;;  %7777 = vmatmul.bf16.vlgmr.msra.gmra.mxu3 %v16438_v45  ;;  %v11997_v11 = vor.u32 %v13993_v6, %v11994_v39  ;;  %v11933_v9 = vor.u32 %v13977_v10, %v11930_v55  ;;  %v12189_v3 = vor.u32 %v14041_v60, %v12186_v4  ;;  %v14166_v14 = vld [vmem:[#allocation10 + $0x8f4] sm:$0xf0]  ;;  %v12928_v41 = vld [vmem:[#allocation10 + $0xbc8] sm:$0xf] }
 0x509   :  { %v14150_v10 = vld [vmem:[#allocation10 + $0x834] sm:$0xf0] }
 0x50a   :  { %7783 = vmatpush.bf16.msrb.mxu0 %v12125_v31  ;;  %7796 = vmatpush.bf16.msra.mxu1 %v12381_v23  ;;  %v12506_v31 = vld [vmem:[#allocation10 + $0x710] sm:$0xf0]  ;;  %v14185_v23 = vld [vmem:[#allocation10 + $0x9e4] sm:$0xf] }
 0x50b   :  { %7809 = vmatpush.bf16.msrb.mxu2 %v12637_v42  ;;  %7822 = vmatpush.bf16.msrb.mxu3 %v12893_v19  ;;  %v12253_v42 = vor.u32 %v14057_v21, %v12250_v43  ;;  %v13985_v19 = vld [vmem:[#allocation10 + $0x84] sm:$0xf]  ;;  %v12509_v52 = vor.u32 %v14121_v44, %v12506_v31  ;;  %v12765_v18 = vor.u32 %v14185_v23, %v12762_v8  ;;  %v14030_v21 = vld [vmem:[#allocation10 + $0x294] sm:$0xf0]  ;;  %v12384_v31 = vld [vmem:[#allocation10 + $0x568] sm:$0xf] }
 0x50c   :  { %v12673_v43 = vor.u32 %v14166_v14, %v12672_v62  ;;  %v14094_v23 = vld [vmem:[#allocation10 + $0x594] sm:$0xf0]  ;;  %v12640_v8 = vld [vmem:[#allocation10 + $0x868] sm:$0xf] }
 0x50d   :  { %v12832_v62 = vld [vmem:[#allocation10 + $0xaa8] sm:$0xf] }
 0x50e   :  { %7784 = vmatpush.bf16.msrb.mxu0 %v12093_v1  ;;  %7797 = vmatpush.bf16.msra.mxu1 %v12349_v7  ;;  %v12474_v1 = vld [vmem:[#allocation10 + $0x6b0] sm:$0xf0]  ;;  %v14177_v7 = vld [vmem:[#allocation10 + $0x984] sm:$0xf] }
 0x50f   :  { %7810 = vmatpush.bf16.msrb.mxu2 %v12605_v33  ;;  %7823 = vmatpush.bf16.msrb.mxu3 %v12861_v5  ;;  %v11965_v33 = vor.u32 %v13985_v19, %v11962_v0  ;;  %v12221_v5 = vor.u32 %v14049_v2, %v12218_v13  ;;  %v12477_v36 = vor.u32 %v14113_v48, %v12474_v1  ;;  %v14222_v19 = vld [vmem:[#allocation10 + $0xb94] sm:$0xf0]  ;;  %v12352_v1 = vld [vmem:[#allocation10 + $0x508] sm:$0xf] }
 0x510   :  { %v12733_v26 = vor.u32 %v14177_v7, %v12730_v25  ;;  %v14022_v2 = vld [vmem:[#allocation10 + $0x234] sm:$0xf0]  ;;  %v12608_v25 = vld [vmem:[#allocation10 + $0x808] sm:$0xf] }
 0x511   :  { %v14086_v7 = vld [vmem:[#allocation10 + $0x534] sm:$0xf0] }
 0x512   :  { %7785 = vmatpush.bf16.msrb.mxu0 %v12061_v58  ;;  %7798 = vmatpush.bf16.msra.mxu1 %v12317_v49  ;;  %v12442_v58 = vld [vmem:[#allocation10 + $0x650] sm:$0xf0]  ;;  %v14169_v49 = vld [vmem:[#allocation10 + $0x924] sm:$0xf] }
 0x513   :  { %7811 = vmatpush.bf16.msrb.mxu2 %v12573_v15  ;;  %7824 = vmatpush.bf16.msrb.mxu3 %v12829_v28  ;;  %v14038_v15 = vld [vmem:[#allocation10 + $0x2f4] sm:$0xf0]  ;;  %v12416_v28 = vld [vmem:[#allocation10 + $0x5c8] sm:$0xf]  ;;  %v12701_v6 = vor.u32 %v14169_v49, %v12698_v53  ;;  %v12609_v49 = vor.u32 %v14150_v10, %v12608_v25 }
 0x514   :  { %v12161_v39 = vor.u32 %v14038_v15, %v12160_v16  ;;  %v12320_v16 = vld [vmem:[#allocation10 + $0x4a8] sm:$0xf]  ;;  %v14078_v15 = vld [vmem:[#allocation10 + $0x4d4] sm:$0xf0] }
 0x515   :  { %v12321_v14 = vor.u32 %v14078_v15, %v12320_v16  ;;  %v14062_v25 = vld [vmem:[#allocation10 + $0x414] sm:$0xf0]  ;;  %v12512_v10 = vld [vmem:[#allocation10 + $0x6e8] sm:$0xf] }
 0x516   :  { %7786 = vmatpush.bf16.msrb.mxu0 %v12029_v54  ;;  %7799 = vmatpush.bf16.msra.mxu1 %v12285_v40  ;;  %v14230_v54 = vld [vmem:[#allocation10 + $0xbf4] sm:$0xf0]  ;;  %v12445_v40 = vor.u32 %v14105_v27, %v12442_v58  ;;  %v12064_v27 = vld [vmem:[#allocation10 + $0x1a8] sm:$0xf] }
 0x517   :  { %7812 = vmatpush.bf16.msrb.mxu2 %v12541_v50  ;;  %7825 = vmatpush.bf16.msrb.mxu3 %v12797_v61  ;;  %v12417_v50 = vor.u32 %v14102_v32, %v12416_v28  ;;  %v12128_v61 = vld [vmem:[#allocation10 + $0x268] sm:$0xf]  ;;  %v12929_v44 = vor.u32 %v14230_v54, %v12928_v41  ;;  %v14014_v58 = vld [vmem:[#allocation10 + $0x1d4] sm:$0xf0] }
 0x518   :  { %v12129_v0 = vor.u32 %v14030_v21, %v12128_v61  ;;  %v12576_v28 = vld [vmem:[#allocation10 + $0x7a8] sm:$0xf]  ;;  %v14142_v32 = vld [vmem:[#allocation10 + $0x7d4] sm:$0xf0] }
 0x519   :  { %v12032_v41 = vld [vmem:[#allocation10 + $0x148] sm:$0xf]  ;;  %v14006_v54 = vld [vmem:[#allocation10 + $0x174] sm:$0xf0] }
 0x51a   :  { %7787 = vmatpush.bf16.msrb.mxu0 %v11997_v11  ;;  %7800 = vmatpush.bf16.msra.mxu1 %v12253_v42  ;;  %v14158_v11 = vld [vmem:[#allocation10 + $0x894] sm:$0xf0]  ;;  %v12896_v42 = vld [vmem:[#allocation10 + $0xb68] sm:$0xf] }
 0x51b   :  { %7813 = vmatpush.bf16.msrb.mxu2 %v12509_v52  ;;  %7826 = vmatpush.bf16.msrb.mxu3 %v12765_v18  ;;  %v12385_v52 = vor.u32 %v14094_v23, %v12384_v31  ;;  %v12096_v18 = vld [vmem:[#allocation10 + $0x208] sm:$0xf]  ;;  %v12641_v13 = vor.u32 %v14158_v11, %v12640_v8  ;;  %v12897_v48 = vor.u32 %v14222_v19, %v12896_v42  ;;  %v14198_v23 = vld [vmem:[#allocation10 + $0xa74] sm:$0xf0] }
 0x51c   :  { %v12097_v4 = vor.u32 %v14022_v2, %v12096_v18  ;;  %v12544_v61 = vld [vmem:[#allocation10 + $0x748] sm:$0xf]  ;;  %v408_v19 = vadd.f32 %v15100_v46, %v15095_v38  ;;  %v13998_v2 = vld [vmem:[#allocation10 + $0x114] sm:$0xf0] }
 0x51d   :  { %v12800_v31 = vld [vmem:[#allocation10 + $0xa48] sm:$0xf] }
 0x51e   :  { %7788 = vmatpush.bf16.msrb.mxu0 %v11965_v33  ;;  %7801 = vmatpush.bf16.msra.mxu1 %v12221_v5  ;;  %v12864_v33 = vld [vmem:[#allocation10 + $0xb08] sm:$0xf]  ;;  %v14214_v5 = vld [vmem:[#allocation10 + $0xb34] sm:$0xf0] }
 0x51f   :  { %7814 = vmatpush.bf16.msrb.mxu2 %v12477_v36  ;;  %7827 = vmatpush.bf16.msrb.mxu3 %v12733_v26  ;;  %v12353_v36 = vor.u32 %v14086_v7, %v12352_v1  ;;  %v12865_v53 = vor.u32 %v14214_v5, %v12864_v33  ;;  %v12000_v18 = vld [vmem:[#allocation10 + $0xe8] sm:$0xf]  ;;  %v12801_v1 = vor.u32 %v14198_v23, %v12800_v31  ;;  %v14126_v33 = vld [vmem:[#allocation10 + $0x714] sm:$0xf0] }
 0x520   :  { %v12256_v7 = vld [vmem:[#allocation10 + $0x3e8] sm:$0xf]  ;;  %v12001_v38 = vor.u32 %v13998_v2, %v12000_v18  ;;  %v14174_v23 = vld [vmem:[#allocation10 + $0x954] sm:$0xf0]  ;;  %v12674_v2 = vld [vmem:[#allocation10 + $0x8f8] sm:$0xf0] }
 0x521   :  { %v7531_v55 = vpop.f32.mrf.mxu0  ;;  %v7544_v60 = vpop.f32.mrf.mxu1  ;;  %v12768_v5 = vld [vmem:[#allocation10 + $0x9e8] sm:$0xf]  ;;  %v12257_v46 = vor.u32 %v14062_v25, %v12256_v7 }
 0x522   :  { %7789 = vmatpush.bf16.msrb.mxu0 %v11933_v9  ;;  %7802 = vmatpush.bf16.msra.mxu1 %v12189_v3  ;;  %v7545_v26 = vadd.f32 %v7544_v60, %v7531_v55  ;;  %v14206_v9 = vld [vmem:[#allocation10 + $0xad4] sm:$0xf0]  ;;  %v12065_v3 = vor.u32 %v14014_v58, %v12064_v27  ;;  %v12224_v58 = vld [vmem:[#allocation10 + $0x388] sm:$0xf] }
 0x523   :  { %7815 = vmatpush.bf16.msrb.mxu2 %v12445_v40  ;;  %7828 = vmatpush.bf16.msrb.mxu3 %v12701_v6  ;;  %v12577_v40 = vor.u32 %v14142_v32, %v12576_v28  ;;  %v12833_v6 = vor.u32 %v14206_v9, %v12832_v62  ;;  %v14190_v55 = vld [vmem:[#allocation10 + $0xa14] sm:$0xf0]  ;;  %v12736_v32 = vld [vmem:[#allocation10 + $0x988] sm:$0xf] }
 0x524   :  { %v12769_v27 = vor.u32 %v14190_v55, %v12768_v5  ;;  %v14118_v28 = vld [vmem:[#allocation10 + $0x6b4] sm:$0xf0]  ;;  %v12704_v31 = vld [vmem:[#allocation10 + $0x928] sm:$0xf]  ;;  %v14026_v55 = vld [vmem:[#allocation10 + $0x26c] sm:$0xf] }
 0x525   :  { %7790 = vmatmul.bf16.vlgmr.msrb.gmra.mxu0 %v16432_v30  ;;  %7803 = vmatmul.bf16.vlgmr.msra.gmra.mxu1 %v16434_v47  ;;  %v14182_v62 = vld [vmem:[#allocation10 + $0x9b4] sm:$0xf0]  ;;  %v12705_v7 = vor.u32 %v14174_v23, %v12704_v31  ;;  %v14210_v31 = vld [vmem:[#allocation10 + $0xb0c] sm:$0xf]  ;;  %v12866_v23 = vld [vmem:[#allocation10 + $0xb38] sm:$0xf0] }
 0x526   :  { %7834 = vmatpush.bf16.msra.mxu0 %v12161_v39  ;;  %7847 = vmatpush.bf16.msrb.mxu1 %v12417_v50  ;;  %v12288_v39 = vld [vmem:[#allocation10 + $0x448] sm:$0xf]  ;;  %v14070_v50 = vld [vmem:[#allocation10 + $0x474] sm:$0xf0] }
 0x527   :  { %7860 = vmatpush.bf16.msra.mxu2 %v12673_v43  ;;  %7873 = vmatpush.bf16.msra.mxu3 %v12929_v44  ;;  %v14134_v44 = vld [vmem:[#allocation10 + $0x774] sm:$0xf0] }
 0x528   :  { %7816 = vmatmul.bf16.vlgmr.msrb.gmra.mxu2 %v16436_v57  ;;  %7829 = vmatmul.bf16.vlgmr.msrb.gmra.mxu3 %v16438_v45  ;;  %v7557_v21 = vpop.f32.mrf.mxu2  ;;  %v7570_v43 = vpop.f32.mrf.mxu3 }
 0x529   :  { %v7558_v8 = vadd.f32 %v7557_v21, %v7545_v26  ;;  %v7533_v11 = vpop.f32.mrf.mxu0  ;;  %v7546_v42 = vpop.f32.mrf.mxu1  ;;  %v12513_v26 = vor.u32 %v14126_v33, %v12512_v10  ;;  %v12737_v21 = vor.u32 %v14182_v62, %v12736_v32  ;;  %v17072_v32 = vld [vmem:[#allocation28_spill] sm:$0xff]  ;;  %v17073_v62 = vld [vmem:[#allocation30_spill] sm:$0xff] }
 0x52a   :  { %7835 = vmatpush.bf16.msra.mxu0 %v12129_v0  ;;  %7848 = vmatpush.bf16.msrb.mxu1 %v12385_v52  ;;  %v12033_v0 = vor.u32 %v14006_v54, %v12032_v41  ;;  %v12289_v52 = vor.u32 %v14070_v50, %v12288_v39  ;;  %v12192_v39 = vld [vmem:[#allocation10 + $0x328] sm:$0xf]  ;;  %v14046_v50 = vld [vmem:[#allocation10 + $0x354] sm:$0xf0]  ;;  %v12162_v11 = vld [vmem:[#allocation10 + $0x2f8] sm:$0xf0] }
 0x52b   :  { %7861 = vmatpush.bf16.msra.mxu2 %v12641_v13  ;;  %7874 = vmatpush.bf16.msra.mxu3 %v12897_v48  ;;  %v7571_v13 = vadd.f32 %v7570_v43, %v7558_v8  ;;  %v12545_v48 = vor.u32 %v14134_v44, %v12544_v61  ;;  %v12448_v43 = vld [vmem:[#allocation10 + $0x628] sm:$0xf]  ;;  %v14110_v44 = vld [vmem:[#allocation10 + $0x654] sm:$0xf0]  ;;  %v14034_v8 = vld [vmem:[#allocation10 + $0x2cc] sm:$0xf]  ;;  %v12193_v18 = vor.u32 %v14046_v50, %v12192_v39 }
 0x52c   :  { %v14098_v42 = vld [vmem:[#allocation10 + $0x5cc] sm:$0xf]  ;;  %v12165_v25 = vor.u32 %v14034_v8, %v12162_v11 }
 0x52d   :  { %v16484_v60 = vadd.f32 %v7571_v13, %v408_v19  ;;  %v12418_v19 = vld [vmem:[#allocation10 + $0x5f8] sm:$0xf0]  ;;  %v14226_v13 = vld [vmem:[#allocation10 + $0xbcc] sm:$0xf] }
 0x52e   :  { %7836 = vmatpush.bf16.msra.mxu0 %v12097_v4  ;;  %7849 = vmatpush.bf16.msrb.mxu1 %v12353_v36  ;;  %v11968_v4 = vld [vmem:[#allocation10 + $0x88] sm:$0xf]  ;;  %v13990_v36 = vld [vmem:[#allocation10 + $0xb4] sm:$0xf0]  ;;  %v12421_v10 = vor.u32 %v14098_v42, %v12418_v19 }
 0x52f   :  { %7862 = vmatpush.bf16.msra.mxu2 %v12609_v49  ;;  %7875 = vmatpush.bf16.msra.mxu3 %v12865_v53  ;;  %v14054_v49 = vld [vmem:[#allocation10 + $0x3b4] sm:$0xf0]  ;;  %v12480_v53 = vld [vmem:[#allocation10 + $0x688] sm:$0xf]  ;;  %v11969_v41 = vor.u32 %v13990_v36, %v11968_v4 }
 0x530   :  { %v7559_v16 = vpop.f32.mrf.mxu2  ;;  %v7572_v15 = vpop.f32.mrf.mxu3  ;;  %v12225_v54 = vor.u32 %v14054_v49, %v12224_v58  ;;  %v12481_v61 = vor.u32 %v14118_v28, %v12480_v53  ;;  %v14090_v58 = vld [vmem:[#allocation10 + $0x56c] sm:$0xf]  ;;  %v12386_v49 = vld [vmem:[#allocation10 + $0x598] sm:$0xf0] }
 0x531   :  { %v7583_v9 = vpop.f32.mrf.mxu0  ;;  %v14154_v53 = vld [vmem:[#allocation10 + $0x86c] sm:$0xf]  ;;  %v12642_v16 = vld [vmem:[#allocation10 + $0x898] sm:$0xf0] }
 0x532   :  { %7837 = vmatpush.bf16.msra.mxu0 %v12065_v3  ;;  %7850 = vmatpush.bf16.msrb.mxu1 %v12321_v14  ;;  %v7596_v3 = vpop.f32.mrf.mxu1  ;;  %v11936_v14 = vld [vmem:[#allocation10 + $0x28] sm:$0xf]  ;;  %v14218_v15 = vld [vmem:[#allocation10 + $0xb6c] sm:$0xf]  ;;  %v12898_v28 = vld [vmem:[#allocation10 + $0xb98] sm:$0xf0]  ;;  %v12645_v39 = vor.u32 %v14154_v53, %v12642_v16 }
 0x533   :  { %7863 = vmatpush.bf16.msra.mxu2 %v12577_v40  ;;  %7876 = vmatpush.bf16.msra.mxu3 %v12833_v6  ;;  %v7597_v40 = vadd.f32 %v7596_v3, %v7583_v9  ;;  %v13982_v6 = vld [vmem:[#allocation10 + $0x54] sm:$0xf0]  ;;  %v437_v9 = vadd.f32 %v17073_v62, %v17072_v32  ;;  %v12901_v50 = vor.u32 %v14218_v15, %v12898_v28  ;;  %v14130_v53 = vld [vmem:[#allocation10 + $0x74c] sm:$0xf]  ;;  %v12546_v16 = vld [vmem:[#allocation10 + $0x778] sm:$0xf0] }
 0x534   :  { %v14194_v15 = vld [vmem:[#allocation10 + $0xa4c] sm:$0xf]  ;;  %v12802_v28 = vld [vmem:[#allocation10 + $0xa78] sm:$0xf0] }
 0x536   :  { %7838 = vmatpush.bf16.msra.mxu0 %v12033_v0  ;;  %7851 = vmatpush.bf16.msrb.mxu1 %v12289_v52  ;;  %v14162_v0 = vld [vmem:[#allocation10 + $0x8cc] sm:$0xf]  ;;  %v11937_v52 = vor.u32 %v13982_v6, %v11936_v14 }
 0x537   :  { %7864 = vmatpush.bf16.msra.mxu2 %v12545_v48  ;;  %7877 = vmatpush.bf16.msra.mxu3 %v12801_v1  ;;  %v12930_v48 = vld [vmem:[#allocation10 + $0xbf8] sm:$0xf0]  ;;  %v12449_v1 = vor.u32 %v14110_v44, %v12448_v43  ;;  %v14146_v43 = vld [vmem:[#allocation10 + $0x80c] sm:$0xf] }
 0x538   :  { %v7609_v33 = vpop.f32.mrf.mxu2  ;;  %v7622_v5 = vpop.f32.mrf.mxu3  ;;  %v12933_v4 = vor.u32 %v14226_v13, %v12930_v48  ;;  %v12610_v44 = vld [vmem:[#allocation10 + $0x838] sm:$0xf0]  ;;  %v14074_v13 = vld [vmem:[#allocation10 + $0x4ac] sm:$0xf] }
 0x539   :  { %v7610_v36 = vadd.f32 %v7609_v33, %v7597_v40  ;;  %v12098_v40 = vld [vmem:[#allocation10 + $0x238] sm:$0xf0] }
 0x53a   :  { %7839 = vmatpush.bf16.msra.mxu0 %v12001_v38  ;;  %7852 = vmatpush.bf16.msrb.mxu1 %v12257_v46  ;;  %v12130_v38 = vld [vmem:[#allocation10 + $0x298] sm:$0xf0]  ;;  %v12677_v46 = vor.u32 %v14162_v0, %v12674_v2  ;;  %v14010_v0 = vld [vmem:[#allocation10 + $0x1ac] sm:$0xf]  ;;  %v12869_v2 = vor.u32 %v14210_v31, %v12866_v23 }
 0x53b   :  { %7865 = vmatpush.bf16.msra.mxu2 %v12513_v26  ;;  %7878 = vmatpush.bf16.msra.mxu3 %v12769_v27  ;;  %v7585_v26 = vpop.f32.mrf.mxu0  ;;  %v7598_v27 = vpop.f32.mrf.mxu1  ;;  %v7623_v3 = vadd.f32 %v7622_v5, %v7610_v36  ;;  %v12133_v14 = vor.u32 %v14026_v55, %v12130_v38  ;;  %v12322_v48 = vld [vmem:[#allocation10 + $0x4d8] sm:$0xf0] }
 0x53c   :  { %v12034_v36 = vld [vmem:[#allocation10 + $0x178] sm:$0xf0] }
 0x53d   :  { %v16488_v6 = vadd.f32 %v7623_v3, %v437_v9  ;;  %v13994_v9 = vld [vmem:[#allocation10 + $0xec] sm:$0xf]  ;;  %v12002_v3 = vld [vmem:[#allocation10 + $0x118] sm:$0xf0] }
 0x53e   :  { %7840 = vmatpush.bf16.msra.mxu0 %v11969_v41  ;;  %7853 = vmatpush.bf16.msrb.mxu1 %v12225_v54  ;;  %v12389_v41 = vor.u32 %v14090_v58, %v12386_v49  ;;  %v14018_v54 = vld [vmem:[#allocation10 + $0x20c] sm:$0xf]  ;;  %v12290_v49 = vld [vmem:[#allocation10 + $0x478] sm:$0xf0] }
 0x53f   :  { %7866 = vmatpush.bf16.msra.mxu2 %v12481_v61  ;;  %7879 = vmatpush.bf16.msra.mxu3 %v12737_v21  ;;  %v14082_v61 = vld [vmem:[#allocation10 + $0x50c] sm:$0xf]  ;;  %v12354_v21 = vld [vmem:[#allocation10 + $0x538] sm:$0xf0]  ;;  %v12101_v8 = vor.u32 %v14018_v54, %v12098_v40 }
 0x540   :  { %v12357_v11 = vor.u32 %v14082_v61, %v12354_v21  ;;  %v7611_v42 = vpop.f32.mrf.mxu2  ;;  %v7624_v19 = vpop.f32.mrf.mxu3  ;;  %v14066_v58 = vld [vmem:[#allocation10 + $0x44c] sm:$0xf]  ;;  %v12258_v40 = vld [vmem:[#allocation10 + $0x418] sm:$0xf0] }
 0x541   :  { %v12293_v62 = vor.u32 %v14066_v58, %v12290_v49  ;;  %v14058_v54 = vld [vmem:[#allocation10 + $0x3ec] sm:$0xf]  ;;  %v12514_v21 = vld [vmem:[#allocation10 + $0x718] sm:$0xf0] }
 0x542   :  { %7841 = vmatpush.bf16.msra.mxu0 %v11937_v52  ;;  %7854 = vmatpush.bf16.msrb.mxu1 %v12193_v18  ;;  %v12066_v52 = vld [vmem:[#allocation10 + $0x1d8] sm:$0xf0]  ;;  %v12613_v18 = vor.u32 %v14146_v43, %v12610_v44  ;;  %v14186_v43 = vld [vmem:[#allocation10 + $0x9ec] sm:$0xf] }
 0x543   :  { %7867 = vmatpush.bf16.msra.mxu2 %v12449_v1  ;;  %7880 = vmatpush.bf16.msra.mxu3 %v12705_v7  ;;  %v14138_v1 = vld [vmem:[#allocation10 + $0x7ac] sm:$0xf]  ;;  %v12578_v7 = vld [vmem:[#allocation10 + $0x7d8] sm:$0xf0]  ;;  %v7635_v33 = vpop.f32.mrf.mxu0  ;;  %v7648_v5 = vpop.f32.mrf.mxu1  ;;  %v12069_v38 = vor.u32 %v14010_v0, %v12066_v52  ;;  %v12005_v0 = vor.u32 %v13994_v9, %v12002_v3  ;;  %v12261_v52 = vor.u32 %v14058_v54, %v12258_v40  ;;  %v13048_v3 = vld [vmem:[#allocation12 + $0xe0] sm:$0xf] }
 0x544   :  { %v7649_v55 = vadd.f32 %v7648_v5, %v7635_v33  ;;  %v12581_v26 = vor.u32 %v14138_v1, %v12578_v7  ;;  %v12770_v44 = vld [vmem:[#allocation10 + $0xa18] sm:$0xf0]  ;;  %v14050_v7 = vld [vmem:[#allocation10 + $0x38c] sm:$0xf]  ;;  %v14293_v54 = vld [vmem:[#allocation12 + $0x1ec] sm:$0xf0] }
 0x545   :  { %7842 = vmatmul.bf16.vlgmr.msra.gmra.mxu0 %v16432_v30  ;;  %7855 = vmatmul.bf16.vlgmr.msrb.gmra.mxu1 %v16434_v47  ;;  %v17075_v42 = vld [vmem:[#allocation27_spill] sm:$0xff]  ;;  %v12773_v1 = vor.u32 %v14186_v43, %v12770_v44  ;;  %v14178_v5 = vld [vmem:[#allocation10 + $0x98c] sm:$0xf]  ;;  %v13304_v40 = vld [vmem:[#allocation12 + $0x2e0] sm:$0xf] }
 0x546   :  { %7886 = vmatpush.bf16.msrb.mxu0 %v12165_v25  ;;  %7899 = vmatpush.bf16.msra.mxu1 %v12421_v10  ;;  %v14202_v25 = vld [vmem:[#allocation10 + $0xaac] sm:$0xf]  ;;  %v12834_v10 = vld [vmem:[#allocation10 + $0xad8] sm:$0xf0]  ;;  %v14357_v43 = vld [vmem:[#allocation12 + $0x3ec] sm:$0xf0] }
 0x547   :  { %7912 = vmatpush.bf16.msrb.mxu2 %v12677_v46  ;;  %7925 = vmatpush.bf16.msrb.mxu3 %v12933_v4  ;;  %v12325_v46 = vor.u32 %v14074_v13, %v12322_v48  ;;  %v14002_v4 = vld [vmem:[#allocation10 + $0x14c] sm:$0xf]  ;;  %v12837_v27 = vor.u32 %v14202_v25, %v12834_v10  ;;  %v12226_v25 = vld [vmem:[#allocation10 + $0x3b8] sm:$0xf0] }
 0x548   :  { %7868 = vmatmul.bf16.vlgmr.msra.gmra.mxu2 %v16436_v57  ;;  %7881 = vmatmul.bf16.vlgmr.msra.gmra.mxu3 %v16438_v45  ;;  %v12037_v32 = vor.u32 %v14002_v4, %v12034_v36  ;;  %v14114_v10 = vld [vmem:[#allocation10 + $0x68c] sm:$0xf]  ;;  %v12482_v33 = vld [vmem:[#allocation10 + $0x6b8] sm:$0xf0]  ;;  %v12229_v36 = vor.u32 %v14050_v7, %v12226_v25 }
 0x549   :  { %v12194_v58 = vld [vmem:[#allocation10 + $0x358] sm:$0xf0]  ;;  %v12485_v49 = vor.u32 %v14114_v10, %v12482_v33  ;;  %v13016_v10 = vld [vmem:[#allocation12 + $0xa0] sm:$0xf]  ;;  %v14253_v33 = vld [vmem:[#allocation12 + $0xac] sm:$0xf0] }
 0x54a   :  { %7887 = vmatpush.bf16.msrb.mxu0 %v12133_v14  ;;  %7900 = vmatpush.bf16.msra.mxu1 %v12389_v41  ;;  %v12549_v14 = vor.u32 %v14130_v53, %v12546_v16  ;;  %v12805_v41 = vor.u32 %v14194_v15, %v12802_v28  ;;  %v14106_v16 = vld [vmem:[#allocation10 + $0x62c] sm:$0xf]  ;;  %v12450_v15 = vld [vmem:[#allocation10 + $0x658] sm:$0xf0] }
 0x54b   :  { %7913 = vmatpush.bf16.msrb.mxu2 %v12645_v39  ;;  %7926 = vmatpush.bf16.msrb.mxu3 %v12901_v50  ;;  %v14122_v39 = vld [vmem:[#allocation10 + $0x6ec] sm:$0xf]  ;;  %v7661_v50 = vpop.f32.mrf.mxu2  ;;  %v7674_v61 = vpop.f32.mrf.mxu3  ;;  %v12706_v9 = vld [vmem:[#allocation10 + $0x958] sm:$0xf0]  ;;  %v12453_v44 = vor.u32 %v14106_v16, %v12450_v15  ;;  %v13000_v16 = vld [vmem:[#allocation12 + $0x80] sm:$0xf] }
 0x54c   :  { %v7662_v31 = vadd.f32 %v7661_v50, %v7649_v55  ;;  %v7637_v23 = vpop.f32.mrf.mxu0  ;;  %v12517_v48 = vor.u32 %v14122_v39, %v12514_v21  ;;  %v12738_v55 = vld [vmem:[#allocation10 + $0x9b8] sm:$0xf0]  ;;  %v14170_v28 = vld [vmem:[#allocation10 + $0x92c] sm:$0xf]  ;;  %v13432_v21 = vld [vmem:[#allocation12 + $0x3e0] sm:$0xf] }
 0x54d   :  { %v12741_v53 = vor.u32 %v14178_v5, %v12738_v55  ;;  %v14249_v15 = vld [vmem:[#allocation12 + $0x8c] sm:$0xf0] }
 0x54e   :  { %7888 = vmatpush.bf16.msrb.mxu0 %v12101_v8  ;;  %7901 = vmatpush.bf16.msra.mxu1 %v12357_v11  ;;  %v7650_v8 = vpop.f32.mrf.mxu1  ;;  %v17074_v11 = vld [vmem:[#allocation25_spill] sm:$0xff]  ;;  %v7675_v13 = vadd.f32 %v7674_v61, %v7662_v31  ;;  %v14325_v61 = vld [vmem:[#allocation12 + $0x2ec] sm:$0xf0]  ;;  %v12709_v31 = vor.u32 %v14170_v28, %v12706_v9 }
 0x54f   :  { %7914 = vmatpush.bf16.msrb.mxu2 %v12613_v18  ;;  %7927 = vmatpush.bf16.msrb.mxu3 %v12869_v2  ;;  %v466_v19 = vadd.f32 %v17075_v42, %v17074_v11  ;;  %v13986_v18 = vld [vmem:[#allocation10 + $0x8c] sm:$0xf]  ;;  %v11970_v2 = vld [vmem:[#allocation10 + $0xb8] sm:$0xf0]  ;;  %v13032_v11 = vld [vmem:[#allocation12 + $0xc0] sm:$0xf] }
 0x550   :  { %v11973_v4 = vor.u32 %v13986_v18, %v11970_v2  ;;  %v14257_v42 = vld [vmem:[#allocation12 + $0xcc] sm:$0xf0]  ;;  %v13288_v2 = vld [vmem:[#allocation12 + $0x2c0] sm:$0xf] }
 0x551   :  { %v14289_v18 = vld [vmem:[#allocation12 + $0x1cc] sm:$0xf0]  ;;  %v13033_v7 = vor.u32 %v14257_v42, %v13032_v11 }
 0x552   :  { %7889 = vmatpush.bf16.msrb.mxu0 %v12069_v38  ;;  %7902 = vmatpush.bf16.msra.mxu1 %v12325_v46  ;;  %v16496_v38 = vadd.f32 %v7675_v13, %v466_v19  ;;  %v13978_v46 = vld [vmem:[#allocation10 + $0x2c] sm:$0xf]  ;;  %v13305_v19 = vor.u32 %v14325_v61, %v13304_v40  ;;  %v14321_v13 = vld [vmem:[#allocation12 + $0x2cc] sm:$0xf0] }
 0x553   :  { %7915 = vmatpush.bf16.msrb.mxu2 %v12581_v26  ;;  %7928 = vmatpush.bf16.msrb.mxu3 %v12837_v27  ;;  %v11938_v26 = vld [vmem:[#allocation10 + $0x58] sm:$0xf0]  ;;  %v14042_v27 = vld [vmem:[#allocation10 + $0x32c] sm:$0xf]  ;;  %v13289_v5 = vor.u32 %v14321_v13, %v13288_v2  ;;  %v14313_v9 = vld [vmem:[#allocation12 + $0x28c] sm:$0xf0] }
 0x554   :  { %v11941_v39 = vor.u32 %v13978_v46, %v11938_v26  ;;  %v12197_v50 = vor.u32 %v14042_v27, %v12194_v58  ;;  %v13144_v46 = vld [vmem:[#allocation12 + $0x1a0] sm:$0xf]  ;;  %v14317_v26 = vld [vmem:[#allocation12 + $0x2ac] sm:$0xf0] }
 0x555   :  { %v13400_v27 = vld [vmem:[#allocation12 + $0x3a0] sm:$0xf]  ;;  %v14349_v58 = vld [vmem:[#allocation12 + $0x3ac] sm:$0xf0] }
 0x556   :  { %7890 = vmatpush.bf16.msrb.mxu0 %v12037_v32  ;;  %7903 = vmatpush.bf16.msra.mxu1 %v12293_v62  ;;  %v7663_v32 = vpop.f32.mrf.mxu2  ;;  %v7676_v62 = vpop.f32.mrf.mxu3  ;;  %v14341_v11 = vld [vmem:[#allocation12 + $0x36c] sm:$0xf0]  ;;  %v13096_v13 = vld [vmem:[#allocation12 + $0x140] sm:$0xf] }
 0x557   :  { %7916 = vmatpush.bf16.msrb.mxu2 %v12549_v14  ;;  %7929 = vmatpush.bf16.msrb.mxu3 %v12805_v41  ;;  %v14261_v14 = vld [vmem:[#allocation12 + $0xec] sm:$0xf0]  ;;  %v13176_v41 = vld [vmem:[#allocation12 + $0x1e0] sm:$0xf]  ;;  %v13401_v32 = vor.u32 %v14349_v58, %v13400_v27 }
 0x558   :  { %v13049_v23 = vor.u32 %v14261_v14, %v13048_v3  ;;  %v13177_v8 = vor.u32 %v14293_v54, %v13176_v41  ;;  %v14281_v62 = vld [vmem:[#allocation12 + $0x18c] sm:$0xf0]  ;;  %v13384_v3 = vld [vmem:[#allocation12 + $0x380] sm:$0xf]  ;;  %v13001_v54 = vor.u32 %v14249_v15, %v13000_v16 }
 0x559   :  { %v14345_v14 = vld [vmem:[#allocation12 + $0x38c] sm:$0xf0] }
 0x55a   :  { %7891 = vmatpush.bf16.msrb.mxu0 %v12005_v0  ;;  %7904 = vmatpush.bf16.msra.mxu1 %v12261_v52  ;;  %v13433_v0 = vor.u32 %v14357_v43, %v13432_v21  ;;  %v13160_v52 = vld [vmem:[#allocation12 + $0x1c0] sm:$0xf]  ;;  %v13385_v21 = vor.u32 %v14345_v14, %v13384_v3  ;;  %v14237_v16 = vld [vmem:[#allocation12 + $0x2c] sm:$0xf0] }
 0x55b   :  { %7917 = vmatpush.bf16.msrb.mxu2 %v12517_v48  ;;  %7930 = vmatpush.bf16.msrb.mxu3 %v12773_v1  ;;  %v13416_v48 = vld [vmem:[#allocation12 + $0x3c0] sm:$0xf]  ;;  %v14353_v1 = vld [vmem:[#allocation12 + $0x3cc] sm:$0xf0]  ;;  %v13161_v25 = vor.u32 %v14289_v18, %v13160_v52 }
 0x55c   :  { %v13417_v55 = vor.u32 %v14353_v1, %v13416_v48  ;;  %v13112_v43 = vld [vmem:[#allocation12 + $0x160] sm:$0xf]  ;;  %v14241_v52 = vld [vmem:[#allocation12 + $0x4c] sm:$0xf0] }
 0x55d   :  { %v14273_v48 = vld [vmem:[#allocation12 + $0x14c] sm:$0xf0]  ;;  %v13224_v1 = vld [vmem:[#allocation12 + $0x240] sm:$0xf] }
 0x55e   :  { %7892 = vmatpush.bf16.msrb.mxu0 %v11973_v4  ;;  %7905 = vmatpush.bf16.msra.mxu1 %v12229_v36  ;;  %v14285_v4 = vld [vmem:[#allocation12 + $0x1ac] sm:$0xf0]  ;;  %v13272_v36 = vld [vmem:[#allocation12 + $0x2a0] sm:$0xf] }
 0x55f   :  { %7918 = vmatpush.bf16.msrb.mxu2 %v12485_v49  ;;  %7931 = vmatpush.bf16.msrb.mxu3 %v12741_v53  ;;  %v13017_v49 = vor.u32 %v14253_v33, %v13016_v10  ;;  %v13145_v53 = vor.u32 %v14285_v4, %v13144_v46  ;;  %v13273_v28 = vor.u32 %v14317_v26, %v13272_v36  ;;  %v14305_v10 = vld [vmem:[#allocation12 + $0x24c] sm:$0xf0]  ;;  %v13352_v33 = vld [vmem:[#allocation12 + $0x340] sm:$0xf]  ;;  %v17077_v26 = vld [vmem:[#allocation29_spill] sm:$0xff] }
 0x560   :  { %v17076_v36 = vld [vmem:[#allocation26_spill] sm:$0xff]  ;;  %v13336_v3 = vld [vmem:[#allocation12 + $0x320] sm:$0xf] }
 0x561   :  { %v495_v27 = vadd.f32 %v17077_v26, %v17076_v36  ;;  %v14333_v14 = vld [vmem:[#allocation12 + $0x32c] sm:$0xf0]  ;;  %v13034_v36 = vld [vmem:[#allocation12 + $0xd0] sm:$0xf0] }
 0x562   :  { %7893 = vmatpush.bf16.msrb.mxu0 %v11941_v39  ;;  %7906 = vmatpush.bf16.msra.mxu1 %v12197_v50  ;;  %v7687_v41 = vpop.f32.mrf.mxu0  ;;  %v12984_v39 = vld [vmem:[#allocation12 + $0x60] sm:$0xf]  ;;  %v14245_v50 = vld [vmem:[#allocation12 + $0x6c] sm:$0xf0] }
 0x563   :  { %7919 = vmatpush.bf16.msrb.mxu2 %v12453_v44  ;;  %7932 = vmatpush.bf16.msrb.mxu3 %v12709_v31  ;;  %v14277_v44 = vld [vmem:[#allocation12 + $0x16c] sm:$0xf0]  ;;  %v13240_v31 = vld [vmem:[#allocation12 + $0x260] sm:$0xf]  ;;  %v12985_v42 = vor.u32 %v14245_v50, %v12984_v39 }
 0x564   :  { %v13064_v39 = vld [vmem:[#allocation12 + $0x100] sm:$0xf] }
 0x565   :  { %7894 = vmatmul.bf16.vlgmr.msrb.gmra.mxu0 %v16432_v30  ;;  %7907 = vmatmul.bf16.vlgmr.msra.gmra.mxu1 %v16434_v47  ;;  %v13128_v30 = vld [vmem:[#allocation12 + $0x180] sm:$0xf] }
 0x566   :  { %8722 = vmatpush.bf16.msra.mxu0 %v13049_v23  ;;  %8740 = vmatpush.bf16.msrb.mxu1 %v13177_v8  ;;  %v13256_v47 = vld [vmem:[#allocation12 + $0x280] sm:$0xf]  ;;  %v13129_v40 = vor.u32 %v14281_v62, %v13128_v30  ;;  %v14309_v23 = vld [vmem:[#allocation12 + $0x26c] sm:$0xf0] }
 0x567   :  { %8758 = vmatpush.bf16.msra.mxu2 %v13305_v19  ;;  %8776 = vmatpush.bf16.msra.mxu3 %v13433_v0  ;;  %v13257_v61 = vor.u32 %v14313_v9, %v13256_v47  ;;  %v13368_v8 = vld [vmem:[#allocation12 + $0x360] sm:$0xf]  ;;  %v13113_v19 = vor.u32 %v14277_v44, %v13112_v43  ;;  %v13241_v18 = vor.u32 %v14309_v23, %v13240_v31  ;;  %v14269_v62 = vld [vmem:[#allocation12 + $0x12c] sm:$0xf0] }
 0x568   :  { %7920 = vmatmul.bf16.vlgmr.msrb.gmra.mxu2 %v16436_v57  ;;  %7933 = vmatmul.bf16.vlgmr.msrb.gmra.mxu3 %v16438_v45  ;;  %v7700_v57 = vpop.f32.mrf.mxu1  ;;  %v12968_v0 = vld [vmem:[#allocation12 + $0x40] sm:$0xf]  ;;  %v13369_v2 = vor.u32 %v14341_v11, %v13368_v8  ;;  %v14301_v9 = vld [vmem:[#allocation12 + $0x22c] sm:$0xf0] }
 0x569   :  { %v7701_v45 = vadd.f32 %v7700_v57, %v7687_v41  ;;  %v12969_v58 = vor.u32 %v14241_v52, %v12968_v0  ;;  %v13080_v30 = vld [vmem:[#allocation12 + $0x120] sm:$0xf]  ;;  %v14297_v44 = vld [vmem:[#allocation12 + $0x20c] sm:$0xf0]  ;;  %v14259_v0 = vld [vmem:[#allocation12 + $0xe4] sm:$0xf] }
 0x56a   :  { %8723 = vmatpush.bf16.msra.mxu0 %v13033_v7  ;;  %8741 = vmatpush.bf16.msrb.mxu1 %v13161_v25  ;;  %v7689_v46 = vpop.f32.mrf.mxu0  ;;  %v13208_v47 = vld [vmem:[#allocation12 + $0x220] sm:$0xf]  ;;  %v14329_v11 = vld [vmem:[#allocation12 + $0x30c] sm:$0xf0]  ;;  %v13050_v52 = vld [vmem:[#allocation12 + $0xf0] sm:$0xf0] }
 0x56b   :  { %8759 = vmatpush.bf16.msra.mxu2 %v13289_v5  ;;  %8777 = vmatpush.bf16.msra.mxu3 %v13417_v55  ;;  %v7713_v7 = vpop.f32.mrf.mxu2  ;;  %v7726_v25 = vpop.f32.mrf.mxu3  ;;  %v14337_v5 = vld [vmem:[#allocation12 + $0x34c] sm:$0xf0]  ;;  %v13209_v50 = vor.u32 %v14301_v9, %v13208_v47  ;;  %v13192_v43 = vld [vmem:[#allocation12 + $0x200] sm:$0xf]  ;;  %v13290_v46 = vld [vmem:[#allocation12 + $0x2d0] sm:$0xf0] }
 0x56c   :  { %v7714_v55 = vadd.f32 %v7713_v7, %v7701_v45  ;;  %v13081_v45 = vor.u32 %v14269_v62, %v13080_v30  ;;  %v13320_v8 = vld [vmem:[#allocation12 + $0x300] sm:$0xf]  ;;  %v13178_v7 = vld [vmem:[#allocation12 + $0x1f0] sm:$0xf0]  ;;  %v14251_v62 = vld [vmem:[#allocation12 + $0xa4] sm:$0xf] }
 0x56d   :  { %v13274_v30 = vld [vmem:[#allocation12 + $0x2b0] sm:$0xf0] }
 0x56e   :  { %8724 = vmatpush.bf16.msra.mxu0 %v13017_v49  ;;  %8742 = vmatpush.bf16.msrb.mxu1 %v13145_v53  ;;  %v13097_v49 = vor.u32 %v14273_v48, %v13096_v13  ;;  %v12952_v53 = vld [vmem:[#allocation12 + $0x20] sm:$0xf]  ;;  %v7727_v15 = vadd.f32 %v7726_v25, %v7714_v55  ;;  %v13193_v13 = vor.u32 %v14297_v44, %v13192_v43  ;;  %v14319_v55 = vld [vmem:[#allocation12 + $0x2c4] sm:$0xf]  ;;  %v13018_v47 = vld [vmem:[#allocation12 + $0xb0] sm:$0xf0] }
 0x56f   :  { %8760 = vmatpush.bf16.msra.mxu2 %v13273_v28  ;;  %8778 = vmatpush.bf16.msra.mxu3 %v13401_v32  ;;  %v13225_v28 = vor.u32 %v14305_v10, %v13224_v1  ;;  %v13353_v32 = vor.u32 %v14337_v5, %v13352_v33  ;;  %v12953_v57 = vor.u32 %v14237_v16, %v12952_v53  ;;  %v14291_v1 = vld [vmem:[#allocation12 + $0x1e4] sm:$0xf]  ;;  %v13434_v5 = vld [vmem:[#allocation12 + $0x3f0] sm:$0xf0] }
 0x570   :  { %v7702_v4 = vpop.f32.mrf.mxu1  ;;  %v16504_v41 = vadd.f32 %v7727_v15, %v495_v27  ;;  %v13321_v48 = vor.u32 %v14329_v11, %v13320_v8  ;;  %v13053_v10 = vor.u32 %v14259_v0, %v13050_v52  ;;  %v14355_v33 = vld [vmem:[#allocation12 + $0x3e4] sm:$0xf]  ;;  %v13181_v26 = vor.u32 %v14291_v1, %v13178_v7  ;;  %v13002_v43 = vld [vmem:[#allocation12 + $0x90] sm:$0xf0] }
 0x571   :  { %v14255_v4 = vld [vmem:[#allocation12 + $0xc4] sm:$0xf]  ;;  %v13437_v27 = vor.u32 %v14355_v33, %v13434_v5  ;;  %v13293_v53 = vor.u32 %v14319_v55, %v13290_v46  ;;  %v12986_v1 = vld [vmem:[#allocation12 + $0x70] sm:$0xf0]  ;;  %v13459_v7 = vmul.f32 -1.442695, %v16488_v6 }
 0x572   :  { %8725 = vmatpush.bf16.msra.mxu0 %v13001_v54  ;;  %8743 = vmatpush.bf16.msrb.mxu1 %v13129_v40  ;;  %v12936_v54 = vld [vmem:[#allocation12] sm:$0xf]  ;;  %v14233_v40 = vld [vmem:[#allocation12 + $0xc] sm:$0xf0]  ;;  %v13037_v16 = vor.u32 %v14255_v4, %v13034_v36  ;;  %v14351_v15 = vld [vmem:[#allocation12 + $0x3c4] sm:$0xf] }
 0x573   :  { %8761 = vmatpush.bf16.msra.mxu2 %v13257_v61  ;;  %8779 = vmatpush.bf16.msra.mxu3 %v13385_v21  ;;  %v13337_v61 = vor.u32 %v14333_v14, %v13336_v3  ;;  %v14265_v21 = vld [vmem:[#allocation12 + $0x10c] sm:$0xf0]  ;;  %v7715_v31 = vpop.f32.mrf.mxu2  ;;  %v7728_v23 = vpop.f32.mrf.mxu3  ;;  %v14283_v14 = vld [vmem:[#allocation12 + $0x1a4] sm:$0xf]  ;;  %v13114_v5 = vld [vmem:[#allocation12 + $0x170] sm:$0xf0]  ;;  %14576 = vpow2.f32 %v13459_v7 }
 0x574   :  { %v14279_v11 = vld [vmem:[#allocation12 + $0x184] sm:$0xf]  ;;  %v13370_v36 = vld [vmem:[#allocation12 + $0x370] sm:$0xf0] }
 0x575   :  { %v14343_v52 = vld [vmem:[#allocation12 + $0x384] sm:$0xf] }
 0x576   :  { %8726 = vmatpush.bf16.msra.mxu0 %v12985_v42  ;;  %8744 = vmatpush.bf16.msrb.mxu1 %v13113_v19  ;;  %v14323_v42 = vld [vmem:[#allocation12 + $0x2e4] sm:$0xf]  ;;  %v13306_v19 = vld [vmem:[#allocation12 + $0x2f0] sm:$0xf0] }
 0x577   :  { %8762 = vmatpush.bf16.msra.mxu2 %v13241_v18  ;;  %8780 = vmatpush.bf16.msra.mxu3 %v13369_v2  ;;  %v12937_v18 = vor.u32 %v14233_v40, %v12936_v54  ;;  %v13065_v2 = vor.u32 %v14265_v21, %v13064_v39  ;;  %v13309_v25 = vor.u32 %v14323_v42, %v13306_v19  ;;  %v14347_v40 = vld [vmem:[#allocation12 + $0x3a4] sm:$0xf]  ;;  %v13402_v39 = vld [vmem:[#allocation12 + $0x3b0] sm:$0xf0] }
 0x578   :  { %v13021_v54 = vor.u32 %v14251_v62, %v13018_v47  ;;  %v14247_v21 = vld [vmem:[#allocation12 + $0x84] sm:$0xf]  ;;  %v13405_v8 = vor.u32 %v14347_v40, %v13402_v39  ;;  %v13130_v42 = vld [vmem:[#allocation12 + $0x190] sm:$0xf0] }
 0x579   :  { %v13005_v0 = vor.u32 %v14247_v21, %v13002_v43  ;;  %v14275_v33 = vld [vmem:[#allocation12 + $0x164] sm:$0xf]  ;;  %v13354_v21 = vld [vmem:[#allocation12 + $0x350] sm:$0xf0] }
 0x57a   :  { %8727 = vmatpush.bf16.msra.mxu0 %v12969_v58  ;;  %8745 = vmatpush.bf16.msrb.mxu1 %v13097_v49  ;;  %v14287_v58 = vld [vmem:[#allocation12 + $0x1c4] sm:$0xf]  ;;  %v13162_v49 = vld [vmem:[#allocation12 + $0x1d0] sm:$0xf0] }
 0x57b   :  { %8763 = vmatpush.bf16.msra.mxu2 %v13225_v28  ;;  %8781 = vmatpush.bf16.msra.mxu3 %v13353_v32  ;;  %v13418_v28 = vld [vmem:[#allocation12 + $0x3d0] sm:$0xf0]  ;;  %v14315_v32 = vld [vmem:[#allocation12 + $0x2a4] sm:$0xf]  ;;  %v13165_v9 = vor.u32 %v14287_v58, %v13162_v49 }
 0x57c   :  { %v13421_v3 = vor.u32 %v14351_v15, %v13418_v28  ;;  %v14339_v4 = vld [vmem:[#allocation12 + $0x364] sm:$0xf]  ;;  %v12970_v49 = vld [vmem:[#allocation12 + $0x50] sm:$0xf0]  ;;  %v14666_v28 = vld [vmem:[#allocation2 + $0xa8] sm:$0xff] }
 0x57d   :  { %v14239_v58 = vld [vmem:[#allocation12 + $0x44] sm:$0xf] }
 0x57e   :  { %8728 = vmatpush.bf16.msra.mxu0 %v12953_v57  ;;  %8746 = vmatpush.bf16.msrb.mxu1 %v13081_v45  ;;  %v13146_v57 = vld [vmem:[#allocation12 + $0x1b0] sm:$0xf0]  ;;  %v13277_v45 = vor.u32 %v14315_v32, %v13274_v30  ;;  %v16521_v32 = vpack.c.bf16 %v14666_v28, %v14666_v28  ;;  %v14667_v30 = vld [vmem:[#allocation2 + $0xb0] sm:$0xff] }
 0x57f   :  { %8764 = vmatpush.bf16.msra.mxu2 %v13209_v50  ;;  %8782 = vmatpush.bf16.msra.mxu3 %v13337_v61  ;;  %v14311_v50 = vld [vmem:[#allocation12 + $0x284] sm:$0xf]  ;;  %v13258_v61 = vld [vmem:[#allocation12 + $0x290] sm:$0xf0]  ;;  %v13149_v23 = vor.u32 %v14283_v14, %v13146_v57  ;;  %v16523_v62 = vpack.c.bf16 %v14667_v30, %v14667_v30  ;;  %v13373_v14 = vor.u32 %v14339_v4, %v13370_v36  ;;  %v14326_v4 = vld [vmem:[#allocation12 + $0x2f4] sm:$0xf0] }
 0x580   :  { %v13261_v19 = vor.u32 %v14311_v50, %v13258_v61  ;;  %v14271_v57 = vld [vmem:[#allocation12 + $0x144] sm:$0xf]  ;;  %v12973_v50 = vor.u32 %v14239_v58, %v12970_v49  ;;  %v13056_v36 = vld [vmem:[#allocation12 + $0xe8] sm:$0xf]  ;;  %v13066_v28 = vld [vmem:[#allocation12 + $0x110] sm:$0xf0] }
 0x581   :  { %v14335_v61 = vld [vmem:[#allocation12 + $0x344] sm:$0xf] }
 0x582   :  { %8729 = vmatpush.bf16.msra.mxu0 %v12937_v18  ;;  %8747 = vmatpush.bf16.msrb.mxu1 %v13065_v2  ;;  %v16510_v44 = vpop.f32.mrf.mxu0  ;;  %v16512_v31 = vpop.f32.mrf.mxu1  ;;  %v13386_v18 = vld [vmem:[#allocation12 + $0x390] sm:$0xf0]  ;;  %v14307_v2 = vld [vmem:[#allocation12 + $0x264] sm:$0xf] }
 0x583   :  { %8765 = vmatpush.bf16.msra.mxu2 %v13193_v13  ;;  %8783 = vmatpush.bf16.msra.mxu3 %v13321_v48  ;;  %v13242_v13 = vld [vmem:[#allocation12 + $0x270] sm:$0xf0]  ;;  %v14243_v48 = vld [vmem:[#allocation12 + $0x64] sm:$0xf] }
 0x584   :  { %v13245_v55 = vor.u32 %v14307_v2, %v13242_v13  ;;  %v12989_v46 = vor.u32 %v14243_v48, %v12986_v1  ;;  %v14299_v43 = vld [vmem:[#allocation12 + $0x224] sm:$0xf]  ;;  %v14577_v2 = vpop.eup %14576  ;;  %v13338_v1 = vld [vmem:[#allocation12 + $0x330] sm:$0xf0] }
 0x585   :  { %8730 = vmatmul.bf16.vlgmr.msra.gmra.mxu0 %v16450_v20  ;;  %8748 = vmatmul.bf16.vlgmr.msrb.gmra.mxu1 %v16454_v35  ;;  %v14295_v7 = vld [vmem:[#allocation12 + $0x204] sm:$0xf] }
 0x586   :  { %8794 = vmatpush.bf16.msrb.mxu0 %v13053_v10  ;;  %8766 = vmatmul.bf16.vlgmr.msra.gmra.mxu2 %v16458_v22  ;;  %v13389_v10 = vor.u32 %v14343_v52, %v13386_v18  ;;  %v13082_v52 = vld [vmem:[#allocation12 + $0x130] sm:$0xf0]  ;;  %v14331_v18 = vld [vmem:[#allocation12 + $0x324] sm:$0xf] }
 0x587   :  { %8830 = vmatpush.bf16.msrb.mxu2 %v13309_v25  ;;  %8784 = vmatmul.bf16.vlgmr.msra.gmra.mxu3 %v16462_v12  ;;  %v13133_v25 = vor.u32 %v14279_v11, %v13130_v42  ;;  %v12954_v11 = vld [vmem:[#allocation12 + $0x30] sm:$0xf0]  ;;  %v13341_v49 = vor.u32 %v14331_v18, %v13338_v1  ;;  %v14290_v18 = vld [vmem:[#allocation12 + $0x1d4] sm:$0xf0] }
 0x588   :  { %8812 = vmatpush.bf16.msra.mxu1 %v13181_v26  ;;  %8848 = vmatpush.bf16.msrb.mxu3 %v13437_v27  ;;  %v14303_v26 = vld [vmem:[#allocation12 + $0x244] sm:$0xf]  ;;  %v13226_v27 = vld [vmem:[#allocation12 + $0x250] sm:$0xf0]  ;;  %v14318_v1 = vld [vmem:[#allocation12 + $0x2b4] sm:$0xf0] }
 0x589   :  { %v13229_v39 = vor.u32 %v14303_v26, %v13226_v27  ;;  %v14262_v26 = vld [vmem:[#allocation12 + $0xf4] sm:$0xf0]  ;;  %v16531_v27 = vadd.f32 1.0, %v14577_v2  ;;  %v13424_v2 = vld [vmem:[#allocation12 + $0x3c8] sm:$0xf] }
 0x58a   :  { %8795 = vmatpush.bf16.msrb.mxu0 %v13037_v16  ;;  %v14665_v16 = vld [vmem:[#allocation2 + $0xa0] sm:$0xff]  ;;  %v7741_v47 = vpop.f32.mrf.mxu0 }
 0x58b   :  { %8831 = vmatpush.bf16.msrb.mxu2 %v13293_v53  ;;  %v16515_v53 = vpop.f32.mrf.mxu2  ;;  %v16517_v6 = vpop.f32.mrf.mxu3  ;;  %v16519_v15 = vpack.c.bf16 %v14665_v16, %v14665_v16  ;;  %v14263_v16 = vld [vmem:[#allocation12 + $0x104] sm:$0xf]  ;;  %14578 = vrcp.f32 %v16531_v27  ;;  %vm9306_vm6 = vweird.f32 %v16531_v27 }
 0x58c   :  { %8813 = vmatpush.bf16.msra.mxu1 %v13165_v9  ;;  %8849 = vmatpush.bf16.msrb.mxu3 %v13421_v3  ;;  %v7754_v9 = vpop.f32.mrf.mxu1  ;;  %v13117_v3 = vor.u32 %v14275_v33, %v13114_v5  ;;  %v12938_v33 = vld [vmem:[#allocation12 + $0x10] sm:$0xf0]  ;;  %v13312_v5 = vld [vmem:[#allocation12 + $0x2e8] sm:$0xf] }
 0x58d   :  { %v14327_v9 = vld [vmem:[#allocation12 + $0x304] sm:$0xf] }
 0x58e   :  { %8796 = vmatpush.bf16.msrb.mxu0 %v13021_v54  ;;  %v14668_v54 = vld [vmem:[#allocation2 + $0xb8] sm:$0xff] }
 0x58f   :  { %8832 = vmatpush.bf16.msrb.mxu2 %v13277_v45  ;;  %v13098_v45 = vld [vmem:[#allocation12 + $0x150] sm:$0xf0]  ;;  %v16525_v40 = vpack.c.bf16 %v14668_v54, %v14668_v54  ;;  %v14294_v54 = vld [vmem:[#allocation12 + $0x1f4] sm:$0xf0] }
 0x590   :  { %8814 = vmatpush.bf16.msra.mxu1 %v13149_v23  ;;  %8850 = vmatpush.bf16.msrb.mxu3 %v13405_v8  ;;  %v13210_v23 = vld [vmem:[#allocation12 + $0x230] sm:$0xf0]  ;;  %v14235_v8 = vld [vmem:[#allocation12 + $0x24] sm:$0xf]  ;;  %v13101_v42 = vor.u32 %v14271_v57, %v13098_v45  ;;  %v13313_v57 = vor.u32 %v14326_v4, %v13312_v5  ;;  %v13057_v45 = vor.u32 %v14262_v26, %v13056_v36  ;;  %v13024_v5 = vld [vmem:[#allocation12 + $0xa8] sm:$0xf] }
 0x591   :  { %v13213_v13 = vor.u32 %v14299_v43, %v13210_v23  ;;  %v12957_v48 = vor.u32 %v14235_v8, %v12954_v11  ;;  %v13069_v43 = vor.u32 %v14263_v16, %v13066_v28  ;;  %v14286_v36 = vld [vmem:[#allocation12 + $0x1b4] sm:$0xf0]  ;;  %v13408_v26 = vld [vmem:[#allocation12 + $0x3a8] sm:$0xf]  ;;  %v16538_v16 = vpop.eup %14578 }
 0x592   :  { %8797 = vmatpush.bf16.msrb.mxu0 %v13005_v0  ;;  %v14267_v0 = vld [vmem:[#allocation12 + $0x124] sm:$0xf]  ;;  %vm9307_vm4 = vweird.f32 %v16538_v16 }
 0x593   :  { %8833 = vmatpush.bf16.msrb.mxu2 %v13261_v19  ;;  %v13357_v19 = vor.u32 %v14335_v61, %v13354_v21  ;;  %v13085_v58 = vor.u32 %v14267_v0, %v13082_v52  ;;  %v13296_v61 = vld [vmem:[#allocation12 + $0x2c8] sm:$0xf]  ;;  %v14322_v21 = vld [vmem:[#allocation12 + $0x2d4] sm:$0xf0]  ;;  %vm16553_vm7 = vmor %vm9306_vm6, %vm9307_vm4 }
 0x594   :  { %8815 = vmatpush.bf16.msra.mxu1 %v13133_v25  ;;  %8851 = vmatpush.bf16.msrb.mxu3 %v13389_v10  ;;  %v13194_v25 = vld [vmem:[#allocation12 + $0x210] sm:$0xf0]  ;;  %v14231_v10 = vld [vmem:[#allocation12 + $0x4] sm:$0xf]  ;;  %v13168_v0 = vld [vmem:[#allocation12 + $0x1c8] sm:$0xf]  ;;  %v13297_v52 = vor.u32 %v14322_v21, %v13296_v61  ;;  %v9302_v21 = vmul.f32 %v16538_v16, %v16531_v27 }
 0x595   :  { %8735 = vmatmul.bf16.gmra.mxu0 %v16519_v15  ;;  %8753 = vmatmul.bf16.gmra.mxu1 %v16521_v32  ;;  %v13197_v30 = vor.u32 %v14295_v7, %v13194_v25  ;;  %v12941_v47 = vor.u32 %v14231_v10, %v12938_v33  ;;  %v13460_v7 = vmul.f32 -1.442695, %v16496_v38  ;;  %v13169_v10 = vor.u32 %v14290_v18, %v13168_v0  ;;  %v13264_v38 = vld [vmem:[#allocation12 + $0x288] sm:$0xf]  ;;  %v14346_v61 = vld [vmem:[#allocation12 + $0x394] sm:$0xf0] }
 0x596   :  { %8798 = vmatpush.bf16.msrb.mxu0 %v12989_v46  ;;  %8771 = vmatmul.bf16.gmra.mxu2 %v16523_v62  ;;  %v7780_v46 = vpop.f32.mrf.mxu3  ;;  %v14246_v0 = vld [vmem:[#allocation12 + $0x74] sm:$0xf0] }
 0x597   :  { %8834 = vmatpush.bf16.msrb.mxu2 %v13245_v55  ;;  %8789 = vmatmul.bf16.gmra.mxu3 %v16525_v40  ;;  %v7767_v55 = vpop.f32.mrf.mxu2  ;;  %v13152_v46 = vld [vmem:[#allocation12 + $0x1a8] sm:$0xf]  ;;  %14580 = vpow2.f32 %v13460_v7 }
 0x598   :  { %8816 = vmatpush.bf16.msra.mxu1 %v13117_v3  ;;  %8852 = vmatpush.bf16.msrb.mxu3 %v13373_v14  ;;  %v13322_v3 = vld [vmem:[#allocation12 + $0x310] sm:$0xf0]  ;;  %v13184_v14 = vld [vmem:[#allocation12 + $0x1e8] sm:$0xf]  ;;  %v14254_v55 = vld [vmem:[#allocation12 + $0xb4] sm:$0xf0] }
 0x599   :  { %v13325_v23 = vor.u32 %v14327_v9, %v13322_v3  ;;  %v13185_v8 = vor.u32 %v14294_v54, %v13184_v14  ;;  %v13025_v28 = vor.u32 %v14254_v55, %v13024_v5  ;;  %v13008_v9 = vld [vmem:[#allocation12 + $0x88] sm:$0xf]  ;;  %v14250_v3 = vld [vmem:[#allocation12 + $0x94] sm:$0xf0]  ;;  %v9312_v5 = vand.u32 2147483648, %v16531_v27 }
 0x59a   :  { %8799 = vmatpush.bf16.msrb.mxu0 %v12973_v50  ;;  %v14358_v50 = vld [vmem:[#allocation12 + $0x3f4] sm:$0xf0]  ;;  %v13136_v14 = vld [vmem:[#allocation12 + $0x188] sm:$0xf] }
 0x59b   :  { %8835 = vmatpush.bf16.msrb.mxu2 %v13229_v39  ;;  %v13440_v39 = vld [vmem:[#allocation12 + $0x3e8] sm:$0xf] }
 0x59c   :  { %8817 = vmatpush.bf16.msra.mxu1 %v13101_v42  ;;  %8853 = vmatpush.bf16.msrb.mxu3 %v13357_v19  ;;  %v13441_v11 = vor.u32 %v14358_v50, %v13440_v39  ;;  %v13040_v42 = vld [vmem:[#allocation12 + $0xc8] sm:$0xf]  ;;  %v14258_v19 = vld [vmem:[#allocation12 + $0xd4] sm:$0xf0] }
 0x59d   :  { %v13041_v25 = vor.u32 %v14258_v19, %v13040_v42  ;;  %v14282_v39 = vld [vmem:[#allocation12 + $0x194] sm:$0xf0]  ;;  %v13392_v50 = vld [vmem:[#allocation12 + $0x388] sm:$0xf] }
 0x59e   :  { %8800 = vmatpush.bf16.msrb.mxu0 %v12957_v48  ;;  %v13280_v48 = vld [vmem:[#allocation12 + $0x2a8] sm:$0xf]  ;;  %v13393_v42 = vor.u32 %v14346_v61, %v13392_v50 }
 0x59f   :  { %8836 = vmatpush.bf16.msrb.mxu2 %v13213_v13  ;;  %v14354_v13 = vld [vmem:[#allocation12 + $0x3d4] sm:$0xf0]  ;;  %v13281_v4 = vor.u32 %v14318_v1, %v13280_v48  ;;  %v12992_v19 = vld [vmem:[#allocation12 + $0x68] sm:$0xf]  ;;  %v9303_v1 = vsub.f32 1.0, %v9302_v21 }
 0x5a0   :  { %8818 = vmatpush.bf16.msra.mxu1 %v13085_v58  ;;  %8854 = vmatpush.bf16.msrb.mxu3 %v13341_v49  ;;  %v13425_v33 = vor.u32 %v14354_v13, %v13424_v2  ;;  %v14350_v58 = vld [vmem:[#allocation12 + $0x3b4] sm:$0xf0]  ;;  %v13376_v13 = vld [vmem:[#allocation12 + $0x368] sm:$0xf]  ;;  %v12993_v55 = vor.u32 %v14246_v0, %v12992_v19 }
 0x5a1   :  { %v14314_v49 = vld [vmem:[#allocation12 + $0x294] sm:$0xf0]  ;;  %v13232_v7 = vld [vmem:[#allocation12 + $0x248] sm:$0xf]  ;;  %v9304_v50 = vmul.f32 %v16538_v16, %v9303_v1 }
 0x5a2   :  { %8801 = vmatpush.bf16.msrb.mxu0 %v12941_v47  ;;  %v13409_v47 = vor.u32 %v14350_v58, %v13408_v26  ;;  %v13265_v54 = vor.u32 %v14314_v49, %v13264_v38  ;;  %v14278_v2 = vld [vmem:[#allocation12 + $0x174] sm:$0xf0]  ;;  %v12976_v58 = vld [vmem:[#allocation12 + $0x48] sm:$0xf] }
 0x5a3   :  { %8837 = vmatpush.bf16.msrb.mxu2 %v13197_v30  ;;  %v13153_v30 = vor.u32 %v14286_v36, %v13152_v46  ;;  %v14342_v48 = vld [vmem:[#allocation12 + $0x374] sm:$0xf0]  ;;  %v13104_v49 = vld [vmem:[#allocation12 + $0x148] sm:$0xf] }
 0x5a4   :  { %8819 = vmatpush.bf16.msra.mxu1 %v13069_v43  ;;  %8855 = vmatpush.bf16.msrb.mxu3 %v13325_v23  ;;  %v13248_v43 = vld [vmem:[#allocation12 + $0x268] sm:$0xf]  ;;  %v14310_v23 = vld [vmem:[#allocation12 + $0x274] sm:$0xf0]  ;;  %v13377_v26 = vor.u32 %v14342_v48, %v13376_v13 }
 0x5a5   :  { %8802 = vmatmul.bf16.vlgmr.msrb.gmra.mxu0 %v16450_v20  ;;  %v13249_v18 = vor.u32 %v14310_v23, %v13248_v43  ;;  %v14242_v38 = vld [vmem:[#allocation12 + $0x54] sm:$0xf0]  ;;  %v13216_v61 = vld [vmem:[#allocation12 + $0x228] sm:$0xf] }
 0x5a6   :  { %8866 = vmatpush.bf16.msra.mxu0 %v13057_v45  ;;  %8838 = vmatmul.bf16.vlgmr.msrb.gmra.mxu2 %v16458_v22  ;;  %v7804_v45 = vpop.f32.mrf.mxu1  ;;  %v14302_v21 = vld [vmem:[#allocation12 + $0x234] sm:$0xf0]  ;;  %v12960_v0 = vld [vmem:[#allocation12 + $0x28] sm:$0xf] }
 0x5a7   :  { %8902 = vmatpush.bf16.msra.mxu2 %v13313_v57  ;;  %8820 = vmatmul.bf16.vlgmr.msra.gmra.mxu1 %v16454_v35  ;;  %v7791_v57 = vpop.f32.mrf.mxu0  ;;  %v13217_v13 = vor.u32 %v14302_v21, %v13216_v61  ;;  %v14270_v48 = vld [vmem:[#allocation12 + $0x134] sm:$0xf0]  ;;  %v13344_v1 = vld [vmem:[#allocation12 + $0x328] sm:$0xf]  ;;  %v14356_v61 = vld [vmem:[#allocation12 + $0x3ec] sm:$0xf] }
 0x5a8   :  { %8884 = vmatpush.bf16.msrb.mxu1 %v13185_v8  ;;  %8920 = vmatpush.bf16.msra.mxu3 %v13441_v11  ;;  %v13009_v8 = vor.u32 %v14250_v3, %v13008_v9  ;;  %v13137_v11 = vor.u32 %v14282_v39, %v13136_v14  ;;  %v14274_v3 = vld [vmem:[#allocation12 + $0x154] sm:$0xf0]  ;;  %v13360_v14 = vld [vmem:[#allocation12 + $0x348] sm:$0xf] }
 0x5a9   :  { %8856 = vmatmul.bf16.vlgmr.msrb.gmra.mxu3 %v16462_v12 }
 0x5aa   :  { %8867 = vmatpush.bf16.msra.mxu0 %v13041_v25  ;;  %v14306_v25 = vld [vmem:[#allocation12 + $0x254] sm:$0xf0] }
 0x5ab   :  { %8903 = vmatpush.bf16.msra.mxu2 %v13297_v52  ;;  %v13120_v52 = vld [vmem:[#allocation12 + $0x168] sm:$0xf]  ;;  %v7817_v46 = vpop.f32.mrf.mxu2  ;;  %v13233_v9 = vor.u32 %v14306_v25, %v13232_v7  ;;  %v14334_v7 = vld [vmem:[#allocation12 + $0x334] sm:$0xf0] }
 0x5ac   :  { %8885 = vmatpush.bf16.msrb.mxu1 %v13169_v10  ;;  %8921 = vmatpush.bf16.msra.mxu3 %v13425_v33  ;;  %v14581_v10 = vpop.eup %14580  ;;  %v7805_v33 = vadd.f32 %v7804_v45, %v7791_v57  ;;  %v13121_v36 = vor.u32 %v14278_v2, %v13120_v52  ;;  %v14338_v57 = vld [vmem:[#allocation12 + $0x354] sm:$0xf0]  ;;  %v17078_v45 = vld [vmem:[#allocation32_spill] sm:$0xff]  ;;  %v13200_v25 = vld [vmem:[#allocation12 + $0x208] sm:$0xf] }
 0x5ad   :  { %v16547_v39 = vadd.f32 1.0, %v14581_v10  ;;  %v13361_v19 = vor.u32 %v14338_v57, %v13360_v14  ;;  %v14238_v52 = vld [vmem:[#allocation12 + $0x34] sm:$0xf0]  ;;  %v13058_v14 = vld [vmem:[#allocation12 + $0xf8] sm:$0xf0] }
 0x5ae   :  { %8868 = vmatpush.bf16.msra.mxu0 %v13025_v28  ;;  %v7818_v28 = vadd.f32 %v7817_v46, %v7805_v33  ;;  %v14298_v10 = vld [vmem:[#allocation12 + $0x214] sm:$0xf0]  ;;  %v12944_v33 = vld [vmem:[#allocation12 + $0x8] sm:$0xf]  ;;  %v14324_v46 = vld [vmem:[#allocation12 + $0x2ec] sm:$0xf] }
 0x5af   :  { %8904 = vmatpush.bf16.msra.mxu2 %v13281_v4  ;;  %v7830_v4 = vpop.f32.mrf.mxu3  ;;  %vm9321_vm2 = vweird.f32 %v16547_v39 }
 0x5b0   :  { %8886 = vmatpush.bf16.msrb.mxu1 %v13153_v30  ;;  %8922 = vmatpush.bf16.msra.mxu3 %v13409_v47  ;;  %v7793_v30 = vpop.f32.mrf.mxu0  ;;  %v7806_v47 = vpop.f32.mrf.mxu1  ;;  %v7831_v43 = vadd.f32 %v7830_v4, %v7818_v28  ;;  %v13314_v4 = vld [vmem:[#allocation12 + $0x2f8] sm:$0xf0]  ;;  %v14266_v28 = vld [vmem:[#allocation12 + $0x114] sm:$0xf0] }
 0x5b1   :  { %v13328_v30 = vld [vmem:[#allocation12 + $0x308] sm:$0xf]  ;;  %v13201_v47 = vor.u32 %v14298_v10, %v13200_v25  ;;  %v14352_v25 = vld [vmem:[#allocation12 + $0x3cc] sm:$0xf]  ;;  %v13426_v10 = vld [vmem:[#allocation12 + $0x3d8] sm:$0xf0] }
 0x5b2   :  { %8869 = vmatpush.bf16.msra.mxu0 %v13009_v8  ;;  %v9310_v8 = vand.u32 2147483647, %v16531_v27  ;;  %v9305_v27 = vadd.f32 %v16538_v16, %v9304_v50  ;;  %v13186_v50 = vld [vmem:[#allocation12 + $0x1f8] sm:$0xf0] }
 0x5b3   :  { %8905 = vmatpush.bf16.msra.mxu2 %v13265_v54  ;;  %v665_v54 = vadd.f32 %v17078_v45, %v15405_v17  ;;  %v12977_v17 = vor.u32 %v14242_v38, %v12976_v58  ;;  %v13345_v38 = vor.u32 %v14334_v7, %v13344_v1  ;;  %v13317_v45 = vor.u32 %v14324_v46, %v13314_v4  ;;  %v14288_v1 = vld [vmem:[#allocation12 + $0x1cc] sm:$0xf]  ;;  %v13170_v7 = vld [vmem:[#allocation12 + $0x1d8] sm:$0xf0] }
 0x5b4   :  { %8887 = vmatpush.bf16.msrb.mxu1 %v13137_v11  ;;  %8923 = vmatpush.bf16.msra.mxu3 %v13393_v42  ;;  %v9313_v11 = vor.u32 1.1754944e-38, %v9312_v5  ;;  %v13105_v42 = vor.u32 %v14274_v3, %v13104_v49  ;;  %v12961_v5 = vor.u32 %v14238_v52, %v12960_v0  ;;  %v13072_v49 = vld [vmem:[#allocation12 + $0x108] sm:$0xf]  ;;  %v14260_v3 = vld [vmem:[#allocation12 + $0xec] sm:$0xf]  ;;  %v9309_v57 = vsel %vm16553_vm7, %v16538_v16, %v9305_v27 }
 0x5b5   :  { %v7943_v2 = vadd.f32 %v7831_v43, %v665_v54  ;;  %8807 = vmatmul.bf16.gmra.mxu0 %v16519_v15  ;;  %v14292_v54 = vld [vmem:[#allocation12 + $0x1ec] sm:$0xf]  ;;  %v13442_v43 = vld [vmem:[#allocation12 + $0x3f8] sm:$0xf0]  ;;  %vm9311_vm8 = vcmp.eq.f32.partialorder %v9310_v8, 8.507059e+37 }
 0x5b6   :  { %8870 = vmatpush.bf16.msra.mxu0 %v12993_v55  ;;  %8843 = vmatmul.bf16.gmra.mxu2 %v16523_v62  ;;  %v14234_v55 = vld [vmem:[#allocation12 + $0x14] sm:$0xf0]  ;;  %v13189_v23 = vor.u32 %v14292_v54, %v13186_v50  ;;  %v14256_v8 = vld [vmem:[#allocation12 + $0xcc] sm:$0xf]  ;;  %v13042_v27 = vld [vmem:[#allocation12 + $0xd8] sm:$0xf0] }
 0x5b7   :  { %8906 = vmatpush.bf16.msra.mxu2 %v13249_v18  ;;  %v13088_v18 = vld [vmem:[#allocation12 + $0x128] sm:$0xf]  ;;  %8825 = vmatmul.bf16.gmra.mxu1 %v16521_v32  ;;  %14582 = vtanh.f32 %v7943_v2  ;;  %v12945_v21 = vor.u32 %v14234_v55, %v12944_v33  ;;  %v13061_v2 = vor.u32 %v14260_v3, %v13058_v14  ;;  %v14316_v33 = vld [vmem:[#allocation12 + $0x2ac] sm:$0xf]  ;;  %v13154_v46 = vld [vmem:[#allocation12 + $0x1b8] sm:$0xf0]  ;;  %v13045_v4 = vor.u32 %v14256_v8, %v13042_v27 }
 0x5b8   :  { %8888 = vmatpush.bf16.msrb.mxu1 %v13121_v36  ;;  %8924 = vmatpush.bf16.msra.mxu3 %v13377_v26  ;;  %v7819_v36 = vpop.f32.mrf.mxu2  ;;  %v7832_v26 = vpop.f32.mrf.mxu3  ;;  %v13089_v58 = vor.u32 %v14270_v48, %v13088_v18  ;;  %v9314_v18 = vsel %vm9311_vm8, %v9313_v11, %v9309_v57  ;;  %14584 = vrcp.f32 %v16547_v39  ;;  %v13173_v11 = vor.u32 %v14288_v1, %v13170_v7  ;;  %v14284_v55 = vld [vmem:[#allocation12 + $0x1ac] sm:$0xf]  ;;  %v13266_v3 = vld [vmem:[#allocation12 + $0x298] sm:$0xf0] }
 0x5b9   :  { %8861 = vmatmul.bf16.gmra.mxu3 %v16525_v40  ;;  %v13429_v26 = vor.u32 %v14352_v25, %v13426_v10  ;;  %v14280_v14 = vld [vmem:[#allocation12 + $0x18c] sm:$0xf]  ;;  %v13138_v57 = vld [vmem:[#allocation12 + $0x198] sm:$0xf0]  ;;  %v13461_v7 = vmul.f32 -1.442695, %v16504_v41 }
 0x5ba   :  { %8871 = vmatpush.bf16.msra.mxu0 %v12977_v17  ;;  %v14320_v17 = vld [vmem:[#allocation12 + $0x2cc] sm:$0xf]  ;;  %v12994_v10 = vld [vmem:[#allocation12 + $0x78] sm:$0xf0] }
 0x5bb   :  { %8907 = vmatpush.bf16.msra.mxu2 %v13233_v9  ;;  %v14330_v9 = vld [vmem:[#allocation12 + $0x314] sm:$0xf0]  ;;  %14586 = vpow2.f32 %v13461_v7  ;;  %v12962_v7 = vld [vmem:[#allocation12 + $0x38] sm:$0xf0] }
 0x5bc   :  { %8889 = vmatpush.bf16.msrb.mxu1 %v13105_v42  ;;  %8925 = vmatpush.bf16.msra.mxu3 %v13361_v19  ;;  %v13298_v42 = vld [vmem:[#allocation12 + $0x2d8] sm:$0xf0]  ;;  %v13073_v19 = vor.u32 %v14266_v28, %v13072_v49  ;;  %v13329_v0 = vor.u32 %v14330_v9, %v13328_v30  ;;  %v14348_v28 = vld [vmem:[#allocation12 + $0x3ac] sm:$0xf]  ;;  %v13157_v30 = vor.u32 %v14284_v55, %v13154_v46 }
 0x5bd   :  { %v14583_v52 = vpop.eup %14582  ;;  %v13301_v48 = vor.u32 %v14320_v17, %v13298_v42  ;;  %v13026_v49 = vld [vmem:[#allocation12 + $0xb8] sm:$0xf0]  ;;  %v14312_v9 = vld [vmem:[#allocation12 + $0x28c] sm:$0xf] }
 0x5be   :  { %8872 = vmatpush.bf16.msra.mxu0 %v12961_v5  ;;  %v16567_v16 = vmul.f32 %v14583_v52, %v9314_v18  ;;  %v13282_v5 = vld [vmem:[#allocation12 + $0x2b8] sm:$0xf0]  ;;  %v16569_v36 = vpop.eup %14584  ;;  %v13269_v17 = vor.u32 %v14312_v9, %v13266_v3  ;;  %v14248_v42 = vld [vmem:[#allocation12 + $0x8c] sm:$0xf]  ;;  %v13141_v52 = vor.u32 %v14280_v14, %v13138_v57 }
 0x5bf   :  { %8908 = vmatpush.bf16.msra.mxu2 %v13217_v13  ;;  %v13445_v13 = vor.u32 %v14356_v61, %v13442_v43  ;;  %v13394_v18 = vld [vmem:[#allocation12 + $0x398] sm:$0xf0]  ;;  %v14304_v46 = vld [vmem:[#allocation12 + $0x24c] sm:$0xf]  ;;  %vm9322_vm1 = vweird.f32 %v16569_v36 }
 0x5c0   :  { %8890 = vmatpush.bf16.msrb.mxu1 %v13089_v58  ;;  %8926 = vmatpush.bf16.msra.mxu3 %v13345_v38  ;;  %v13285_v58 = vor.u32 %v14316_v33, %v13282_v5  ;;  %v14252_v38 = vld [vmem:[#allocation12 + $0xac] sm:$0xf]  ;;  %v13378_v55 = vld [vmem:[#allocation12 + $0x378] sm:$0xf0]  ;;  %vm16591_vm3 = vmor %vm9321_vm2, %vm9322_vm1 }
 0x5c1   :  { %v13029_v61 = vor.u32 %v14252_v38, %v13026_v49  ;;  %v14340_v33 = vld [vmem:[#allocation12 + $0x36c] sm:$0xf]  ;;  %v13106_v49 = vld [vmem:[#allocation12 + $0x158] sm:$0xf0] }
 0x5c2   :  { %8873 = vmatpush.bf16.msra.mxu0 %v12945_v21  ;;  %v7843_v54 = vpop.f32.mrf.mxu0  ;;  %v7856_v50 = vpop.f32.mrf.mxu1  ;;  %v14272_v38 = vld [vmem:[#allocation12 + $0x14c] sm:$0xf]  ;;  %v13381_v3 = vor.u32 %v14340_v33, %v13378_v55 }
 0x5c3   :  { %8909 = vmatpush.bf16.msra.mxu2 %v13201_v47  ;;  %v13410_v47 = vld [vmem:[#allocation12 + $0x3b8] sm:$0xf0]  ;;  %v7857_v21 = vadd.f32 %v7856_v50, %v7843_v54  ;;  %v14240_v57 = vld [vmem:[#allocation12 + $0x4c] sm:$0xf]  ;;  %v14587_v33 = vpop.eup %14586 }
 0x5c4   :  { %8891 = vmatpush.bf16.msrb.mxu1 %v13073_v19  ;;  %8927 = vmatpush.bf16.msra.mxu3 %v13329_v0  ;;  %v13413_v43 = vor.u32 %v14348_v28, %v13410_v47  ;;  %v13010_v19 = vld [vmem:[#allocation12 + $0x98] sm:$0xf0]  ;;  %v14344_v0 = vld [vmem:[#allocation12 + $0x38c] sm:$0xf] }
 0x5c5   :  { %8874 = vmatmul.bf16.vlgmr.msra.gmra.mxu0 %v16450_v20  ;;  %v13013_v8 = vor.u32 %v14248_v42, %v13010_v19  ;;  %v13397_v27 = vor.u32 %v14344_v0, %v13394_v18  ;;  %v14336_v54 = vld [vmem:[#allocation12 + $0x34c] sm:$0xf]  ;;  %v13218_v19 = vld [vmem:[#allocation12 + $0x238] sm:$0xf0] }
 0x5c6   :  { %8938 = vmatpush.bf16.msrb.mxu0 %v13061_v2  ;;  %8910 = vmatmul.bf16.vlgmr.msra.gmra.mxu2 %v16458_v22  ;;  %v14308_v2 = vld [vmem:[#allocation12 + $0x26c] sm:$0xf] }
 0x5c7   :  { %8974 = vmatpush.bf16.msrb.mxu2 %v13317_v45  ;;  %8892 = vmatmul.bf16.vlgmr.msrb.gmra.mxu1 %v16454_v35  ;;  %v9317_v45 = vmul.f32 %v16569_v36, %v16547_v39  ;;  %v17081_v50 = vld [vmem:[#allocation33_spill] sm:$0xff] }
 0x5c8   :  { %8956 = vmatpush.bf16.msra.mxu1 %v13189_v23  ;;  %8992 = vmatpush.bf16.msrb.mxu3 %v13445_v13  ;;  %v13250_v23 = vld [vmem:[#allocation12 + $0x278] sm:$0xf0]  ;;  %v14276_v13 = vld [vmem:[#allocation12 + $0x16c] sm:$0xf] }
 0x5c9   :  { %8928 = vmatmul.bf16.vlgmr.msra.gmra.mxu3 %v16462_v12  ;;  %v9318_v1 = vsub.f32 1.0, %v9317_v45  ;;  %v13253_v25 = vor.u32 %v14308_v2, %v13250_v23  ;;  %v12978_v45 = vld [vmem:[#allocation12 + $0x58] sm:$0xf0]  ;;  %v14300_v42 = vld [vmem:[#allocation12 + $0x22c] sm:$0xf]  ;;  %v9327_v2 = vand.u32 2147483648, %v16547_v39 }
 0x5ca   :  { %8939 = vmatpush.bf16.msrb.mxu0 %v13045_v4  ;;  %v13234_v4 = vld [vmem:[#allocation12 + $0x258] sm:$0xf0]  ;;  %v7845_v41 = vpop.f32.mrf.mxu0  ;;  %v14268_v0 = vld [vmem:[#allocation12 + $0x12c] sm:$0xf]  ;;  %v12981_v23 = vor.u32 %v14240_v57, %v12978_v45 }
 0x5cb   :  { %8975 = vmatpush.bf16.msrb.mxu2 %v13301_v48  ;;  %v13122_v48 = vld [vmem:[#allocation12 + $0x178] sm:$0xf0]  ;;  %v9319_v9 = vmul.f32 %v16569_v36, %v9318_v1  ;;  %v13237_v14 = vor.u32 %v14304_v46, %v13234_v4  ;;  %v14236_v1 = vld [vmem:[#allocation12 + $0x2c] sm:$0xf] }
 0x5cc   :  { %8957 = vmatpush.bf16.msra.mxu1 %v13173_v11  ;;  %8993 = vmatpush.bf16.msrb.mxu3 %v13429_v26  ;;  %v14244_v11 = vld [vmem:[#allocation12 + $0x6c] sm:$0xf]  ;;  %v13125_v5 = vor.u32 %v14276_v13, %v13122_v48  ;;  %v7869_v26 = vpop.f32.mrf.mxu2  ;;  %v13221_v48 = vor.u32 %v14300_v42, %v13218_v19  ;;  %v13330_v57 = vld [vmem:[#allocation12 + $0x318] sm:$0xf0] }
 0x5cd   :  { %v7870_v28 = vadd.f32 %v7869_v26, %v7857_v21  ;;  %v12997_v47 = vor.u32 %v14244_v11, %v12994_v10  ;;  %v13109_v21 = vor.u32 %v14272_v38, %v13106_v49  ;;  %v9320_v13 = vadd.f32 %v16569_v36, %v9319_v9  ;;  %v14296_v11 = vld [vmem:[#allocation12 + $0x20c] sm:$0xf]  ;;  %v13202_v10 = vld [vmem:[#allocation12 + $0x218] sm:$0xf0] }
 0x5ce   :  { %8940 = vmatpush.bf16.msrb.mxu0 %v13029_v61  ;;  %v694_v61 = vadd.f32 %v17081_v50, %v15298_v63  ;;  %v14264_v4 = vld [vmem:[#allocation12 + $0x10c] sm:$0xf]  ;;  %v13074_v26 = vld [vmem:[#allocation12 + $0x118] sm:$0xf0]  ;;  %v12965_v38 = vor.u32 %v14236_v1, %v12962_v7  ;;  %v9328_v9 = vor.u32 1.1754944e-38, %v9327_v2 }
 0x5cf   :  { %8976 = vmatpush.bf16.msrb.mxu2 %v13285_v58  ;;  %v7882_v58 = vpop.f32.mrf.mxu3  ;;  %v14232_v41 = vld [vmem:[#allocation12 + $0xc] sm:$0xf] }
 0x5d0   :  { %8958 = vmatpush.bf16.msra.mxu1 %v13157_v30  ;;  %8994 = vmatpush.bf16.msrb.mxu3 %v13413_v43  ;;  %v7858_v30 = vpop.f32.mrf.mxu1  ;;  %v7883_v43 = vadd.f32 %v7882_v58, %v7870_v28  ;;  %v13205_v28 = vor.u32 %v14296_v11, %v13202_v10 }
 0x5d1   :  { %v12946_v30 = vld [vmem:[#allocation12 + $0x18] sm:$0xf0] }
 0x5d2   :  { %8941 = vmatpush.bf16.msrb.mxu0 %v13013_v8  ;;  %v7944_v18 = vadd.f32 %v7883_v43, %v694_v61  ;;  %v14332_v8 = vld [vmem:[#allocation12 + $0x32c] sm:$0xf]  ;;  %v12949_v50 = vor.u32 %v14232_v41, %v12946_v30 }
 0x5d3   :  { %8977 = vmatpush.bf16.msrb.mxu2 %v13269_v17  ;;  %v13362_v17 = vld [vmem:[#allocation12 + $0x358] sm:$0xf0] }
 0x5d4   :  { %8959 = vmatpush.bf16.msra.mxu1 %v13141_v52  ;;  %8995 = vmatpush.bf16.msrb.mxu3 %v13397_v27  ;;  %v13090_v52 = vld [vmem:[#allocation12 + $0x138] sm:$0xf0]  ;;  %v13365_v63 = vor.u32 %v14336_v54, %v13362_v17  ;;  %14588 = vtanh.f32 %v7944_v18  ;;  %v7871_v55 = vpop.f32.mrf.mxu2 }
 0x5d5   :  { %8879 = vmatmul.bf16.gmra.mxu0 %v16519_v15  ;;  %v13093_v27 = vor.u32 %v14268_v0, %v13090_v52 }
 0x5d6   :  { %8942 = vmatpush.bf16.msrb.mxu0 %v12997_v47  ;;  %8915 = vmatmul.bf16.gmra.mxu2 %v16523_v62  ;;  %v9285_v47 = vadd.f32 1.0, %v14587_v33 }
 0x5d7   :  { %8978 = vmatpush.bf16.msrb.mxu2 %v13253_v25  ;;  %v13346_v25 = vld [vmem:[#allocation12 + $0x338] sm:$0xf0]  ;;  %8897 = vmatmul.bf16.gmra.mxu1 %v16521_v32  ;;  %v7884_v46 = vpop.f32.mrf.mxu3 }
 0x5d8   :  { %8960 = vmatpush.bf16.msra.mxu1 %v13125_v5  ;;  %8996 = vmatpush.bf16.msrb.mxu3 %v13381_v3  ;;  %v9325_v5 = vand.u32 2147483647, %v16547_v39  ;;  %v9324_v39 = vsel %vm16591_vm3, %v16569_v36, %v9320_v13  ;;  %v13349_v49 = vor.u32 %v14332_v8, %v13346_v25  ;;  %v13077_v3 = vor.u32 %v14264_v4, %v13074_v26 }
 0x5d9   :  { %8933 = vmatmul.bf16.gmra.mxu3 %v16525_v40  ;;  %14590 = vrcp.f32 %v9285_v47  ;;  %vm9336_vm9 = vweird.f32 %v9285_v47 }
 0x5da   :  { %8943 = vmatpush.bf16.msrb.mxu0 %v12981_v23  ;;  %vm9326_vm5 = vcmp.eq.f32.partialorder %v9325_v5, 8.507059e+37  ;;  %v14589_v45 = vpop.eup %14588 }
 0x5db   :  { %8979 = vmatpush.bf16.msrb.mxu2 %v13237_v14  ;;  %v14328_v14 = vld [vmem:[#allocation12 + $0x30c] sm:$0xf]  ;;  %v9329_v54 = vsel %vm9326_vm5, %v9328_v9, %v9324_v39 }
 0x5dc   :  { %8961 = vmatpush.bf16.msra.mxu1 %v13109_v21  ;;  %8997 = vmatpush.bf16.msrb.mxu3 %v13365_v63  ;;  %v16599_v61 = vmul.f32 %v14589_v45, %v9329_v54  ;;  %v13333_v36 = vor.u32 %v14328_v14, %v13330_v57  ;;  %v9396_v57 = vld [vmem:[#allocation13 + $0x70] sm:$0xff] }
 0x5de   :  { %8944 = vmatpush.bf16.msrb.mxu0 %v12965_v38 }
 0x5df   :  { %8980 = vmatpush.bf16.msrb.mxu2 %v13221_v48  ;;  %v14591_v43 = vpop.eup %14590  ;;  %v17084_v48 = vld [vmem:[#allocation34_spill] sm:$0xff] }
 0x5e0   :  { %8962 = vmatpush.bf16.msra.mxu1 %v13093_v27  ;;  %8998 = vmatpush.bf16.msrb.mxu3 %v13349_v49  ;;  %v9332_v42 = vmul.f32 %v14591_v43, %v9285_v47  ;;  %v723_v1 = vadd.f32 %v17084_v48, %v15339_v24  ;;  %vm9337_vm0 = vweird.f32 %v14591_v43  ;;  %v9342_v27 = vand.u32 2147483648, %v9285_v47  ;;  %v9397_v49 = vld [vmem:[#allocation13 + $0x78] sm:$0xff] }
 0x5e1   :  { %vm9338_vm10 = vmor %vm9336_vm9, %vm9337_vm0 }
 0x5e2   :  { %8945 = vmatpush.bf16.msrb.mxu0 %v12949_v50  ;;  %v7895_v21 = vpop.f32.mrf.mxu0  ;;  %v7908_v17 = vpop.f32.mrf.mxu1  ;;  %v9333_v0 = vsub.f32 1.0, %v9332_v42  ;;  %v9343_v11 = vor.u32 1.1754944e-38, %v9342_v27  ;;  %v9393_v42 = vld [vmem:[#allocation13 + $0x58] sm:$0xff] }
 0x5e3   :  { %8981 = vmatpush.bf16.msrb.mxu2 %v13205_v28  ;;  %v7909_v19 = vadd.f32 %v7908_v17, %v7895_v21 }
 0x5e4   :  { %8963 = vmatpush.bf16.msra.mxu1 %v13077_v3  ;;  %8999 = vmatpush.bf16.msrb.mxu3 %v13333_v36  ;;  %v9334_v63 = vmul.f32 %v14591_v43, %v9333_v0  ;;  %v9394_v36 = vld [vmem:[#allocation13 + $0x60] sm:$0xff] }
 0x5e5   :  { %8946 = vmatmul.bf16.vlgmr.msrb.gmra.mxu0 %v16450_v20 }
 0x5e6   :  { %8982 = vmatmul.bf16.vlgmr.msrb.gmra.mxu2 %v16458_v22  ;;  %v9335_v8 = vadd.f32 %v14591_v43, %v9334_v63  ;;  %9511 = vmatpush.msra.mxu0 %v9397_v49 }
 0x5e7   :  { %8964 = vmatmul.bf16.vlgmr.msra.gmra.mxu1 %v16454_v35  ;;  %v9340_v35 = vand.u32 2147483647, %v9285_v47 }
 0x5e8   :  { %v9339_v25 = vsel %vm9338_vm10, %v14591_v43, %v9335_v8  ;;  %9512 = vmatpush.msra.mxu0 %v9396_v57 }
 0x5e9   :  { %9000 = vmatmul.bf16.vlgmr.msrb.gmra.mxu3 %v16462_v12  ;;  %vm9341_vm11 = vcmp.eq.f32.partialorder %v9340_v35, 8.507059e+37  ;;  %v9389_v35 = vld [vmem:[#allocation13 + $0x38] sm:$0xff] }
 0x5ea   :  { %v7897_v23 = vpop.f32.mrf.mxu0  ;;  %v7910_v13 = vpop.f32.mrf.mxu1  ;;  %v9344_v10 = vsel %vm9341_vm11, %v9343_v11, %v9339_v25 }
 0x5eb   :  { %v7921_v52 = vpop.f32.mrf.mxu2  ;;  %v7934_v18 = vpop.f32.mrf.mxu3  ;;  %v9392_v23 = vld [vmem:[#allocation13 + $0x50] sm:$0xff] }
 0x5ec   :  { %v7922_v2 = vadd.f32 %v7921_v52, %v7909_v19 }
 0x5ee   :  { %v7935_v7 = vadd.f32 %v7934_v18, %v7922_v2 }
 0x5f0   :  { %v7945_v20 = vadd.f32 %v7935_v7, %v723_v1  ;;  %v9391_v1 = vld [vmem:[#allocation13 + $0x48] sm:$0xff] }
 0x5f2   :  { %14592 = vtanh.f32 %v7945_v20  ;;  %v9390_v20 = vld [vmem:[#allocation13 + $0x40] sm:$0xff] }
 0x5f3   :  { %v7923_v22 = vpop.f32.mrf.mxu2  ;;  %v7936_v12 = vpop.f32.mrf.mxu3 }
 0x5f5   :  { %8951 = vmatmul.bf16.gmra.mxu0 %v16519_v15  ;;  %v17085_v15 = vld [vmem:[#allocation35_spill] sm:$0xff] }
 0x5f6   :  { %8987 = vmatmul.bf16.gmra.mxu2 %v16523_v62 }
 0x5f7   :  { %8969 = vmatmul.bf16.gmra.mxu1 %v16521_v32  ;;  %v750_v32 = vadd.f32 %v17085_v15, %v348_v34  ;;  %v9395_v34 = vld [vmem:[#allocation13 + $0x68] sm:$0xff] }
 0x5f8   :  { %v14593_v24 = vpop.eup %14592  ;;  %9513 = vmatpush.msra.mxu0 %v9395_v34 }
 0x5f9   :  { %9005 = vmatmul.bf16.gmra.mxu3 %v16525_v40  ;;  %v16611_v33 = vmul.f32 %v14593_v24, %v9344_v10  ;;  %v13458_v40 = vmul.f32 -1.442695, %v16484_v60  ;;  %v9388_v24 = vld [vmem:[#allocation13 + $0x30] sm:$0xff] }
 0x5fa   :  { %9514 = vmatpush.msra.mxu0 %v9394_v36  ;;  %v17087_v36 = vld [vmem:[#allocation31_spill] sm:$0xff] }
 0x5fb   :  { %14594 = vpow2.f32 %v13458_v40 }
 0x5fc   :  { %9515 = vmatpush.msra.mxu0 %v9393_v42  ;;  %v9382_v42 = vld [vmem:[#allocation13] sm:$0xff] }
 0x5fe   :  { %9516 = vmatpush.msra.mxu0 %v9392_v23 }
 0x600   :  { %9517 = vmatpush.msra.mxu0 %v9391_v1 }
 0x601   :  { %v14595_v43 = vpop.eup %14594 }
 0x602   :  { %v8731_v5 = vpop.f32.mrf.mxu0  ;;  %v8749_v55 = vpop.f32.mrf.mxu1  ;;  %v16619_v18 = vadd.f32 1.0, %v14595_v43  ;;  %9518 = vmatpush.msra.mxu0 %v9390_v20  ;;  %v636_v43 = vadd.f32 %v17087_v36, %v15186_v59  ;;  %v9401_v36 = vld [vmem:[#allocation13 + $0x98] sm:$0xff] }
 0x603   :  { %v8750_v46 = vadd.f32 %v8749_v55, %v8731_v5 }
 0x604   :  { %9519 = vmatpush.msra.mxu0 %v9389_v35  ;;  %vm9291_vm14 = vweird.f32 %v16619_v18 }
 0x606   :  { %9520 = vmatpush.msra.mxu0 %v9388_v24 }
 0x609   :  { %v8767_v4 = vpop.f32.mrf.mxu2 }
 0x60a   :  { %v8785_v26 = vpop.f32.mrf.mxu3  ;;  %v8768_v58 = vadd.f32 %v8767_v4, %v8750_v46  ;;  %v8733_v62 = vpop.f32.mrf.mxu0  ;;  %v9387_v46 = vld [vmem:[#allocation13 + $0x28] sm:$0xff]  ;;  %v7753_v4 = vadd.f32 %v16512_v31, %v16510_v44 }
 0x60b   :  { %v8751_v39 = vpop.f32.mrf.mxu1  ;;  %9521 = vmatpush.msra.mxu0 %v9387_v46 }
 0x60c   :  { %v8786_v38 = vadd.f32 %v8785_v26, %v8768_v58  ;;  %v8752_v30 = vadd.f32 %v8751_v39, %v8733_v62  ;;  %v9386_v58 = vld [vmem:[#allocation13 + $0x20] sm:$0xff]  ;;  %v9385_v39 = vld [vmem:[#allocation13 + $0x18] sm:$0xff] }
 0x60d   :  { %9522 = vmatpush.msra.mxu0 %v9386_v58 }
 0x60e   :  { %v9010_v28 = vadd.f32 %v8786_v38, %v750_v32 }
 0x60f   :  { %9523 = vmatpush.msra.mxu0 %v9385_v39  ;;  %v9460_v39 = vld [vmem:[#allocation13 + $0x270] sm:$0xff] }
 0x610   :  { %v13446_v41 = vmul.f32 -1.442695, %v9010_v28 }
 0x611   :  { %v8769_v47 = vpop.f32.mrf.mxu2 }
 0x612   :  { %v8787_v9 = vpop.f32.mrf.mxu3  ;;  %14596 = vpow2.f32 %v13446_v41  ;;  %v8770_v3 = vadd.f32 %v8769_v47, %v8752_v30  ;;  %v8736_v45 = vpop.f32.mrf.mxu0 }
 0x613   :  { %v8754_v54 = vpop.f32.mrf.mxu1 }
 0x614   :  { %v8788_v14 = vadd.f32 %v8787_v9, %v8770_v3  ;;  %v8755_v17 = vadd.f32 %v8754_v54, %v8736_v45  ;;  %v9384_v45 = vld [vmem:[#allocation13 + $0x10] sm:$0xff] }
 0x615   :  { %9524 = vmatpush.msra.mxu0 %v9384_v45  ;;  %v9458_v45 = vld [vmem:[#allocation13 + $0x260] sm:$0xff] }
 0x616   :  { %v9094_v50 = vadd.f32 %v8788_v14, %v750_v32 }
 0x618   :  { %v14597_v60 = vpop.eup %14596  ;;  %v13450_v21 = vmul.f32 -1.442695, %v9094_v50  ;;  %v9383_v50 = vld [vmem:[#allocation13 + $0x8] sm:$0xff] }
 0x619   :  { %v16617_v19 = vadd.f32 1.0, %v14597_v60  ;;  %v8772_v0 = vpop.f32.mrf.mxu2  ;;  %9525 = vmatpush.msra.mxu0 %v9383_v50 }
 0x61a   :  { %v8790_v52 = vpop.f32.mrf.mxu3  ;;  %14598 = vpow2.f32 %v13450_v21  ;;  %v8773_v2 = vadd.f32 %v8772_v0, %v8755_v17  ;;  %v8738_v63 = vpop.f32.mrf.mxu0 }
 0x61b   :  { %14600 = vrcp.f32 %v16617_v19  ;;  %v8756_v48 = vpop.f32.mrf.mxu1  ;;  %9526 = vmatpush.msra.mxu0 %v9382_v42  ;;  %vm9035_vm6 = vweird.f32 %v16617_v19 }
 0x61c   :  { %v8791_v13 = vadd.f32 %v8790_v52, %v8773_v2  ;;  %14602 = vrcp.f32 %v16619_v18  ;;  %v9041_v52 = vand.u32 2147483648, %v16617_v19  ;;  %v9461_v2 = vld [vmem:[#allocation13 + $0x278] sm:$0xff] }
 0x61d   :  { %9591 = vmatpush.msrb.mxu0 %v9461_v2 }
 0x61e   :  { %v9182_v7 = vadd.f32 %v8791_v13, %v750_v32  ;;  %v7766_v32 = vadd.f32 %v16515_v53, %v7753_v4  ;;  %v17086_v53 = vld [vmem:[#allocation36_spill] sm:$0xff]  ;;  %v9042_v46 = vor.u32 1.1754944e-38, %v9041_v52 }
 0x61f   :  { %v16648_v3 = vadd.f32 %v17086_v53, %v349_v56  ;;  %9592 = vmatpush.msrb.mxu0 %v9460_v39  ;;  %v5966_v53 = vld [vmem:[#allocation3 + $0x80] sm:$0xff] }
 0x620   :  { %v14599_v8 = vpop.eup %14598  ;;  %v13454_v27 = vmul.f32 -1.442695, %v9182_v7  ;;  %v7779_v9 = vadd.f32 %v16517_v6, %v7766_v32  ;;  %v9413_v6 = vld [vmem:[#allocation13 + $0xf8] sm:$0xff] }
 0x621   :  { %v16623_v22 = vadd.f32 1.0, %v14599_v8  ;;  %v8774_v12 = vpop.f32.mrf.mxu2  ;;  %v16625_v11 = vpop.eup %14600  ;;  %9531 = vmatpush.msrb.mxu1 %v9413_v6  ;;  %v9295_v8 = vand.u32 2147483647, %v16619_v18 }
 0x622   :  { %v8792_v25 = vpop.f32.mrf.mxu3  ;;  %14604 = vpow2.f32 %v13454_v27  ;;  %v16628_v10 = vpop.eup %14602  ;;  %v9031_v26 = vmul.f32 %v16625_v11, %v16617_v19  ;;  %v7942_v0 = vadd.f32 %v7779_v9, %v636_v43  ;;  %vm9036_vm13 = vweird.f32 %v16625_v11 }
 0x623   :  { %14606 = vrcp.f32 %v16623_v22  ;;  %v8803_v5 = vpop.f32.mrf.mxu0  ;;  %v9287_v15 = vmul.f32 %v16628_v10, %v16619_v18  ;;  %v9125_v23 = vand.u32 2147483648, %v16623_v22  ;;  %vm9119_vm15 = vweird.f32 %v16623_v22  ;;  %vm16684_vm7 = vmor %vm9035_vm6, %vm9036_vm13 }
 0x624   :  { %v8821_v55 = vpop.f32.mrf.mxu1  ;;  %v9032_v40 = vsub.f32 1.0, %v9031_v26  ;;  %v9123_v1 = vand.u32 2147483647, %v16623_v22  ;;  %v9297_v27 = vand.u32 2147483648, %v16619_v18  ;;  %vm9292_vm2 = vweird.f32 %v16628_v10 }
 0x625   :  { %v8822_v62 = vadd.f32 %v8821_v55, %v8803_v5  ;;  %v9288_v47 = vsub.f32 1.0, %v9287_v15  ;;  %v9126_v4 = vor.u32 1.1754944e-38, %v9125_v23  ;;  %vm16712_vm9 = vmor %vm9291_vm14, %vm9292_vm2  ;;  %vm9296_vm11 = vcmp.eq.f32.partialorder %v9295_v8, 8.507059e+37  ;;  %v9407_v55 = vld [vmem:[#allocation13 + $0xc8] sm:$0xff] }
 0x626   :  { %v9033_v60 = vmul.f32 %v16625_v11, %v9032_v40  ;;  %vm9124_vm8 = vcmp.eq.f32.partialorder %v9123_v1, 8.507059e+37  ;;  %v9456_v1 = vld [vmem:[#allocation13 + $0x250] sm:$0xff] }
 0x627   :  { %v9289_v56 = vmul.f32 %v16628_v10, %v9288_v47 }
 0x628   :  { %v14605_v38 = vpop.eup %14604  ;;  %v9034_v48 = vadd.f32 %v16625_v11, %v9033_v60 }
 0x629   :  { %v16637_v49 = vpop.eup %14606  ;;  %v16639_v28 = vadd.f32 1.0, %v14605_v38  ;;  %v8839_v44 = vpop.f32.mrf.mxu2 }
 0x62a   :  { %v9115_v31 = vmul.f32 %v16637_v49, %v16623_v22  ;;  %v8840_v41 = vadd.f32 %v8839_v44, %v8822_v62  ;;  %vm9120_vm12 = vweird.f32 %v16637_v49  ;;  %v9039_v22 = vand.u32 2147483647, %v16617_v19 }
 0x62b   :  { %14608 = vrcp.f32 %v16639_v28  ;;  %v8805_v54 = vpop.f32.mrf.mxu0  ;;  %vm16671_vm4 = vmor %vm9119_vm15, %vm9120_vm12  ;;  %v9038_v58 = vsel %vm16684_vm7, %v16625_v11, %v9034_v48  ;;  %v9213_v19 = vand.u32 2147483648, %v16639_v28  ;;  %v9211_v62 = vand.u32 2147483647, %v16639_v28 }
 0x62c   :  { %v8857_v30 = vpop.f32.mrf.mxu3  ;;  %v9116_v14 = vsub.f32 1.0, %v9115_v31  ;;  %v8823_v34 = vpop.f32.mrf.mxu1  ;;  %v9459_v31 = vld [vmem:[#allocation13 + $0x268] sm:$0xff]  ;;  %vm9040_vm3 = vcmp.eq.f32.partialorder %v9039_v22, 8.507059e+37  ;;  %vm9207_vm5 = vweird.f32 %v16639_v28  ;;  %v9298_v48 = vor.u32 1.1754944e-38, %v9297_v27 }
 0x62d   :  { %v8858_v57 = vadd.f32 %v8857_v30, %v8840_v41  ;;  %v8824_v7 = vadd.f32 %v8823_v34, %v8805_v54  ;;  %v9290_v41 = vadd.f32 %v16628_v10, %v9289_v56  ;;  %v9411_v30 = vld [vmem:[#allocation13 + $0xe8] sm:$0xff]  ;;  %v9043_v9 = vsel %vm9040_vm3, %v9042_v46, %v9038_v58  ;;  %v9410_v54 = vld [vmem:[#allocation13 + $0xe0] sm:$0xff]  ;;  %v5962_v34 = vld [vmem:[#allocation3 + $0x60] sm:$0xff]  ;;  %9593 = vmatpush.msrb.mxu0 %v9459_v31 }
 0x62e   :  { %v9117_v21 = vmul.f32 %v16637_v49, %v9116_v14  ;;  %v9214_v43 = vor.u32 1.1754944e-38, %v9213_v19  ;;  %vm9212_vm10 = vcmp.eq.f32.partialorder %v9211_v62, 8.507059e+37  ;;  %v9457_v56 = vld [vmem:[#allocation13 + $0x258] sm:$0xff]  ;;  %v9090_v23 = vmul.f32 %v9043_v9, %v5962_v34  ;;  %v9406_v58 = vld [vmem:[#allocation13 + $0xc0] sm:$0xff] }
 0x62f   :  { %v9011_v17 = vadd.f32 %v8858_v57, %v16648_v3  ;;  %9594 = vmatpush.msrb.mxu0 %v9458_v45  ;;  %v9402_v45 = vld [vmem:[#allocation13 + $0xa0] sm:$0xff] }
 0x630   :  { %v9118_v59 = vadd.f32 %v16637_v49, %v9117_v21 }
 0x631   :  { %v13447_v13 = vmul.f32 -1.442695, %v9011_v17  ;;  %v16661_v63 = vpop.eup %14608  ;;  %v8841_v20 = vpop.f32.mrf.mxu2  ;;  %9595 = vmatpush.msrb.mxu0 %v9457_v56 }
 0x632   :  { %v9203_v12 = vmul.f32 %v16661_v63, %v16639_v28  ;;  %v9122_v24 = vsel %vm16671_vm4, %v16637_v49, %v9118_v59  ;;  %v8842_v5 = vadd.f32 %v8841_v20, %v8824_v7  ;;  %vm9208_vm1 = vweird.f32 %v16661_v63  ;;  %v9412_v49 = vld [vmem:[#allocation13 + $0xf0] sm:$0xff] }
 0x633   :  { %14610 = vpow2.f32 %v13447_v13  ;;  %v9127_v32 = vsel %vm9124_vm8, %v9126_v4, %v9122_v24  ;;  %v8808_v40 = vpop.f32.mrf.mxu0  ;;  %9532 = vmatpush.msrb.mxu1 %v9412_v49  ;;  %vm16702_vm0 = vmor %vm9207_vm5, %vm9208_vm1  ;;  %v9294_v59 = vsel %vm16712_vm9, %v16628_v10, %v9290_v41  ;;  %v9408_v7 = vld [vmem:[#allocation13 + $0xd0] sm:$0xff]  ;;  %9596 = vmatpush.msrb.mxu0 %v9456_v1  ;;  %v9399_v1 = vld [vmem:[#allocation13 + $0x88] sm:$0xff] }
 0x634   :  { %v8859_v25 = vpop.f32.mrf.mxu3  ;;  %14612 = vtanh.f32 %v7942_v0  ;;  %v9204_v26 = vsub.f32 1.0, %v9203_v12  ;;  %v8826_v44 = vpop.f32.mrf.mxu1  ;;  %v9174_v50 = vmul.f32 %v9127_v32, %v5966_v53  ;;  %v9409_v0 = vld [vmem:[#allocation13 + $0xd8] sm:$0xff]  ;;  %v5970_v20 = vld [vmem:[#allocation3 + $0xa0] sm:$0xff]  ;;  %v9299_v12 = vsel %vm9296_vm11, %v9298_v48, %v9294_v59 }
 0x635   :  { %v8860_v15 = vadd.f32 %v8859_v25, %v8842_v5  ;;  %v8827_v57 = vadd.f32 %v8826_v44, %v8808_v40  ;;  %9533 = vmatpush.msrb.mxu1 %v9411_v30  ;;  %v9455_v5 = vld [vmem:[#allocation13 + $0x248] sm:$0xff]  ;;  %v9405_v32 = vld [vmem:[#allocation13 + $0xb8] sm:$0xff]  ;;  %v9452_v40 = vld [vmem:[#allocation13 + $0x230] sm:$0xff] }
 0x636   :  { %v9205_v38 = vmul.f32 %v16661_v63, %v9204_v26  ;;  %v9178_v10 = vadd.f32 %v9174_v50, %v9090_v23  ;;  %v9454_v26 = vld [vmem:[#allocation13 + $0x240] sm:$0xff]  ;;  %9597 = vmatpush.msrb.mxu0 %v9455_v5  ;;  %v9404_v44 = vld [vmem:[#allocation13 + $0xb0] sm:$0xff]  ;;  %v9403_v30 = vld [vmem:[#allocation13 + $0xa8] sm:$0xff] }
 0x637   :  { %v9095_v11 = vadd.f32 %v8860_v15, %v16648_v3  ;;  %9534 = vmatpush.msrb.mxu1 %v9410_v54  ;;  %v9449_v50 = vld [vmem:[#allocation13 + $0x218] sm:$0xff]  ;;  %v9398_v5 = vld [vmem:[#allocation13 + $0x80] sm:$0xff] }
 0x638   :  { %v9206_v14 = vadd.f32 %v16661_v63, %v9205_v38  ;;  %9598 = vmatpush.msrb.mxu0 %v9454_v26 }
 0x639   :  { %v14611_v47 = vpop.eup %14610  ;;  %v13451_v6 = vmul.f32 -1.442695, %v9095_v11  ;;  %v8844_v21 = vpop.f32.mrf.mxu2  ;;  %9535 = vmatpush.msrb.mxu1 %v9409_v0  ;;  %v9451_v11 = vld [vmem:[#allocation13 + $0x228] sm:$0xff] }
 0x63a   :  { %v16706_v60 = vadd.f32 1.0, %v14611_v47  ;;  %v14613_v17 = vpop.eup %14612  ;;  %v9210_v42 = vsel %vm16702_vm0, %v16661_v63, %v9206_v14  ;;  %v8845_v52 = vadd.f32 %v8844_v21, %v8827_v57  ;;  %v9450_v57 = vld [vmem:[#allocation13 + $0x220] sm:$0xff] }
 0x63b   :  { %v9215_v13 = vsel %vm9212_vm10, %v9214_v43, %v9210_v42  ;;  %v8810_v22 = vpop.f32.mrf.mxu0  ;;  %v9350_v27 = vmul.f32 %v14613_v17, %v9299_v12  ;;  %9536 = vmatpush.msrb.mxu1 %v9408_v7  ;;  %v17096_v42 = vld [vmem:[#allocation38_spill] sm:$0xff] }
 0x63c   :  { %v8862_v2 = vpop.f32.mrf.mxu3  ;;  %14614 = vrcp.f32 %v16706_v60  ;;  %v9262_v35 = vmul.f32 %v9215_v13, %v5970_v20  ;;  %v8828_v24 = vpop.f32.mrf.mxu1  ;;  %v16746_v56 = vadd.f32 %v17096_v42, %v350_v29  ;;  %v9054_v59 = vand.u32 2147483647, %v16706_v60  ;;  %v9425_v42 = vld [vmem:[#allocation13 + $0x158] sm:$0xff] }
 0x63d   :  { %14616 = vpow2.f32 %v13451_v6  ;;  %v8863_v63 = vadd.f32 %v8862_v2, %v8845_v52  ;;  %9537 = vmatpush.msrb.mxu1 %v9407_v55  ;;  %v9448_v52 = vld [vmem:[#allocation13 + $0x210] sm:$0xff]  ;;  %v9056_v20 = vand.u32 2147483648, %v16706_v60  ;;  %v9446_v24 = vld [vmem:[#allocation13 + $0x200] sm:$0xff]  ;;  %vm9050_vm14 = vweird.f32 %v16706_v60 }
 0x63e   :  { %v9266_v46 = vadd.f32 %v9262_v35, %v9178_v10  ;;  %v9400_v2 = vld [vmem:[#allocation13 + $0x90] sm:$0xff]  ;;  %v9429_v35 = vld [vmem:[#allocation13 + $0x178] sm:$0xff]  ;;  %vm16770_vm6 = vcmp.eq.f32.partialorder %v9054_v59, 8.507059e+37 }
 0x63f   :  { %v9183_v25 = vadd.f32 %v8863_v63, %v16648_v3  ;;  %v9453_v3 = vld [vmem:[#allocation13 + $0x238] sm:$0xff]  ;;  %9538 = vmatpush.msrb.mxu1 %v9406_v58  ;;  %v9447_v63 = vld [vmem:[#allocation13 + $0x208] sm:$0xff]  ;;  %9551 = vmatpush.msra.mxu2 %v9429_v35  ;;  %v9472_v35 = vld [vmem:[#allocation13 + $0x2d0] sm:$0xff] }
 0x640   :  { %v9354_v19 = vadd.f32 %v9350_v27, %v9266_v46  ;;  %9599 = vmatpush.msrb.mxu0 %v9453_v3  ;;  %v9473_v59 = vld [vmem:[#allocation13 + $0x2d8] sm:$0xff] }
 0x641   :  { %v13455_v4 = vmul.f32 -1.442695, %v9183_v25  ;;  %v8846_v8 = vpop.f32.mrf.mxu2  ;;  %9539 = vmatpush.msrb.mxu1 %v9405_v32 }
 0x642   :  { %v16728_v18 = vpop.eup %14614  ;;  %v9362_v39 = vrot.slane %v9354_v19, 1  ;;  %9600 = vmatpush.msrb.mxu0 %v9452_v40 }
 0x643   :  { %v14617_v15 = vpop.eup %14616  ;;  %14618 = vpow2.f32 %v13455_v4  ;;  %v9046_v49 = vmul.f32 %v16728_v18, %v16706_v60  ;;  %v8875_v31 = vpop.f32.mrf.mxu0  ;;  %9540 = vmatpush.msrb.mxu1 %v9404_v44  ;;  %vm9051_vm12 = vweird.f32 %v16728_v18  ;;  %v9477_v4 = vld [vmem:[#allocation13 + $0x2f8] sm:$0xff] }
 0x644   :  { %v8864_v38 = vpop.f32.mrf.mxu3  ;;  %v16730_v62 = vadd.f32 1.0, %v14617_v15  ;;  %v8893_v41 = vpop.f32.mrf.mxu1  ;;  %v9370_v47 = vmul.f32 %v9362_v39, %v9354_v19  ;;  %9601 = vmatpush.msrb.mxu0 %v9451_v11  ;;  %v9374_v7 = vsub.f32 %v9354_v19, %v9362_v39  ;;  %vm16763_vm4 = vmor %vm9050_vm14, %vm9051_vm12  ;;  %v9428_v11 = vld [vmem:[#allocation13 + $0x170] sm:$0xff] }
 0x645   :  { %v9047_v53 = vsub.f32 1.0, %v9046_v49  ;;  %v8894_v14 = vadd.f32 %v8893_v41, %v8875_v31  ;;  %9541 = vmatpush.msrb.mxu1 %v9403_v30  ;;  %v9057_v38 = vor.u32 1.1754944e-38, %v9056_v20  ;;  %v9476_v41 = vld [vmem:[#allocation13 + $0x2f0] sm:$0xff]  ;;  %9552 = vmatpush.msra.mxu2 %v9428_v11 }
 0x646   :  { %14620 = vrcp.f32 %v16730_v62  ;;  %9527 = vmatmul.f32.vlgmr.msra.gmra.mxu0 %v9370_v47  ;;  %v9140_v29 = vand.u32 2147483648, %v16730_v62  ;;  %vm9134_vm15 = vweird.f32 %v16730_v62  ;;  %v9138_v27 = vand.u32 2147483647, %v16730_v62 }
 0x647   :  { %9602 = vmatpush.msrb.mxu0 %v9450_v57  ;;  %9542 = vmatpush.msrb.mxu1 %v9402_v45  ;;  %v9048_v17 = vmul.f32 %v16728_v18, %v9047_v53  ;;  %v9378_v19 = vand.u32 2147483647, %v9374_v7  ;;  %v9427_v53 = vld [vmem:[#allocation13 + $0x168] sm:$0xff] }
 0x648   :  { %v9141_v49 = vor.u32 1.1754944e-38, %v9140_v29  ;;  %vm9139_vm8 = vcmp.eq.f32.partialorder %v9138_v27, 8.507059e+37  ;;  %9553 = vmatpush.msra.mxu2 %v9427_v53  ;;  %v5971_v29 = vld [vmem:[#allocation3 + $0xa8] sm:$0xff]  ;;  %v9423_v27 = vld [vmem:[#allocation13 + $0x148] sm:$0xff] }
 0x649   :  { %v14619_v9 = vpop.eup %14618  ;;  %v8911_v34 = vpop.f32.mrf.mxu2  ;;  %9603 = vmatpush.msrb.mxu0 %v9449_v50  ;;  %9543 = vmatpush.msrb.mxu1 %v9401_v36  ;;  %v9049_v12 = vadd.f32 %v16728_v18, %v9048_v17  ;;  %v9426_v50 = vld [vmem:[#allocation13 + $0x160] sm:$0xff] }
 0x64a   :  { %v16735_v54 = vadd.f32 1.0, %v14619_v9  ;;  %v8912_v43 = vadd.f32 %v8911_v34, %v8894_v14  ;;  %v9475_v9 = vld [vmem:[#allocation13 + $0x2e8] sm:$0xff]  ;;  %9554 = vmatpush.msra.mxu2 %v9426_v50 }
 0x64b   :  { %v8877_v13 = vpop.f32.mrf.mxu0  ;;  %9604 = vmatpush.msrb.mxu0 %v9448_v52  ;;  %9544 = vmatpush.msrb.mxu1 %v9400_v2  ;;  %v9053_v40 = vsel %vm16763_vm4, %v16728_v18, %v9049_v12  ;;  %v9424_v12 = vld [vmem:[#allocation13 + $0x150] sm:$0xff] }
 0x64c   :  { %v8929_v6 = vpop.f32.mrf.mxu3  ;;  %v16737_v21 = vpop.eup %14620  ;;  %14622 = vrcp.f32 %v16735_v54  ;;  %v9226_v30 = vand.u32 2147483647, %v16735_v54  ;;  %v9228_v47 = vand.u32 2147483648, %v16735_v54  ;;  %v9058_v36 = vsel %vm16770_vm6, %v9057_v38, %v9053_v40  ;;  %9555 = vmatpush.msra.mxu2 %v9425_v42  ;;  %v9420_v40 = vld [vmem:[#allocation13 + $0x130] sm:$0xff] }
 0x64d   :  { %v9130_v28 = vmul.f32 %v16737_v21, %v16730_v62  ;;  %v8930_v0 = vadd.f32 %v8929_v6, %v8912_v43  ;;  %v8895_v48 = vpop.f32.mrf.mxu1  ;;  %vm9135_vm13 = vweird.f32 %v16737_v21  ;;  %9605 = vmatpush.msrb.mxu0 %v9447_v63  ;;  %9545 = vmatpush.msrb.mxu1 %v9399_v1  ;;  %v9474_v43 = vld [vmem:[#allocation13 + $0x2e0] sm:$0xff]  ;;  %v5967_v6 = vld [vmem:[#allocation3 + $0x88] sm:$0xff]  ;;  %vm9222_vm2 = vweird.f32 %v16735_v54 }
 0x64e   :  { %v8896_v22 = vadd.f32 %v8895_v48, %v8877_v13  ;;  %vm16778_vm7 = vmor %vm9134_vm15, %vm9135_vm13  ;;  %vm9227_vm5 = vcmp.eq.f32.partialorder %v9226_v30, 8.507059e+37  ;;  %v9229_v2 = vor.u32 1.1754944e-38, %v9228_v47  ;;  %v5963_v13 = vld [vmem:[#allocation3 + $0x68] sm:$0xff]  ;;  %9556 = vmatpush.msra.mxu2 %v9424_v12  ;;  %v9466_v47 = vld [vmem:[#allocation13 + $0x2a0] sm:$0xff] }
 0x64f   :  { %v9131_v23 = vsub.f32 1.0, %v9130_v28  ;;  %v9012_v10 = vadd.f32 %v8930_v0, %v16746_v56  ;;  %9606 = vmatpush.msrb.mxu0 %v9446_v24  ;;  %9546 = vmatpush.msrb.mxu1 %v9398_v5  ;;  %v9091_v7 = vmul.f32 %v9058_v36, %v5963_v13 }
 0x650   :  { %9607 = vmatmul.f32.vlgmr.msrb.gmra.mxu0 %v9378_v19  ;;  %9557 = vmatpush.msra.mxu2 %v9423_v27 }
 0x651   :  { %v9132_v25 = vmul.f32 %v16737_v21, %v9131_v23  ;;  %v13448_v46 = vmul.f32 -1.442695, %v9012_v10  ;;  %v8913_v26 = vpop.f32.mrf.mxu2  ;;  %9611 = vmatpush.msra.mxu1 %v9477_v4  ;;  %v9470_v4 = vld [vmem:[#allocation13 + $0x2c0] sm:$0xff] }
 0x652   :  { %v16756_v55 = vpop.eup %14622  ;;  %v8914_v15 = vadd.f32 %v8913_v26, %v8896_v22  ;;  %v9422_v26 = vld [vmem:[#allocation13 + $0x140] sm:$0xff] }
 0x653   :  { %v9133_v8 = vadd.f32 %v16737_v21, %v9132_v25  ;;  %v9218_v60 = vmul.f32 %v16756_v55, %v16735_v54  ;;  %14624 = vpow2.f32 %v13448_v46  ;;  %vm9223_vm1 = vweird.f32 %v16756_v55  ;;  %9612 = vmatpush.msra.mxu1 %v9476_v41  ;;  %v8880_v45 = vpop.f32.mrf.mxu0  ;;  %v9471_v25 = vld [vmem:[#allocation13 + $0x2c8] sm:$0xff]  ;;  %9558 = vmatpush.msra.mxu2 %v9422_v26 }
 0x654   :  { %v8931_v3 = vpop.f32.mrf.mxu3  ;;  %vm9224_vm3 = vmor %vm9222_vm2, %vm9223_vm1 }
 0x655   :  { %v9137_v44 = vsel %vm16778_vm7, %v16737_v21, %v9133_v8  ;;  %v9219_v31 = vsub.f32 1.0, %v9218_v60  ;;  %v8932_v62 = vadd.f32 %v8931_v3, %v8914_v15  ;;  %v8898_v34 = vpop.f32.mrf.mxu1  ;;  %9613 = vmatpush.msra.mxu1 %v9475_v9  ;;  %v9469_v15 = vld [vmem:[#allocation13 + $0x2b8] sm:$0xff]  ;;  %v9418_v9 = vld [vmem:[#allocation13 + $0x120] sm:$0xff] }
 0x656   :  { %v9142_v14 = vsel %vm9139_vm8, %v9141_v49, %v9137_v44  ;;  %v8899_v28 = vadd.f32 %v8898_v34, %v8880_v45  ;;  %v9421_v3 = vld [vmem:[#allocation13 + $0x138] sm:$0xff] }
 0x657   :  { %v9220_v18 = vmul.f32 %v16756_v55, %v9219_v31  ;;  %v9096_v57 = vadd.f32 %v8932_v62, %v16746_v56  ;;  %v9175_v52 = vmul.f32 %v9142_v14, %v5967_v6  ;;  %9614 = vmatpush.msra.mxu1 %v9474_v43  ;;  %9559 = vmatpush.msra.mxu2 %v9421_v3  ;;  %v9467_v31 = vld [vmem:[#allocation13 + $0x2a8] sm:$0xff] }
 0x658   :  { %v9419_v62 = vld [vmem:[#allocation13 + $0x128] sm:$0xff] }
 0x659   :  { %v9221_v21 = vadd.f32 %v16756_v55, %v9220_v18  ;;  %v13452_v17 = vmul.f32 -1.442695, %v9096_v57  ;;  %v14625_v0 = vpop.eup %14624  ;;  %v8916_v23 = vpop.f32.mrf.mxu2  ;;  %9615 = vmatpush.msra.mxu1 %v9473_v59  ;;  %v9179_v22 = vadd.f32 %v9175_v52, %v9091_v7  ;;  %9560 = vmatpush.msra.mxu2 %v9420_v40  ;;  %v9465_v18 = vld [vmem:[#allocation13 + $0x298] sm:$0xff]  ;;  %v9464_v52 = vld [vmem:[#allocation13 + $0x290] sm:$0xff]  ;;  %v9463_v59 = vld [vmem:[#allocation13 + $0x288] sm:$0xff] }
 0x65a   :  { %v16800_v63 = vadd.f32 1.0, %v14625_v0  ;;  %v8917_v54 = vadd.f32 %v8916_v23, %v8899_v28  ;;  %v9417_v57 = vld [vmem:[#allocation13 + $0x118] sm:$0xff]  ;;  %v9415_v23 = vld [vmem:[#allocation13 + $0x108] sm:$0xff]  ;;  %v9482_v40 = vld [vmem:[#allocation13 + $0x320] sm:$0xff] }
 0x65b   :  { %v9225_v48 = vsel %vm9224_vm3, %v16756_v55, %v9221_v21  ;;  %14626 = vpow2.f32 %v13452_v17  ;;  %9616 = vmatpush.msra.mxu1 %v9472_v35  ;;  %v8882_v5 = vpop.f32.mrf.mxu0  ;;  %9561 = vmatpush.msra.mxu2 %v9419_v62  ;;  %v17103_v17 = vld [vmem:[#allocation37_spill] sm:$0xff]  ;;  %v9445_v7 = vld [vmem:[#allocation13 + $0x1f8] sm:$0xff] }
 0x65c   :  { %v8934_v1 = vpop.f32.mrf.mxu3  ;;  %v9230_v20 = vsel %vm9227_vm5, %v9229_v2, %v9225_v48  ;;  %14628 = vrcp.f32 %v16800_v63  ;;  %v16821_v28 = vadd.f32 %v17103_v17, %v351_v51  ;;  %v9416_v2 = vld [vmem:[#allocation13 + $0x110] sm:$0xff]  ;;  %9571 = vmatpush.msra.mxu3 %v9445_v7  ;;  %vm9065_vm12 = vweird.f32 %v16800_v63  ;;  %v9439_v7 = vld [vmem:[#allocation13 + $0x1c8] sm:$0xff] }
 0x65d   :  { %v8935_v10 = vadd.f32 %v8934_v1, %v8917_v54  ;;  %v9263_v24 = vmul.f32 %v9230_v20, %v5971_v29  ;;  %v8900_v55 = vpop.f32.mrf.mxu1  ;;  %9617 = vmatpush.msra.mxu1 %v9471_v25  ;;  %9562 = vmatpush.msra.mxu2 %v9418_v9  ;;  %v9069_v20 = vand.u32 2147483647, %v16800_v63  ;;  %v9462_v29 = vld [vmem:[#allocation13 + $0x280] sm:$0xff] }
 0x65f   :  { %v9184_v46 = vadd.f32 %v8935_v10, %v16746_v56  ;;  %v9267_v58 = vadd.f32 %v9263_v24, %v9179_v22  ;;  %9618 = vmatpush.msra.mxu1 %v9470_v4  ;;  %v9468_v56 = vld [vmem:[#allocation13 + $0x2b0] sm:$0xff]  ;;  %9563 = vmatpush.msra.mxu2 %v9417_v57  ;;  %v9414_v10 = vld [vmem:[#allocation13 + $0x100] sm:$0xff]  ;;  %v9493_v22 = vld [vmem:[#allocation13 + $0x378] sm:$0xff]  ;;  %vm16856_vm14 = vcmp.eq.f32.partialorder %v9069_v20, 8.507059e+37 }
 0x661   :  { %v14627_v8 = vpop.eup %14626  ;;  %v13456_v19 = vmul.f32 -1.442695, %v9184_v46  ;;  %v8918_v32 = vpop.f32.mrf.mxu2  ;;  %v9355_v38 = vadd.f32 %v16567_v16, %v9267_v58  ;;  %9619 = vmatpush.msra.mxu1 %v9469_v15  ;;  %9564 = vmatpush.msra.mxu2 %v9416_v2 }
 0x662   :  { %v16804_v60 = vadd.f32 1.0, %v14627_v8  ;;  %v16807_v49 = vpop.eup %14628  ;;  %v9071_v8 = vand.u32 2147483648, %v16800_v63  ;;  %v9492_v32 = vld [vmem:[#allocation13 + $0x370] sm:$0xff] }
 0x663   :  { %v9363_v44 = vrot.slane %v9355_v38, 1  ;;  %v9061_v41 = vmul.f32 %v16807_v49, %v16800_v63  ;;  %9620 = vmatpush.msra.mxu1 %v9468_v56  ;;  %v8947_v16 = vpop.f32.mrf.mxu0  ;;  %9565 = vmatpush.msra.mxu2 %v9415_v23  ;;  %vm9066_vm9 = vweird.f32 %v16807_v49 }
 0x664   :  { %v8936_v39 = vpop.f32.mrf.mxu3  ;;  %14630 = vrcp.f32 %v16804_v60  ;;  %vm9149_vm10 = vweird.f32 %v16804_v60  ;;  %v9155_v24 = vand.u32 2147483648, %v16804_v60  ;;  %v9153_v46 = vand.u32 2147483647, %v16804_v60  ;;  %vm16852_vm13 = vmor %vm9065_vm12, %vm9066_vm9 }
 0x665   :  { %14632 = vpow2.f32 %v13456_v19  ;;  %v8965_v11 = vpop.f32.mrf.mxu1  ;;  %v9371_v30 = vmul.f32 %v9363_v44, %v9355_v38  ;;  %9621 = vmatpush.msra.mxu1 %v9467_v31  ;;  %v9062_v50 = vsub.f32 1.0, %v9061_v41  ;;  %v9375_v13 = vsub.f32 %v9355_v38, %v9363_v44  ;;  %9566 = vmatpush.msra.mxu2 %v9414_v10  ;;  %v9444_v38 = vld [vmem:[#allocation13 + $0x1f0] sm:$0xff]  ;;  %v9491_v39 = vld [vmem:[#allocation13 + $0x368] sm:$0xff] }
 0x666   :  { %v8966_v53 = vadd.f32 %v8965_v11, %v8947_v16  ;;  %v9156_v63 = vor.u32 1.1754944e-38, %v9155_v24  ;;  %9572 = vmatpush.msra.mxu3 %v9444_v38  ;;  %v9443_v44 = vld [vmem:[#allocation13 + $0x1e8] sm:$0xff]  ;;  %vm9154_vm15 = vcmp.eq.f32.partialorder %v9153_v46, 8.507059e+37  ;;  %v9072_v9 = vor.u32 1.1754944e-38, %v9071_v8  ;;  %v9485_v46 = vld [vmem:[#allocation13 + $0x338] sm:$0xff] }
 0x667   :  { %9547 = vmatmul.f32.vlgmr.msrb.gmra.mxu1 %v9371_v30  ;;  %v9063_v48 = vmul.f32 %v16807_v49, %v9062_v50  ;;  %v9379_v5 = vand.u32 2147483647, %v9375_v13  ;;  %9631 = vmatpush.msrb.mxu2 %v9493_v22  ;;  %v9490_v30 = vld [vmem:[#allocation13 + $0x360] sm:$0xff]  ;;  %v9489_v50 = vld [vmem:[#allocation13 + $0x358] sm:$0xff]  ;;  %v9483_v38 = vld [vmem:[#allocation13 + $0x328] sm:$0xff] }
 0x668   :  { %9622 = vmatpush.msra.mxu1 %v9466_v47  ;;  %v9442_v47 = vld [vmem:[#allocation13 + $0x1e0] sm:$0xff]  ;;  %9573 = vmatpush.msra.mxu3 %v9443_v44 }
 0x669   :  { %v8983_v45 = vpop.f32.mrf.mxu2  ;;  %v9064_v27 = vadd.f32 %v16807_v49, %v9063_v48  ;;  %9632 = vmatpush.msrb.mxu2 %v9492_v32  ;;  %v9440_v48 = vld [vmem:[#allocation13 + $0x1d0] sm:$0xff]  ;;  %v9438_v22 = vld [vmem:[#allocation13 + $0x1c0] sm:$0xff] }
 0x66a   :  { %v16812_v14 = vpop.eup %14630  ;;  %v8984_v43 = vadd.f32 %v8983_v45, %v8966_v53  ;;  %9623 = vmatpush.msra.mxu1 %v9465_v18  ;;  %9574 = vmatpush.msra.mxu3 %v9442_v47  ;;  %v9434_v44 = vld [vmem:[#allocation13 + $0x1a0] sm:$0xff]  ;;  %v9480_v47 = vld [vmem:[#allocation13 + $0x310] sm:$0xff] }
 0x66b   :  { %v14633_v34 = vpop.eup %14632  ;;  %v9145_v36 = vmul.f32 %v16812_v14, %v16804_v60  ;;  %v8949_v51 = vpop.f32.mrf.mxu0  ;;  %vm9150_vm0 = vweird.f32 %v16812_v14  ;;  %v9068_v31 = vsel %vm16852_vm13, %v16807_v49, %v9064_v27  ;;  %9633 = vmatpush.msrb.mxu2 %v9491_v39  ;;  %v9435_v39 = vld [vmem:[#allocation13 + $0x1a8] sm:$0xff] }
 0x66c   :  { %v9001_v6 = vpop.f32.mrf.mxu3  ;;  %v16816_v21 = vadd.f32 1.0, %v14633_v34  ;;  %9624 = vmatpush.msra.mxu1 %v9464_v52  ;;  %vm16840_vm11 = vmor %vm9149_vm10, %vm9150_vm0 }
 0x66d   :  { %v9146_v42 = vsub.f32 1.0, %v9145_v36  ;;  %v9002_v0 = vadd.f32 %v9001_v6, %v8984_v43  ;;  %v8967_v1 = vpop.f32.mrf.mxu1  ;;  %v9441_v36 = vld [vmem:[#allocation13 + $0x1d8] sm:$0xff]  ;;  %v9073_v43 = vsel %vm16856_vm14, %v9072_v9, %v9068_v31  ;;  %v5968_v6 = vld [vmem:[#allocation3 + $0x90] sm:$0xff]  ;;  %9634 = vmatpush.msrb.mxu2 %v9490_v30  ;;  %v9432_v9 = vld [vmem:[#allocation13 + $0x190] sm:$0xff] }
 0x66e   :  { %14634 = vrcp.f32 %v16816_v21  ;;  %v8968_v25 = vadd.f32 %v8967_v1, %v8949_v51  ;;  %9625 = vmatpush.msra.mxu1 %v9463_v59  ;;  %v9243_v18 = vand.u32 2147483648, %v16816_v21  ;;  %vm9237_vm6 = vweird.f32 %v16816_v21  ;;  %9575 = vmatpush.msra.mxu3 %v9441_v36  ;;  %v9487_v1 = vld [vmem:[#allocation13 + $0x348] sm:$0xff] }
 0x66f   :  { %v9147_v54 = vmul.f32 %v16812_v14, %v9146_v42  ;;  %v9013_v37 = vadd.f32 %v9002_v0, %v16821_v28  ;;  %v5964_v0 = vld [vmem:[#allocation3 + $0x70] sm:$0xff]  ;;  %9635 = vmatpush.msrb.mxu2 %v9489_v50 }
 0x670   :  { %9626 = vmatpush.msra.mxu1 %v9462_v29  ;;  %v9244_v13 = vor.u32 1.1754944e-38, %v9243_v18  ;;  %9576 = vmatpush.msra.mxu3 %v9440_v48  ;;  %v5972_v29 = vld [vmem:[#allocation3 + $0xb0] sm:$0xff]  ;;  %v9479_v18 = vld [vmem:[#allocation13 + $0x308] sm:$0xff] }
 0x671   :  { %v9148_v35 = vadd.f32 %v16812_v14, %v9147_v54  ;;  %v13449_v12 = vmul.f32 -1.442695, %v9013_v37  ;;  %v8985_v55 = vpop.f32.mrf.mxu2  ;;  %9627 = vmatmul.f32.vlgmr.msra.gmra.mxu1 %v9379_v5  ;;  %v9092_v54 = vmul.f32 %v9073_v43, %v5964_v0  ;;  %v9430_v50 = vld [vmem:[#allocation13 + $0x180] sm:$0xff]  ;;  %v9509_v43 = vld [vmem:[#allocation13 + $0x3f8] sm:$0xff] }
 0x672   :  { %v8986_v4 = vadd.f32 %v8985_v55, %v8968_v25  ;;  %v9486_v25 = vld [vmem:[#allocation13 + $0x340] sm:$0xff]  ;;  %9577 = vmatpush.msra.mxu3 %v9439_v7 }
 0x673   :  { %14636 = vpow2.f32 %v13449_v12  ;;  %v9152_v60 = vsel %vm16840_vm11, %v16812_v14, %v9148_v35  ;;  %v8952_v16 = vpop.f32.mrf.mxu0  ;;  %v9241_v14 = vand.u32 2147483647, %v16816_v21 }
 0x674   :  { %v9003_v26 = vpop.f32.mrf.mxu3  ;;  %v16835_v58 = vpop.eup %14634  ;;  %v9157_v53 = vsel %vm9154_vm15, %v9156_v63, %v9152_v60  ;;  %9578 = vmatpush.msra.mxu3 %v9438_v22  ;;  %v9484_v60 = vld [vmem:[#allocation13 + $0x330] sm:$0xff] }
 0x675   :  { %v9233_v15 = vmul.f32 %v16835_v58, %v16816_v21  ;;  %v9004_v3 = vadd.f32 %v9003_v26, %v8986_v4  ;;  %v8970_v11 = vpop.f32.mrf.mxu1  ;;  %vm9238_vm4 = vweird.f32 %v16835_v58  ;;  %v9176_v52 = vmul.f32 %v9157_v53, %v5968_v6  ;;  %v9488_v21 = vld [vmem:[#allocation13 + $0x350] sm:$0xff]  ;;  %v9437_v4 = vld [vmem:[#allocation13 + $0x1b8] sm:$0xff] }
 0x676   :  { %v8971_v34 = vadd.f32 %v8970_v11, %v8952_v16  ;;  %vm9239_vm7 = vmor %vm9237_vm6, %vm9238_vm4  ;;  %vm9242_vm8 = vcmp.eq.f32.partialorder %v9241_v14, 8.507059e+37  ;;  %9636 = vmatpush.msrb.mxu2 %v9488_v21  ;;  %9579 = vmatpush.msra.mxu3 %v9437_v4 }
 0x677   :  { %v9234_v62 = vsub.f32 1.0, %v9233_v15  ;;  %v9097_v41 = vadd.f32 %v9004_v3, %v16821_v28  ;;  %v9180_v24 = vadd.f32 %v9176_v52, %v9092_v54  ;;  %v9436_v15 = vld [vmem:[#allocation13 + $0x1b0] sm:$0xff] }
 0x678   :  { %9637 = vmatpush.msrb.mxu2 %v9487_v1  ;;  %9580 = vmatpush.msra.mxu3 %v9436_v15  ;;  %v9507_v1 = vld [vmem:[#allocation13 + $0x3e8] sm:$0xff] }
 0x679   :  { %v14637_v57 = vpop.eup %14636  ;;  %v9235_v45 = vmul.f32 %v16835_v58, %v9234_v62  ;;  %v13453_v49 = vmul.f32 -1.442695, %v9097_v41  ;;  %v8988_v42 = vpop.f32.mrf.mxu2  ;;  %v9433_v41 = vld [vmem:[#allocation13 + $0x198] sm:$0xff] }
 0x67a   :  { %v16871_v17 = vadd.f32 1.0, %v14637_v57  ;;  %v8989_v59 = vadd.f32 %v8988_v42, %v8971_v34  ;;  %9638 = vmatpush.msrb.mxu2 %v9486_v25  ;;  %9581 = vmatpush.msra.mxu3 %v9435_v39  ;;  %v9431_v57 = vld [vmem:[#allocation13 + $0x188] sm:$0xff]  ;;  %v9478_v34 = vld [vmem:[#allocation13 + $0x300] sm:$0xff]  ;;  %v9501_v39 = vld [vmem:[#allocation13 + $0x3b8] sm:$0xff] }
 0x67b   :  { %v9236_v2 = vadd.f32 %v16835_v58, %v9235_v45  ;;  %14638 = vpow2.f32 %v13453_v49  ;;  %v8954_v35 = vpop.f32.mrf.mxu0 }
 0x67c   :  { %v9006_v23 = vpop.f32.mrf.mxu3  ;;  %14640 = vrcp.f32 %v16871_v17  ;;  %9639 = vmatpush.msrb.mxu2 %v9485_v46  ;;  %9582 = vmatpush.msra.mxu3 %v9434_v44  ;;  %vm9080_vm0 = vweird.f32 %v16871_v17  ;;  %v9084_v21 = vand.u32 2147483647, %v16871_v17  ;;  %v9506_v35 = vld [vmem:[#allocation13 + $0x3e0] sm:$0xff]  ;;  %v5965_v46 = vld [vmem:[#allocation3 + $0x78] sm:$0xff] }
 0x67d   :  { %v9240_v37 = vsel %vm9239_vm7, %v16835_v58, %v9236_v2  ;;  %v9007_v51 = vadd.f32 %v9006_v23, %v8989_v59  ;;  %v8972_v12 = vpop.f32.mrf.mxu1  ;;  %v9086_v59 = vand.u32 2147483648, %v16871_v17  ;;  %v9499_v44 = vld [vmem:[#allocation13 + $0x3a8] sm:$0xff] }
 0x67e   :  { %v9245_v20 = vsel %vm9242_vm8, %v9244_v13, %v9240_v37  ;;  %9640 = vmatpush.msrb.mxu2 %v9484_v60  ;;  %9583 = vmatpush.msra.mxu3 %v9433_v41  ;;  %v9508_v13 = vld [vmem:[#allocation13 + $0x3f0] sm:$0xff]  ;;  %vm9085_vm11 = vcmp.eq.f32.partialorder %v9084_v21, 8.507059e+37  ;;  %v5973_v60 = vld [vmem:[#allocation3 + $0xb8] sm:$0xff]  ;;  %v9700_v21 = vld [vmem:[%s16982_s7 + $0x50] sm:$0xff] }
 0x67f   :  { %v9185_v10 = vadd.f32 %v9007_v51, %v16821_v28  ;;  %v9264_v5 = vmul.f32 %v9245_v20, %v5972_v29  ;;  %v9087_v20 = vor.u32 1.1754944e-38, %v9086_v59  ;;  %v9496_v41 = vld [vmem:[#allocation13 + $0x390] sm:$0xff] }
 0x680   :  { %9641 = vmatpush.msrb.mxu2 %v9483_v38  ;;  %9584 = vmatpush.msra.mxu3 %v9432_v9  ;;  %v9699_v37 = vld [vmem:[%s16982_s7 + $0x48] sm:$0xff] }
 0x681   :  { %v14639_v55 = vpop.eup %14638  ;;  %v13457_v27 = vmul.f32 -1.442695, %v9185_v10  ;;  %v9268_v26 = vadd.f32 %v9264_v5, %v9180_v24  ;;  %v8990_v28 = vpop.f32.mrf.mxu2  ;;  %v5969_v24 = vld [vmem:[#allocation3 + $0x98] sm:$0xff]  ;;  %v9505_v5 = vld [vmem:[#allocation13 + $0x3d8] sm:$0xff] }
 0x682   :  { %v16879_v58 = vpop.eup %14640  ;;  %v16881_v8 = vadd.f32 1.0, %v14639_v55  ;;  %9642 = vmatpush.msrb.mxu2 %v9482_v40  ;;  %9585 = vmatpush.msra.mxu3 %v9431_v57  ;;  %v9500_v40 = vld [vmem:[#allocation13 + $0x3b0] sm:$0xff] }
 0x683   :  { %14642 = vpow2.f32 %v13457_v27  ;;  %v9356_v3 = vadd.f32 %v16599_v61, %v9268_v26  ;;  %v9076_v32 = vmul.f32 %v16879_v58, %v16871_v17  ;;  %v9481_v61 = vld [vmem:[#allocation13 + $0x318] sm:$0xff]  ;;  %vm9081_vm2 = vweird.f32 %v16879_v58  ;;  %v9504_v26 = vld [vmem:[#allocation13 + $0x3d0] sm:$0xff] }
 0x684   :  { %v9008_v19 = vpop.f32.mrf.mxu3  ;;  %14644 = vrcp.f32 %v16881_v8  ;;  %9643 = vmatpush.msrb.mxu2 %v9481_v61  ;;  %vm9164_vm3 = vweird.f32 %v16881_v8  ;;  %v9170_v36 = vand.u32 2147483648, %v16881_v8  ;;  %v9168_v0 = vand.u32 2147483647, %v16881_v8  ;;  %9586 = vmatpush.msra.mxu3 %v9430_v50  ;;  %vm16910_vm9 = vmor %vm9080_vm0, %vm9081_vm2  ;;  %v9497_v61 = vld [vmem:[#allocation13 + $0x398] sm:$0xff]  ;;  %v9705_v50 = vld [vmem:[%s16982_s7 + $0x78] sm:$0xff] }
 0x685   :  { %v9364_v56 = vrot.slane %v9356_v3, 1  ;;  %v9077_v62 = vsub.f32 1.0, %v9076_v32  ;;  %v9503_v19 = vld [vmem:[#allocation13 + $0x3c8] sm:$0xff]  ;;  %v9502_v32 = vld [vmem:[#allocation13 + $0x3c0] sm:$0xff]  ;;  %9707 = vmatpush.msra.mxu0 %v9705_v50 }
 0x686   :  { %9644 = vmatpush.msrb.mxu2 %v9480_v47  ;;  %9651 = vmatpush.msrb.mxu3 %v9509_v43  ;;  %v9171_v51 = vor.u32 1.1754944e-38, %v9170_v36  ;;  %vm9169_vm10 = vcmp.eq.f32.partialorder %v9168_v0, 8.507059e+37  ;;  %v9704_v36 = vld [vmem:[%s16982_s7 + $0x70] sm:$0xff] }
 0x687   :  { %v9372_v63 = vmul.f32 %v9364_v56, %v9356_v3  ;;  %v9078_v53 = vmul.f32 %v16879_v58, %v9077_v62  ;;  %v9376_v45 = vsub.f32 %v9356_v3, %v9364_v56  ;;  %v9498_v62 = vld [vmem:[#allocation13 + $0x3a0] sm:$0xff]  ;;  %9708 = vmatpush.msra.mxu0 %v9704_v36 }
 0x688   :  { %9645 = vmatpush.msrb.mxu2 %v9479_v18  ;;  %9652 = vmatpush.msrb.mxu3 %v9508_v13  ;;  %v9701_v13 = vld [vmem:[%s16982_s7 + $0x58] sm:$0xff] }
 0x689   :  { %v14643_v31 = vpop.eup %14642  ;;  %9567 = vmatmul.f32.vlgmr.msra.gmra.mxu2 %v9372_v63  ;;  %v9079_v6 = vadd.f32 %v16879_v58, %v9078_v53  ;;  %v9380_v52 = vand.u32 2147483647, %v9376_v45 }
 0x68a   :  { %v14645_v16 = vpop.eup %14644  ;;  %v16887_v11 = vadd.f32 1.0, %v14643_v31  ;;  %9646 = vmatpush.msrb.mxu2 %v9478_v34  ;;  %9653 = vmatpush.msrb.mxu3 %v9507_v1  ;;  %v9698_v1 = vld [vmem:[%s16982_s7 + $0x40] sm:$0xff] }
 0x68b   :  { %v9160_v30 = vmul.f32 %v14645_v16, %v16881_v8  ;;  %vm9165_vm1 = vweird.f32 %v14645_v16  ;;  %v9083_v7 = vsel %vm16910_vm9, %v16879_v58, %v9079_v6 }
 0x68c   :  { %14646 = vrcp.f32 %v16887_v11  ;;  %vm16899_vm5 = vmor %vm9164_vm3, %vm9165_vm1  ;;  %v9258_v10 = vand.u32 2147483648, %v16887_v11  ;;  %v9256_v25 = vand.u32 2147483647, %v16887_v11  ;;  %v9088_v22 = vsel %vm9085_vm11, %v9087_v20, %v9083_v7  ;;  %9654 = vmatpush.msrb.mxu3 %v9506_v35  ;;  %v9697_v7 = vld [vmem:[%s16982_s7 + $0x38] sm:$0xff]  ;;  %v9695_v20 = vld [vmem:[%s16982_s7 + $0x28] sm:$0xff] }
 0x68d   :  { %v9161_v14 = vsub.f32 1.0, %v9160_v30  ;;  %vm9252_vm13 = vweird.f32 %v16887_v11  ;;  %v9093_v58 = vmul.f32 %v9088_v22, %v5965_v46  ;;  %v9494_v30 = vld [vmem:[#allocation13 + $0x380] sm:$0xff]  ;;  %v9691_v22 = vld [vmem:[%s16982_s7 + $0x8] sm:$0xff]  ;;  %vm9727_vm1 = vcmask 32768  }
 0x68e   :  { %v9259_v4 = vor.u32 1.1754944e-38, %v9258_v10  ;;  %vm9257_vm15 = vcmp.eq.f32.partialorder %v9256_v25, 8.507059e+37  ;;  %9655 = vmatpush.msrb.mxu3 %v9505_v5  ;;  %v9694_v10 = vld [vmem:[%s16982_s7 + $0x20] sm:$0xff]  ;;  %v9692_v25 = vld [vmem:[%s16982_s7 + $0x10] sm:$0xff] }
 0x68f   :  { %v9162_v49 = vmul.f32 %v14645_v16, %v9161_v14 }
 0x690   :  { %9656 = vmatpush.msrb.mxu3 %v9504_v26 }
 0x691   :  { %v9163_v42 = vadd.f32 %v14645_v16, %v9162_v49  ;;  %9647 = vmatmul.f32.vlgmr.msrb.gmra.mxu2 %v9380_v52 }
 0x692   :  { %v14647_v2 = vpop.eup %14646  ;;  %9657 = vmatpush.msrb.mxu3 %v9503_v19 }
 0x693   :  { %v9167_v48 = vsel %vm16899_vm5, %v14645_v16, %v9163_v42  ;;  %v9248_v54 = vmul.f32 %v14647_v2, %v16887_v11  ;;  %vm9253_vm12 = vweird.f32 %v14647_v2  ;;  %v9495_v16 = vld [vmem:[#allocation13 + $0x388] sm:$0xff]  ;;  %v9703_v42 = vld [vmem:[%s16982_s7 + $0x68] sm:$0xff] }
 0x694   :  { %v9172_v29 = vsel %vm9169_vm10, %v9171_v51, %v9167_v48  ;;  %vm9254_vm14 = vmor %vm9252_vm13, %vm9253_vm12  ;;  %9658 = vmatpush.msrb.mxu3 %v9502_v32  ;;  %9709 = vmatpush.msra.mxu0 %v9703_v42 }
 0x695   :  { %v9249_v17 = vsub.f32 1.0, %v9248_v54  ;;  %v9177_v55 = vmul.f32 %v9172_v29, %v5969_v24  ;;  %v9690_v24 = vld [vmem:[%s16982_s7] sm:$0xff] }
 0x696   :  { %9659 = vmatpush.msrb.mxu3 %v9501_v39 }
 0x697   :  { %v9250_v12 = vmul.f32 %v14647_v2, %v9249_v17  ;;  %v9181_v15 = vadd.f32 %v9177_v55, %v9093_v58  ;;  %v9696_v17 = vld [vmem:[%s16982_s7 + $0x30] sm:$0xff] }
 0x698   :  { %9660 = vmatpush.msrb.mxu3 %v9500_v40 }
 0x699   :  { %v9251_v27 = vadd.f32 %v14647_v2, %v9250_v12  ;;  %v9693_v12 = vld [vmem:[%s16982_s7 + $0x18] sm:$0xff] }
 0x69a   :  { %9661 = vmatpush.msrb.mxu3 %v9499_v44 }
 0x69b   :  { %v9255_v8 = vsel %vm9254_vm14, %v14647_v2, %v9251_v27  ;;  %v9702_v2 = vld [vmem:[%s16982_s7 + $0x60] sm:$0xff]  ;;  %s14913_s7 = smov [#allocation18]  }
 0x69c   :  { %v9260_v28 = vsel %vm9257_vm15, %v9259_v4, %v9255_v8  ;;  %9662 = vmatpush.msrb.mxu3 %v9498_v62  ;;  %9710 = vmatpush.msra.mxu0 %v9702_v2  ;;  %s9746_s3 = sshll.u32 %s14913_s7, 4  ;;  %s9747_s3 = int_to_ptr.vmem [resolvable:$true] %s9746_s3 }
 0x69d   :  { %v9265_v3 = vmul.f32 %v9260_v28, %v5973_v60  ;;  %v9706_v60 = vld [vmem:[#allocation16] sm:$0x1] }
 0x69e   :  { %9663 = vmatpush.msrb.mxu3 %v9497_v61  ;;  %9711 = vmatpush.msra.mxu0 %v9701_v13 }
 0x69f   :  { %v9269_v38 = vadd.f32 %v9265_v3, %v9181_v15 }
 0x6a0   :  { %9664 = vmatpush.msrb.mxu3 %v9496_v41  ;;  %9712 = vmatpush.msra.mxu0 %v9700_v21 }
 0x6a1   :  { %v9357_v56 = vadd.f32 %v16611_v33, %v9269_v38  ;;  %v9510_v33 = vld [vmem:[#allocation15] sm:$0x1] }
 0x6a2   :  { %9665 = vmatpush.msrb.mxu3 %v9495_v16  ;;  %9713 = vmatpush.msra.mxu0 %v9699_v37 }
 0x6a3   :  { %v9365_v63 = vrot.slane %v9357_v56, 1 }
 0x6a4   :  { %9666 = vmatpush.msrb.mxu3 %v9494_v30  ;;  %9714 = vmatpush.msra.mxu0 %v9698_v1 }
 0x6a5   :  { %v9373_v31 = vmul.f32 %v9365_v63, %v9357_v56  ;;  %v9377_v11 = vsub.f32 %v9357_v56, %v9365_v63 }
 0x6a6   :  { %9715 = vmatpush.msra.mxu0 %v9697_v7 }
 0x6a7   :  { %9587 = vmatmul.f32.vlgmr.msra.gmra.mxu3 %v9373_v31  ;;  %v9381_v47 = vand.u32 2147483647, %v9377_v11 }
 0x6a8   :  { %9716 = vmatpush.msra.mxu0 %v9696_v17 }
 0x6aa   :  { %9717 = vmatpush.msra.mxu0 %v9695_v20 }
 0x6ac   :  { %9718 = vmatpush.msra.mxu0 %v9694_v10 }
 0x6ae   :  { %9719 = vmatpush.msra.mxu0 %v9693_v12 }
 0x6af   :  { %9667 = vmatmul.f32.vlgmr.msrb.gmra.mxu3 %v9381_v47 }
 0x6b0   :  { %9720 = vmatpush.msra.mxu0 %v9692_v25 }
 0x6b2   :  { %9721 = vmatpush.msra.mxu0 %v9691_v22 }
 0x6b4   :  { %9722 = vmatpush.msra.mxu0 %v9690_v24 }
 0x6c3   :  { %v9528_v9 = vpop.f32.mrf.mxu0 }
 0x6c4   :  { %v9529_v14 = vadd.f32 %v9528_v9, %v9510_v33 }
 0x6cd   :  { %v9608_v43 = vpop.f32.mrf.mxu0 }
 0x6e4   :  { %v9548_v53 = vpop.f32.mrf.mxu1 }
 0x6e5   :  { %v9549_v57 = vadd.f32 %v9548_v53, %v9529_v14 }
 0x6ee   :  { %v9628_v0 = vpop.f32.mrf.mxu1 }
 0x70c   :  { %v9568_v18 = vpop.f32.mrf.mxu2 }
 0x70d   :  { %v9569_v45 = vadd.f32 %v9568_v18, %v9549_v57 }
 0x714   :  { %v9648_v59 = vpop.f32.mrf.mxu2 }
 0x72a   :  { %v9588_v49 = vpop.f32.mrf.mxu3 }
 0x72b   :  { %v9589_v34 = vadd.f32 %v9588_v49, %v9569_v45 }
 0x72d   :  { %v9609_v6 = vadd.f32 %v9608_v43, %v9589_v34 }
 0x72f   :  { %v9629_v52 = vadd.f32 %v9628_v0, %v9609_v6 }
 0x731   :  { %v9649_v23 = vadd.f32 %v9648_v59, %v9629_v52 }
 0x732   :  { %v9668_v48 = vpop.f32.mrf.mxu3 }
 0x733   :  { %v9669_v54 = vadd.f32 %v9668_v48, %v9649_v23 }
 0x735   :  { %v13462_v51 = vmul.f32 -1.442695, %v9669_v54 }
 0x737   :  { %14648 = vpow2.f32 %v13462_v51 }
 0x73d   :  { %v14649_v29 = vpop.eup %14648 }
 0x73e   :  { %v9674_v35 = vadd.f32 1.0, %v14649_v29 }
 0x740   :  { %14650 = vrcp.f32 %v9674_v35  ;;  %v9686_v46 = vand.u32 2147483648, %v9674_v35  ;;  %v9684_v26 = vand.u32 2147483647, %v9674_v35  ;;  %vm9680_vm6 = vweird.f32 %v9674_v35 }
 0x742   :  { %v9687_v8 = vor.u32 1.1754944e-38, %v9686_v46  ;;  %vm9685_vm8 = vcmp.eq.f32.partialorder %v9684_v26, 8.507059e+37 }
 0x746   :  { %v14651_v5 = vpop.eup %14650 }
 0x747   :  { %v9676_v55 = vmul.f32 %v14651_v5, %v9674_v35  ;;  %vm9681_vm4 = vweird.f32 %v14651_v5 }
 0x748   :  { %vm9682_vm7 = vmor %vm9680_vm6, %vm9681_vm4 }
 0x749   :  { %v9677_v27 = vsub.f32 1.0, %v9676_v55 }
 0x74b   :  { %v9678_v4 = vmul.f32 %v14651_v5, %v9677_v27 }
 0x74d   :  { %v9679_v58 = vadd.f32 %v14651_v5, %v9678_v4 }
 0x74f   :  { %v9683_v28 = vsel %vm9682_vm7, %v14651_v5, %v9679_v58 }
 0x750   :  { %v9688_v19 = vsel %vm9685_vm8, %v9687_v8, %v9683_v28 }
 0x751   :  { %9723 = vmatmul.f32.vlgmr.msra.gmra.mxu0 %v9688_v19 }
 0x7ce   :  { %v9724_v15 = vpop.f32.mrf.mxu0 }
 0x7cf   :  { %v9725_v3 = vadd.f32 %v9724_v15, %v9706_v60 }
 0x7d1   :  { %v9728_v32 = vsel %vm9727_vm1, %v9725_v3, -inf }
 0x7d2   :  { %9729 = vmax.xlane.f32.xlu0 %v9728_v32 }
 0x845   :  { %v9730_v38 = vpop.xlane.xlu0 %9729 }
 0x846   :  { %v9731_v39 = vsub.f32 %v9725_v3, %v9730_v38 }
 0x848   :  { %v9732_v56 = vmul.f32 1.442695, %v9731_v39 }
 0x84a   :  { %14652 = vpow2.f32 %v9732_v56 }
 0x850   :  { %v14653_v40 = vpop.eup %14652 }
 0x851   :  { %v9734_v63 = vsel %vm9727_vm1, %v14653_v40, 0.0 }
 0x852   :  { %9735 = vadd.xlane.f32.xlu0 %v9734_v63 }
 0x8c5   :  { %v9736_v44 = vpop.xlane.xlu0 %9735 }
 0x8c6   :  { %14654 = vlog2.f32 %v9736_v44 }
 0x8cc   :  { %v14655_v31 = vpop.eup %14654 }
 0x8cd   :  { %v9738_v62 = vmul.f32 0.6931472, %v14655_v31 }
 0x8cf   :  { %v9739_v61 = vsub.f32 %v9731_v39, %v9738_v62 }
 0x8d1   :  { %9740 = vst.msk [vmem:[#allocation18] sm:$0x1] %vm9727_vm1, %v9739_v61 }
 0x8d2   :  { %9751 = dma.vmem_to_hbm [thread:$0]  %s9747_s3, 16, %s9749_s10, [#allocation6]  }
 0x8d3   :  { %14895 = dma.done.wait [#allocation6], 16  }
 0x8d4   :  { %14896 = vsyncadd [#allocation6], 4294967280 }
 0x8d5   :  { %9756 = vsyncpa [#allocation5], 1 }
 0x8d6   :  { %9757 = vsyncpa [#allocation8], 1 }
 0x8d7   :  { %9758 = vsyncpa [#allocation11], 1 }
 0x8d8   :  { %9759 = vsyncpa [#allocation14], 1 }
 0x8d9   :  { %9760 = vsyncpa [#allocation17], 1 }
 0x8da   :  { %9761 = vsyncpa [#allocation6], 1 }

</bundles_post_ra>
